<compile_context>
chip_gen: v5e
topology: v5e:2x2
jax: 0.10.0
libtpu: 0.0.40
codegen_flags: <defaults>
</compile_context>

<pallas_src>
import functools
import math

import jax
import jax.numpy as jnp
from jax import lax
from jax.experimental import pallas as pl
from jax.experimental.pallas import tpu as pltpu

NUM_BINS = 6      # DownSampleToken.num_bins
KNN_K = 32        # DownSampleToken.K (neighbor_mask)
BOLTZMANN_T = 0.1

_VMEM_BUDGET = 12 * 1024 * 1024   # working-set target: fits v5e's 16 MiB scoped default
_VMEM_LIMIT = 32 * 1024 * 1024    # raises v5e's scoped VMEM; safely below v7x physical


# ---------------------------------------------------------------------------
# VMEM-aware tile selection
# ---------------------------------------------------------------------------
def _row_tile(rows, per_row_bytes, fixed_bytes=0, budget=_VMEM_BUDGET):
    """Largest power-of-two row tile dividing `rows` whose working set fits budget."""
    avail = max(budget - fixed_bytes, 8 * per_row_bytes)
    for t in (512, 256, 128, 64, 32, 16, 8):
        if t <= rows and rows % t == 0 and t * per_row_bytes <= avail:
            return t
    return rows


def _attn_tile(n, nt, c, k, nb):
    fixed = nt * c * 12 + 12 * c * c + 8 * n        # xt (2 buf f32) + k/v bf16 + wqkv + num
    per_row = 4 * (5 * nt + 2 * n + 2 * k + 6 * c + 2 * nb)
    return _row_tile(n, per_row, fixed)


def _sqdist_tile(m, n, c, b_bytes, out_bytes):
    fixed = 2 * n * c * b_bytes + 3 * n * 4         # b block (2 buf) + |b|^2
    per_row = n * (2 * out_bytes + 8) + 24 * c
    return _row_tile(m, per_row, fixed)


def _group_tile(s, k, c):
    per_row = k * c * 4 * 18 + 32 * c               # grouped (2 buf) + padded 5-D out (2 buf)
    return _row_tile(s, per_row, 0)


# ---------------------------------------------------------------------------
# Pallas kernels
# ---------------------------------------------------------------------------
def _attn_score_kernel(xt_ref, idx_ref, w_ref, f_ref, bins_ref, num_ref,
                       k_s, v_s, *, n):
    """Fused DownSampleToken attention + sparse attention-score numerator.

    Grid = (B, P, T); batch & row-split axes "parallel", row-tile axis "arbitrary"
    (carries the numerator accumulator output and the cached k/v projections).

    xt_ref  : [Nt, C]  points ++ bin tokens (Nt = N + num_bins), f32, resident/batch
    idx_ref : [tq, K]  knn indices of the query rows (feature-space knn)
    w_ref   : [3, C, C] bf16 stacked (W_q^T / sqrt(C), W_k^T, W_v^T)
    f_ref   : [tq, C]  attention_map @ v
    bins_ref: [tq, nb] pre-softmax bin-token columns
    num_ref : [1, N]   accumulator output: sum_i attn[i, j] * mask[i, j]
    k_s/v_s : [Nt, C]  bf16 cached k / v projections (computed once per (b, p))
    """
    t = pl.program_id(2)

    @pl.when(t == 0)
    def _():
        xtb = xt_ref[...].astype(jnp.bfloat16)
        k_s[...] = jnp.dot(xtb, w_ref[1],
                           preferred_element_type=jnp.float32).astype(jnp.bfloat16)
        v_s[...] = jnp.dot(xtb, w_ref[2],
                           preferred_element_type=jnp.float32).astype(jnp.bfloat16)
        num_ref[...] = jnp.zeros_like(num_ref)

    tq = idx_ref.shape[0]
    row_tile = pl.program_id(1) * pl.num_programs(2) + t
    start = pl.multiple_of(row_tile * tq, tq)
    # query rows sliced from the resident xt block (no separate x input stream)
    xb = xt_ref[pl.ds(start, tq), :].astype(jnp.bfloat16)                 # [tq, C]
    q = jnp.dot(xb, w_ref[0], preferred_element_type=jnp.float32)         # scale folded in
    energy = lax.dot_general(q.astype(jnp.bfloat16), k_s[...],
                             (((1,), (1,)), ((), ())),
                             preferred_element_type=jnp.float32)          # [tq, Nt]

    # manual softmax over points + tokens; EUP exp + approx reciprocal
    m = jnp.max(energy, axis=-1, keepdims=True)
    e = jnp.exp(energy - m)
    ssum = jnp.sum(e, axis=-1, keepdims=True)
    attn = e * pl.reciprocal(ssum, approx=True)                           # [tq, Nt]

    f_ref[...] = jnp.dot(attn.astype(jnp.bfloat16), v_s[...],
                         preferred_element_type=jnp.float32)              # [tq, C]
    bins_ref[...] = energy[:, n:]                                         # [tq, nb]

    # sparse attention score numerator: single masked-attn accumulator (no msum,
    # no per-k cast/mul); the count denominator lives in JAX glue.
    idx = idx_ref[...]                                                    # [tq, K]
    attn_pts = attn[:, :n]
    jcol = lax.broadcasted_iota(jnp.int32, (tq, n), 1)
    acc = jnp.zeros((tq, n), jnp.float32)
    for k in range(idx.shape[1]):                                         # K static
        acc = acc + jnp.where(idx[:, k:k + 1] == jcol, attn_pts, 0.0)
    num_ref[...] += jnp.sum(acc, axis=0, keepdims=True)


def attention_score_pallas(xt, nn_idx, wqkv, *, n):
    B, Nt, C = xt.shape
    K = nn_idx.shape[-1]
    nb = Nt - n
    tq = _attn_tile(n, Nt, C, K, nb)
    num_tiles = n // tq
    # v7x megacore: if the batch axis alone cannot feed both TensorCores, split rows.
    row_splits = 2 if (B == 1 and num_tiles % 2 == 0) else 1
    T = num_tiles // row_splits
    kernel = functools.partial(_attn_score_kernel, n=n)
    return pl.pallas_call(
        kernel,
        grid=(B, row_splits, T),
        in_specs=[
            pl.BlockSpec((None, Nt, C), lambda b, p, t: (b, 0, 0)),
            pl.BlockSpec((None, tq, K), lambda b, p, t: (b, p * T + t, 0)),
            pl.BlockSpec((3, C, C), lambda b, p, t: (0, 0, 0)),
        ],
        out_specs=(
            pl.BlockSpec((None, tq, C), lambda b, p, t: (b, p * T + t, 0)),
            pl.BlockSpec((None, tq, nb), lambda b, p, t: (b, p * T + t, 0)),
            pl.BlockSpec((None, None, 1, n), lambda b, p, t: (b, p, 0, 0)),
        ),
        out_shape=(
            jax.ShapeDtypeStruct((B, n, C), jnp.float32),
            jax.ShapeDtypeStruct((B, n, nb), jnp.float32),
            jax.ShapeDtypeStruct((B, row_splits, 1, n), jnp.float32),
        ),
        scratch_shapes=[
            pltpu.VMEM((Nt, C), jnp.bfloat16),
            pltpu.VMEM((Nt, C), jnp.bfloat16),
        ],
        compiler_params=pltpu.CompilerParams(
            dimension_semantics=("parallel", "parallel", "arbitrary"),
            vmem_limit_bytes=_VMEM_LIMIT),
    )(xt, nn_idx, wqkv)


def _neg_sqdist_kernel(a_ref, b_ref, bsq_ref, o_ref):
    """Negated pairwise squared distance: 2 a.b - |a|^2 - |b|^2 (top_k-ready)."""
    a = a_ref[...]                                                        # [tm, C] f32
    b = b_ref[...]                                                        # [N, C] (bf16 or f32)
    ab = lax.dot_general(a.astype(b.dtype), b, (((1,), (1,)), ((), ())),
                         preferred_element_type=jnp.float32)              # [tm, N]
    asq = jnp.sum(a * a, axis=-1, keepdims=True)                          # [tm, 1]
    o_ref[...] = (2.0 * ab - asq - bsq_ref[...]).astype(o_ref.dtype)


def pairwise_neg_sqdist_pallas(a, b, bsq, *, out_dtype=jnp.float32):
    """a: [B,M,C] f32; b: [B,N,C] (pre-cast to bf16 in glue if desired);
    bsq: [B,1,N] precomputed |b|^2 (f32). Returns -(squared distance)."""
    B, M, C = a.shape
    N = b.shape[1]
    tm = _sqdist_tile(M, N, C, jnp.dtype(b.dtype).itemsize, jnp.dtype(out_dtype).itemsize)
    return pl.pallas_call(
        _neg_sqdist_kernel,
        grid=(B, M // tm),
        in_specs=[
            pl.BlockSpec((None, tm, C), lambda b_, m: (b_, m, 0)),
            pl.BlockSpec((None, N, C), lambda b_, m: (b_, 0, 0)),
            pl.BlockSpec((None, 1, N), lambda b_, m: (b_, 0, 0)),
        ],
        out_specs=pl.BlockSpec((None, tm, N), lambda b_, m: (b_, m, 0)),
        out_shape=jax.ShapeDtypeStruct((B, M, N), out_dtype),
        compiler_params=pltpu.CompilerParams(
            dimension_semantics=("parallel", "parallel"),
            vmem_limit_bytes=_VMEM_LIMIT),
    )(a, b, bsq)


def _group_affine_kernel(g_ref, scale_ref, shift_ref, np_ref, o_ref):
    """Purely elementwise affine (stats hoisted to glue) + anchor broadcast.

    g_ref    : [ts, K, C] grouped features
    scale_ref: [1, C]     alpha / (std_b + 1e-5)
    shift_ref: [ts, C]    beta - mean_{b,s,c} * scale
    np_ref   : [ts, C]    anchor (downsampled) features
    o_ref    : [ts, K, 2, C]; glue reshapes to [..., 2C]
    """
    g = g_ref[...]
    ts, k, c = g.shape
    gn = g * scale_ref[...][:, None, :] + shift_ref[...][:, None, :]
    o_ref[:, :, 0:1, :] = gn[:, :, None, :]
    o_ref[:, :, 1:2, :] = jnp.broadcast_to(np_ref[...][:, None, None, :], (ts, k, 1, c))


def group_affine_pallas(grouped, scale, shift, anchors):
    B, S, K, C = grouped.shape
    ts = _group_tile(S, K, C)
    return pl.pallas_call(
        _group_affine_kernel,
        grid=(B, S // ts),
        in_specs=[
            pl.BlockSpec((None, ts, K, C), lambda b, s: (b, s, 0, 0)),
            pl.BlockSpec((None, 1, C), lambda b, s: (b, 0, 0)),
            pl.BlockSpec((None, ts, C), lambda b, s: (b, s, 0)),
            pl.BlockSpec((None, ts, C), lambda b, s: (b, s, 0)),
        ],
        out_specs=pl.BlockSpec((None, ts, K, 2, C), lambda b, s: (b, s, 0, 0, 0)),
        out_shape=jax.ShapeDtypeStruct((B, S, K, 2, C), jnp.float32),
        compiler_params=pltpu.CompilerParams(
            dimension_semantics=("parallel", "parallel"),
            vmem_limit_bytes=_VMEM_LIMIT),
    )(grouped, scale, shift, anchors)


# ---------------------------------------------------------------------------
# JAX glue (index logic, sorting / sampling / ragged concat)
# ---------------------------------------------------------------------------
def _calc_num_points_to_choose(bin_prob, max_num_points, total):
    """calculate_num_points_to_choose: iterative water-filling allocation."""
    B, nb = bin_prob.shape
    maxf = max_num_points.astype(jnp.float32)
    bp = bin_prob * maxf + 1e-10
    chosen = jnp.zeros_like(bp)

    def body(_, carry):
        bp, chosen = carry
        num_to_choose = total - jnp.sum(chosen, axis=1, keepdims=True)
        done = jnp.all(num_to_choose == 0)                 # emulates torch `break`
        bpn = bp / jnp.sum(bp, axis=1, keepdims=True)
        new_chosen = chosen + bpn * num_to_choose
        new_chosen = jnp.where(new_chosen >= maxf, maxf, new_chosen)
        new_bp = bpn * jnp.where(new_chosen >= maxf, 0.0, 1.0)
        chosen = jnp.where(done, chosen, new_chosen)
        bp = jnp.where(done, bp, new_bp)
        return bp, chosen

    bp, chosen = lax.fori_loop(0, nb, body, (bp, chosen))
    chosen = chosen.astype(jnp.int32)
    deficit = (total - jnp.sum(chosen, axis=1)).astype(jnp.int32)
    slack_bin = jnp.argmax(maxf - chosen.astype(jnp.float32), axis=1)
    chosen = chosen.at[jnp.arange(B), slack_bin].add(deficit)
    return chosen


def downsample_token_forward(points, params, stride, key):
    """DownSampleToken.forward (bin_mode='token', heads=1, 'random' sampling)."""
    B, N, C = points.shape
    nb = NUM_BINS
    x = points                                                     # [B, N, C]
    tokens = jnp.transpose(params["bin_tokens"][0])                # [nb, C]
    xt = jnp.concatenate([x, jnp.broadcast_to(tokens[None], (B, nb, C))], axis=1)

    # neighbor_mask: knn (K=32) in normalized feature space; only the [B,N,K]
    # indices are kept (the dense mask is rebuilt on the fly inside the fused
    # attention kernel). Distances written in bf16 to halve the N^2 HBM traffic.
    a_mean = jnp.mean(x, axis=1, keepdims=True)
    a = x - a_mean
    a_std = jnp.mean(jnp.std(a, axis=1, ddof=1, keepdims=True), axis=2, keepdims=True)
    an = a / a_std
    an_sq = jnp.sum(an * an, axis=-1)[:, None, :]                  # [B,1,N]
    negd = pairwise_neg_sqdist_pallas(an, an.astype(jnp.bfloat16), an_sq,
                                      out_dtype=jnp.bfloat16)      # [B,N,N] bf16
    nn_idx = lax.top_k(negd, KNN_K)[1].astype(jnp.int32)           # [B,N,K]

    # score denominator: per-column neighbour histogram, computed once in glue.
    cnt = jnp.zeros((B, N), jnp.float32).at[
        jnp.arange(B, dtype=jnp.int32)[:, None],
        nn_idx.reshape(B, N * KNN_K)].add(1.0)

    # fused single-head attention + sparse attention-score numerator
    f, attn_bins_pre, num = attention_score_pallas(xt, nn_idx, params["wqkv_t"], n=N)
    num = jnp.sum(num[:, :, 0, :], axis=1)                         # [B, N]
    sp = cnt + 1e-8
    score = num / sp / sp                                          # / count^2 (as reference)
    score = jnp.where(jnp.isnan(score), 0.0, score)[:, None, :]    # [B, 1, N]

    # bin_partition: z_score normalization + dynamic bin boundaries (initial None)
    sz = (score - jnp.mean(score, axis=2, keepdims=True)) / jnp.std(score, axis=2, keepdims=True)
    sz4 = sz.reshape(B, 1, N, 1)
    n_el = B * N
    b_idx = (jnp.arange(1, nb) / nb * n_el).astype(jnp.int32)
    sorted_desc = jnp.sort(sz4.reshape(-1))[::-1]
    bnd = sorted_desc[b_idx]
    upper = jnp.concatenate([jnp.array([jnp.inf], jnp.float32), bnd]).reshape(1, 1, 1, nb)
    lower = jnp.concatenate([bnd, jnp.array([-jnp.inf], jnp.float32)]).reshape(1, 1, 1, nb)
    bin_mask = (sz4 < upper) & (sz4 >= lower)                      # [B, 1, N, nb]

    # bin weights ('mean_relu')
    masked_tok = attn_bins_pre.reshape(B, 1, N, nb) * bin_mask
    cntb = jnp.sum(bin_mask, axis=2)
    bw_pre = (jnp.sum(masked_tok, axis=2) / (cntb + 1e-8))[:, 0, :]  # [B, nb]
    bin_weights = jax.nn.relu(bw_pre)

    max_num_points = jnp.sum(bin_mask[:, 0], axis=1)               # [B, nb]
    total = N // stride        # static: every point lands in exactly one bin
    k_choose = _calc_num_points_to_choose(bin_weights, max_num_points, total)

    # 'random' bin sampling: Boltzmann probabilities per bin.
    # TODO(synk): torch.multinomial(without replacement) reproduced
    # distributionally via the Gumbel-top-k trick in JAX glue (not in-kernel).
    szn = jnp.tanh((score - jnp.mean(score, axis=2, keepdims=True))
                   / jnp.std(score, axis=2, keepdims=True))
    probs = jnp.exp(szn.reshape(B, 1, N, 1) / BOLTZMANN_T) * bin_mask
    probs = probs / jnp.sum(probs, axis=2, keepdims=True)
    probs = jnp.where(jnp.isnan(probs), 1e-8, probs)[:, 0]         # [B, N, nb]
    probs = jnp.transpose(probs, (0, 2, 1))                        # [B, nb, N]
    gumbel = jax.random.gumbel(key, probs.shape, dtype=jnp.float32)
    sampled = lax.top_k(jnp.log(probs) + gumbel, total)[1]         # [B, nb, total]

    # ragged concat of the first k_choose[b, j] samples of each bin -> [B, total]
    cum = jnp.cumsum(k_choose, axis=1)                             # [B, nb]
    slots = jnp.arange(total, dtype=jnp.int32)
    bin_of_slot = jnp.sum((slots[None, :, None] >= cum[:, None, :]).astype(jnp.int32), axis=-1)
    prev_cum = jnp.concatenate([jnp.zeros((B, 1), cum.dtype), cum[:, :-1]], axis=1)
    pos_in_bin = slots[None, :] - jnp.take_along_axis(prev_cum, bin_of_slot, axis=1)
    idx_down = sampled[jnp.arange(B)[:, None], bin_of_slot, pos_in_bin]

    return f, idx_down


@functools.partial(jax.jit, static_argnums=(3, 4))
def local_grouper_forward(xyz, points, params, sample_ratio, kneighbors, key):
    """LocalGrouper.forward (use_xyz=False, normalize='center')."""
    B, N, _ = xyz.shape
    C = points.shape[-1]
    S = N // sample_ratio
    points, idx = downsample_token_forward(points, params, sample_ratio, key)

    bidx = jnp.arange(B)[:, None]
    new_xyz = xyz[bidx, idx]                                       # [B, S, 3]
    new_points = points[bidx, idx]                                 # [B, S, C]

    # knn_point on xyz (C=3, f32)
    xyz_sq = jnp.sum(xyz * xyz, axis=-1)[:, None, :]               # [B, 1, N]
    negd = pairwise_neg_sqdist_pallas(new_xyz, xyz, xyz_sq, out_dtype=jnp.float32)
    knn_idx = lax.top_k(negd, kneighbors)[1]                       # [B, S, k]

    bidx3 = jnp.arange(B)[:, None, None]
    grouped = points[bidx3, knn_idx]                               # [B, S, k, C]
    # use_xyz=False: grouped_xyz is never needed.

    # 'center' normalization stats hoisted to XLA glue (cheap global reductions).
    mean = jnp.mean(grouped, axis=2, keepdims=True)                # [B, S, 1, C]
    d = grouped - mean
    std = jnp.sqrt(jnp.sum(d * d, axis=(1, 2, 3)) / (S * kneighbors * C - 1))  # unbiased
    inv = 1.0 / (std + 1e-5)                                       # [B]
    scale = params["affine_alpha"].reshape(1, 1, C) * inv[:, None, None]       # [B, 1, C]
    shift = params["affine_beta"].reshape(1, 1, C) - mean[:, :, 0, :] * scale  # [B, S, C]

    out5 = group_affine_pallas(grouped, scale, shift, new_points)  # [B, S, k, 2, C]
    new_points_out = out5.reshape(B, S, kneighbors, 2 * C)         # free reshape
    return new_xyz, new_points_out


# ---------------------------------------------------------------------------
# Deterministic parameter init (shapes per DownSampleToken / LocalGrouper init)
# ---------------------------------------------------------------------------
def init_params(key, channel):
    c = channel
    k1, k2, k3, k4 = jax.random.split(key, 4)
    std = 1.0 / math.sqrt(c)
    wq = jax.random.normal(k1, (c, c), jnp.float32) * std          # Conv1d weight [C_out, C_in]
    wk = jax.random.normal(k2, (c, c), jnp.float32) * std
    wv = jax.random.normal(k3, (c, c), jnp.float32) * std
    bin_tokens = jax.random.normal(k4, (1, c, NUM_BINS), jnp.float32) * std
    # pre-transpose to [C_in, C_out], fold 1/sqrt(C) attention scale into W_q,
    # stack and cast to bf16 once (kernels never cast weights).
    wqkv_t = jnp.stack([wq.T / math.sqrt(c), wk.T, wv.T], axis=0).astype(jnp.bfloat16)
    return {
        "wqkv_t": wqkv_t,
        "bin_tokens": bin_tokens,
        "affine_alpha": jnp.ones((1, c), jnp.float32),
        "affine_beta": jnp.zeros((1, c), jnp.float32),
    }


if __name__ == "__main__":
    B, N, C = 2, 64, 8                 # batch, points, feature channels
    sample_ratio, kneighbors = 2, 8    # -> S = 32 sampled points, k = 8 neighbors

    root = jax.random.PRNGKey(0)
    kxyz, kpts, kparam, ksample = jax.random.split(root, 4)
    xyz = jax.random.normal(kxyz, (B, N, 3), jnp.float32)
    points = jax.random.normal(kpts, (B, N, C), jnp.float32)
    params = init_params(kparam, C)

    new_xyz, new_points = local_grouper_forward(
        xyz, points, params, sample_ratio, kneighbors, ksample)
    jax.block_until_ready((new_xyz, new_points))

    assert new_xyz.shape == (B, N // sample_ratio, 3)
    assert new_points.shape == (B, N // sample_ratio, kneighbors, 2 * C)
    print("KERNEL_OK")
</pallas_src>

<mosaic_0001>
module attributes {stable_mosaic.version = 11 : i64} {
  func.func @_neg_sqdist_kernel(%arg0: i32, %arg1: i32, %arg2: memref<1x64x8xf32, #tpu.memory_space<vmem>>, %arg3: memref<1x64x8xbf16, #tpu.memory_space<vmem>>, %arg4: memref<1x1x64xf32, #tpu.memory_space<vmem>>, %arg5: memref<1x64x64xbf16, #tpu.memory_space<vmem>>) attributes {dimension_semantics = [#tpu.dimension_semantics<parallel>, #tpu.dimension_semantics<parallel>], iteration_bounds = array<i64: 2, 1>, scalar_prefetch = 0 : i64, scratch_operands = 0 : i64, tpu.core_type = #tpu.core_type<tc>, window_params = [{transform_indices = @transform_0, window_bounds = array<i64: 1, 64, 8>}, {transform_indices = @transform_1, window_bounds = array<i64: 1, 64, 8>}, {transform_indices = @transform_2, window_bounds = array<i64: 1, 1, 64>}, {transform_indices = @transform_3, window_bounds = array<i64: 1, 64, 64>}]} {
    %c0 = arith.constant 0 : index
    %c0_0 = arith.constant 0 : index
    %c0_1 = arith.constant 0 : index
    %0 = vector.load %arg2[%c0, %c0_0, %c0_1] : memref<1x64x8xf32, #tpu.memory_space<vmem>>, vector<1x64x8xf32>
    %1 = vector.shape_cast %0 : vector<1x64x8xf32> to vector<64x8xf32>
    %c0_2 = arith.constant 0 : index
    %c0_3 = arith.constant 0 : index
    %c0_4 = arith.constant 0 : index
    %2 = vector.load %arg3[%c0_2, %c0_3, %c0_4] : memref<1x64x8xbf16, #tpu.memory_space<vmem>>, vector<1x64x8xbf16>
    %3 = vector.shape_cast %2 : vector<1x64x8xbf16> to vector<64x8xbf16>
    %4 = arith.truncf %1 : vector<64x8xf32> to vector<64x8xbf16>
    %cst = arith.constant dense<0.000000e+00> : vector<64x64xf32>
    %5 = tpu.matmul %4, %3, %cst {dimension_numbers = #tpu.dot_dimension_numbers<[1], [1], [0], [0], [0, 0, 1, 0], [], []>} : vector<64x8xbf16>, vector<64x8xbf16>, vector<64x64xf32> -> vector<64x64xf32>
    %6 = arith.mulf %1, %1 : vector<64x8xf32>
    %cst_5 = arith.constant dense<0.000000e+00> : vector<64xf32>
    %7 = vector.multi_reduction <add>, %6, %cst_5 [1] : vector<64x8xf32> to vector<64xf32>
    %8 = vector.shape_cast %7 : vector<64xf32> to vector<64x1xf32>
    %cst_6 = arith.constant 2.000000e+00 : f32
    %9 = vector.broadcast %cst_6 : f32 to vector<64x64xf32>
    %10 = arith.mulf %9, %5 : vector<64x64xf32>
    %11 = vector.broadcast %8 : vector<64x1xf32> to vector<64x64xf32>
    %12 = arith.subf %10, %11 : vector<64x64xf32>
    %c0_7 = arith.constant 0 : index
    %c0_8 = arith.constant 0 : index
    %c0_9 = arith.constant 0 : index
    %13 = vector.load %arg4[%c0_7, %c0_8, %c0_9] : memref<1x1x64xf32, #tpu.memory_space<vmem>>, vector<1x1x64xf32>
    %14 = vector.shape_cast %13 : vector<1x1x64xf32> to vector<1x64xf32>
    %15 = vector.broadcast %14 : vector<1x64xf32> to vector<64x64xf32>
    %16 = arith.subf %12, %15 : vector<64x64xf32>
    %17 = arith.truncf %16 : vector<64x64xf32> to vector<64x64xbf16>
    %c0_10 = arith.constant 0 : index
    %c0_11 = arith.constant 0 : index
    %c0_12 = arith.constant 0 : index
    %18 = vector.load %arg5[%c0_10, %c0_11, %c0_12] : memref<1x64x64xbf16, #tpu.memory_space<vmem>>, vector<1x64x64xbf16>
    %19 = vector.shape_cast %18 : vector<1x64x64xbf16> to vector<64x64xbf16>
    %20 = vector.shape_cast %17 : vector<64x64xbf16> to vector<1x64x64xbf16>
    tpu.vector_store %arg5[%c0_10, %c0_11, %c0_12], %20 {strides = array<i32>} : memref<1x64x64xbf16, #tpu.memory_space<vmem>>, vector<1x64x64xbf16>,
    return
  }
  func.func @transform_0(%arg0: i32, %arg1: i32) -> (i32, i32, i32) {
    %c0_i32 = arith.constant 0 : i32
    %c0_i32_0 = arith.constant 0 : i32
    return %arg0, %arg1, %c0_i32 : i32, i32, i32
  }
  func.func @transform_1(%arg0: i32, %arg1: i32) -> (i32, i32, i32) {
    %c0_i32 = arith.constant 0 : i32
    %c0_i32_0 = arith.constant 0 : i32
    %c0_i32_1 = arith.constant 0 : i32
    return %arg0, %c0_i32, %c0_i32_0 : i32, i32, i32
  }
  func.func @transform_2(%arg0: i32, %arg1: i32) -> (i32, i32, i32) {
    %c0_i32 = arith.constant 0 : i32
    %c0_i32_0 = arith.constant 0 : i32
    %c0_i32_1 = arith.constant 0 : i32
    return %arg0, %c0_i32, %c0_i32_0 : i32, i32, i32
  }
  func.func @transform_3(%arg0: i32, %arg1: i32) -> (i32, i32, i32) {
    %c0_i32 = arith.constant 0 : i32
    %c0_i32_0 = arith.constant 0 : i32
    return %arg0, %arg1, %c0_i32 : i32, i32, i32
  }
}

module attributes {stable_mosaic.version = 11 : i64} {
  func.func @_attn_score_kernel(%arg0: i32, %arg1: i32, %arg2: i32, %arg3: memref<1x70x8xf32, #tpu.memory_space<vmem>>, %arg4: memref<1x64x32xi32, #tpu.memory_space<vmem>>, %arg5: memref<3x8x8xbf16, #tpu.memory_space<vmem>>, %arg6: memref<1x64x8xf32, #tpu.memory_space<vmem>>, %arg7: memref<1x64x6xf32, #tpu.memory_space<vmem>>, %arg8: memref<1x1x1x64xf32, #tpu.memory_space<vmem>>, %arg9: memref<70x8xbf16, #tpu.memory_space<vmem>>, %arg10: memref<70x8xbf16, #tpu.memory_space<vmem>>) attributes {dimension_semantics = [#tpu.dimension_semantics<parallel>, #tpu.dimension_semantics<parallel>, #tpu.dimension_semantics<arbitrary>], iteration_bounds = array<i64: 2, 1, 1>, scalar_prefetch = 0 : i64, scratch_operands = 2 : i64, tpu.core_type = #tpu.core_type<tc>, window_params = [{transform_indices = @transform_0, window_bounds = array<i64: 1, 70, 8>}, {transform_indices = @transform_1, window_bounds = array<i64: 1, 64, 32>}, {pipeline_mode = #tpu.pipeline_mode<synchronous>, transform_indices = @transform_2, window_bounds = array<i64: 3, 8, 8>}, {transform_indices = @transform_3, window_bounds = array<i64: 1, 64, 8>}, {transform_indices = @transform_4, window_bounds = array<i64: 1, 64, 6>}, {transform_indices = @transform_5, window_bounds = array<i64: 1, 1, 1, 64>}]} {
    %c0_i32 = arith.constant 0 : i32
    %0 = arith.cmpi eq, %arg2, %c0_i32 : i32
    %1 = arith.extui %0 : i1 to i32
    %c0_i32_0 = arith.constant 0 : i32
    %2 = arith.cmpi ne, %1, %c0_i32_0 : i32
    scf.if %2 {
      %c0_64 = arith.constant 0 : index
      %c0_65 = arith.constant 0 : index
      %c0_66 = arith.constant 0 : index
      %242 = vector.load %arg3[%c0_64, %c0_65, %c0_66] : memref<1x70x8xf32, #tpu.memory_space<vmem>>, vector<1x70x8xf32>
      %243 = vector.shape_cast %242 : vector<1x70x8xf32> to vector<70x8xf32>
      %244 = arith.truncf %243 : vector<70x8xf32> to vector<70x8xbf16>
      %c1 = arith.constant 1 : index
      %c0_67 = arith.constant 0 : index
      %c0_68 = arith.constant 0 : index
      %245 = vector.load %arg5[%c1, %c0_67, %c0_68] : memref<3x8x8xbf16, #tpu.memory_space<vmem>>, vector<1x8x8xbf16>
      %246 = vector.shape_cast %245 : vector<1x8x8xbf16> to vector<8x8xbf16>
      %cst_69 = arith.constant dense<0.000000e+00> : vector<70x8xf32>
      %247 = tpu.matmul %244, %246, %cst_69 {dimension_numbers = #tpu.dot_dimension_numbers<[1], [0], [0], [1], [0, 0, 1, 1], [], []>} : vector<70x8xbf16>, vector<8x8xbf16>, vector<70x8xf32> -> vector<70x8xf32>
      %248 = arith.truncf %247 : vector<70x8xf32> to vector<70x8xbf16>
      %c0_70 = arith.constant 0 : index
      %c0_71 = arith.constant 0 : index
      %249 = vector.load %arg9[%c0_70, %c0_71] : memref<70x8xbf16, #tpu.memory_space<vmem>>, vector<70x8xbf16>
      tpu.vector_store %arg9[%c0_70, %c0_71], %248 {strides = array<i32>} : memref<70x8xbf16, #tpu.memory_space<vmem>>, vector<70x8xbf16>,
      %c2 = arith.constant 2 : index
      %c0_72 = arith.constant 0 : index
      %c0_73 = arith.constant 0 : index
      %250 = vector.load %arg5[%c2, %c0_72, %c0_73] : memref<3x8x8xbf16, #tpu.memory_space<vmem>>, vector<1x8x8xbf16>
      %251 = vector.shape_cast %250 : vector<1x8x8xbf16> to vector<8x8xbf16>
      %cst_74 = arith.constant dense<0.000000e+00> : vector<70x8xf32>
      %252 = tpu.matmul %244, %251, %cst_74 {dimension_numbers = #tpu.dot_dimension_numbers<[1], [0], [0], [1], [0, 0, 1, 1], [], []>} : vector<70x8xbf16>, vector<8x8xbf16>, vector<70x8xf32> -> vector<70x8xf32>
      %253 = arith.truncf %252 : vector<70x8xf32> to vector<70x8xbf16>
      %c0_75 = arith.constant 0 : index
      %c0_76 = arith.constant 0 : index
      %254 = vector.load %arg10[%c0_75, %c0_76] : memref<70x8xbf16, #tpu.memory_space<vmem>>, vector<70x8xbf16>
      tpu.vector_store %arg10[%c0_75, %c0_76], %253 {strides = array<i32>} : memref<70x8xbf16, #tpu.memory_space<vmem>>, vector<70x8xbf16>,
      %cst_77 = arith.constant 0.000000e+00 : f32
      %255 = vector.broadcast %cst_77 : f32 to vector<1x64xf32>
      %c0_78 = arith.constant 0 : index
      %c0_79 = arith.constant 0 : index
      %c0_80 = arith.constant 0 : index
      %c0_81 = arith.constant 0 : index
      %256 = vector.load %arg8[%c0_78, %c0_79, %c0_80, %c0_81] : memref<1x1x1x64xf32, #tpu.memory_space<vmem>>, vector<1x1x1x64xf32>
      %257 = vector.shape_cast %256 : vector<1x1x1x64xf32> to vector<1x64xf32>
      %258 = vector.shape_cast %255 : vector<1x64xf32> to vector<1x1x1x64xf32>
      tpu.vector_store %arg8[%c0_78, %c0_79, %c0_80, %c0_81], %258 {strides = array<i32>} : memref<1x1x1x64xf32, #tpu.memory_space<vmem>>, vector<1x1x1x64xf32>,
    } else {
    }
    %c1_i32 = arith.constant 1 : i32
    %3 = arith.muli %arg1, %c1_i32 : i32
    %4 = arith.addi %3, %arg2 : i32
    %c64_i32 = arith.constant 64 : i32
    %5 = arith.muli %4, %c64_i32 : i32
    %6 = tpu.assume_multiple %5, 64 : i32
    %c0 = arith.constant 0 : index
    %7 = arith.index_cast %6 : i32 to index
    %c0_1 = arith.constant 0 : index
    %8 = vector.load %arg3[%c0, %7, %c0_1] : memref<1x70x8xf32, #tpu.memory_space<vmem>>, vector<1x64x8xf32>
    %9 = vector.shape_cast %8 : vector<1x64x8xf32> to vector<64x8xf32>
    %10 = arith.truncf %9 : vector<64x8xf32> to vector<64x8xbf16>
    %c0_2 = arith.constant 0 : index
    %c0_3 = arith.constant 0 : index
    %c0_4 = arith.constant 0 : index
    %11 = vector.load %arg5[%c0_2, %c0_3, %c0_4] : memref<3x8x8xbf16, #tpu.memory_space<vmem>>, vector<1x8x8xbf16>
    %12 = vector.shape_cast %11 : vector<1x8x8xbf16> to vector<8x8xbf16>
    %cst = arith.constant dense<0.000000e+00> : vector<64x8xf32>
    %13 = tpu.matmul %10, %12, %cst {dimension_numbers = #tpu.dot_dimension_numbers<[1], [0], [0], [1], [0, 0, 1, 1], [], []>} : vector<64x8xbf16>, vector<8x8xbf16>, vector<64x8xf32> -> vector<64x8xf32>
    %14 = arith.truncf %13 : vector<64x8xf32> to vector<64x8xbf16>
    %c0_5 = arith.constant 0 : index
    %c0_6 = arith.constant 0 : index
    %15 = vector.load %arg9[%c0_5, %c0_6] : memref<70x8xbf16, #tpu.memory_space<vmem>>, vector<70x8xbf16>
    %cst_7 = arith.constant dense<0.000000e+00> : vector<64x70xf32>
    %16 = tpu.matmul %14, %15, %cst_7 {dimension_numbers = #tpu.dot_dimension_numbers<[1], [1], [0], [0], [0, 0, 1, 0], [], []>} : vector<64x8xbf16>, vector<70x8xbf16>, vector<64x70xf32> -> vector<64x70xf32>
    %cst_8 = arith.constant dense<0xFF800000> : vector<64xf32>
    %17 = vector.multi_reduction <maximumf>, %16, %cst_8 [1] : vector<64x70xf32> to vector<64xf32>
    %18 = vector.shape_cast %17 : vector<64xf32> to vector<64x1xf32>
    %19 = vector.broadcast %18 : vector<64x1xf32> to vector<64x70xf32>
    %20 = arith.subf %16, %19 : vector<64x70xf32>
    %21 = math.exp %20 : vector<64x70xf32>
    %cst_9 = arith.constant dense<0.000000e+00> : vector<64xf32>
    %22 = vector.multi_reduction <add>, %21, %cst_9 [1] : vector<64x70xf32> to vector<64xf32>
    %23 = vector.shape_cast %22 : vector<64xf32> to vector<64x1xf32>
    %24 = tpu.reciprocal %23 {approx = true} : vector<64x1xf32> -> vector<64x1xf32>
    %25 = vector.broadcast %24 : vector<64x1xf32> to vector<64x70xf32>
    %26 = arith.mulf %21, %25 : vector<64x70xf32>
    %27 = arith.truncf %26 : vector<64x70xf32> to vector<64x70xbf16>
    %c0_10 = arith.constant 0 : index
    %c0_11 = arith.constant 0 : index
    %28 = vector.load %arg10[%c0_10, %c0_11] : memref<70x8xbf16, #tpu.memory_space<vmem>>, vector<70x8xbf16>
    %cst_12 = arith.constant dense<0.000000e+00> : vector<64x8xf32>
    %29 = tpu.matmul %27, %28, %cst_12 {dimension_numbers = #tpu.dot_dimension_numbers<[1], [0], [0], [1], [0, 0, 1, 1], [], []>} : vector<64x70xbf16>, vector<70x8xbf16>, vector<64x8xf32> -> vector<64x8xf32>
    %c0_13 = arith.constant 0 : index
    %c0_14 = arith.constant 0 : index
    %c0_15 = arith.constant 0 : index
    %30 = vector.load %arg6[%c0_13, %c0_14, %c0_15] : memref<1x64x8xf32, #tpu.memory_space<vmem>>, vector<1x64x8xf32>
    %31 = vector.shape_cast %30 : vector<1x64x8xf32> to vector<64x8xf32>
    %32 = vector.shape_cast %29 : vector<64x8xf32> to vector<1x64x8xf32>
    tpu.vector_store %arg6[%c0_13, %c0_14, %c0_15], %32 {strides = array<i32>} : memref<1x64x8xf32, #tpu.memory_space<vmem>>, vector<1x64x8xf32>,
    %33 = vector.extract_strided_slice %16 {offsets = [0, 64], sizes = [64, 6], strides = [1, 1]} : vector<64x70xf32> to vector<64x6xf32>
    %c0_16 = arith.constant 0 : index
    %c0_17 = arith.constant 0 : index
    %c0_18 = arith.constant 0 : index
    %34 = vector.load %arg7[%c0_16, %c0_17, %c0_18] : memref<1x64x6xf32, #tpu.memory_space<vmem>>, vector<1x64x6xf32>
    %35 = vector.shape_cast %34 : vector<1x64x6xf32> to vector<64x6xf32>
    %36 = vector.shape_cast %33 : vector<64x6xf32> to vector<1x64x6xf32>
    tpu.vector_store %arg7[%c0_16, %c0_17, %c0_18], %36 {strides = array<i32>} : memref<1x64x6xf32, #tpu.memory_space<vmem>>, vector<1x64x6xf32>,
    %c0_19 = arith.constant 0 : index
    %c0_20 = arith.constant 0 : index
    %c0_21 = arith.constant 0 : index
    %37 = vector.load %arg4[%c0_19, %c0_20, %c0_21] : memref<1x64x32xi32, #tpu.memory_space<vmem>>, vector<1x64x32xi32>
    %38 = vector.shape_cast %37 : vector<1x64x32xi32> to vector<64x32xi32>
    %39 = vector.extract_strided_slice %26 {offsets = [0, 0], sizes = [64, 64], strides = [1, 1]} : vector<64x70xf32> to vector<64x64xf32>
    %40 = tpu.iota {dimensions = array<i32: 1>} : vector<64x64xi32>
    %cst_22 = arith.constant 0.000000e+00 : f32
    %41 = vector.broadcast %cst_22 : f32 to vector<64x64xf32>
    %42 = vector.extract_strided_slice %38 {offsets = [0, 0], sizes = [64, 1], strides = [1, 1]} : vector<64x32xi32> to vector<64x1xi32>
    %43 = vector.broadcast %42 : vector<64x1xi32> to vector<64x64xi32>
    %44 = arith.cmpi eq, %43, %40 : vector<64x64xi32>
    %cst_23 = arith.constant 0.000000e+00 : f32
    %45 = vector.broadcast %cst_23 : f32 to vector<64x64xf32>
    %46 = arith.select %44, %39, %45 : vector<64x64xi1>, vector<64x64xf32>
    %47 = arith.addf %41, %46 : vector<64x64xf32>
    %48 = vector.extract_strided_slice %38 {offsets = [0, 1], sizes = [64, 1], strides = [1, 1]} : vector<64x32xi32> to vector<64x1xi32>
    %49 = vector.broadcast %48 : vector<64x1xi32> to vector<64x64xi32>
    %50 = arith.cmpi eq, %49, %40 : vector<64x64xi32>
    %cst_24 = arith.constant 0.000000e+00 : f32
    %51 = vector.broadcast %cst_24 : f32 to vector<64x64xf32>
    %52 = arith.select %50, %39, %51 : vector<64x64xi1>, vector<64x64xf32>
    %53 = arith.addf %47, %52 : vector<64x64xf32>
    %54 = vector.extract_strided_slice %38 {offsets = [0, 2], sizes = [64, 1], strides = [1, 1]} : vector<64x32xi32> to vector<64x1xi32>
    %55 = vector.broadcast %54 : vector<64x1xi32> to vector<64x64xi32>
    %56 = arith.cmpi eq, %55, %40 : vector<64x64xi32>
    %cst_25 = arith.constant 0.000000e+00 : f32
    %57 = vector.broadcast %cst_25 : f32 to vector<64x64xf32>
    %58 = arith.select %56, %39, %57 : vector<64x64xi1>, vector<64x64xf32>
    %59 = arith.addf %53, %58 : vector<64x64xf32>
    %60 = vector.extract_strided_slice %38 {offsets = [0, 3], sizes = [64, 1], strides = [1, 1]} : vector<64x32xi32> to vector<64x1xi32>
    %61 = vector.broadcast %60 : vector<64x1xi32> to vector<64x64xi32>
    %62 = arith.cmpi eq, %61, %40 : vector<64x64xi32>
    %cst_26 = arith.constant 0.000000e+00 : f32
    %63 = vector.broadcast %cst_26 : f32 to vector<64x64xf32>
    %64 = arith.select %62, %39, %63 : vector<64x64xi1>, vector<64x64xf32>
    %65 = arith.addf %59, %64 : vector<64x64xf32>
    %66 = vector.extract_strided_slice %38 {offsets = [0, 4], sizes = [64, 1], strides = [1, 1]} : vector<64x32xi32> to vector<64x1xi32>
    %67 = vector.broadcast %66 : vector<64x1xi32> to vector<64x64xi32>
    %68 = arith.cmpi eq, %67, %40 : vector<64x64xi32>
    %cst_27 = arith.constant 0.000000e+00 : f32
    %69 = vector.broadcast %cst_27 : f32 to vector<64x64xf32>
    %70 = arith.select %68, %39, %69 : vector<64x64xi1>, vector<64x64xf32>
    %71 = arith.addf %65, %70 : vector<64x64xf32>
    %72 = vector.extract_strided_slice %38 {offsets = [0, 5], sizes = [64, 1], strides = [1, 1]} : vector<64x32xi32> to vector<64x1xi32>
    %73 = vector.broadcast %72 : vector<64x1xi32> to vector<64x64xi32>
    %74 = arith.cmpi eq, %73, %40 : vector<64x64xi32>
    %cst_28 = arith.constant 0.000000e+00 : f32
    %75 = vector.broadcast %cst_28 : f32 to vector<64x64xf32>
    %76 = arith.select %74, %39, %75 : vector<64x64xi1>, vector<64x64xf32>
    %77 = arith.addf %71, %76 : vector<64x64xf32>
    %78 = vector.extract_strided_slice %38 {offsets = [0, 6], sizes = [64, 1], strides = [1, 1]} : vector<64x32xi32> to vector<64x1xi32>
    %79 = vector.broadcast %78 : vector<64x1xi32> to vector<64x64xi32>
    %80 = arith.cmpi eq, %79, %40 : vector<64x64xi32>
    %cst_29 = arith.constant 0.000000e+00 : f32
    %81 = vector.broadcast %cst_29 : f32 to vector<64x64xf32>
    %82 = arith.select %80, %39, %81 : vector<64x64xi1>, vector<64x64xf32>
    %83 = arith.addf %77, %82 : vector<64x64xf32>
    %84 = vector.extract_strided_slice %38 {offsets = [0, 7], sizes = [64, 1], strides = [1, 1]} : vector<64x32xi32> to vector<64x1xi32>
    %85 = vector.broadcast %84 : vector<64x1xi32> to vector<64x64xi32>
    %86 = arith.cmpi eq, %85, %40 : vector<64x64xi32>
    %cst_30 = arith.constant 0.000000e+00 : f32
    %87 = vector.broadcast %cst_30 : f32 to vector<64x64xf32>
    %88 = arith.select %86, %39, %87 : vector<64x64xi1>, vector<64x64xf32>
    %89 = arith.addf %83, %88 : vector<64x64xf32>
    %90 = vector.extract_strided_slice %38 {offsets = [0, 8], sizes = [64, 1], strides = [1, 1]} : vector<64x32xi32> to vector<64x1xi32>
    %91 = vector.broadcast %90 : vector<64x1xi32> to vector<64x64xi32>
    %92 = arith.cmpi eq, %91, %40 : vector<64x64xi32>
    %cst_31 = arith.constant 0.000000e+00 : f32
    %93 = vector.broadcast %cst_31 : f32 to vector<64x64xf32>
    %94 = arith.select %92, %39, %93 : vector<64x64xi1>, vector<64x64xf32>
    %95 = arith.addf %89, %94 : vector<64x64xf32>
    %96 = vector.extract_strided_slice %38 {offsets = [0, 9], sizes = [64, 1], strides = [1, 1]} : vector<64x32xi32> to vector<64x1xi32>
    %97 = vector.broadcast %96 : vector<64x1xi32> to vector<64x64xi32>
    %98 = arith.cmpi eq, %97, %40 : vector<64x64xi32>
    %cst_32 = arith.constant 0.000000e+00 : f32
    %99 = vector.broadcast %cst_32 : f32 to vector<64x64xf32>
    %100 = arith.select %98, %39, %99 : vector<64x64xi1>, vector<64x64xf32>
    %101 = arith.addf %95, %100 : vector<64x64xf32>
    %102 = vector.extract_strided_slice %38 {offsets = [0, 10], sizes = [64, 1], strides = [1, 1]} : vector<64x32xi32> to vector<64x1xi32>
    %103 = vector.broadcast %102 : vector<64x1xi32> to vector<64x64xi32>
    %104 = arith.cmpi eq, %103, %40 : vector<64x64xi32>
    %cst_33 = arith.constant 0.000000e+00 : f32
    %105 = vector.broadcast %cst_33 : f32 to vector<64x64xf32>
    %106 = arith.select %104, %39, %105 : vector<64x64xi1>, vector<64x64xf32>
    %107 = arith.addf %101, %106 : vector<64x64xf32>
    %108 = vector.extract_strided_slice %38 {offsets = [0, 11], sizes = [64, 1], strides = [1, 1]} : vector<64x32xi32> to vector<64x1xi32>
    %109 = vector.broadcast %108 : vector<64x1xi32> to vector<64x64xi32>
    %110 = arith.cmpi eq, %109, %40 : vector<64x64xi32>
    %cst_34 = arith.constant 0.000000e+00 : f32
    %111 = vector.broadcast %cst_34 : f32 to vector<64x64xf32>
    %112 = arith.select %110, %39, %111 : vector<64x64xi1>, vector<64x64xf32>
    %113 = arith.addf %107, %112 : vector<64x64xf32>
    %114 = vector.extract_strided_slice %38 {offsets = [0, 12], sizes = [64, 1], strides = [1, 1]} : vector<64x32xi32> to vector<64x1xi32>
    %115 = vector.broadcast %114 : vector<64x1xi32> to vector<64x64xi32>
    %116 = arith.cmpi eq, %115, %40 : vector<64x64xi32>
    %cst_35 = arith.constant 0.000000e+00 : f32
    %117 = vector.broadcast %cst_35 : f32 to vector<64x64xf32>
    %118 = arith.select %116, %39, %117 : vector<64x64xi1>, vector<64x64xf32>
    %119 = arith.addf %113, %118 : vector<64x64xf32>
    %120 = vector.extract_strided_slice %38 {offsets = [0, 13], sizes = [64, 1], strides = [1, 1]} : vector<64x32xi32> to vector<64x1xi32>
    %121 = vector.broadcast %120 : vector<64x1xi32> to vector<64x64xi32>
    %122 = arith.cmpi eq, %121, %40 : vector<64x64xi32>
    %cst_36 = arith.constant 0.000000e+00 : f32
    %123 = vector.broadcast %cst_36 : f32 to vector<64x64xf32>
    %124 = arith.select %122, %39, %123 : vector<64x64xi1>, vector<64x64xf32>
    %125 = arith.addf %119, %124 : vector<64x64xf32>
    %126 = vector.extract_strided_slice %38 {offsets = [0, 14], sizes = [64, 1], strides = [1, 1]} : vector<64x32xi32> to vector<64x1xi32>
    %127 = vector.broadcast %126 : vector<64x1xi32> to vector<64x64xi32>
    %128 = arith.cmpi eq, %127, %40 : vector<64x64xi32>
    %cst_37 = arith.constant 0.000000e+00 : f32
    %129 = vector.broadcast %cst_37 : f32 to vector<64x64xf32>
    %130 = arith.select %128, %39, %129 : vector<64x64xi1>, vector<64x64xf32>
    %131 = arith.addf %125, %130 : vector<64x64xf32>
    %132 = vector.extract_strided_slice %38 {offsets = [0, 15], sizes = [64, 1], strides = [1, 1]} : vector<64x32xi32> to vector<64x1xi32>
    %133 = vector.broadcast %132 : vector<64x1xi32> to vector<64x64xi32>
    %134 = arith.cmpi eq, %133, %40 : vector<64x64xi32>
    %cst_38 = arith.constant 0.000000e+00 : f32
    %135 = vector.broadcast %cst_38 : f32 to vector<64x64xf32>
    %136 = arith.select %134, %39, %135 : vector<64x64xi1>, vector<64x64xf32>
    %137 = arith.addf %131, %136 : vector<64x64xf32>
    %138 = vector.extract_strided_slice %38 {offsets = [0, 16], sizes = [64, 1], strides = [1, 1]} : vector<64x32xi32> to vector<64x1xi32>
    %139 = vector.broadcast %138 : vector<64x1xi32> to vector<64x64xi32>
    %140 = arith.cmpi eq, %139, %40 : vector<64x64xi32>
    %cst_39 = arith.constant 0.000000e+00 : f32
    %141 = vector.broadcast %cst_39 : f32 to vector<64x64xf32>
    %142 = arith.select %140, %39, %141 : vector<64x64xi1>, vector<64x64xf32>
    %143 = arith.addf %137, %142 : vector<64x64xf32>
    %144 = vector.extract_strided_slice %38 {offsets = [0, 17], sizes = [64, 1], strides = [1, 1]} : vector<64x32xi32> to vector<64x1xi32>
    %145 = vector.broadcast %144 : vector<64x1xi32> to vector<64x64xi32>
    %146 = arith.cmpi eq, %145, %40 : vector<64x64xi32>
    %cst_40 = arith.constant 0.000000e+00 : f32
    %147 = vector.broadcast %cst_40 : f32 to vector<64x64xf32>
    %148 = arith.select %146, %39, %147 : vector<64x64xi1>, vector<64x64xf32>
    %149 = arith.addf %143, %148 : vector<64x64xf32>
    %150 = vector.extract_strided_slice %38 {offsets = [0, 18], sizes = [64, 1], strides = [1, 1]} : vector<64x32xi32> to vector<64x1xi32>
    %151 = vector.broadcast %150 : vector<64x1xi32> to vector<64x64xi32>
    %152 = arith.cmpi eq, %151, %40 : vector<64x64xi32>
    %cst_41 = arith.constant 0.000000e+00 : f32
    %153 = vector.broadcast %cst_41 : f32 to vector<64x64xf32>
    %154 = arith.select %152, %39, %153 : vector<64x64xi1>, vector<64x64xf32>
    %155 = arith.addf %149, %154 : vector<64x64xf32>
    %156 = vector.extract_strided_slice %38 {offsets = [0, 19], sizes = [64, 1], strides = [1, 1]} : vector<64x32xi32> to vector<64x1xi32>
    %157 = vector.broadcast %156 : vector<64x1xi32> to vector<64x64xi32>
    %158 = arith.cmpi eq, %157, %40 : vector<64x64xi32>
    %cst_42 = arith.constant 0.000000e+00 : f32
    %159 = vector.broadcast %cst_42 : f32 to vector<64x64xf32>
    %160 = arith.select %158, %39, %159 : vector<64x64xi1>, vector<64x64xf32>
    %161 = arith.addf %155, %160 : vector<64x64xf32>
    %162 = vector.extract_strided_slice %38 {offsets = [0, 20], sizes = [64, 1], strides = [1, 1]} : vector<64x32xi32> to vector<64x1xi32>
    %163 = vector.broadcast %162 : vector<64x1xi32> to vector<64x64xi32>
    %164 = arith.cmpi eq, %163, %40 : vector<64x64xi32>
    %cst_43 = arith.constant 0.000000e+00 : f32
    %165 = vector.broadcast %cst_43 : f32 to vector<64x64xf32>
    %166 = arith.select %164, %39, %165 : vector<64x64xi1>, vector<64x64xf32>
    %167 = arith.addf %161, %166 : vector<64x64xf32>
    %168 = vector.extract_strided_slice %38 {offsets = [0, 21], sizes = [64, 1], strides = [1, 1]} : vector<64x32xi32> to vector<64x1xi32>
    %169 = vector.broadcast %168 : vector<64x1xi32> to vector<64x64xi32>
    %170 = arith.cmpi eq, %169, %40 : vector<64x64xi32>
    %cst_44 = arith.constant 0.000000e+00 : f32
    %171 = vector.broadcast %cst_44 : f32 to vector<64x64xf32>
    %172 = arith.select %170, %39, %171 : vector<64x64xi1>, vector<64x64xf32>
    %173 = arith.addf %167, %172 : vector<64x64xf32>
    %174 = vector.extract_strided_slice %38 {offsets = [0, 22], sizes = [64, 1], strides = [1, 1]} : vector<64x32xi32> to vector<64x1xi32>
    %175 = vector.broadcast %174 : vector<64x1xi32> to vector<64x64xi32>
    %176 = arith.cmpi eq, %175, %40 : vector<64x64xi32>
    %cst_45 = arith.constant 0.000000e+00 : f32
    %177 = vector.broadcast %cst_45 : f32 to vector<64x64xf32>
    %178 = arith.select %176, %39, %177 : vector<64x64xi1>, vector<64x64xf32>
    %179 = arith.addf %173, %178 : vector<64x64xf32>
    %180 = vector.extract_strided_slice %38 {offsets = [0, 23], sizes = [64, 1], strides = [1, 1]} : vector<64x32xi32> to vector<64x1xi32>
    %181 = vector.broadcast %180 : vector<64x1xi32> to vector<64x64xi32>
    %182 = arith.cmpi eq, %181, %40 : vector<64x64xi32>
    %cst_46 = arith.constant 0.000000e+00 : f32
    %183 = vector.broadcast %cst_46 : f32 to vector<64x64xf32>
    %184 = arith.select %182, %39, %183 : vector<64x64xi1>, vector<64x64xf32>
    %185 = arith.addf %179, %184 : vector<64x64xf32>
    %186 = vector.extract_strided_slice %38 {offsets = [0, 24], sizes = [64, 1], strides = [1, 1]} : vector<64x32xi32> to vector<64x1xi32>
    %187 = vector.broadcast %186 : vector<64x1xi32> to vector<64x64xi32>
    %188 = arith.cmpi eq, %187, %40 : vector<64x64xi32>
    %cst_47 = arith.constant 0.000000e+00 : f32
    %189 = vector.broadcast %cst_47 : f32 to vector<64x64xf32>
    %190 = arith.select %188, %39, %189 : vector<64x64xi1>, vector<64x64xf32>
    %191 = arith.addf %185, %190 : vector<64x64xf32>
    %192 = vector.extract_strided_slice %38 {offsets = [0, 25], sizes = [64, 1], strides = [1, 1]} : vector<64x32xi32> to vector<64x1xi32>
    %193 = vector.broadcast %192 : vector<64x1xi32> to vector<64x64xi32>
    %194 = arith.cmpi eq, %193, %40 : vector<64x64xi32>
    %cst_48 = arith.constant 0.000000e+00 : f32
    %195 = vector.broadcast %cst_48 : f32 to vector<64x64xf32>
    %196 = arith.select %194, %39, %195 : vector<64x64xi1>, vector<64x64xf32>
    %197 = arith.addf %191, %196 : vector<64x64xf32>
    %198 = vector.extract_strided_slice %38 {offsets = [0, 26], sizes = [64, 1], strides = [1, 1]} : vector<64x32xi32> to vector<64x1xi32>
    %199 = vector.broadcast %198 : vector<64x1xi32> to vector<64x64xi32>
    %200 = arith.cmpi eq, %199, %40 : vector<64x64xi32>
    %cst_49 = arith.constant 0.000000e+00 : f32
    %201 = vector.broadcast %cst_49 : f32 to vector<64x64xf32>
    %202 = arith.select %200, %39, %201 : vector<64x64xi1>, vector<64x64xf32>
    %203 = arith.addf %197, %202 : vector<64x64xf32>
    %204 = vector.extract_strided_slice %38 {offsets = [0, 27], sizes = [64, 1], strides = [1, 1]} : vector<64x32xi32> to vector<64x1xi32>
    %205 = vector.broadcast %204 : vector<64x1xi32> to vector<64x64xi32>
    %206 = arith.cmpi eq, %205, %40 : vector<64x64xi32>
    %cst_50 = arith.constant 0.000000e+00 : f32
    %207 = vector.broadcast %cst_50 : f32 to vector<64x64xf32>
    %208 = arith.select %206, %39, %207 : vector<64x64xi1>, vector<64x64xf32>
    %209 = arith.addf %203, %208 : vector<64x64xf32>
    %210 = vector.extract_strided_slice %38 {offsets = [0, 28], sizes = [64, 1], strides = [1, 1]} : vector<64x32xi32> to vector<64x1xi32>
    %211 = vector.broadcast %210 : vector<64x1xi32> to vector<64x64xi32>
    %212 = arith.cmpi eq, %211, %40 : vector<64x64xi32>
    %cst_51 = arith.constant 0.000000e+00 : f32
    %213 = vector.broadcast %cst_51 : f32 to vector<64x64xf32>
    %214 = arith.select %212, %39, %213 : vector<64x64xi1>, vector<64x64xf32>
    %215 = arith.addf %209, %214 : vector<64x64xf32>
    %216 = vector.extract_strided_slice %38 {offsets = [0, 29], sizes = [64, 1], strides = [1, 1]} : vector<64x32xi32> to vector<64x1xi32>
    %217 = vector.broadcast %216 : vector<64x1xi32> to vector<64x64xi32>
    %218 = arith.cmpi eq, %217, %40 : vector<64x64xi32>
    %cst_52 = arith.constant 0.000000e+00 : f32
    %219 = vector.broadcast %cst_52 : f32 to vector<64x64xf32>
    %220 = arith.select %218, %39, %219 : vector<64x64xi1>, vector<64x64xf32>
    %221 = arith.addf %215, %220 : vector<64x64xf32>
    %222 = vector.extract_strided_slice %38 {offsets = [0, 30], sizes = [64, 1], strides = [1, 1]} : vector<64x32xi32> to vector<64x1xi32>
    %223 = vector.broadcast %222 : vector<64x1xi32> to vector<64x64xi32>
    %224 = arith.cmpi eq, %223, %40 : vector<64x64xi32>
    %cst_53 = arith.constant 0.000000e+00 : f32
    %225 = vector.broadcast %cst_53 : f32 to vector<64x64xf32>
    %226 = arith.select %224, %39, %225 : vector<64x64xi1>, vector<64x64xf32>
    %227 = arith.addf %221, %226 : vector<64x64xf32>
    %228 = vector.extract_strided_slice %38 {offsets = [0, 31], sizes = [64, 1], strides = [1, 1]} : vector<64x32xi32> to vector<64x1xi32>
    %229 = vector.broadcast %228 : vector<64x1xi32> to vector<64x64xi32>
    %230 = arith.cmpi eq, %229, %40 : vector<64x64xi32>
    %cst_54 = arith.constant 0.000000e+00 : f32
    %231 = vector.broadcast %cst_54 : f32 to vector<64x64xf32>
    %232 = arith.select %230, %39, %231 : vector<64x64xi1>, vector<64x64xf32>
    %233 = arith.addf %227, %232 : vector<64x64xf32>
    %c0_55 = arith.constant 0 : index
    %c0_56 = arith.constant 0 : index
    %c0_57 = arith.constant 0 : index
    %c0_58 = arith.constant 0 : index
    %234 = vector.load %arg8[%c0_55, %c0_56, %c0_57, %c0_58] : memref<1x1x1x64xf32, #tpu.memory_space<vmem>>, vector<1x1x1x64xf32>
    %235 = vector.shape_cast %234 : vector<1x1x1x64xf32> to vector<1x64xf32>
    %cst_59 = arith.constant dense<0.000000e+00> : vector<64xf32>
    %236 = vector.multi_reduction <add>, %233, %cst_59 [0] : vector<64x64xf32> to vector<64xf32>
    %237 = vector.shape_cast %236 : vector<64xf32> to vector<1x64xf32>
    %238 = arith.addf %235, %237 : vector<1x64xf32>
    %c0_60 = arith.constant 0 : index
    %c0_61 = arith.constant 0 : index
    %c0_62 = arith.constant 0 : index
    %c0_63 = arith.constant 0 : index
    %239 = vector.load %arg8[%c0_60, %c0_61, %c0_62, %c0_63] : memref<1x1x1x64xf32, #tpu.memory_space<vmem>>, vector<1x1x1x64xf32>
    %240 = vector.shape_cast %239 : vector<1x1x1x64xf32> to vector<1x64xf32>
    %241 = vector.shape_cast %238 : vector<1x64xf32> to vector<1x1x1x64xf32>
    tpu.vector_store %arg8[%c0_60, %c0_61, %c0_62, %c0_63], %241 {strides = array<i32>} : memref<1x1x1x64xf32, #tpu.memory_space<vmem>>, vector<1x1x1x64xf32>,
    return
  }
  func.func @transform_0(%arg0: i32, %arg1: i32, %arg2: i32) -> (i32, i32, i32) {
    %c0_i32 = arith.constant 0 : i32
    %c0_i32_0 = arith.constant 0 : i32
    %c0_i32_1 = arith.constant 0 : i32
    return %arg0, %c0_i32, %c0_i32_0 : i32, i32, i32
  }
  func.func @transform_1(%arg0: i32, %arg1: i32, %arg2: i32) -> (i32, i32, i32) {
    %c1_i32 = arith.constant 1 : i32
    %0 = arith.muli %arg1, %c1_i32 : i32
    %1 = arith.addi %0, %arg2 : i32
    %c0_i32 = arith.constant 0 : i32
    %c0_i32_0 = arith.constant 0 : i32
    return %arg0, %1, %c0_i32 : i32, i32, i32
  }
  func.func @transform_2(%arg0: i32, %arg1: i32, %arg2: i32) -> (i32, i32, i32) {
    %c0_i32 = arith.constant 0 : i32
    %c0_i32_0 = arith.constant 0 : i32
    %c0_i32_1 = arith.constant 0 : i32
    %c0_i32_2 = arith.constant 0 : i32
    return %c0_i32, %c0_i32_0, %c0_i32_1 : i32, i32, i32
  }
  func.func @transform_3(%arg0: i32, %arg1: i32, %arg2: i32) -> (i32, i32, i32) {
    %c1_i32 = arith.constant 1 : i32
    %0 = arith.muli %arg1, %c1_i32 : i32
    %1 = arith.addi %0, %arg2 : i32
    %c0_i32 = arith.constant 0 : i32
    %c0_i32_0 = arith.constant 0 : i32
    return %arg0, %1, %c0_i32 : i32, i32, i32
  }
  func.func @transform_4(%arg0: i32, %arg1: i32, %arg2: i32) -> (i32, i32, i32) {
    %c1_i32 = arith.constant 1 : i32
    %0 = arith.muli %arg1, %c1_i32 : i32
    %1 = arith.addi %0, %arg2 : i32
    %c0_i32 = arith.constant 0 : i32
    %c0_i32_0 = arith.constant 0 : i32
    return %arg0, %1, %c0_i32 : i32, i32, i32
  }
  func.func @transform_5(%arg0: i32, %arg1: i32, %arg2: i32) -> (i32, i32, i32, i32) {
    %c0_i32 = arith.constant 0 : i32
    %c0_i32_0 = arith.constant 0 : i32
    %c0_i32_1 = arith.constant 0 : i32
    return %arg0, %arg1, %c0_i32, %c0_i32_0 : i32, i32, i32, i32
  }
}

module attributes {stable_mosaic.version = 11 : i64} {
  func.func @_neg_sqdist_kernel(%arg0: i32, %arg1: i32, %arg2: memref<1x32x3xf32, #tpu.memory_space<vmem>>, %arg3: memref<1x64x3xf32, #tpu.memory_space<vmem>>, %arg4: memref<1x1x64xf32, #tpu.memory_space<vmem>>, %arg5: memref<1x32x64xf32, #tpu.memory_space<vmem>>) attributes {dimension_semantics = [#tpu.dimension_semantics<parallel>, #tpu.dimension_semantics<parallel>], iteration_bounds = array<i64: 2, 1>, scalar_prefetch = 0 : i64, scratch_operands = 0 : i64, tpu.core_type = #tpu.core_type<tc>, window_params = [{transform_indices = @transform_0, window_bounds = array<i64: 1, 32, 3>}, {transform_indices = @transform_1, window_bounds = array<i64: 1, 64, 3>}, {transform_indices = @transform_2, window_bounds = array<i64: 1, 1, 64>}, {transform_indices = @transform_3, window_bounds = array<i64: 1, 32, 64>}]} {
    %c0 = arith.constant 0 : index
    %c0_0 = arith.constant 0 : index
    %c0_1 = arith.constant 0 : index
    %0 = vector.load %arg2[%c0, %c0_0, %c0_1] : memref<1x32x3xf32, #tpu.memory_space<vmem>>, vector<1x32x3xf32>
    %1 = vector.shape_cast %0 : vector<1x32x3xf32> to vector<32x3xf32>
    %c0_2 = arith.constant 0 : index
    %c0_3 = arith.constant 0 : index
    %c0_4 = arith.constant 0 : index
    %2 = vector.load %arg3[%c0_2, %c0_3, %c0_4] : memref<1x64x3xf32, #tpu.memory_space<vmem>>, vector<1x64x3xf32>
    %3 = vector.shape_cast %2 : vector<1x64x3xf32> to vector<64x3xf32>
    %cst = arith.constant dense<0.000000e+00> : vector<32x64xf32>
    %4 = tpu.matmul %1, %3, %cst {dimension_numbers = #tpu.dot_dimension_numbers<[1], [1], [0], [0], [0, 0, 1, 0], [], []>} : vector<32x3xf32>, vector<64x3xf32>, vector<32x64xf32> -> vector<32x64xf32>
    %5 = arith.mulf %1, %1 : vector<32x3xf32>
    %cst_5 = arith.constant dense<0.000000e+00> : vector<32xf32>
    %6 = vector.multi_reduction <add>, %5, %cst_5 [1] : vector<32x3xf32> to vector<32xf32>
    %7 = vector.shape_cast %6 : vector<32xf32> to vector<32x1xf32>
    %cst_6 = arith.constant 2.000000e+00 : f32
    %8 = vector.broadcast %cst_6 : f32 to vector<32x64xf32>
    %9 = arith.mulf %8, %4 : vector<32x64xf32>
    %10 = vector.broadcast %7 : vector<32x1xf32> to vector<32x64xf32>
    %11 = arith.subf %9, %10 : vector<32x64xf32>
    %c0_7 = arith.constant 0 : index
    %c0_8 = arith.constant 0 : index
    %c0_9 = arith.constant 0 : index
    %12 = vector.load %arg4[%c0_7, %c0_8, %c0_9] : memref<1x1x64xf32, #tpu.memory_space<vmem>>, vector<1x1x64xf32>
    %13 = vector.shape_cast %12 : vector<1x1x64xf32> to vector<1x64xf32>
    %14 = vector.broadcast %13 : vector<1x64xf32> to vector<32x64xf32>
    %15 = arith.subf %11, %14 : vector<32x64xf32>
    %c0_10 = arith.constant 0 : index
    %c0_11 = arith.constant 0 : index
    %c0_12 = arith.constant 0 : index
    %16 = vector.load %arg5[%c0_10, %c0_11, %c0_12] : memref<1x32x64xf32, #tpu.memory_space<vmem>>, vector<1x32x64xf32>
    %17 = vector.shape_cast %16 : vector<1x32x64xf32> to vector<32x64xf32>
    %18 = vector.shape_cast %15 : vector<32x64xf32> to vector<1x32x64xf32>
    tpu.vector_store %arg5[%c0_10, %c0_11, %c0_12], %18 {strides = array<i32>} : memref<1x32x64xf32, #tpu.memory_space<vmem>>, vector<1x32x64xf32>,
    return
  }
  func.func @transform_0(%arg0: i32, %arg1: i32) -> (i32, i32, i32) {
    %c0_i32 = arith.constant 0 : i32
    %c0_i32_0 = arith.constant 0 : i32
    return %arg0, %arg1, %c0_i32 : i32, i32, i32
  }
  func.func @transform_1(%arg0: i32, %arg1: i32) -> (i32, i32, i32) {
    %c0_i32 = arith.constant 0 : i32
    %c0_i32_0 = arith.constant 0 : i32
    %c0_i32_1 = arith.constant 0 : i32
    return %arg0, %c0_i32, %c0_i32_0 : i32, i32, i32
  }
  func.func @transform_2(%arg0: i32, %arg1: i32) -> (i32, i32, i32) {
    %c0_i32 = arith.constant 0 : i32
    %c0_i32_0 = arith.constant 0 : i32
    %c0_i32_1 = arith.constant 0 : i32
    return %arg0, %c0_i32, %c0_i32_0 : i32, i32, i32
  }
  func.func @transform_3(%arg0: i32, %arg1: i32) -> (i32, i32, i32) {
    %c0_i32 = arith.constant 0 : i32
    %c0_i32_0 = arith.constant 0 : i32
    return %arg0, %arg1, %c0_i32 : i32, i32, i32
  }
}

module attributes {stable_mosaic.version = 11 : i64} {
  func.func @_group_affine_kernel(%arg0: i32, %arg1: i32, %arg2: memref<1x32x8x8xf32, #tpu.memory_space<vmem>>, %arg3: memref<1x1x8xf32, #tpu.memory_space<vmem>>, %arg4: memref<1x32x8xf32, #tpu.memory_space<vmem>>, %arg5: memref<1x32x8xf32, #tpu.memory_space<vmem>>, %arg6: memref<1x32x8x2x8xf32, #tpu.memory_space<vmem>>) attributes {dimension_semantics = [#tpu.dimension_semantics<parallel>, #tpu.dimension_semantics<parallel>], iteration_bounds = array<i64: 2, 1>, scalar_prefetch = 0 : i64, scratch_operands = 0 : i64, tpu.core_type = #tpu.core_type<tc>, window_params = [{transform_indices = @transform_0, window_bounds = array<i64: 1, 32, 8, 8>}, {transform_indices = @transform_1, window_bounds = array<i64: 1, 1, 8>}, {transform_indices = @transform_2, window_bounds = array<i64: 1, 32, 8>}, {transform_indices = @transform_3, window_bounds = array<i64: 1, 32, 8>}, {transform_indices = @transform_4, window_bounds = array<i64: 1, 32, 8, 2, 8>}]} {
    %c0 = arith.constant 0 : index
    %c0_0 = arith.constant 0 : index
    %c0_1 = arith.constant 0 : index
    %c0_2 = arith.constant 0 : index
    %0 = vector.load %arg2[%c0, %c0_0, %c0_1, %c0_2] : memref<1x32x8x8xf32, #tpu.memory_space<vmem>>, vector<1x32x8x8xf32>
    %1 = vector.shape_cast %0 : vector<1x32x8x8xf32> to vector<32x8x8xf32>
    %c0_3 = arith.constant 0 : index
    %c0_4 = arith.constant 0 : index
    %c0_5 = arith.constant 0 : index
    %2 = vector.load %arg3[%c0_3, %c0_4, %c0_5] : memref<1x1x8xf32, #tpu.memory_space<vmem>>, vector<1x1x8xf32>
    %3 = vector.shape_cast %2 : vector<1x1x8xf32> to vector<1x8xf32>
    %4 = vector.shape_cast %3 : vector<1x8xf32> to vector<1x1x8xf32>
    %5 = vector.broadcast %4 : vector<1x1x8xf32> to vector<32x8x8xf32>
    %6 = arith.mulf %1, %5 : vector<32x8x8xf32>
    %c0_6 = arith.constant 0 : index
    %c0_7 = arith.constant 0 : index
    %c0_8 = arith.constant 0 : index
    %7 = vector.load %arg4[%c0_6, %c0_7, %c0_8] : memref<1x32x8xf32, #tpu.memory_space<vmem>>, vector<1x32x8xf32>
    %8 = vector.shape_cast %7 : vector<1x32x8xf32> to vector<32x8xf32>
    %9 = vector.shape_cast %8 : vector<32x8xf32> to vector<32x1x8xf32>
    %10 = vector.broadcast %9 : vector<32x1x8xf32> to vector<32x8x8xf32>
    %11 = arith.addf %6, %10 : vector<32x8x8xf32>
    %12 = vector.shape_cast %11 : vector<32x8x8xf32> to vector<32x8x1x8xf32>
    %c0_9 = arith.constant 0 : index
    %c0_10 = arith.constant 0 : index
    %c0_11 = arith.constant 0 : index
    %c0_12 = arith.constant 0 : index
    %c0_13 = arith.constant 0 : index
    %13 = vector.load %arg6[%c0_9, %c0_10, %c0_11, %c0_12, %c0_13] : memref<1x32x8x2x8xf32, #tpu.memory_space<vmem>>, vector<1x32x8x1x8xf32>
    %14 = vector.shape_cast %13 : vector<1x32x8x1x8xf32> to vector<32x8x1x8xf32>
    %15 = vector.shape_cast %12 : vector<32x8x1x8xf32> to vector<1x32x8x1x8xf32>
    tpu.vector_store %arg6[%c0_9, %c0_10, %c0_11, %c0_12, %c0_13], %15 {strides = array<i32>} : memref<1x32x8x2x8xf32, #tpu.memory_space<vmem>>, vector<1x32x8x1x8xf32>,
    %c0_14 = arith.constant 0 : index
    %c0_15 = arith.constant 0 : index
    %c0_16 = arith.constant 0 : index
    %16 = vector.load %arg5[%c0_14, %c0_15, %c0_16] : memref<1x32x8xf32, #tpu.memory_space<vmem>>, vector<1x32x8xf32>
    %17 = vector.shape_cast %16 : vector<1x32x8xf32> to vector<32x8xf32>
    %18 = vector.shape_cast %17 : vector<32x8xf32> to vector<32x1x1x8xf32>
    %19 = vector.shape_cast %18 : vector<32x1x1x8xf32> to vector<32x1x1x8xf32>
    %20 = vector.broadcast %19 : vector<32x1x1x8xf32> to vector<32x8x1x8xf32>
    %c0_17 = arith.constant 0 : index
    %c0_18 = arith.constant 0 : index
    %c0_19 = arith.constant 0 : index
    %c1 = arith.constant 1 : index
    %c0_20 = arith.constant 0 : index
    %21 = vector.load %arg6[%c0_17, %c0_18, %c0_19, %c1, %c0_20] : memref<1x32x8x2x8xf32, #tpu.memory_space<vmem>>, vector<1x32x8x1x8xf32>
    %22 = vector.shape_cast %21 : vector<1x32x8x1x8xf32> to vector<32x8x1x8xf32>
    %23 = vector.shape_cast %20 : vector<32x8x1x8xf32> to vector<1x32x8x1x8xf32>
    tpu.vector_store %arg6[%c0_17, %c0_18, %c0_19, %c1, %c0_20], %23 {strides = array<i32>} : memref<1x32x8x2x8xf32, #tpu.memory_space<vmem>>, vector<1x32x8x1x8xf32>,
    return
  }
  func.func @transform_0(%arg0: i32, %arg1: i32) -> (i32, i32, i32, i32) {
    %c0_i32 = arith.constant 0 : i32
    %c0_i32_0 = arith.constant 0 : i32
    %c0_i32_1 = arith.constant 0 : i32
    return %arg0, %arg1, %c0_i32, %c0_i32_0 : i32, i32, i32, i32
  }
  func.func @transform_1(%arg0: i32, %arg1: i32) -> (i32, i32, i32) {
    %c0_i32 = arith.constant 0 : i32
    %c0_i32_0 = arith.constant 0 : i32
    %c0_i32_1 = arith.constant 0 : i32
    return %arg0, %c0_i32, %c0_i32_0 : i32, i32, i32
  }
  func.func @transform_2(%arg0: i32, %arg1: i32) -> (i32, i32, i32) {
    %c0_i32 = arith.constant 0 : i32
    %c0_i32_0 = arith.constant 0 : i32
    return %arg0, %arg1, %c0_i32 : i32, i32, i32
  }
  func.func @transform_3(%arg0: i32, %arg1: i32) -> (i32, i32, i32) {
    %c0_i32 = arith.constant 0 : i32
    %c0_i32_0 = arith.constant 0 : i32
    return %arg0, %arg1, %c0_i32 : i32, i32, i32
  }
  func.func @transform_4(%arg0: i32, %arg1: i32) -> (i32, i32, i32, i32, i32) {
    %c0_i32 = arith.constant 0 : i32
    %c0_i32_0 = arith.constant 0 : i32
    %c0_i32_1 = arith.constant 0 : i32
    %c0_i32_2 = arith.constant 0 : i32
    return %arg0, %arg1, %c0_i32, %c0_i32_0, %c0_i32_1 : i32, i32, i32, i32, i32
  }
}

</mosaic_0001>

<bundles_post_ra>
// kernel: custom-call.12
= control target key start
LH: loop header
LB: loop body
LE: loop exit
PB: predicated region body
PF: predicated region fallthrough
CT: control target
= control target key end

     0   :  { %s6_s0 = inlined_call_operand.vmem [shape: f32[2,6], index: 0, kind: output, shape index: {}]  }

// kernel: local_grouper_forward.4
= control target key start
LH: loop header
LB: loop body
LE: loop exit
PB: predicated region body
PF: predicated region fallthrough
CT: control target
= control target key end

     0   :  { %s645_s12 = smov 0   ;;  %s647_s13 = smov 0   ;;  %s748_s0 = inlined_call_operand.vmem [shape: f32[2,64,8], index: 0, kind: input, shape index: {}]   ;;  %s749_s1 = inlined_call_operand.vmem [shape: bf16[2,64,8], index: 1, kind: input, shape index: {}]   ;;  %s750_s2 = inlined_call_operand.vmem [shape: f32[2,1,64], index: 2, kind: input, shape index: {}]   ;;  %s751_s3 = inlined_call_operand.vmem [shape: bf16[2,64,64], index: 3, kind: output, shape index: {}]  }
   0x1   :  { %s649_s14 = smov 0  }
   0x2 LB: > { %s25_s15 = sadd.s32 1, %s619_s13  ;;  %p528_p0 = scmp.ge.s32.totalorder %s623_s14, 1  ;;  %s623_s14 = sphi %s649_s14, %s13_s14   ;;  %s619_s13 = sphi %s647_s13, %s753_s13   ;;  %s615_s12 = sphi %s645_s12, %s752_s12  }
   0x3   : > { %p27_p1 = scmp.ge.s32.totalorder %s25_s15, 2  ;;  %p176_p2 = scmp.lt.s32.totalorder %s623_s14, 3 }
   0x5   : > { %s755_s15 = smov (%p27_p1, %s25_s15), 0  ;;  %p177_p3 = pnand %p528_p0, %p176_p2 }
   0x6   : > { %p217_p4 = scmp.lt.s32.totalorder (!%p177_p3), %s615_s12, 1 }
   0x7   : > { %180 = sbr.rel (%p177_p3) target bundleno = 199 (0xc7), region = 32 }
   0xc   : > { %s757_s12 = smov (!%p217_p4, %s615_s12), 1  ;;  %vm285_vm0 = vcmask 64512   ;;  %vm407_vm1 = vcmask 519168  }
   0xd   : > { %s558_s16 = sshll.u32 %s757_s12, 5  ;;  %s233_s19 = scalar_lea.vmem %s750_s2, %s757_s12 }
   0xe   : > { %s675_s22 = scalar_lea.vmem %s749_s1, %s558_s16  ;;  %s557_s23 = sshll.u32 %s757_s12, 6  ;;  %v600_v41 = vld [vmem:[%s233_s19] ss:$0 sm:$0xff] }
   0xf   : > { %v563_v0 = vld [vmem:[%s675_s22 + $0x18] sm:$0xff]  ;;  %s682_s26 = scalar_lea.vmem %s748_s0, %s557_s23  ;;  %v562_v6 = vld [vmem:[%s675_s22 + $0x10] sm:$0xff]  ;;  %v561_v21 = vld [vmem:[%s675_s22 + $0x8] sm:$0xff]  ;;  %s721_s4 = scalar_lea.vmem %s751_s3, %s558_s16 }
  0x10   : > { %v245_v1 = vld [vmem:[%s682_s26] sm:$0xff]  ;;  %v308_v2 = vsel %vm285_vm0, %v563_v0, 0  ;;  %v247_v3 = vld [vmem:[%s682_s26 + $0x10] sm:$0xff]  ;;  %v246_v11 = vld [vmem:[%s682_s26 + $0x8] sm:$0xff]  ;;  %v305_v16 = vsel %vm285_vm0, %v562_v6, 0  ;;  %v302_v27 = vsel %vm285_vm0, %v561_v21, 0 }
  0x11   : > { %314 = vmatpush.bf16.xpose.msra.mxu0 %v308_v2  ;;  %564 = vmatpush.bf16.xpose.msra.mxu1 %v308_v2  ;;  %v339_v4 = vmul.f32 %v245_v1, %v245_v1  ;;  %v341_v5 = vmul.f32 %v247_v3, %v247_v3  ;;  %v249_v7 = vld [vmem:[%s682_s26 + $0x20] sm:$0xff]  ;;  %v248_v12 = vld [vmem:[%s682_s26 + $0x18] sm:$0xff]  ;;  %v340_v13 = vmul.f32 %v246_v11, %v246_v11  ;;  %v250_v17 = vld [vmem:[%s682_s26 + $0x28] sm:$0xff] }
  0x12   : > { %565 = vmatpush.bf16.xpose.msra.mxu2 %v308_v2  ;;  %566 = vmatpush.bf16.xpose.msra.mxu3 %v308_v2  ;;  %v343_v10 = vmul.f32 %v249_v7, %v249_v7  ;;  %v342_v15 = vmul.f32 %v248_v12, %v248_v12  ;;  %v344_v18 = vmul.f32 %v250_v17, %v250_v17  ;;  %v251_v23 = vld [vmem:[%s682_s26 + $0x30] sm:$0xff]  ;;  %v252_v24 = vld [vmem:[%s682_s26 + $0x38] sm:$0xff]  ;;  %v560_v30 = vld [vmem:[%s675_s22] sm:$0xff] }
  0x13   : > { %v347_v8 = vsel %vm285_vm0, %v339_v4, 0.0  ;;  %v353_v9 = vsel %vm285_vm0, %v341_v5, 0.0  ;;  %v350_v19 = vsel %vm285_vm0, %v340_v13, 0.0  ;;  %v345_v25 = vmul.f32 %v251_v23, %v251_v23 }
  0x14   : > { %348 = vadd.xlane.f32.xlu0 %v347_v8  ;;  %354 = vadd.xlane.f32.xlu1 %v353_v9  ;;  %v359_v14 = vsel %vm285_vm0, %v343_v10, 0.0  ;;  %v356_v20 = vsel %vm285_vm0, %v342_v15, 0.0  ;;  %v362_v22 = vsel %vm285_vm0, %v344_v18, 0.0  ;;  %v346_v26 = vmul.f32 %v252_v24, %v252_v24 }
  0x15   : > { %360 = vadd.xlane.f32.xlu2 %v359_v14  ;;  %v365_v28 = vsel %vm285_vm0, %v345_v25, 0.0  ;;  %v299_v31 = vsel %vm285_vm0, %v560_v30, 0  ;;  %v261_v32 = vpack.c.bf16 %v246_v11, %v245_v1  ;;  %v262_v33 = vpack.c.bf16 %v248_v12, %v247_v3 }
  0x16   : > { %v368_v29 = vsel %vm285_vm0, %v346_v26, 0.0  ;;  %v263_v34 = vpack.c.bf16 %v250_v17, %v249_v7  ;;  %v264_v35 = vpack.c.bf16 %v252_v24, %v251_v23 }
  0x19   : > { %315 = vmatpush.bf16.xpose.msra.mxu0 %v305_v16  ;;  %567 = vmatpush.bf16.xpose.msra.mxu1 %v305_v16 }
  0x1a   : > { %568 = vmatpush.bf16.xpose.msra.mxu2 %v305_v16  ;;  %569 = vmatpush.bf16.xpose.msra.mxu3 %v305_v16 }
  0x1c   : > { %351 = vadd.xlane.f32.xlu0 %v350_v19  ;;  %357 = vadd.xlane.f32.xlu1 %v356_v20 }
  0x1d   : > { %363 = vadd.xlane.f32.xlu2 %v362_v22 }
  0x21   : > { %316 = vmatpush.bf16.xpose.msra.mxu0 %v302_v27  ;;  %570 = vmatpush.bf16.xpose.msra.mxu1 %v302_v27 }
  0x22   : > { %571 = vmatpush.bf16.xpose.msra.mxu2 %v302_v27  ;;  %572 = vmatpush.bf16.xpose.msra.mxu3 %v302_v27 }
  0x24   : > { %366 = vadd.xlane.f32.xlu0 %v365_v28  ;;  %369 = vadd.xlane.f32.xlu1 %v368_v29 }
  0x29   : > { %317 = vmatpush.bf16.xpose.msra.mxu0 %v299_v31  ;;  %573 = vmatpush.bf16.xpose.msra.mxu1 %v299_v31 }
  0x2a   : > { %574 = vmatpush.bf16.xpose.msra.mxu2 %v299_v31  ;;  %575 = vmatpush.bf16.xpose.msra.mxu3 %v299_v31 }
  0x30   : > { %551 = vmatmul.msk.bf16.vlgmr.msra.gmra.mxu0 %vm285_vm0, %v261_v32  ;;  %552 = vmatmul.msk.bf16.vlgmr.msra.gmra.mxu1 %vm285_vm0, %v262_v33 }
  0x31   : > { %553 = vmatmul.msk.bf16.vlgmr.msra.gmra.mxu2 %vm285_vm0, %v263_v34  ;;  %554 = vmatmul.msk.bf16.vlgmr.msra.gmra.mxu3 %vm285_vm0, %v264_v35 }
  0x87   : > { %v349_v36 = vpop.xlane.xlu0 %348  ;;  %v355_v37 = vpop.xlane.xlu1 %354 }
  0x88   : > { %v361_v46 = vpop.xlane.xlu2 %360 }
  0x8f   : > { %v352_v38 = vpop.xlane.xlu0 %351  ;;  %v358_v47 = vpop.xlane.xlu1 %357 }
  0x90   : > { %v364_v7 = vpop.xlane.xlu2 %363 }
  0x97   : > { %v367_v50 = vpop.xlane.xlu0 %366  ;;  %v370_v8 = vpop.xlane.xlu1 %369 }
  0xad   : > { %v324_v39 = vpop.f32.mrf.mxu1  ;;  %v319_v40 = vpop.f32.mrf.mxu0 }
  0xae   : > { %v373_v42 = vmul.f32 2.0, %v324_v39  ;;  %v371_v43 = vmul.f32 2.0, %v319_v40 }
  0xb0   : > { %v381_v44 = vsub.f32 %v373_v42, %v355_v37  ;;  %v379_v45 = vsub.f32 %v371_v43, %v349_v36 }
  0xb2   : > { %v393_v48 = vsub.f32 %v381_v44, %v600_v41  ;;  %v391_v49 = vsub.f32 %v379_v45, %v600_v41 }
  0xb4   : > { %v401_v51 = vpack.c.bf16 %v393_v48, %v393_v48  ;;  %v399_v52 = vpack.c.bf16 %v391_v49, %v391_v49  ;;  %v329_v53 = vpop.f32.mrf.mxu2  ;;  %v334_v54 = vpop.f32.mrf.mxu3 }
  0xb5   : > { %v375_v55 = vmul.f32 2.0, %v329_v53  ;;  %v377_v56 = vmul.f32 2.0, %v334_v54  ;;  %v326_v57 = vpop.f32.mrf.mxu1  ;;  %v321_v58 = vpop.f32.mrf.mxu0 }
  0xb6   : > { %410 = vst.msk [vmem:[%s721_s4 + $0x8] sm:$0xf] %vm407_vm1, %v401_v51  ;;  %v374_v59 = vmul.f32 2.0, %v326_v57  ;;  %v372_v60 = vmul.f32 2.0, %v321_v58 }
  0xb7   : > { %408 = vst.msk [vmem:[%s721_s4] sm:$0xf] %vm407_vm1, %v399_v52  ;;  %v383_v61 = vsub.f32 %v375_v55, %v361_v46  ;;  %v385_v62 = vsub.f32 %v377_v56, %v367_v50 }
  0xb8   : > { %v382_v63 = vsub.f32 %v374_v59, %v358_v47  ;;  %v380_v0 = vsub.f32 %v372_v60, %v352_v38 }
  0xb9   : > { %v395_v1 = vsub.f32 %v383_v61, %v600_v41  ;;  %v397_v2 = vsub.f32 %v385_v62, %v600_v41 }
  0xba   : > { %v394_v3 = vsub.f32 %v382_v63, %v600_v41  ;;  %v392_v4 = vsub.f32 %v380_v0, %v600_v41 }
  0xbb   : > { %v403_v5 = vpack.c.bf16 %v395_v1, %v395_v1  ;;  %v405_v6 = vpack.c.bf16 %v397_v2, %v397_v2 }
  0xbc   : > { %v402_v9 = vpack.c.bf16 %v394_v3, %v394_v3  ;;  %v400_v10 = vpack.c.bf16 %v392_v4, %v392_v4  ;;  %v331_v11 = vpop.f32.mrf.mxu2  ;;  %v336_v12 = vpop.f32.mrf.mxu3 }
  0xbd   : > { %412 = vst.msk [vmem:[%s721_s4 + $0x10] sm:$0xf] %vm407_vm1, %v403_v5  ;;  %v376_v13 = vmul.f32 2.0, %v331_v11  ;;  %v378_v14 = vmul.f32 2.0, %v336_v12 }
  0xbe   : > { %411 = vst.msk [vmem:[%s721_s4 + $0xc] sm:$0xf] %vm407_vm1, %v402_v9 }
  0xbf   : > { %414 = vst.msk [vmem:[%s721_s4 + $0x18] sm:$0xf] %vm407_vm1, %v405_v6  ;;  %v384_v15 = vsub.f32 %v376_v13, %v364_v7  ;;  %v386_v16 = vsub.f32 %v378_v14, %v370_v8 }
  0xc0   : > { %409 = vst.msk [vmem:[%s721_s4 + $0x4] sm:$0xf] %vm407_vm1, %v400_v10 }
  0xc1   : > { %v396_v17 = vsub.f32 %v384_v15, %v600_v41  ;;  %v398_v18 = vsub.f32 %v386_v16, %v600_v41 }
  0xc3   : > { %v404_v19 = vpack.c.bf16 %v396_v17, %v396_v17  ;;  %v406_v20 = vpack.c.bf16 %v398_v18, %v398_v18 }
  0xc5   : > { %413 = vst.msk [vmem:[%s721_s4 + $0x14] sm:$0xf] %vm407_vm1, %v404_v19 }
  0xc6   : > { %415 = vst.msk [vmem:[%s721_s4 + $0x1c] sm:$0xf] %vm407_vm1, %v406_v20 }
  0xc7 PF: > { %s13_s14 = sadd.s32 1, %s623_s14   ;;  %s752_s12 = smov %s619_s13 }
  0xc8   : > { %p10_p5 = scmp.ge.s32.totalorder %s13_s14, 4   ;;  %s753_s13 = smov %s755_s15 }
  0xca   :  { %12 = sbr.rel (!%p10_p5) target bundleno = 2 (0x2), region = 68 }

// kernel: local_grouper_forward.5
= control target key start
LH: loop header
LB: loop body
LE: loop exit
PB: predicated region body
PF: predicated region fallthrough
CT: control target
= control target key end

     0   :  { %s3025_s18 = smov 0   ;;  %s3027_s19 = smov 0   ;;  %s4834_s0 = inlined_call_operand.vmem [shape: f32[2,70,8], index: 0, kind: input, shape index: {}]   ;;  %s4835_s1 = inlined_call_operand.vmem [shape: s32[2,64,32], index: 1, kind: input, shape index: {}]   ;;  %s4836_s2 = inlined_call_operand.vmem [shape: bf16[3,8,8], index: 2, kind: input, shape index: {}]   ;;  %s4837_s3 = inlined_call_operand.vmem [shape: f32[2,64,8], index: 3, kind: output, shape index: {0}]   ;;  %s4838_s4 = inlined_call_operand.vmem [shape: f32[2,64,6], index: 4, kind: output, shape index: {1}]   ;;  %s4839_s5 = inlined_call_operand.vmem [shape: f32[2,1,1,64], index: 5, kind: output, shape index: {2}]  }
   0x1   :  { %s3029_s20 = smov 0  }
   0x2 LB: > { %s35_s21 = sadd.s32 1, %s2955_s19  ;;  %p2649_p0 = scmp.ge.s32.totalorder %s2959_s20, 1  ;;  %s2959_s20 = sphi %s3029_s20, %s16_s20   ;;  %s2955_s19 = sphi %s3027_s19, %s5075_s19   ;;  %s2951_s18 = sphi %s3025_s18, %s5074_s18  }
   0x3   : > { %p37_p1 = scmp.ge.s32.totalorder %s35_s21, 2  ;;  %p242_p2 = scmp.lt.s32.totalorder %s2959_s20, 3 }
   0x5   : > { %s5077_s21 = smov (%p37_p1, %s35_s21), 0  ;;  %p243_p3 = pnand %p2649_p0, %p242_p2 }
   0x7   : > { %246 = sbr.rel (%p243_p3) target bundleno = 1219 (0x4c3), region = 32 }
   0xc   : > { %v2657_v0 = vld [vmem:[%s4836_s2 + $0x4] sm:$0xf]  ;;  %vm385_vm0 = vcmask 1043456   ;;  %v2663_v1 = vld [vmem:[%s4836_s2 + $0x8] sm:$0xf]  ;;  %v2961_v2 = vmov 0  }
   0xd   : > { %2789 = vset.pattern.permute.xlu1 %v2961_v2  ;;  %v387_v3 = vsel %vm385_vm0, %v2657_v0, 0  ;;  %v445_v4 = vsel %vm385_vm0, %v2663_v1, 0  ;;  %p301_p4 = scmp.lt.s32.totalorder %s2951_s18, 1  ;;  %2788 = vset.pattern.permute.xlu2 %v2961_v2  ;;  %v515_v5 = vld [vmem:[%s4836_s2] sm:$0xf]  ;;  %vm369_vm1 = vcmask 64512  }
   0xe   : > { %396 = vmatpush.bf16.msra.mxu0 %v387_v3  ;;  %454 = vmatpush.bf16.msra.mxu1 %v445_v4  ;;  %v531_v6 = vsel %vm385_vm0, %v515_v5, 0  ;;  %v2962_v25 = vmov 1   ;;  %v2963_v26 = vmov 2   ;;  %v2964_v31 = vmov 3   ;;  %s2977_s11 = smov 64  }
   0xf   : > { %s5079_s18 = smov (!%p301_p4, %s2951_s18), 1  ;;  %2787 = vset.pattern.permute.xlu0 %v2961_v2  ;;  %2727 = vmatpush.bf16.msra.mxu2 %v531_v6  ;;  %v2965_v34 = vmov 4   ;;  %v2966_v40 = vmov 5   ;;  %vm431_vm2 = vcmask 60416   ;;  %v2967_v59 = vmov 6  }
  0x10   : > { %s3055_s28 = sshll.u32 %s5079_s18, 6  ;;  %s2728_s29 = smul.u32 72, %s5079_s18  ;;  %vm440_vm3 = vcmask 59392   ;;  %vm795_vm4 = vcmask 1042432   ;;  %vm654_vm5 = vcmask 572416   ;;  %vm868_vm6 = vcmask 48128  }
  0x11   : > { %s3062_s7 = scalar_lea.vmem %s4835_s1, %s3055_s28  ;;  %s3551_s14 = scalar_lea.vmem %s4838_s4, %s3055_s28 }
  0x12   : > { %540 = vmatpush.bf16.msrb.mxu0 %v531_v6  ;;  %2726 = vmatpush.bf16.msrb.mxu1 %v531_v6  ;;  %v3065_v7 = vld [vmem:[%s3062_s7 + $0x10] sm:$0xff]  ;;  %s3070_s10 = scalar_lea.vmem %s4834_s0, %s2728_s29  ;;  %v3073_v8 = vld [vmem:[%s3062_s7 + $0x8] sm:$0xff]  ;;  %v3088_v15 = vld [vmem:[%s3062_s7 + $0x20] sm:$0xff]  ;;  %s4282_s17 = scalar_lea.vmem %s4837_s3, %s3055_s28 }
  0x13   : > { %894 = vperm.xlu1 %2789, %v3065_v7   ;;  %v353_v9 = vld [vmem:[%s3070_s10] sm:$0xff]  ;;  %v354_v10 = vld [vmem:[%s3070_s10 + $0x8] sm:$0xff]  ;;  %891 = vperm.xlu2 %2788, %v3073_v8   ;;  %v3091_v16 = vld [vmem:[%s3062_s7 + $0x18] sm:$0xff]  ;;  %s4764_s24 = scalar_lea.vmem %s4839_s5, %s5079_s18 }
  0x14   : > { %v3079_v11 = vpack.c.bf16 %v354_v10, %v353_v9  ;;  %v357_v12 = vld [vmem:[%s3070_s10 + $0x20] sm:$0xff]  ;;  %v358_v13 = vld [vmem:[%s3070_s10 + $0x28] sm:$0xff]  ;;  %v355_v17 = vld [vmem:[%s3070_s10 + $0x10] sm:$0xff] }
  0x15   : > { %v364_v14 = vpack.c.bf16 %v358_v13, %v357_v12  ;;  %v356_v18 = vld [vmem:[%s3070_s10 + $0x18] sm:$0xff]  ;;  %v3102_v20 = vld [vmem:[%s3062_s7 + $0x30] sm:$0xff]  ;;  %v3126_v27 = vld [vmem:[%s3062_s7] sm:$0xff] }
  0x16   : > { %2658 = vmatmul.msk.bf16.vlgmr.msra.gmra.mxu0 %vm369_vm1, %v3079_v11  ;;  %2664 = vmatmul.msk.bf16.vlgmr.msra.gmra.mxu1 %vm369_vm1, %v3079_v11  ;;  %v3099_v19 = vld [vmem:[%s3062_s7 + $0x38] sm:$0xff]  ;;  %v363_v21 = vpack.c.bf16 %v356_v18, %v355_v17  ;;  %v359_v22 = vld [vmem:[%s3070_s10 + $0x30] sm:$0xff]  ;;  %v361_v28 = vld [vmem:[%s3070_s10 + $0x40] sm:$0x3f]  ;;  %v2968_v18 = vmov 7  }
  0x17   : > { %2671 = vmatmul.msk.bf16.vlgmr.msra.gmra.mxu2 %vm369_vm1, %v364_v14  ;;  %v360_v23 = vld [vmem:[%s3070_s10 + $0x38] sm:$0xff]  ;;  %888 = vperm.xlu0 %2787, %v3126_v27   ;;  %v366_v29 = vpack.c.bf16 %v361_v28, %v361_v28  ;;  %v3135_v30 = vld [vmem:[%s3062_s7 + $0x28] sm:$0xff] }
  0x18   : > { %v365_v24 = vpack.c.bf16 %v360_v23, %v359_v22 }
  0x1b   : > { %900 = vperm.xlu1 %2789, %v3088_v15   ;;  %897 = vperm.xlu2 %2788, %v3091_v16  }
  0x1f   : > { %903 = vperm.xlu0 %2787, %v3135_v30  }
  0x23   : > { %909 = vperm.xlu1 %2789, %v3099_v19   ;;  %906 = vperm.xlu2 %2788, %v3102_v20  }
  0x26   : > { %2659 = vmatmul.msk.bf16.gmra.mxu0 %vm369_vm1, %v363_v21  ;;  %2665 = vmatmul.msk.bf16.gmra.mxu1 %vm369_vm1, %v363_v21 }
  0x27   : > { %2672 = vmatmul.msk.bf16.gmra.mxu2 %vm369_vm1, %v365_v24  ;;  %2790 = vset.pattern.permute.xlu0 %v2962_v25 }
  0x28   : > { %936 = vperm.xlu0 %2790, %v3126_v27  }
  0x2b   : > { %2792 = vset.pattern.permute.xlu1 %v2962_v25  ;;  %2791 = vset.pattern.permute.xlu2 %v2962_v25 }
  0x2c   : > { %942 = vperm.xlu1 %2792, %v3065_v7   ;;  %939 = vperm.xlu2 %2791, %v3073_v8  }
  0x30   : > { %951 = vperm.xlu0 %2790, %v3135_v30  }
  0x34   : > { %948 = vperm.xlu1 %2792, %v3088_v15   ;;  %945 = vperm.xlu2 %2791, %v3091_v16  }
  0x36   : > { %2660 = vmatmul.msk.bf16.gmra.mxu0 %vm369_vm1, %v364_v14  ;;  %2666 = vmatmul.msk.bf16.gmra.mxu1 %vm369_vm1, %v364_v14 }
  0x38   : > { %2793 = vset.pattern.permute.xlu0 %v2963_v26 }
  0x39   : > { %984 = vperm.xlu0 %2793, %v3126_v27  }
  0x3c   : > { %957 = vperm.xlu1 %2792, %v3099_v19   ;;  %954 = vperm.xlu2 %2791, %v3102_v20  }
  0x41   : > { %999 = vperm.xlu0 %2793, %v3135_v30  }
  0x44   : > { %2795 = vset.pattern.permute.xlu1 %v2963_v26  ;;  %2794 = vset.pattern.permute.xlu2 %v2963_v26 }
  0x45   : > { %990 = vperm.xlu1 %2795, %v3065_v7   ;;  %987 = vperm.xlu2 %2794, %v3073_v8  }
  0x46   : > { %2661 = vmatmul.msk.bf16.gmra.mxu0 %vm369_vm1, %v365_v24  ;;  %2667 = vmatmul.msk.bf16.gmra.mxu1 %vm369_vm1, %v365_v24 }
  0x49   : > { %2796 = vset.pattern.permute.xlu0 %v2964_v31 }
  0x4a   : > { %1032 = vperm.xlu0 %2796, %v3126_v27  }
  0x4d   : > { %996 = vperm.xlu1 %2795, %v3088_v15   ;;  %993 = vperm.xlu2 %2794, %v3091_v16  }
  0x52   : > { %1047 = vperm.xlu0 %2796, %v3135_v30  }
  0x55   : > { %1005 = vperm.xlu1 %2795, %v3099_v19   ;;  %1002 = vperm.xlu2 %2794, %v3102_v20  }
  0x56   : > { %2662 = vmatmul.msk.bf16.gmra.mxu0 %vm369_vm1, %v366_v29  ;;  %2668 = vmatmul.msk.bf16.gmra.mxu1 %vm369_vm1, %v366_v29 }
  0x5a   : > { %2799 = vset.pattern.permute.xlu0 %v2965_v34 }
  0x5b   : > { %1080 = vperm.xlu0 %2799, %v3126_v27  }
  0x5d   : > { %2798 = vset.pattern.permute.xlu1 %v2964_v31  ;;  %2797 = vset.pattern.permute.xlu2 %v2964_v31 }
  0x5e   : > { %1038 = vperm.xlu1 %2798, %v3065_v7   ;;  %1035 = vperm.xlu2 %2797, %v3073_v8  }
  0x63   : > { %1095 = vperm.xlu0 %2799, %v3135_v30  }
  0x66   : > { %1044 = vperm.xlu1 %2798, %v3088_v15   ;;  %1041 = vperm.xlu2 %2797, %v3091_v16  }
  0x67   : > { %2669 = vmatmul.msk.bf16.vlgmr.msrb.gmra.mxu0 %vm369_vm1, %v3079_v11  ;;  %2670 = vmatmul.msk.bf16.vlgmr.msrb.gmra.mxu1 %vm369_vm1, %v363_v21 }
  0x6b   : > { %2802 = vset.pattern.permute.xlu0 %v2966_v40 }
  0x6c   : > { %1128 = vperm.xlu0 %2802, %v3126_v27  }
  0x6d   : > { %v3147_v32 = vpop.permute.xlu2 %891 }
  0x6e   : > { %1053 = vperm.xlu1 %2798, %v3099_v19   ;;  %1050 = vperm.xlu2 %2797, %v3102_v20  }
  0x74   : > { %1143 = vperm.xlu0 %2802, %v3135_v30  }
  0x75   : > { %v3152_v33 = vpop.permute.xlu2 %897 }
  0x76   : > { %4865 = vst [vmem:[#allocation4_spill] sm:$0xff] %v3152_v33  ;;  %2801 = vset.pattern.permute.xlu1 %v2965_v34  ;;  %2800 = vset.pattern.permute.xlu2 %v2965_v34 }
  0x77   : > { %1086 = vperm.xlu1 %2801, %v3065_v7   ;;  %1083 = vperm.xlu2 %2800, %v3073_v8  }
  0x7c   : > { %2805 = vset.pattern.permute.xlu0 %v2967_v59 }
  0x7d   : > { %v3157_v35 = vpop.permute.xlu2 %906  ;;  %1176 = vperm.xlu0 %2805, %v3126_v27  }
  0x7e   : > { %4866 = vst [vmem:[#allocation5_spill] sm:$0xff] %v3157_v35  ;;  %v2975_v35 = vmov 14  }
  0x7f   : > { %1092 = vperm.xlu1 %2801, %v3088_v15   ;;  %1089 = vperm.xlu2 %2800, %v3091_v16  }
  0x85   : > { %v3162_v36 = vpop.permute.xlu1 %894  ;;  %1191 = vperm.xlu0 %2805, %v3135_v30  }
  0x86   : > { %4867 = vst [vmem:[#allocation6_spill] sm:$0xff] %v3162_v36  ;;  %v3164_v37 = vpop.permute.xlu2 %939 }
  0x87   : > { %1101 = vperm.xlu1 %2801, %v3099_v19   ;;  %1098 = vperm.xlu2 %2800, %v3102_v20  }
  0x8d   : > { %v3169_v38 = vpop.permute.xlu1 %900  ;;  %2808 = vset.pattern.permute.xlu0 %v2968_v18 }
  0x8e   : > { %v3171_v39 = vpop.permute.xlu2 %945  ;;  %1224 = vperm.xlu0 %2808, %v3126_v27  }
  0x8f   : > { %4868 = vst [vmem:[#allocation7_spill] sm:$0xff] %v3171_v39  ;;  %2804 = vset.pattern.permute.xlu1 %v2966_v40  ;;  %2803 = vset.pattern.permute.xlu2 %v2966_v40 }
  0x90   : > { %1134 = vperm.xlu1 %2804, %v3065_v7   ;;  %1131 = vperm.xlu2 %2803, %v3073_v8  }
  0x93   : > { %v398_v41 = vpop.f32.mrf.mxu0  ;;  %v456_v42 = vpop.f32.mrf.mxu1 }
  0x94   : > { %v422_v43 = vpack.c.bf16 %v398_v41, %v398_v41  ;;  %v480_v44 = vpack.c.bf16 %v456_v42, %v456_v42 }
  0x95   : > { %v3176_v45 = vpop.permute.xlu1 %909 }
  0x96   : > { %4869 = vst [vmem:[#allocation8_spill] sm:$0xff] %v3176_v45  ;;  %v3179_v46 = vpop.permute.xlu2 %954  ;;  %1239 = vperm.xlu0 %2808, %v3135_v30  }
  0x97   : > { %432 = vst.msk [vmem:[#allocation2] sm:$0xf] %vm431_vm2, %v422_v43 }
  0x98   : > { %4870 = vst [vmem:[#allocation9_spill] sm:$0xff] %v3179_v46  ;;  %1140 = vperm.xlu1 %2804, %v3088_v15   ;;  %1137 = vperm.xlu2 %2803, %v3091_v16  }
  0x99   : > { %489 = vst.msk [vmem:[#allocation3] sm:$0xf] %vm431_vm2, %v480_v44 }
  0x9b   : > { %v400_v47 = vpop.f32.mrf.mxu0  ;;  %v458_v48 = vpop.f32.mrf.mxu1 }
  0x9c   : > { %v423_v49 = vpack.c.bf16 %v400_v47, %v400_v47  ;;  %v481_v50 = vpack.c.bf16 %v458_v48, %v458_v48  ;;  %v2969_v48 = vmov 8  }
  0x9e   : > { %433 = vst.msk [vmem:[#allocation2 + $0x4] sm:$0xf] %vm431_vm2, %v423_v49  ;;  %v3186_v51 = vpop.permute.xlu1 %942  ;;  %2811 = vset.pattern.permute.xlu0 %v2969_v48 }
  0x9f   : > { %4871 = vst [vmem:[#allocation10_spill] sm:$0xff] %v3186_v51  ;;  %v3189_v52 = vpop.permute.xlu2 %987  ;;  %1272 = vperm.xlu0 %2811, %v3126_v27  }
  0xa0   : > { %490 = vst.msk [vmem:[#allocation3 + $0x4] sm:$0xf] %vm431_vm2, %v481_v50  ;;  %1149 = vperm.xlu1 %2804, %v3099_v19   ;;  %1146 = vperm.xlu2 %2803, %v3102_v20  }
  0xa3   : > { %v403_v53 = vpop.f32.mrf.mxu0  ;;  %v461_v54 = vpop.f32.mrf.mxu1 }
  0xa4   : > { %v424_v55 = vpack.c.bf16 %v403_v53, %v403_v53  ;;  %v482_v56 = vpack.c.bf16 %v461_v54, %v461_v54 }
  0xa6   : > { %434 = vst.msk [vmem:[#allocation2 + $0x8] sm:$0xf] %vm431_vm2, %v424_v55  ;;  %v3195_v57 = vpop.permute.xlu1 %948 }
  0xa7   : > { %4872 = vst [vmem:[#allocation11_spill] sm:$0xff] %v3195_v57  ;;  %v3198_v58 = vpop.permute.xlu2 %993  ;;  %1287 = vperm.xlu0 %2811, %v3135_v30  }
  0xa8   : > { %491 = vst.msk [vmem:[#allocation3 + $0x8] sm:$0xf] %vm431_vm2, %v482_v56  ;;  %2807 = vset.pattern.permute.xlu1 %v2967_v59  ;;  %2806 = vset.pattern.permute.xlu2 %v2967_v59 }
  0xa9   : > { %4873 = vst [vmem:[#allocation12_spill] sm:$0xff] %v3198_v58  ;;  %1182 = vperm.xlu1 %2807, %v3065_v7   ;;  %1179 = vperm.xlu2 %2806, %v3073_v8  }
  0xab   : > { %v405_v60 = vpop.f32.mrf.mxu0  ;;  %v463_v61 = vpop.f32.mrf.mxu1 }
  0xac   : > { %v425_v62 = vpack.c.bf16 %v405_v60, %v405_v60  ;;  %v483_v63 = vpack.c.bf16 %v463_v61, %v463_v61 }
  0xae   : > { %435 = vst.msk [vmem:[#allocation2 + $0xc] sm:$0xf] %vm431_vm2, %v425_v62  ;;  %v3204_v0 = vpop.permute.xlu1 %957 }
  0xaf   : > { %4874 = vst [vmem:[#allocation13_spill] sm:$0xff] %v3204_v0  ;;  %v3207_v1 = vpop.permute.xlu2 %1002 }
  0xb0   : > { %492 = vst.msk [vmem:[#allocation3 + $0xc] sm:$0xf] %vm431_vm2, %v483_v63 }
  0xb1   : > { %4875 = vst [vmem:[#allocation14_spill] sm:$0xff] %v3207_v1  ;;  %1188 = vperm.xlu1 %2807, %v3088_v15   ;;  %1185 = vperm.xlu2 %2806, %v3091_v16  }
  0xb3   : > { %v408_v2 = vpop.f32.mrf.mxu0  ;;  %v466_v3 = vpop.f32.mrf.mxu1 }
  0xb4   : > { %v426_v4 = vpack.c.bf16 %v408_v2, %v408_v2  ;;  %v484_v5 = vpack.c.bf16 %v466_v3, %v466_v3 }
  0xb6   : > { %436 = vst.msk [vmem:[#allocation2 + $0x10] sm:$0xf] %vm431_vm2, %v426_v4 }
  0xb7   : > { %493 = vst.msk [vmem:[#allocation3 + $0x10] sm:$0xf] %vm431_vm2, %v484_v5  ;;  %v3214_v6 = vpop.permute.xlu1 %990 }
  0xb8   : > { %4876 = vst [vmem:[#allocation15_spill] sm:$0xff] %v3214_v6  ;;  %v3216_v9 = vpop.permute.xlu2 %1035 }
  0xb9   : > { %1197 = vperm.xlu1 %2807, %v3099_v19   ;;  %1194 = vperm.xlu2 %2806, %v3102_v20  }
  0xbb   : > { %v410_v10 = vpop.f32.mrf.mxu0  ;;  %v468_v11 = vpop.f32.mrf.mxu1 }
  0xbc   : > { %v427_v12 = vpack.c.bf16 %v410_v10, %v410_v10  ;;  %v485_v13 = vpack.c.bf16 %v468_v11, %v468_v11  ;;  %v2970_v11 = vmov 9  }
  0xbd   : > { %2814 = vset.pattern.permute.xlu0 %v2970_v11 }
  0xbe   : > { %437 = vst.msk [vmem:[#allocation2 + $0x14] sm:$0xf] %vm431_vm2, %v427_v12  ;;  %1320 = vperm.xlu0 %2814, %v3126_v27  }
  0xbf   : > { %494 = vst.msk [vmem:[#allocation3 + $0x14] sm:$0xf] %vm431_vm2, %v485_v13  ;;  %v3223_v14 = vpop.permute.xlu1 %996 }
  0xc0   : > { %4877 = vst [vmem:[#allocation16_spill] sm:$0xff] %v3223_v14  ;;  %v3225_v17 = vpop.permute.xlu2 %1041  ;;  %v3688_v14 = vld [vmem:[%s3062_s7] sm:$0xff] }
  0xc1   : > { %4878 = vst [vmem:[#allocation17_spill] sm:$0xff] %v3225_v17  ;;  %2810 = vset.pattern.permute.xlu1 %v2968_v18  ;;  %2809 = vset.pattern.permute.xlu2 %v2968_v18 }
  0xc2   : > { %1230 = vperm.xlu1 %2810, %v3065_v7   ;;  %1227 = vperm.xlu2 %2809, %v3073_v8  }
  0xc3   : > { %v413_v21 = vpop.f32.mrf.mxu0  ;;  %v471_v22 = vpop.f32.mrf.mxu1 }
  0xc4   : > { %v428_v23 = vpack.c.bf16 %v413_v21, %v413_v21  ;;  %v486_v24 = vpack.c.bf16 %v471_v22, %v471_v22  ;;  %v2723_v22 = vld [vmem:[#allocation3 + $0x8] sm:$0xff] }
  0xc6   : > { %438 = vst.msk [vmem:[#allocation2 + $0x18] sm:$0xf] %vm431_vm2, %v428_v23  ;;  %v2724_v12 = vld [vmem:[#allocation3 + $0x10] sm:$0xff]  ;;  %1335 = vperm.xlu0 %2814, %v3135_v30  }
  0xc7   : > { %495 = vst.msk [vmem:[#allocation3 + $0x18] sm:$0xf] %vm431_vm2, %v486_v24  ;;  %v3232_v25 = vpop.permute.xlu1 %1005  ;;  %v2720_v23 = vld [vmem:[#allocation2 + $0x10] sm:$0xff] }
  0xc8   : > { %4879 = vst [vmem:[#allocation18_spill] sm:$0xff] %v3232_v25  ;;  %v3234_v26 = vpop.permute.xlu2 %1050 }
  0xc9   : > { %4880 = vst [vmem:[#allocation19_spill] sm:$0xff] %v3234_v26 }
  0xca   : > { %1236 = vperm.xlu1 %2810, %v3088_v15   ;;  %1233 = vperm.xlu2 %2809, %v3091_v16  }
  0xcb   : > { %v415_v28 = vpop.f32.mrf.mxu0  ;;  %v473_v29 = vpop.f32.mrf.mxu1 }
  0xcc   : > { %v429_v31 = vpack.c.bf16 %v415_v28, %v415_v28  ;;  %v487_v34 = vpack.c.bf16 %v473_v29, %v473_v29  ;;  %v617_v28 = vsel %vm369_vm1, %v2720_v23, 0  ;;  %v2722_v29 = vld [vmem:[#allocation3] sm:$0xff] }
  0xce   : > { %439 = vst.msk [vmem:[#allocation2 + $0x1c] sm:$0xf] %vm431_vm2, %v429_v31 }
  0xcf   : > { %496 = vst.msk [vmem:[#allocation3 + $0x1c] sm:$0xf] %vm431_vm2, %v487_v34  ;;  %v3276_v34 = vpop.permute.xlu0 %888 }
  0xd0   : > { %v3241_v40 = vpop.permute.xlu1 %1038 }
  0xd1   : > { %4881 = vst [vmem:[#allocation20_spill] sm:$0xff] %v3241_v40  ;;  %v3243_v41 = vpop.permute.xlu2 %1083 }
  0xd2   : > { %1245 = vperm.xlu1 %2810, %v3099_v19   ;;  %1242 = vperm.xlu2 %2809, %v3102_v20  }
  0xd3   : > { %v418_v42 = vpop.f32.mrf.mxu0  ;;  %v476_v43 = vpop.f32.mrf.mxu1 }
  0xd4   : > { %v430_v44 = vpack.c.bf16 %v418_v42, %v418_v42  ;;  %v488_v47 = vpack.c.bf16 %v476_v43, %v476_v43  ;;  %v2719_v42 = vld [vmem:[#allocation2 + $0x8] sm:$0xff]  ;;  %v2971_v43 = vmov 10  }
  0xd5   : > { %v2721_v10 = vld [vmem:[#allocation2 + $0x18] sm:$0xff]  ;;  %2817 = vset.pattern.permute.xlu0 %v2971_v43 }
  0xd6   : > { %441 = vst.msk [vmem:[#allocation2 + $0x20] sm:$0x7] %vm440_vm3, %v430_v44  ;;  %v2725_v5 = vld [vmem:[#allocation3 + $0x18] sm:$0xff]  ;;  %v620_v18 = vsel %vm369_vm1, %v2721_v10, 0  ;;  %1368 = vperm.xlu0 %2817, %v3126_v27  }
  0xd7   : > { %497 = vst.msk [vmem:[#allocation3 + $0x20] sm:$0x7] %vm440_vm3, %v488_v47  ;;  %v614_v47 = vsel %vm369_vm1, %v2719_v42, 0  ;;  %v552_v42 = vpop.f32.mrf.mxu2 }
  0xd8   : > { %v3248_v49 = vpop.permute.xlu1 %1044 }
  0xd9   : > { %4882 = vst [vmem:[#allocation21_spill] sm:$0xff] %v3248_v49  ;;  %v3250_v50 = vpop.permute.xlu2 %1089 }
  0xda   : > { %4883 = vst [vmem:[#allocation22_spill] sm:$0xff] %v3250_v50  ;;  %2813 = vset.pattern.permute.xlu1 %v2969_v48  ;;  %2812 = vset.pattern.permute.xlu2 %v2969_v48 }
  0xdb   : > { %1278 = vperm.xlu1 %2813, %v3065_v7   ;;  %v420_v53 = vpop.f32.mrf.mxu0  ;;  %1275 = vperm.xlu2 %2812, %v3073_v8   ;;  %v478_v54 = vpop.f32.mrf.mxu1 }
  0xdc   : > { %v3286_v54 = vpop.permute.xlu0 %903 }
  0xdd   : > { %v574_v55 = vld [vmem:[#allocation2 + $0x20] sm:$0x7]  ;;  %4891 = vst [vmem:[#allocation30_spill] sm:$0xff] %v3286_v54 }
  0xde   : > { %v592_v56 = vunpack.c.l.b16 %v574_v55  ;;  %v755_v59 = vld [vmem:[#allocation3 + $0x20] sm:$0x7]  ;;  %1383 = vperm.xlu0 %2817, %v3135_v30  }
  0xdf   : > { %v773_v60 = vunpack.c.l.b16 %v755_v59  ;;  %v2718_v55 = vld [vmem:[#allocation2] sm:$0xff] }
  0xe0   : > { %v3255_v61 = vpop.permute.xlu1 %1053  ;;  %v597_v62 = vpack.c.b16 %v592_v56, %v592_v56  ;;  %v611_v59 = vsel %vm369_vm1, %v2718_v55, 0 }
  0xe1   : > { %4884 = vst [vmem:[#allocation23_spill] sm:$0xff] %v3255_v61  ;;  %v778_v63 = vpack.c.b16 %v773_v60, %v773_v60  ;;  %v3257_v2 = vpop.permute.xlu2 %1098 }
  0xe2   : > { %4885 = vst [vmem:[#allocation24_spill] sm:$0xff] %v3257_v2  ;;  %v623_v3 = vsel %vm369_vm1, %v597_v62, 0 }
  0xe3   : > { %1284 = vperm.xlu1 %2813, %v3088_v15   ;;  %628 = vmatpush.bf16.xpose.msra.mxu3 %v623_v3  ;;  %v797_v4 = vsel %vm795_vm4, %v778_v63, 0 }
  0xe4   : > { %802 = vmatpush.bf16.msrb.mxu2 %v797_v4  ;;  %1281 = vperm.xlu2 %2812, %v3091_v16   ;;  %v542_v53 = vpop.f32.mrf.mxu0  ;;  %v3296_v62 = vpop.permute.xlu0 %936 }
  0xe5   : > { %v547_v4 = vpop.f32.mrf.mxu1 }
  0xe8   : > { %803 = vmatpush.bf16.msrb.mxu2 %v2725_v5  ;;  %v2972_v5 = vmov 11  }
  0xe9   : > { %v3263_v13 = vpop.permute.xlu1 %1086  ;;  %2820 = vset.pattern.permute.xlu0 %v2972_v5 }
  0xea   : > { %4886 = vst [vmem:[#allocation25_spill] sm:$0xff] %v3263_v13  ;;  %v3266_v21 = vpop.permute.xlu2 %1131  ;;  %1416 = vperm.xlu0 %2820, %v3126_v27  }
  0xeb   : > { %1293 = vperm.xlu1 %2813, %v3099_v19   ;;  %629 = vmatpush.bf16.xpose.msra.mxu3 %v620_v18 }
  0xec   : > { %804 = vmatpush.bf16.msrb.mxu2 %v2724_v12  ;;  %1290 = vperm.xlu2 %2812, %v3102_v20   ;;  %v544_v63 = vpop.f32.mrf.mxu0  ;;  %v3306_v12 = vpop.permute.xlu0 %951 }
  0xed   : > { %v562_v3 = vpack.c.bf16 %v544_v63, %v542_v53  ;;  %4895 = vst [vmem:[#allocation34_spill] sm:$0xff] %v3306_v12 }
  0xf0   : > { %805 = vmatpush.bf16.msrb.mxu2 %v2723_v22  ;;  %v549_v22 = vpop.f32.mrf.mxu1 }
  0xf1   : > { %v3271_v24 = vpop.permute.xlu1 %1092 }
  0xf2   : > { %4887 = vst [vmem:[#allocation26_spill] sm:$0xff] %v3271_v24  ;;  %v3274_v31 = vpop.permute.xlu2 %1137  ;;  %1431 = vperm.xlu0 %2820, %v3135_v30  }
  0xf3   : > { %4888 = vst [vmem:[#allocation27_spill] sm:$0xff] %v3274_v31  ;;  %2816 = vset.pattern.permute.xlu1 %v2970_v11  ;;  %630 = vmatpush.bf16.xpose.msra.mxu3 %v617_v28 }
  0xf4   : > { %806 = vmatpush.bf16.msrb.mxu2 %v2722_v29  ;;  %1326 = vperm.xlu1 %2816, %v3065_v7   ;;  %v3315_v28 = vpop.permute.xlu0 %984  ;;  %v563_v29 = vpack.c.bf16 %v549_v22, %v547_v4 }
  0xf5   : > { %2815 = vset.pattern.permute.xlu2 %v2970_v11 }
  0xf6   : > { %1323 = vperm.xlu2 %2815, %v3073_v8  }
  0xf9   : > { %v3280_v44 = vpop.permute.xlu1 %1101 }
  0xfa   : > { %4889 = vst [vmem:[#allocation28_spill] sm:$0xff] %v3280_v44  ;;  %v3284_v48 = vpop.permute.xlu2 %1146 }
  0xfb   : > { %4890 = vst [vmem:[#allocation29_spill] sm:$0xff] %v3284_v48  ;;  %631 = vmatpush.bf16.xpose.msra.mxu3 %v614_v47  ;;  %v2974_v48 = vmov 13  }
  0xfc   : > { %1332 = vperm.xlu1 %2816, %v3088_v15   ;;  %v3322_v53 = vpop.permute.xlu0 %999 }
  0xfd   : > { %4899 = vst [vmem:[#allocation38_spill] sm:$0xff] %v3322_v53 }
  0xfe   : > { %1329 = vperm.xlu2 %2815, %v3091_v16  }
 0x102   : > { %v3291_v56 = vpop.permute.xlu1 %1134 }
 0x103   : > { %4892 = vst [vmem:[#allocation31_spill] sm:$0xff] %v3291_v56  ;;  %632 = vmatpush.bf16.xpose.msra.mxu3 %v611_v59  ;;  %v3294_v60 = vpop.permute.xlu2 %1179  ;;  %v554_v59 = vpop.f32.mrf.mxu2 }
 0x104   : > { %1341 = vperm.xlu1 %2816, %v3099_v19   ;;  %v564_v22 = vpack.c.bf16 %v554_v59, %v552_v42 }
 0x106   : > { %1338 = vperm.xlu2 %2815, %v3102_v20  }
 0x10a   : > { %v3300_v10 = vpop.permute.xlu1 %1140  ;;  %2689 = vmatmul.msk.bf16.vlgmr.msra.gmra.mxu3 %vm369_vm1, %v562_v3  ;;  %v3331_v3 = vpop.permute.xlu0 %1032 }
 0x10b   : > { %4893 = vst [vmem:[#allocation32_spill] sm:$0xff] %v3300_v10  ;;  %v3304_v11 = vpop.permute.xlu2 %1185  ;;  %v557_v26 = vpop.f32.mrf.mxu2 }
 0x10c   : > { %4894 = vst [vmem:[#allocation33_spill] sm:$0xff] %v3304_v11  ;;  %2819 = vset.pattern.permute.xlu1 %v2971_v43 }
 0x10d   : > { %1374 = vperm.xlu1 %2819, %v3065_v7  }
 0x10e   : > { %2818 = vset.pattern.permute.xlu2 %v2971_v43  ;;  %v2973_v43 = vmov 12  }
 0x10f   : > { %1371 = vperm.xlu2 %2818, %v3073_v8   ;;  %2823 = vset.pattern.permute.xlu0 %v2973_v43 }
 0x110   : > { %1464 = vperm.xlu0 %2823, %v3126_v27  }
 0x112   : > { %v3310_v18 = vpop.permute.xlu1 %1149 }
 0x113   : > { %4896 = vst [vmem:[#allocation35_spill] sm:$0xff] %v3310_v18  ;;  %v3313_v23 = vpop.permute.xlu2 %1194 }
 0x114   : > { %4897 = vst [vmem:[#allocation36_spill] sm:$0xff] %v3313_v23  ;;  %v3341_v23 = vpop.permute.xlu0 %1047 }
 0x115   : > { %1380 = vperm.xlu1 %2819, %v3088_v15   ;;  %4903 = vst [vmem:[#allocation42_spill] sm:$0xff] %v3341_v23 }
 0x117   : > { %1377 = vperm.xlu2 %2818, %v3091_v16  }
 0x118   : > { %1479 = vperm.xlu0 %2823, %v3135_v30  }
 0x11a   : > { %2690 = vmatmul.msk.bf16.gmra.mxu3 %vm369_vm1, %v563_v29 }
 0x11b   : > { %v3320_v47 = vpop.permute.xlu1 %1182 }
 0x11c   : > { %4898 = vst [vmem:[#allocation37_spill] sm:$0xff] %v3320_v47  ;;  %v3325_v55 = vpop.permute.xlu2 %1227 }
 0x11d   : > { %1389 = vperm.xlu1 %2819, %v3099_v19  }
 0x11f   : > { %1386 = vperm.xlu2 %2818, %v3102_v20  }
 0x120   : > { %2826 = vset.pattern.permute.xlu0 %v2974_v48 }
 0x121   : > { %1512 = vperm.xlu0 %2826, %v3126_v27  }
 0x123   : > { %v3329_v63 = vpop.permute.xlu1 %1188 }
 0x124   : > { %4900 = vst [vmem:[#allocation39_spill] sm:$0xff] %v3329_v63  ;;  %v3334_v4 = vpop.permute.xlu2 %1233 }
 0x125   : > { %4901 = vst [vmem:[#allocation40_spill] sm:$0xff] %v3334_v4  ;;  %2822 = vset.pattern.permute.xlu1 %v2972_v5 }
 0x126   : > { %1422 = vperm.xlu1 %2822, %v3065_v7  }
 0x127   : > { %2821 = vset.pattern.permute.xlu2 %v2972_v5  ;;  %v3348_v5 = vpop.permute.xlu0 %1080 }
 0x128   : > { %1419 = vperm.xlu2 %2821, %v3073_v8  }
 0x129   : > { %1527 = vperm.xlu0 %2826, %v3135_v30  }
 0x12a   : > { %2691 = vmatmul.msk.bf16.gmra.mxu3 %vm369_vm1, %v564_v22  ;;  %v559_v22 = vpop.f32.mrf.mxu2 }
 0x12b   : > { %v3339_v29 = vpop.permute.xlu1 %1197 }
 0x12c   : > { %4902 = vst [vmem:[#allocation41_spill] sm:$0xff] %v3339_v29  ;;  %v3343_v2 = vpop.permute.xlu2 %1242 }
 0x12d   : > { %4904 = vst [vmem:[#allocation43_spill] sm:$0xff] %v3343_v2  ;;  %v565_v2 = vpack.c.bf16 %v559_v22, %v557_v26 }
 0x12e   : > { %1428 = vperm.xlu1 %2822, %v3088_v15  }
 0x12f   : > { %v3357_v1 = vpop.permute.xlu0 %1095 }
 0x130   : > { %1425 = vperm.xlu2 %2821, %v3091_v16   ;;  %4906 = vst [vmem:[#allocation45_spill] sm:$0xff] %v3357_v1 }
 0x131   : > { %2829 = vset.pattern.permute.xlu0 %v2975_v35 }
 0x132   : > { %1560 = vperm.xlu0 %2829, %v3126_v27  }
 0x134   : > { %v3350_v42 = vpop.permute.xlu1 %1230 }
 0x135   : > { %4905 = vst [vmem:[#allocation44_spill] sm:$0xff] %v3350_v42  ;;  %v3353_v59 = vpop.permute.xlu2 %1275 }
 0x136   : > { %1437 = vperm.xlu1 %2822, %v3099_v19  }
 0x137   : > { %v3367_v53 = vpop.permute.xlu0 %1128 }
 0x138   : > { %1434 = vperm.xlu2 %2821, %v3102_v20  }
 0x13a   : > { %2692 = vmatmul.msk.bf16.gmra.mxu3 %vm369_vm1, %v565_v2  ;;  %1575 = vperm.xlu0 %2829, %v3135_v30  }
 0x13c   : > { %v3360_v46 = vpop.permute.xlu1 %1236 }
 0x13d   : > { %4907 = vst [vmem:[#allocation46_spill] sm:$0xff] %v3360_v46  ;;  %v3626_v46 = vld [vmem:[%s3062_s7 + $0x38] sm:$0xff] }
 0x13e   : > { %2825 = vset.pattern.permute.xlu1 %v2973_v43  ;;  %v3363_v23 = vpop.permute.xlu2 %1281 }
 0x13f   : > { %4908 = vst [vmem:[#allocation47_spill] sm:$0xff] %v3363_v23  ;;  %1470 = vperm.xlu1 %2825, %v3065_v7   ;;  %v3378_v1 = vpop.permute.xlu0 %1143 }
 0x140   : > { %2824 = vset.pattern.permute.xlu2 %v2973_v43  ;;  %4912 = vst [vmem:[#allocation51_spill] sm:$0xff] %v3378_v1 }
 0x141   : > { %1467 = vperm.xlu2 %2824, %v3073_v8  }
 0x144   : > { %v3369_v26 = vpop.permute.xlu1 %1245 }
 0x145   : > { %4909 = vst [vmem:[#allocation48_spill] sm:$0xff] %v3369_v26 }
 0x146   : > { %v3372_v2 = vpop.permute.xlu2 %1290 }
 0x147   : > { %4910 = vst [vmem:[#allocation49_spill] sm:$0xff] %v3372_v2  ;;  %1476 = vperm.xlu1 %2825, %v3088_v15   ;;  %v3386_v54 = vpop.permute.xlu0 %1176 }
 0x149   : > { %1473 = vperm.xlu2 %2824, %v3091_v16  }
 0x14d   : > { %v3376_v22 = vpop.permute.xlu1 %1278 }
 0x14e   : > { %4911 = vst [vmem:[#allocation50_spill] sm:$0xff] %v3376_v22 }
 0x14f   : > { %1485 = vperm.xlu1 %2825, %v3099_v19   ;;  %v3397_v29 = vpop.permute.xlu0 %1191 }
 0x150   : > { %v3381_v43 = vpop.permute.xlu2 %1323  ;;  %4917 = vst [vmem:[#allocation56_spill] sm:$0xff] %v3397_v29  ;;  %v2976_v29 = vmov 15  }
 0x151   : > { %1482 = vperm.xlu2 %2824, %v3102_v20   ;;  %2832 = vset.pattern.permute.xlu0 %v2976_v29 }
 0x155   : > { %v3384_v12 = vpop.permute.xlu1 %1284 }
 0x156   : > { %4913 = vst [vmem:[#allocation52_spill] sm:$0xff] %v3384_v12  ;;  %v3620_v12 = vld [vmem:[%s3062_s7 + $0x30] sm:$0xff] }
 0x157   : > { %2828 = vset.pattern.permute.xlu1 %v2974_v48 }
 0x158   : > { %1518 = vperm.xlu1 %2828, %v3065_v7   ;;  %v3389_v2 = vpop.permute.xlu2 %1329 }
 0x159   : > { %4914 = vst [vmem:[#allocation53_spill] sm:$0xff] %v3389_v2  ;;  %2827 = vset.pattern.permute.xlu2 %v2974_v48  ;;  %v3406_v48 = vpop.permute.xlu0 %1224 }
 0x15a   : > { %1515 = vperm.xlu2 %2827, %v3073_v8  }
 0x15d   : > { %v3392_v26 = vpop.permute.xlu1 %1293 }
 0x15e   : > { %4915 = vst [vmem:[#allocation54_spill] sm:$0xff] %v3392_v26 }
 0x160   : > { %1524 = vperm.xlu1 %2828, %v3088_v15   ;;  %v3395_v1 = vpop.permute.xlu2 %1338 }
 0x161   : > { %4916 = vst [vmem:[#allocation55_spill] sm:$0xff] %v3395_v1  ;;  %v3414_v26 = vpop.permute.xlu0 %1239 }
 0x162   : > { %1521 = vperm.xlu2 %2827, %v3091_v16   ;;  %4921 = vst [vmem:[#allocation60_spill] sm:$0xff] %v3414_v26 }
 0x166   : > { %v3400_v18 = vpop.permute.xlu1 %1326 }
 0x167   : > { %4918 = vst [vmem:[#allocation57_spill] sm:$0xff] %v3400_v18 }
 0x168   : > { %1533 = vperm.xlu1 %2828, %v3099_v19  }
 0x169   : > { %v3403_v44 = vpop.permute.xlu2 %1371  ;;  %v3424_v2 = vpop.permute.xlu0 %1272 }
 0x16a   : > { %1530 = vperm.xlu2 %2827, %v3102_v20  }
 0x16e   : > { %v3408_v61 = vpop.permute.xlu1 %1332 }
 0x16f   : > { %4919 = vst [vmem:[#allocation58_spill] sm:$0xff] %v3408_v61 }
 0x170   : > { %2831 = vset.pattern.permute.xlu1 %v2975_v35 }
 0x171   : > { %1566 = vperm.xlu1 %2831, %v3065_v7   ;;  %v3411_v1 = vpop.permute.xlu2 %1377  ;;  %v3432_v26 = vpop.permute.xlu0 %1287 }
 0x172   : > { %4920 = vst [vmem:[#allocation59_spill] sm:$0xff] %v3411_v1  ;;  %2830 = vset.pattern.permute.xlu2 %v2975_v35 }
 0x173   : > { %1563 = vperm.xlu2 %2830, %v3073_v8   ;;  %4926 = vst [vmem:[#allocation65_spill] sm:$0xff] %v3432_v26 }
 0x176   : > { %v3416_v25 = vpop.permute.xlu1 %1341 }
 0x177   : > { %4922 = vst [vmem:[#allocation61_spill] sm:$0xff] %v3416_v25 }
 0x179   : > { %1572 = vperm.xlu1 %2831, %v3088_v15   ;;  %v3419_v0 = vpop.permute.xlu2 %1386  ;;  %v3446_v4 = vpop.permute.xlu0 %1320 }
 0x17a   : > { %4923 = vst [vmem:[#allocation62_spill] sm:$0xff] %v3419_v0 }
 0x17b   : > { %1569 = vperm.xlu2 %2830, %v3091_v16  }
 0x17f   : > { %v3422_v45 = vpop.permute.xlu1 %1374 }
 0x180   : > { %4924 = vst [vmem:[#allocation63_spill] sm:$0xff] %v3422_v45 }
 0x181   : > { %1581 = vperm.xlu1 %2831, %v3099_v19  }
 0x182   : > { %v3427_v1 = vpop.permute.xlu2 %1419 }
 0x183   : > { %1578 = vperm.xlu2 %2830, %v3102_v20  }
 0x187   : > { %v3430_v35 = vpop.permute.xlu1 %1380 }
 0x188   : > { %4925 = vst [vmem:[#allocation64_spill] sm:$0xff] %v3430_v35 }
 0x189   : > { %2834 = vset.pattern.permute.xlu1 %v2976_v29 }
 0x18a   : > { %v3434_v25 = vpop.permute.xlu2 %1425 }
 0x18b   : > { %4927 = vst [vmem:[#allocation66_spill] sm:$0xff] %v3434_v25  ;;  %2833 = vset.pattern.permute.xlu2 %v2976_v29 }
 0x18d   : > { %v3436_v0 = vpop.f32.mrf.mxu3 }
 0x18e   : > { %844 = vrot.lane.b32.xlu1 %v3436_v0, %s2977_s11  ;;  %v655_v45 = vsel %vm654_vm5, %v3436_v0, -inf }
 0x18f   : > { %v3442_v23 = vpop.permute.xlu1 %1389  ;;  %656 = vmax.xlane.f32.xlu0 %v655_v45  ;;  %v3459_v45 = vpop.permute.xlu0 %1335 }
 0x190   : > { %4928 = vst [vmem:[#allocation67_spill] sm:$0xff] %v3442_v23 }
 0x191   : > { %4931 = vst [vmem:[#allocation70_spill] sm:$0xff] %v3459_v45 }
 0x192   : > { %v3444_v18 = vpop.permute.xlu2 %1434 }
 0x193   : > { %4929 = vst [vmem:[#allocation68_spill] sm:$0xff] %v3444_v18 }
 0x195   : > { %v3448_v26 = vpop.f32.mrf.mxu3 }
 0x196   : > { %1614 = vperm.xlu1 %2834, %v3065_v7   ;;  %846 = vrot.lane.b32.xlu2 %v3448_v26, %s2977_s11  ;;  %v658_v29 = vsel %vm654_vm5, %v3448_v26, -inf }
 0x197   : > { %659 = vmax.xlane.f32.xlu0 %v658_v29  ;;  %v3470_v11 = vpop.permute.xlu0 %1368 }
 0x198   : > { %v3455_v25 = vpop.permute.xlu1 %1422 }
 0x199   : > { %4930 = vst [vmem:[#allocation69_spill] sm:$0xff] %v3455_v25 }
 0x19b   : > { %v3457_v22 = vpop.permute.xlu2 %1467 }
 0x19d   : > { %v3465_v7 = vpop.f32.mrf.mxu3 }
 0x19e   : > { %1620 = vperm.xlu1 %2834, %v3088_v15   ;;  %1611 = vperm.xlu2 %2833, %v3073_v8   ;;  %v661_v17 = vsel %vm654_vm5, %v3465_v7, -inf }
 0x19f   : > { %v3484_v42 = vpop.permute.xlu0 %1383 }
 0x1a0   : > { %v3463_v18 = vpop.permute.xlu1 %1428  ;;  %4937 = vst [vmem:[#allocation76_spill] sm:$0xff] %v3484_v42 }
 0x1a1   : > { %4932 = vst [vmem:[#allocation71_spill] sm:$0xff] %v3463_v18  ;;  %v3601_v18 = vld [vmem:[%s3062_s7 + $0x8] sm:$0xff] }
 0x1a3   : > { %v3467_v23 = vpop.permute.xlu2 %1473 }
 0x1a4   : > { %4933 = vst [vmem:[#allocation72_spill] sm:$0xff] %v3467_v23 }
 0x1a5   : > { %v3476_v45 = vpop.f32.mrf.mxu3 }
 0x1a6   : > { %1617 = vperm.xlu2 %2833, %v3091_v16  }
 0x1a8   : > { %v3472_v29 = vpop.permute.xlu1 %1437 }
 0x1a9   : > { %4934 = vst [vmem:[#allocation73_spill] sm:$0xff] %v3472_v29 }
 0x1ab   : > { %848 = vrot.lane.b32.xlu0 %v3465_v7, %s2977_s11  ;;  %v3478_v15 = vpop.permute.xlu2 %1482 }
 0x1ac   : > { %4935 = vst [vmem:[#allocation74_spill] sm:$0xff] %v3478_v15  ;;  %v3495_v15 = vpop.permute.xlu0 %1416 }
 0x1ad   : > { %v3490_v29 = vpop.f32.mrf.mxu3 }
 0x1ae   : > { %850 = vrot.lane.b32.xlu2 %v3476_v45, %s2977_s11 }
 0x1b1   : > { %v3482_v25 = vpop.permute.xlu1 %1470 }
 0x1b2   : > { %4936 = vst [vmem:[#allocation75_spill] sm:$0xff] %v3482_v25 }
 0x1b3   : > { %1608 = vperm.xlu0 %2832, %v3126_v27  }
 0x1b4   : > { %v3487_v23 = vpop.permute.xlu2 %1515  ;;  %v3505_v42 = vpop.permute.xlu0 %1431 }
 0x1b5   : > { %v3499_v50 = vpop.f32.mrf.mxu3  ;;  %4941 = vst [vmem:[#allocation80_spill] sm:$0xff] %v3505_v42 }
 0x1b6   : > { %1626 = vperm.xlu2 %2833, %v3102_v20  }
 0x1b9   : > { %v3492_v47 = vpop.permute.xlu1 %1476 }
 0x1ba   : > { %4938 = vst [vmem:[#allocation77_spill] sm:$0xff] %v3492_v47 }
 0x1bb   : > { %1623 = vperm.xlu0 %2832, %v3135_v30  }
 0x1bc   : > { %v3497_v31 = vpop.permute.xlu2 %1521  ;;  %v3515_v13 = vpop.permute.xlu0 %1464 }
 0x1bd   : > { %4939 = vst [vmem:[#allocation78_spill] sm:$0xff] %v3497_v31  ;;  %v664_v31 = vsel %vm654_vm5, %v3476_v45, -inf }
 0x1c1   : > { %v3501_v25 = vpop.permute.xlu1 %1485 }
 0x1c2   : > { %4940 = vst [vmem:[#allocation79_spill] sm:$0xff] %v3501_v25 }
 0x1c3   : > { %854 = vrot.lane.b32.xlu0 %v3499_v50, %s2977_s11 }
 0x1c4   : > { %v3509_v56 = vpop.permute.xlu2 %1530  ;;  %v3521_v33 = vpop.permute.xlu0 %1479 }
 0x1c5   : > { %4942 = vst [vmem:[#allocation81_spill] sm:$0xff] %v3509_v56  ;;  %v2978_v56 = vmov 16  }
 0x1c6   : > { %4945 = vst [vmem:[#allocation84_spill] sm:$0xff] %v3521_v33  ;;  %2835 = vset.pattern.permute.xlu0 %v2978_v56  ;;  %2836 = vset.pattern.permute.xlu2 %v2978_v56 }
 0x1c8   : > { %662 = vmax.xlane.f32.xlu1 %v661_v17  ;;  %v667_v17 = vsel %vm654_vm5, %v3490_v29, -inf }
 0x1ca   : > { %v3511_v58 = vpop.permute.xlu1 %1518 }
 0x1cb   : > { %4943 = vst [vmem:[#allocation82_spill] sm:$0xff] %v3511_v58 }
 0x1cc   : > { %v3529_v58 = vpop.permute.xlu0 %1512 }
 0x1cd   : > { %v3519_v39 = vpop.permute.xlu2 %1563 }
 0x1d0   : > { %665 = vmax.xlane.f32.xlu1 %v664_v31 }
 0x1d2   : > { %v3517_v25 = vpop.permute.xlu1 %1524 }
 0x1d3   : > { %4944 = vst [vmem:[#allocation83_spill] sm:$0xff] %v3517_v25  ;;  %v670_v25 = vsel %vm654_vm5, %v3499_v50, -inf }
 0x1d5   : > { %v3525_v40 = vpop.permute.xlu2 %1569 }
 0x1d6   : > { %4947 = vst [vmem:[#allocation86_spill] sm:$0xff] %v3525_v40  ;;  %v3543_v40 = vpop.permute.xlu0 %1527 }
 0x1d7   : > { %4950 = vst [vmem:[#allocation89_spill] sm:$0xff] %v3543_v40 }
 0x1da   : > { %v3523_v42 = vpop.permute.xlu1 %1533 }
 0x1db   : > { %4946 = vst [vmem:[#allocation85_spill] sm:$0xff] %v3523_v42  ;;  %v3539_v42 = vpop.f32.mrf.mxu3 }
 0x1dd   : > { %v3535_v33 = vpop.permute.xlu2 %1578 }
 0x1de   : > { %4949 = vst [vmem:[#allocation88_spill] sm:$0xff] %v3535_v33  ;;  %v3558_v40 = vpop.permute.xlu0 %1560 }
 0x1df   : > { %668 = vmax.xlane.f32.xlu2 %v667_v17  ;;  %v673_v17 = vsel %vm654_vm5, %v3539_v42, -inf }
 0x1e3   : > { %v3531_v31 = vpop.permute.xlu1 %1566  ;;  %v3556_v33 = vpop.f32.mrf.mxu3 }
 0x1e4   : > { %4948 = vst [vmem:[#allocation87_spill] sm:$0xff] %v3531_v31 }
 0x1e6   : > { %v3570_v47 = vpop.permute.xlu0 %1575 }
 0x1e7   : > { %671 = vmax.xlane.f32.xlu2 %v670_v25  ;;  %4954 = vst [vmem:[#allocation93_spill] sm:$0xff] %v3570_v47 }
 0x1e9   : > { %852 = vrot.lane.b32.xlu1 %v3490_v29, %s2977_s11 }
 0x1eb   : > { %v3545_v6 = vpop.permute.xlu1 %1572 }
 0x1ec   : > { %4951 = vst [vmem:[#allocation90_spill] sm:$0xff] %v3545_v6 }
 0x1ed   : > { %674 = vmax.xlane.f32.xlu0 %v673_v17 }
 0x1f0   : > { %v847_v25 = vpop.permute.xlu2 %846 }
 0x1f1   : > { %870 = vst.msk [vmem:[%s3551_s14 + $0x8] sm:$0xff] %vm868_vm6, %v847_v25  ;;  %1629 = vperm.xlu1 %2834, %v3099_v19  }
 0x1f3   : > { %v3560_v17 = vpop.permute.xlu1 %1581 }
 0x1f4   : > { %4952 = vst [vmem:[#allocation91_spill] sm:$0xff] %v3560_v17  ;;  %v2979_v17 = vmov 17  }
 0x1f8   : > { %v3562_v31 = vpop.permute.xlu2 %1611 }
 0x1f9   : > { %858 = vrot.lane.b32.xlu1 %v3556_v33, %s2977_s11 }
 0x1fa   : > { %2837 = vset.pattern.permute.xlu1 %v2978_v56 }
 0x1ff   : > { %856 = vrot.lane.b32.xlu2 %v3539_v42, %s2977_s11 }
 0x200   : > { %v845_v6 = vpop.permute.xlu1 %844  ;;  %v3568_v25 = vpop.permute.xlu2 %1617 }
 0x201   : > { %4953 = vst [vmem:[#allocation92_spill] sm:$0xff] %v3568_v25  ;;  %1656 = vperm.xlu0 %2835, %v3126_v27   ;;  %v676_v25 = vsel %vm654_vm5, %v3556_v33, -inf }
 0x202   : > { %869 = vst.msk [vmem:[%s3551_s14] sm:$0xff] %vm868_vm6, %v845_v6  ;;  %v657_v56 = vpop.xlane.xlu0 %656 }
 0x203   : > { %v679_v10 = vsub.f32 %v3436_v0, %v657_v56 }
 0x205   : > { %v687_v49 = vmul.f32 1.442695, %v679_v10 }
 0x207   : > { %1659 = vperm.xlu2 %2836, %v3073_v8  }
 0x208   : > { %v851_v19 = vpop.permute.xlu2 %850  ;;  %v3598_v36 = vpop.permute.xlu1 %1614 }
 0x209   : > { %872 = vst.msk [vmem:[%s3551_s14 + $0x18] sm:$0xff] %vm868_vm6, %v851_v19  ;;  %1671 = vperm.xlu0 %2835, %v3135_v30   ;;  %v2980_v19 = vmov 18  }
 0x20a   : > { %v660_v47 = vpop.xlane.xlu0 %659  ;;  %4956 = vst [vmem:[#allocation95_spill] sm:$0xff] %v3598_v36  ;;  %v2981_v36 = vmov 19  }
 0x20f   : > { %1665 = vperm.xlu2 %2836, %v3091_v16  }
 0x211   : > { %2838 = vset.pattern.permute.xlu0 %v2979_v17 }
 0x212   : > { %1704 = vperm.xlu0 %2838, %v3126_v27  }
 0x217   : > { %1674 = vperm.xlu2 %2836, %v3102_v20  }
 0x21a   : > { %1719 = vperm.xlu0 %2838, %v3135_v30  }
 0x21d   : > { %v849_v6 = vpop.permute.xlu0 %848 }
 0x21e   : > { %871 = vst.msk [vmem:[%s3551_s14 + $0x10] sm:$0xff] %vm868_vm6, %v849_v6 }
 0x21f   : > { %2839 = vset.pattern.permute.xlu2 %v2979_v17 }
 0x220   : > { %1707 = vperm.xlu2 %2839, %v3073_v8  }
 0x222   : > { %2841 = vset.pattern.permute.xlu0 %v2980_v19 }
 0x223   : > { %1752 = vperm.xlu0 %2841, %v3126_v27   ;;  %677 = vmax.xlane.f32.xlu1 %v676_v25  ;;  %v3605_v25 = vld [vmem:[%s3062_s7 + $0x10] sm:$0xff] }
 0x225   : > { %v3589_v51 = vpop.permute.xlu0 %1608 }
 0x228   : > { %1713 = vperm.xlu2 %2839, %v3091_v16   ;;  %v3608_v16 = vpop.permute.xlu1 %1620 }
 0x229   : > { %4957 = vst [vmem:[#allocation96_spill] sm:$0xff] %v3608_v16  ;;  %v3623_v16 = vpop.permute.xlu2 %1626 }
 0x22a   : > { %4959 = vst [vmem:[#allocation98_spill] sm:$0xff] %v3623_v16 }
 0x22b   : > { %1767 = vperm.xlu0 %2841, %v3135_v30  }
 0x22d   : > { %v3593_v6 = vpop.permute.xlu0 %1623 }
 0x22e   : > { %4955 = vst [vmem:[#allocation94_spill] sm:$0xff] %v3593_v6  ;;  %v3611_v6 = vld [vmem:[%s3062_s7 + $0x18] sm:$0xff] }
 0x22f   : > { %4958 = vst [vmem:[#allocation97_spill] sm:$0xff] %v3611_v6 }
 0x230   : > { %1722 = vperm.xlu2 %2839, %v3102_v20   ;;  %v680_v20 = vsub.f32 %v3448_v26, %v660_v47 }
 0x232   : > { %v689_v35 = vmul.f32 1.442695, %v680_v20 }
 0x233   : > { %2844 = vset.pattern.permute.xlu0 %v2981_v36 }
 0x234   : > { %2889 = vpow2.f32 %v689_v35 }
 0x235   : > { %v855_v8 = vpop.permute.xlu0 %854  ;;  %2891 = vpow2.f32 %v687_v49 }
 0x236   : > { %874 = vst.msk [vmem:[%s3551_s14 + $0x28] sm:$0xff] %vm868_vm6, %v855_v8  ;;  %v3616_v8 = vld [vmem:[%s3062_s7 + $0x20] sm:$0xff] }
 0x238   : > { %2842 = vset.pattern.permute.xlu2 %v2980_v19 }
 0x239   : > { %1755 = vperm.xlu2 %2842, %v3601_v18  }
 0x23a   : > { %v3629_v47 = vpop.eup %2889 }
 0x23b   : > { %v663_v61 = vpop.xlane.xlu1 %662  ;;  %v706_v20 = vsel %vm654_vm5, %v3629_v47, 0.0 }
 0x23c   : > { %1662 = vperm.xlu1 %2837, %v3605_v25  }
 0x241   : > { %1761 = vperm.xlu2 %2842, %v3611_v6  }
 0x243   : > { %v666_v63 = vpop.xlane.xlu1 %665 }
 0x244   : > { %1668 = vperm.xlu1 %2837, %v3616_v8  }
 0x249   : > { %1770 = vperm.xlu2 %2842, %v3620_v12  }
 0x24c   : > { %1677 = vperm.xlu1 %2837, %v3626_v46  }
 0x251   : > { %2845 = vset.pattern.permute.xlu2 %v2981_v36 }
 0x252   : > { %v669_v26 = vpop.xlane.xlu2 %668 }
 0x254   : > { %2840 = vset.pattern.permute.xlu1 %v2979_v17 }
 0x255   : > { %707 = vadd.xlane.f32.xlu0 %v706_v20  ;;  %1710 = vperm.xlu1 %2840, %v3605_v25  }
 0x25a   : > { %v3634_v16 = vpop.xlane.xlu2 %671 }
 0x25b   : > { %v853_v35 = vpop.permute.xlu1 %852 }
 0x25c   : > { %873 = vst.msk [vmem:[%s3551_s14 + $0x20] sm:$0xff] %vm868_vm6, %v853_v35  ;;  %v3648_v35 = vpop.eup %2891 }
 0x25d   : > { %1716 = vperm.xlu1 %2840, %v3616_v8   ;;  %v703_v0 = vsel %vm654_vm5, %v3648_v35, 0.0 }
 0x260   : > { %v3656_v49 = vpop.xlane.xlu0 %674 }
 0x262   : > { %v857_v24 = vpop.permute.xlu2 %856 }
 0x263   : > { %875 = vst.msk [vmem:[%s3551_s14 + $0x30] sm:$0xff] %vm868_vm6, %v857_v24  ;;  %v3642_v17 = vpop.permute.xlu1 %1629 }
 0x264   : > { %4960 = vst [vmem:[#allocation99_spill] sm:$0xff] %v3642_v17 }
 0x265   : > { %1725 = vperm.xlu1 %2840, %v3626_v46  }
 0x269   : > { %1800 = vperm.xlu0 %2844, %v3126_v27   ;;  %v683_v27 = vsub.f32 %v3490_v29, %v669_v26  ;;  %v681_v26 = vsub.f32 %v3465_v7, %v663_v61 }
 0x26a   : > { %v3664_v56 = vpop.permute.xlu2 %1659 }
 0x26b   : > { %v859_v20 = vpop.permute.xlu1 %858  ;;  %v695_v10 = vmul.f32 1.442695, %v683_v27 }
 0x26c   : > { %876 = vst.msk [vmem:[%s3551_s14 + $0x38] sm:$0xff] %vm868_vm6, %v859_v20 }
 0x26d   : > { %2843 = vset.pattern.permute.xlu1 %v2980_v19  ;;  %2893 = vpow2.f32 %v695_v10  ;;  %v691_v10 = vmul.f32 1.442695, %v681_v26 }
 0x26e   : > { %1758 = vperm.xlu1 %2843, %v3605_v25  }
 0x26f   : > { %2895 = vpow2.f32 %v691_v10 }
 0x271   : > { %1815 = vperm.xlu0 %2844, %v3135_v30   ;;  %v4858_v30 = vmov 20  }
 0x272   : > { %704 = vadd.xlane.f32.xlu2 %v703_v0  ;;  %v3671_v20 = vpop.permute.xlu2 %1665 }
 0x273   : > { %v3661_v24 = vpop.permute.xlu0 %1656  ;;  %4962 = vst [vmem:[#allocation101_spill] sm:$0xff] %v3671_v20 }
 0x276   : > { %1764 = vperm.xlu1 %2843, %v3616_v8  }
 0x279   : > { %2847 = vset.pattern.permute.xlu0 %v4858_v30  ;;  %v682_v30 = vsub.f32 %v3476_v45, %v666_v63 }
 0x27a   : > { %v3678_v27 = vpop.permute.xlu2 %1674 }
 0x27b   : > { %v3667_v19 = vpop.permute.xlu0 %1671  ;;  %4963 = vst [vmem:[#allocation102_spill] sm:$0xff] %v3678_v27  ;;  %v693_v20 = vmul.f32 1.442695, %v682_v30 }
 0x27c   : > { %4961 = vst [vmem:[#allocation100_spill] sm:$0xff] %v3667_v19 }
 0x27d   : > { %2897 = vpow2.f32 %v693_v20 }
 0x27e   : > { %1773 = vperm.xlu1 %2843, %v3626_v46  }
 0x282   : > { %v3683_v19 = vpop.permute.xlu2 %1707 }
 0x284   : > { %v3676_v0 = vpop.permute.xlu0 %1704 }
 0x286   : > { %2846 = vset.pattern.permute.xlu1 %v2981_v36  ;;  %v3669_v36 = vpop.eup %2893 }
 0x287   : > { %1806 = vperm.xlu1 %2846, %v3605_v25   ;;  %v715_v29 = vsel %vm654_vm5, %v3669_v36, 0.0 }
 0x28a   : > { %1803 = vperm.xlu2 %2845, %v3601_v18  }
 0x28c   : > { %v3681_v17 = vpop.permute.xlu0 %1719 }
 0x28d   : > { %4964 = vst [vmem:[#allocation103_spill] sm:$0xff] %v3681_v17 }
 0x292   : > { %1809 = vperm.xlu2 %2845, %v3611_v6   ;;  %v3685_v6 = vpop.eup %2895 }
 0x293   : > { %4965 = vst [vmem:[#allocation104_spill] sm:$0xff] %v3685_v6  ;;  %v709_v61 = vsel %vm654_vm5, %v3685_v6, 0.0  ;;  %v3697_v63 = vpop.eup %2897 }
 0x294   : > { %4967 = vst [vmem:[#allocation106_spill] sm:$0xff] %v3697_v63  ;;  %v712_v26 = vsel %vm654_vm5, %v3697_v63, 0.0 }
 0x295   : > { %v3693_v7 = vpop.permute.xlu0 %1752 }
 0x296   : > { %v678_v45 = vpop.xlane.xlu1 %677 }
 0x297   : > { %v686_v20 = vsub.f32 %v3556_v33, %v678_v45 }
 0x299   : > { %v701_v6 = vmul.f32 1.442695, %v686_v20 }
 0x29b   : > { %716 = vadd.xlane.f32.xlu0 %v715_v29  ;;  %v3695_v29 = vpop.permute.xlu2 %1713 }
 0x29c   : > { %4966 = vst [vmem:[#allocation105_spill] sm:$0xff] %v3695_v29  ;;  %v885_v29 = vlaneseq }
 0x29d   : > { %v3701_v30 = vpop.permute.xlu0 %1767 }
 0x2a3   : > { %v3703_v10 = vpop.permute.xlu2 %1722 }
 0x2a4   : > { %4968 = vst [vmem:[#allocation107_spill] sm:$0xff] %v3703_v10 }
 0x2ab   : > { %v3708_v17 = vpop.permute.xlu2 %1755 }
 0x2ae   : > { %v3705_v27 = vpop.permute.xlu1 %1662 }
 0x2af   : > { %1848 = vperm.xlu0 %2847, %v3688_v14  }
 0x2b1   : > { %710 = vadd.xlane.f32.xlu1 %v709_v61 }
 0x2b6   : > { %v3711_v57 = vpop.permute.xlu1 %1668 }
 0x2bb   : > { %713 = vadd.xlane.f32.xlu2 %v712_v26  ;;  %v3713_v26 = vand.u32 127, %v885_v29  ;;  %v3727_v29 = vpop.permute.xlu2 %1761 }
 0x2bd   : > { %vm912_vm7 = vcmp.eq.s32.totalorder %v3147_v32, %v3713_v26  ;;  %vm960_vm8 = vcmp.eq.s32.totalorder %v3164_v37, %v3713_v26  ;;  %vm1008_vm9 = vcmp.eq.s32.totalorder %v3189_v52, %v3713_v26  ;;  %vm1056_vm10 = vcmp.eq.s32.totalorder %v3216_v9, %v3713_v26 }
 0x2be   : > { %vm1104_vm11 = vcmp.eq.s32.totalorder %v3243_v41, %v3713_v26  ;;  %vm1152_vm12 = vcmp.eq.s32.totalorder %v3266_v21, %v3713_v26  ;;  %vm1200_vm13 = vcmp.eq.s32.totalorder %v3294_v60, %v3713_v26  ;;  %vm1248_vm14 = vcmp.eq.s32.totalorder %v3325_v55, %v3713_v26 }
 0x2bf   : > { %vm1296_vm15 = vcmp.eq.s32.totalorder %v3353_v59, %v3713_v26  ;;  %vm1344_vm0 = vcmp.eq.s32.totalorder %v3381_v43, %v3713_v26  ;;  %vm1392_vm2 = vcmp.eq.s32.totalorder %v3403_v44, %v3713_v26  ;;  %vm1440_vm3 = vcmp.eq.s32.totalorder %v3427_v1, %v3713_v26 }
 0x2c0   : > { %vm1488_vm4 = vcmp.eq.s32.totalorder %v3457_v22, %v3713_v26  ;;  %vm1536_vm6 = vcmp.eq.s32.totalorder %v3487_v23, %v3713_v26  ;;  %v684_v44 = vsub.f32 %v3499_v50, %v3634_v16  ;;  %v3790_v16 = vld [vmem:[%s3062_s7 + $0x28] sm:$0xff] }
 0x2c3   : > { %v3754_v21 = vpop.permute.xlu2 %1770 }
 0x2c8   : > { %v708_v61 = vpop.xlane.xlu0 %707 }
 0x2c9   : > { %2899 = vrcp.f32 %v708_v61 }
 0x2ca   : > { %1812 = vperm.xlu1 %2846, %v3616_v8   ;;  %2901 = vpow2.f32 %v701_v6 }
 0x2cf   : > { %v2900_v63 = vpop.eup %2899 }
 0x2d0   : > { %v3716_v10 = vmul.f32 %v2900_v63, %v3629_v47  ;;  %v3731_v32 = vpop.eup %2901  ;;  %v3735_v63 = vpop.permute.xlu1 %1677 }
 0x2d1   : > { %v724_v61 = vsel %vm654_vm5, %v3731_v32, 0.0 }
 0x2d2   : > { %1821 = vperm.xlu1 %2846, %v3626_v46   ;;  %v920_v33 = vsel %vm912_vm7, %v3716_v10, 0.0  ;;  %v968_v45 = vsel %vm960_vm8, %v3716_v10, 0.0  ;;  %v1016_v47 = vsel %vm1008_vm9, %v3716_v10, 0.0  ;;  %v1064_v20 = vsel %vm1056_vm10, %v3716_v10, 0.0 }
 0x2d3   : > { %1818 = vperm.xlu2 %2845, %v3620_v12   ;;  %v976_v6 = vadd.f32 %v968_v45, %v920_v33  ;;  %v1112_v33 = vsel %vm1104_vm11, %v3716_v10, 0.0  ;;  %v1160_v9 = vsel %vm1152_vm12, %v3716_v10, 0.0  ;;  %vm1584_vm7 = vcmp.eq.s32.totalorder %v3519_v39, %v3713_v26 }
 0x2d4   : > { %vm1632_vm8 = vcmp.eq.s32.totalorder %v3562_v31, %v3713_v26  ;;  %vm911_vm9 = vcmp.eq.s32.totalorder %v3276_v34, %v3713_v26  ;;  %vm959_vm10 = vcmp.eq.s32.totalorder %v3296_v62, %v3713_v26  ;;  %vm1680_vm11 = vcmp.eq.s32.totalorder %v3664_v56, %v3713_v26 }
 0x2d5   : > { %v1024_v37 = vadd.f32 %v1016_v47, %v976_v6  ;;  %v4969_v6 = vmov 20   ;;  %v1208_v47 = vsel %vm1200_vm13, %v3716_v10, 0.0  ;;  %v1640_v39 = vsel %vm1632_vm8, %v3716_v10, 0.0 }
 0x2d6   : > { %vm1007_vm12 = vcmp.eq.s32.totalorder %v3315_v28, %v3713_v26  ;;  %vm1055_vm13 = vcmp.eq.s32.totalorder %v3331_v3, %v3713_v26  ;;  %vm1343_vm8 = vcmp.eq.s32.totalorder %v3446_v4, %v3713_v26 }
 0x2d7   : > { %v1072_v52 = vadd.f32 %v1064_v20, %v1024_v37  ;;  %v1256_v20 = vsel %vm1248_vm14, %v3716_v10, 0.0  ;;  %vm1728_vm14 = vcmp.eq.s32.totalorder %v3683_v19, %v3713_v26 }
 0x2d8   : > { %v3759_v60 = vpop.permute.xlu1 %1710 }
 0x2d9   : > { %725 = vadd.xlane.f32.xlu0 %v724_v61  ;;  %v1120_v45 = vadd.f32 %v1112_v33, %v1072_v52  ;;  %v1304_v61 = vsel %vm1296_vm15, %v3716_v10, 0.0  ;;  %vm1776_vm15 = vcmp.eq.s32.totalorder %v3708_v17, %v3713_v26 }
 0x2da   : > { %2849 = vset.pattern.permute.xlu1 %v4969_v6 }
 0x2db   : > { %2848 = vset.pattern.permute.xlu2 %v4969_v6  ;;  %v1168_v41 = vadd.f32 %v1160_v9, %v1120_v45  ;;  %v1352_v45 = vsel %vm1344_vm0, %v3716_v10, 0.0  ;;  %v1400_v9 = vsel %vm1392_vm2, %v3716_v10, 0.0  ;;  %vm1103_vm2 = vcmp.eq.s32.totalorder %v3348_v5, %v3713_v26 }
 0x2dc   : > { %1851 = vperm.xlu2 %2848, %v3601_v18  }
 0x2dd   : > { %v1216_v37 = vadd.f32 %v1208_v47, %v1168_v41  ;;  %v1448_v41 = vsel %vm1440_vm3, %v3716_v10, 0.0  ;;  %v1496_v47 = vsel %vm1488_vm4, %v3716_v10, 0.0  ;;  %vm1151_vm3 = vcmp.eq.s32.totalorder %v3367_v53, %v3713_v26 }
 0x2de   : > { %vm1199_vm4 = vcmp.eq.s32.totalorder %v3386_v54, %v3713_v26  ;;  %v1801_v54 = vpop.permute.xlu0 %1800 }
 0x2df   : > { %v1264_v52 = vadd.f32 %v1256_v20, %v1216_v37  ;;  %v1544_v20 = vsel %vm1536_vm6, %v3716_v10, 0.0  ;;  %vm1247_vm6 = vcmp.eq.s32.totalorder %v3406_v48, %v3713_v26 }
 0x2e0   : > { %v3778_v1 = vpop.permute.xlu1 %1716 }
 0x2e1   : > { %v1312_v33 = vadd.f32 %v1304_v61, %v1264_v52  ;;  %v1592_v61 = vsel %vm1584_vm7, %v3716_v10, 0.0  ;;  %vm1295_vm7 = vcmp.eq.s32.totalorder %v3424_v2, %v3713_v26 }
 0x2e3   : > { %v1360_v55 = vadd.f32 %v1352_v45, %v1312_v33  ;;  %v697_v33 = vmul.f32 1.442695, %v684_v44  ;;  %v2983_v44 = vmov 21  }
 0x2e5   : > { %v705_v59 = vpop.xlane.xlu2 %704  ;;  %v1408_v6 = vadd.f32 %v1400_v9, %v1360_v55  ;;  %v1688_v55 = vsel %vm1680_vm11, %v3716_v10, 0.0  ;;  %vm1487_vm11 = vcmp.eq.s32.totalorder %v3515_v13, %v3713_v26 }
 0x2e6   : > { %2903 = vrcp.f32 %v705_v59  ;;  %v685_v59 = vsub.f32 %v3539_v42, %v3656_v49 }
 0x2e7   : > { %v1456_v43 = vadd.f32 %v1448_v41, %v1408_v6  ;;  %2905 = vpow2.f32 %v697_v33  ;;  %v1736_v6 = vsel %vm1728_vm14, %v3716_v10, 0.0  ;;  %vm1631_vm14 = vcmp.eq.s32.totalorder %v3589_v51, %v3713_v26 }
 0x2e8   : > { %v3819_v19 = vpop.permute.xlu1 %1725 }
 0x2e9   : > { %v1504_v37 = vadd.f32 %v1496_v47, %v1456_v43  ;;  %v1784_v43 = vsel %vm1776_vm15, %v3716_v10, 0.0  ;;  %vm1679_vm15 = vcmp.eq.s32.totalorder %v3661_v24, %v3713_v26 }
 0x2eb   : > { %v1552_v52 = vadd.f32 %v1544_v20, %v1504_v37 }
 0x2ec   : > { %v2904_v22 = vpop.eup %2903 }
 0x2ed   : > { %v3787_v23 = vmul.f32 %v2904_v22, %v3648_v35  ;;  %v1600_v50 = vadd.f32 %v1592_v61, %v1552_v52  ;;  %1863 = vperm.xlu0 %2847, %v3790_v16   ;;  %v1804_v34 = vpop.permute.xlu2 %1803  ;;  %v3830_v20 = vpop.eup %2905  ;;  %v699_v52 = vmul.f32 1.442695, %v685_v59 }
 0x2ee   : > { %vm1824_vm0 = vcmp.eq.s32.totalorder %v1804_v34, %v3713_v26 }
 0x2ef   : > { %v1648_v31 = vadd.f32 %v1640_v39, %v1600_v50  ;;  %v919_v35 = vsel %vm911_vm9, %v3787_v23, 0.0  ;;  %v967_v45 = vsel %vm959_vm10, %v3787_v23, 0.0  ;;  %v1015_v9 = vsel %vm1007_vm12, %v3787_v23, 0.0 }
 0x2f0   : > { %v975_v62 = vadd.f32 %v967_v45, %v919_v35  ;;  %v1063_v41 = vsel %vm1055_vm13, %v3787_v23, 0.0  ;;  %v1111_v49 = vsel %vm1103_vm2, %v3787_v23, 0.0  ;;  %v1832_v17 = vsel %vm1824_vm0, %v3716_v10, 0.0  ;;  %v3849_v34 = vpop.permute.xlu1 %1758 }
 0x2f1   : > { %v1696_v56 = vadd.f32 %v1688_v55, %v1648_v31  ;;  %v743_v5 = vpack.c.bf16 %v3716_v10, %v3787_v23  ;;  %v1159_v61 = vsel %vm1151_vm3, %v3787_v23, 0.0  ;;  %v1207_v53 = vsel %vm1199_vm4, %v3787_v23, 0.0 }
 0x2f2   : > { %v1023_v28 = vadd.f32 %v1015_v9, %v975_v62  ;;  %2907 = vpow2.f32 %v699_v52  ;;  %v1255_v39 = vsel %vm1247_vm6, %v3787_v23, 0.0  ;;  %v718_v31 = vsel %vm654_vm5, %v3830_v20, 0.0 }
 0x2f3   : > { %v1744_v3 = vadd.f32 %v1736_v6, %v1696_v56  ;;  %2709 = vmatmul.msk.bf16.vlgmr.msrb.gmra.mxu2 %vm654_vm5, %v743_v5  ;;  %v1303_v45 = vsel %vm1295_vm7, %v3787_v23, 0.0  ;;  %v1351_v55 = vsel %vm1343_vm8, %v3787_v23, 0.0  ;;  %vm1391_vm9 = vcmp.eq.s32.totalorder %v3470_v11, %v3713_v26 }
 0x2f4   : > { %v1071_v47 = vadd.f32 %v1063_v41, %v1023_v28  ;;  %v1399_v56 = vsel %vm1391_vm9, %v3787_v23, 0.0  ;;  %vm1439_vm10 = vcmp.eq.s32.totalorder %v3495_v15, %v3713_v26  ;;  %v3865_v28 = vpop.permute.xlu0 %1815  ;;  %v1495_v11 = vsel %vm1487_vm11, %v3787_v23, 0.0 }
 0x2f5   : > { %v1792_v42 = vadd.f32 %v1784_v43, %v1744_v3  ;;  %2850 = vset.pattern.permute.xlu0 %v2983_v44  ;;  %v1447_v4 = vsel %vm1439_vm10, %v3787_v23, 0.0  ;;  %vm1535_vm12 = vcmp.eq.s32.totalorder %v3529_v58, %v3713_v26  ;;  %v2984_v15 = vmov 22  }
 0x2f6   : > { %v1119_v37 = vadd.f32 %v1111_v49, %v1071_v47  ;;  %1896 = vperm.xlu0 %2850, %v3688_v14   ;;  %v1543_v41 = vsel %vm1535_vm12, %v3787_v23, 0.0  ;;  %vm1583_vm13 = vcmp.eq.s32.totalorder %v3558_v40, %v3713_v26  ;;  %vm1727_vm0 = vcmp.eq.s32.totalorder %v3676_v0, %v3713_v26 }
 0x2f7   : > { %v3832_v22 = vadd.f32 %v1832_v17, %v1792_v42  ;;  %v1591_v47 = vsel %vm1583_vm13, %v3787_v23, 0.0  ;;  %v1639_v42 = vsel %vm1631_vm14, %v3787_v23, 0.0  ;;  %v1687_v40 = vsel %vm1679_vm15, %v3787_v23, 0.0 }
 0x2f8   : > { %v1167_v33 = vadd.f32 %v1159_v61, %v1119_v37  ;;  %v3855_v2 = vpop.eup %2907  ;;  %v3875_v13 = vpop.permute.xlu1 %1764  ;;  %vm1775_vm2 = vcmp.eq.s32.totalorder %v3693_v7, %v3713_v26  ;;  %v1735_v5 = vsel %vm1727_vm0, %v3787_v23, 0.0  ;;  %vm1823_vm3 = vcmp.eq.s32.totalorder %v1801_v54, %v3713_v26  ;;  %v4971_v54 = vld [vmem:[#allocation16_spill] sm:$0xff] }
 0x2f9   : > { %v721_v6 = vsel %vm654_vm5, %v3855_v2, 0.0  ;;  %v1783_v24 = vsel %vm1775_vm2, %v3787_v23, 0.0  ;;  %v1831_v61 = vsel %vm1823_vm3, %v3787_v23, 0.0  ;;  %vm915_vm4 = vcmp.eq.s32.totalorder %v3169_v38, %v3713_v26  ;;  %v4972_v38 = vld [vmem:[#allocation21_spill] sm:$0xff] }
 0x2fa   : > { %v1215_v50 = vadd.f32 %v1207_v53, %v1167_v33  ;;  %vm1011_vm7 = vcmp.eq.s32.totalorder %v4971_v54, %v3713_v26  ;;  %vm1059_vm8 = vcmp.eq.s32.totalorder %v4972_v38, %v3713_v26  ;;  %v4981_v38 = vld [vmem:[#allocation71_spill] sm:$0xff] }
 0x2fb   : > { %vm1443_vm2 = vcmp.eq.s32.totalorder %v4981_v38, %v3713_v26 }
 0x2fc   : > { %v1263_v35 = vadd.f32 %v1255_v39, %v1215_v50  ;;  %719 = vadd.xlane.f32.xlu1 %v718_v31  ;;  %v4970_v50 = vld [vmem:[#allocation11_spill] sm:$0xff]  ;;  %v2985_v39 = vmov 23  }
 0x2fd   : > { %vm963_vm6 = vcmp.eq.s32.totalorder %v4970_v50, %v3713_v26  ;;  %v2986_v50 = vmov 24  }
 0x2fe   : > { %v1311_v48 = vadd.f32 %v1303_v45, %v1263_v35  ;;  %1911 = vperm.xlu0 %2850, %v3790_v16  }
 0x300   : > { %v1359_v62 = vadd.f32 %v1351_v55, %v1311_v48  ;;  %v3892_v0 = vpop.permute.xlu1 %1773 }
 0x302   : > { %v1407_v9 = vadd.f32 %v1399_v56, %v1359_v62  ;;  %v4973_v56 = vld [vmem:[#allocation26_spill] sm:$0xff] }
 0x303   : > { %vm1107_vm9 = vcmp.eq.s32.totalorder %v4973_v56, %v3713_v26  ;;  %v4983_v56 = vld [vmem:[#allocation104_spill] sm:$0xff] }
 0x304   : > { %v1455_v59 = vadd.f32 %v1447_v4, %v1407_v9  ;;  %v4974_v9 = vld [vmem:[#allocation97_spill] sm:$0xff] }
 0x305   : > { %722 = vadd.xlane.f32.xlu2 %v721_v6  ;;  %v4975_v6 = vld [vmem:[#allocation32_spill] sm:$0xff] }
 0x306   : > { %v1503_v3 = vadd.f32 %v1495_v11, %v1455_v59  ;;  %2853 = vset.pattern.permute.xlu0 %v2984_v15  ;;  %vm1155_vm10 = vcmp.eq.s32.totalorder %v4975_v6, %v3713_v26  ;;  %v4984_v6 = vld [vmem:[#allocation10_spill] sm:$0xff] }
 0x307   : > { %1944 = vperm.xlu0 %2853, %v3688_v14  }
 0x308   : > { %v1551_v43 = vadd.f32 %v1543_v41, %v1503_v3  ;;  %v3912_v55 = vpop.permute.xlu1 %1806  ;;  %v4976_v41 = vld [vmem:[#allocation39_spill] sm:$0xff] }
 0x309   : > { %vm1203_vm11 = vcmp.eq.s32.totalorder %v4976_v41, %v3713_v26  ;;  %v4986_v41 = vld [vmem:[#allocation15_spill] sm:$0xff] }
 0x30a   : > { %v1599_v58 = vadd.f32 %v1591_v47, %v1551_v43 }
 0x30c   : > { %v1647_v49 = vadd.f32 %v1639_v42, %v1599_v58  ;;  %v4977_v42 = vld [vmem:[#allocation46_spill] sm:$0xff] }
 0x30d   : > { %vm1251_vm13 = vcmp.eq.s32.totalorder %v4977_v42, %v3713_v26 }
 0x30e   : > { %v1695_v17 = vadd.f32 %v1687_v40, %v1647_v49  ;;  %v717_v37 = vpop.xlane.xlu0 %716 }
 0x30f   : > { %2909 = vrcp.f32 %v717_v37  ;;  %1959 = vperm.xlu0 %2853, %v3790_v16  }
 0x310   : > { %v1743_v51 = vadd.f32 %v1735_v5, %v1695_v17 }
 0x312   : > { %v1791_v52 = vadd.f32 %v1783_v24, %v1743_v51  ;;  %v4978_v51 = vld [vmem:[#allocation52_spill] sm:$0xff] }
 0x313   : > { %vm1299_vm14 = vcmp.eq.s32.totalorder %v4978_v51, %v3713_v26  ;;  %v4988_v51 = vld [vmem:[#allocation20_spill] sm:$0xff] }
 0x314   : > { %v1839_v33 = vadd.f32 %v1831_v61, %v1791_v52  ;;  %v3938_v52 = vpop.permute.xlu2 %1809 }
 0x315   : > { %v2910_v53 = vpop.eup %2909  ;;  %1854 = vperm.xlu1 %2849, %v3605_v25  }
 0x316   : > { %v3897_v7 = vmul.f32 %v2910_v53, %v3669_v36  ;;  %v4979_v53 = vld [vmem:[#allocation58_spill] sm:$0xff] }
 0x317   : > { %2856 = vset.pattern.permute.xlu0 %v2985_v39  ;;  %vm1347_vm15 = vcmp.eq.s32.totalorder %v4979_v53, %v3713_v26 }
 0x318   : > { %1992 = vperm.xlu0 %2856, %v3688_v14   ;;  %v923_v31 = vsel %vm915_vm4, %v3897_v7, 0.0  ;;  %v971_v35 = vsel %vm963_vm6, %v3897_v7, 0.0  ;;  %v1019_v45 = vsel %vm1011_vm7, %v3897_v7, 0.0  ;;  %v1067_v62 = vsel %vm1059_vm8, %v3897_v7, 0.0 }
 0x319   : > { %v979_v36 = vadd.f32 %v971_v35, %v923_v31  ;;  %v1115_v59 = vsel %vm1107_vm9, %v3897_v7, 0.0  ;;  %v1163_v3 = vsel %vm1155_vm10, %v3897_v7, 0.0  ;;  %v1211_v58 = vsel %vm1203_vm11, %v3897_v7, 0.0  ;;  %v4980_v35 = vld [vmem:[#allocation64_spill] sm:$0xff] }
 0x31a   : > { %v1259_v5 = vsel %vm1251_vm13, %v3897_v7, 0.0  ;;  %v1307_v61 = vsel %vm1299_vm14, %v3897_v7, 0.0  ;;  %v1355_v31 = vsel %vm1347_vm15, %v3897_v7, 0.0  ;;  %vm1395_vm0 = vcmp.eq.s32.totalorder %v4980_v35, %v3713_v26  ;;  %v4990_v35 = vld [vmem:[#allocation96_spill] sm:$0xff] }
 0x31b   : > { %v1027_v48 = vadd.f32 %v1019_v45, %v979_v36  ;;  %v1403_v36 = vsel %vm1395_vm0, %v3897_v7, 0.0  ;;  %vm961_vm4 = vcmp.eq.s32.totalorder %v4984_v6, %v3713_v26  ;;  %vm1009_vm7 = vcmp.eq.s32.totalorder %v4986_v41, %v3713_v26  ;;  %v4994_v6 = vld [vmem:[#allocation106_spill] sm:$0xff] }
 0x31c   : > { %vm1057_vm9 = vcmp.eq.s32.totalorder %v4988_v51, %v3713_v26  ;;  %vm1635_vm11 = vcmp.eq.s32.totalorder %v4990_v35, %v3713_v26  ;;  %vm1683_vm15 = vcmp.eq.s32.totalorder %v3711_v57, %v3713_v26 }
 0x31d   : > { %1857 = vperm.xlu2 %2848, %v4974_v9   ;;  %1860 = vperm.xlu1 %2849, %v3616_v8   ;;  %v1075_v4 = vadd.f32 %v1067_v62, %v1027_v48  ;;  %v4982_v62 = vld [vmem:[#allocation6_spill] sm:$0xff]  ;;  %v1643_v38 = vsel %vm1635_vm11, %v3897_v7, 0.0  ;;  %v1691_v41 = vsel %vm1683_vm15, %v3897_v7, 0.0 }
 0x31e   : > { %vm913_vm3 = vcmp.eq.s32.totalorder %v4982_v62, %v3713_v26  ;;  %v4992_v62 = vld [vmem:[#allocation7_spill] sm:$0xff] }
 0x31f   : > { %v1123_v11 = vadd.f32 %v1115_v59, %v1075_v4  ;;  %v1451_v59 = vsel %vm1443_vm2, %v3897_v7, 0.0  ;;  %vm962_vm13 = vcmp.eq.s32.totalorder %v4992_v62, %v3713_v26  ;;  %vm1731_vm2 = vcmp.eq.s32.totalorder %v3778_v1, %v3713_v26 }
 0x320   : > { %2007 = vperm.xlu0 %2856, %v3790_v16   ;;  %v2987_v1 = vmov 25  }
 0x321   : > { %v1849_v43 = vpop.permute.xlu0 %1848  ;;  %v1171_v47 = vadd.f32 %v1163_v3, %v1123_v11  ;;  %v4985_v11 = vld [vmem:[#allocation77_spill] sm:$0xff] }
 0x322   : > { %vm1871_vm12 = vcmp.eq.s32.totalorder %v1849_v43, %v3713_v26  ;;  %vm1491_vm6 = vcmp.eq.s32.totalorder %v4985_v11, %v3713_v26 }
 0x323   : > { %v1879_v49 = vsel %vm1871_vm12, %v3787_v23, 0.0  ;;  %v1219_v40 = vadd.f32 %v1211_v58, %v1171_v47  ;;  %v1499_v47 = vsel %vm1491_vm6, %v3897_v7, 0.0 }
 0x324   : > { %v3931_v17 = vadd.f32 %v1879_v49, %v1839_v33  ;;  %v711_v37 = vpop.xlane.xlu1 %710  ;;  %v4987_v49 = vld [vmem:[#allocation83_spill] sm:$0xff] }
 0x325   : > { %2911 = vrcp.f32 %v711_v37  ;;  %1866 = vperm.xlu2 %2848, %v3620_v12   ;;  %1869 = vperm.xlu1 %2849, %v3626_v46   ;;  %v1267_v24 = vadd.f32 %v1259_v5, %v1219_v40  ;;  %vm1539_vm8 = vcmp.eq.s32.totalorder %v4987_v49, %v3713_v26  ;;  %v1739_v49 = vsel %vm1731_vm2, %v3897_v7, 0.0 }
 0x326   : > { %v1547_v37 = vsel %vm1539_vm8, %v3897_v7, 0.0 }
 0x327   : > { %v1315_v33 = vadd.f32 %v1307_v61, %v1267_v24  ;;  %v4989_v24 = vld [vmem:[#allocation90_spill] sm:$0xff] }
 0x328   : > { %2859 = vset.pattern.permute.xlu0 %v2986_v50  ;;  %vm1587_vm10 = vcmp.eq.s32.totalorder %v4989_v24, %v3713_v26 }
 0x329   : > { %2040 = vperm.xlu0 %2859, %v3688_v14   ;;  %v1363_v54 = vadd.f32 %v1355_v31, %v1315_v33  ;;  %v1595_v33 = vsel %vm1587_vm10, %v3897_v7, 0.0 }
 0x32b   : > { %v2912_v45 = vpop.eup %2911  ;;  %v1411_v48 = vadd.f32 %v1403_v36, %v1363_v54 }
 0x32c   : > { %v3954_v4 = vmul.f32 %v2912_v45, %v4983_v56  ;;  %v4991_v45 = vld [vmem:[#allocation4_spill] sm:$0xff]  ;;  %v4993_v56 = vld [vmem:[#allocation25_spill] sm:$0xff] }
 0x32d   : > { %2851 = vset.pattern.permute.xlu2 %v2983_v44  ;;  %2852 = vset.pattern.permute.xlu1 %v2983_v44  ;;  %v1459_v3 = vadd.f32 %v1451_v59, %v1411_v48  ;;  %vm914_vm12 = vcmp.eq.s32.totalorder %v4991_v45, %v3713_v26  ;;  %vm1105_vm14 = vcmp.eq.s32.totalorder %v4993_v56, %v3713_v26  ;;  %v5001_v56 = vld [vmem:[#allocation44_spill] sm:$0xff] }
 0x32e   : > { %v714_v43 = vpop.xlane.xlu2 %713  ;;  %1899 = vperm.xlu2 %2851, %v3601_v18   ;;  %1902 = vperm.xlu1 %2852, %v3605_v25   ;;  %v921_v58 = vsel %vm913_vm3, %v3954_v4, 0.0  ;;  %v969_v42 = vsel %vm961_vm4, %v3954_v4, 0.0  ;;  %v1017_v5 = vsel %vm1009_vm7, %v3954_v4, 0.0  ;;  %v1065_v31 = vsel %vm1057_vm9, %v3954_v4, 0.0 }
 0x32f   : > { %2913 = vrcp.f32 %v714_v43  ;;  %v1507_v44 = vadd.f32 %v1499_v47, %v1459_v3  ;;  %v977_v40 = vadd.f32 %v969_v42, %v921_v58  ;;  %v1113_v43 = vsel %vm1105_vm14, %v3954_v4, 0.0  ;;  %v4995_v47 = vld [vmem:[#allocation12_spill] sm:$0xff] }
 0x330   : > { %vm1010_vm0 = vcmp.eq.s32.totalorder %v4995_v47, %v3713_v26  ;;  %vm1779_vm4 = vcmp.eq.s32.totalorder %v3875_v13, %v3713_v26  ;;  %v4997_v13 = vld [vmem:[#allocation17_spill] sm:$0xff]  ;;  %vm1249_vm11 = vcmp.eq.s32.totalorder %v5001_v56, %v3713_v26 }
 0x331   : > { %2055 = vperm.xlu0 %2859, %v3790_v16   ;;  %v1555_v61 = vadd.f32 %v1547_v37, %v1507_v44  ;;  %v1025_v53 = vadd.f32 %v1017_v5, %v977_v40  ;;  %v4996_v37 = vld [vmem:[#allocation31_spill] sm:$0xff]  ;;  %v1787_v24 = vsel %vm1779_vm4, %v3897_v7, 0.0  ;;  %vm1058_vm6 = vcmp.eq.s32.totalorder %v4997_v13, %v3713_v26  ;;  %v5004_v13 = vld [vmem:[#allocation40_spill] sm:$0xff] }
 0x332   : > { %vm1153_vm3 = vcmp.eq.s32.totalorder %v4996_v37, %v3713_v26  ;;  %v5003_v37 = vld [vmem:[#allocation50_spill] sm:$0xff]  ;;  %vm1250_vm15 = vcmp.eq.s32.totalorder %v5004_v13, %v3713_v26 }
 0x333   : > { %v1603_v54 = vadd.f32 %v1595_v33, %v1555_v61  ;;  %v1073_v36 = vadd.f32 %v1065_v31, %v1025_v53  ;;  %v1161_v53 = vsel %vm1153_vm3, %v3954_v4, 0.0  ;;  %vm1297_vm14 = vcmp.eq.s32.totalorder %v5003_v37, %v3713_v26  ;;  %v5012_v37 = vld [vmem:[#allocation66_spill] sm:$0xff] }
 0x335   : > { %v2914_v48 = vpop.eup %2913  ;;  %v1651_v59 = vadd.f32 %v1643_v38, %v1603_v54  ;;  %v1121_v58 = vadd.f32 %v1113_v43, %v1073_v36  ;;  %v4998_v54 = vld [vmem:[#allocation22_spill] sm:$0xff]  ;;  %v4999_v38 = vld [vmem:[#allocation27_spill] sm:$0xff] }
 0x336   : > { %v3993_v11 = vmul.f32 %v2914_v48, %v4994_v6  ;;  %v3995_v3 = vpop.permute.xlu2 %1818  ;;  %1905 = vperm.xlu2 %2851, %v4974_v9   ;;  %1908 = vperm.xlu1 %2852, %v3616_v8   ;;  %vm1106_vm7 = vcmp.eq.s32.totalorder %v4998_v54, %v3713_v26  ;;  %vm1154_vm8 = vcmp.eq.s32.totalorder %v4999_v38, %v3713_v26  ;;  %v5000_v48 = vld [vmem:[#allocation37_spill] sm:$0xff] }
 0x337   : > { %v1699_v57 = vadd.f32 %v1691_v41, %v1651_v59  ;;  %v1169_v35 = vadd.f32 %v1161_v53, %v1121_v58  ;;  %vm1201_vm9 = vcmp.eq.s32.totalorder %v5000_v48, %v3713_v26  ;;  %v1305_v53 = vsel %vm1297_vm14, %v3954_v4, 0.0 }
 0x338   : > { %v744_v42 = vpack.c.bf16 %v3993_v11, %v3954_v4  ;;  %v922_v44 = vsel %vm914_vm12, %v3993_v11, 0.0  ;;  %v970_v40 = vsel %vm962_vm13, %v3993_v11, 0.0  ;;  %v1018_v61 = vsel %vm1010_vm0, %v3993_v11, 0.0 }
 0x339   : > { %2862 = vset.pattern.permute.xlu0 %v2987_v1  ;;  %v1747_v5 = vadd.f32 %v1739_v49, %v1699_v57  ;;  %v978_v51 = vadd.f32 %v970_v40, %v922_v44  ;;  %v1066_v45 = vsel %vm1058_vm6, %v3993_v11, 0.0  ;;  %v1114_v41 = vsel %vm1106_vm7, %v3993_v11, 0.0 }
 0x33a   : > { %2088 = vperm.xlu0 %2862, %v3688_v14   ;;  %2710 = vmatmul.msk.bf16.gmra.mxu2 %vm654_vm5, %v744_v42  ;;  %v1209_v43 = vsel %vm1201_vm9, %v3954_v4, 0.0  ;;  %v5002_v42 = vld [vmem:[#allocation33_spill] sm:$0xff]  ;;  %v1162_v44 = vsel %vm1154_vm8, %v3993_v11, 0.0  ;;  %v1257_v40 = vsel %vm1249_vm11, %v3954_v4, 0.0  ;;  %v1258_v54 = vsel %vm1250_vm15, %v3993_v11, 0.0 }
 0x33b   : > { %v1795_v33 = vadd.f32 %v1787_v24, %v1747_v5  ;;  %v1026_v31 = vadd.f32 %v1018_v61, %v978_v51  ;;  %v1217_v58 = vadd.f32 %v1209_v43, %v1169_v35  ;;  %vm1202_vm13 = vcmp.eq.s32.totalorder %v5002_v42, %v3713_v26  ;;  %v5010_v42 = vld [vmem:[#allocation59_spill] sm:$0xff] }
 0x33c   : > { %v1813_v36 = vpop.permute.xlu1 %1812  ;;  %v1210_v61 = vsel %vm1202_vm13, %v3993_v11, 0.0  ;;  %vm1394_vm7 = vcmp.eq.s32.totalorder %v5010_v42, %v3713_v26  ;;  %vm1442_vm9 = vcmp.eq.s32.totalorder %v5012_v37, %v3713_v26  ;;  %v5022_v42 = vld [vmem:[#allocation23_spill] sm:$0xff] }
 0x33d   : > { %vm1827_vm10 = vcmp.eq.s32.totalorder %v1813_v36, %v3713_v26  ;;  %v1074_v62 = vadd.f32 %v1066_v45, %v1026_v31  ;;  %v1265_v24 = vadd.f32 %v1257_v40, %v1217_v58  ;;  %v5006_v36 = vld [vmem:[#allocation47_spill] sm:$0xff]  ;;  %v2988_v40 = vmov 26  }
 0x33e   : > { %v1835_v59 = vsel %vm1827_vm10, %v3897_v7, 0.0  ;;  %v1852_v6 = vpop.permute.xlu2 %1851  ;;  %1914 = vperm.xlu2 %2851, %v3620_v12   ;;  %1917 = vperm.xlu1 %2852, %v3626_v46   ;;  %vm1298_vm2 = vcmp.eq.s32.totalorder %v5006_v36, %v3713_v26  ;;  %v5007_v45 = vld [vmem:[#allocation63_spill] sm:$0xff]  ;;  %v5016_v36 = vld [vmem:[#allocation8_spill] sm:$0xff] }
 0x33f   : > { %v4046_v47 = vadd.f32 %v1835_v59, %v1795_v33  ;;  %vm1872_vm12 = vcmp.eq.s32.totalorder %v1852_v6, %v3713_v26  ;;  %v1122_v57 = vadd.f32 %v1114_v41, %v1074_v62  ;;  %v5005_v33 = vld [vmem:[#allocation57_spill] sm:$0xff]  ;;  %v1313_v35 = vadd.f32 %v1305_v53, %v1265_v24  ;;  %v5014_v53 = vld [vmem:[#allocation72_spill] sm:$0xff] }
 0x340   : > { %v1880_v49 = vsel %vm1872_vm12, %v3716_v10, 0.0  ;;  %vm1345_vm0 = vcmp.eq.s32.totalorder %v5005_v33, %v3713_v26  ;;  %vm1393_vm3 = vcmp.eq.s32.totalorder %v5007_v45, %v3713_v26  ;;  %v5008_v62 = vld [vmem:[#allocation53_spill] sm:$0xff]  ;;  %v1306_v56 = vsel %vm1298_vm2, %v3993_v11, 0.0  ;;  %v5017_v45 = vld [vmem:[#allocation78_spill] sm:$0xff] }
 0x341   : > { %v4060_v5 = vadd.f32 %v1880_v49, %v3832_v22  ;;  %v1170_v51 = vadd.f32 %v1162_v44, %v1122_v57  ;;  %v1353_v22 = vsel %vm1345_vm0, %v3954_v4, 0.0  ;;  %vm1346_vm4 = vcmp.eq.s32.totalorder %v5008_v62, %v3713_v26  ;;  %v5009_v6 = vld [vmem:[#allocation69_spill] sm:$0xff]  ;;  %v5018_v62 = vld [vmem:[#allocation95_spill] sm:$0xff] }
 0x342   : > { %2103 = vperm.xlu0 %2862, %v3790_v16   ;;  %v1361_v48 = vadd.f32 %v1353_v22, %v1313_v35  ;;  %v1401_v59 = vsel %vm1393_vm3, %v3954_v4, 0.0  ;;  %vm1441_vm6 = vcmp.eq.s32.totalorder %v5009_v6, %v3713_v26  ;;  %v1354_v57 = vsel %vm1346_vm4, %v3993_v11, 0.0  ;;  %v5015_v35 = vld [vmem:[#allocation87_spill] sm:$0xff]  ;;  %v5019_v6 = vld [vmem:[#allocation13_spill] sm:$0xff] }
 0x343   : > { %v1218_v31 = vadd.f32 %v1210_v61, %v1170_v51  ;;  %v1449_v58 = vsel %vm1441_vm6, %v3954_v4, 0.0  ;;  %v5013_v51 = vld [vmem:[#allocation82_spill] sm:$0xff]  ;;  %vm1490_vm11 = vcmp.eq.s32.totalorder %v5014_v53, %v3713_v26  ;;  %v1450_v33 = vsel %vm1442_vm9, %v3993_v11, 0.0 }
 0x344   : > { %v1409_v43 = vadd.f32 %v1401_v59, %v1361_v48  ;;  %vm1537_vm10 = vcmp.eq.s32.totalorder %v5013_v51, %v3713_v26  ;;  %vm1585_vm12 = vcmp.eq.s32.totalorder %v5015_v35, %v3713_v26  ;;  %vm918_vm13 = vcmp.eq.s32.totalorder %v5016_v36, %v3713_v26  ;;  %v5025_v51 = vld [vmem:[#allocation105_spill] sm:$0xff] }
 0x345   : > { %v1266_v38 = vadd.f32 %v1258_v54, %v1218_v31  ;;  %v1545_v31 = vsel %vm1537_vm10, %v3954_v4, 0.0  ;;  %vm1538_vm14 = vcmp.eq.s32.totalorder %v5017_v45, %v3713_v26  ;;  %v1593_v48 = vsel %vm1585_vm12, %v3954_v4, 0.0 }
 0x346   : > { %2854 = vset.pattern.permute.xlu2 %v2984_v15  ;;  %2855 = vset.pattern.permute.xlu1 %v2984_v15  ;;  %v5011_v15 = vld [vmem:[#allocation75_spill] sm:$0xff]  ;;  %v1457_v44 = vadd.f32 %v1449_v58, %v1409_v43  ;;  %vm1633_vm15 = vcmp.eq.s32.totalorder %v5018_v62, %v3713_v26  ;;  %vm966_vm0 = vcmp.eq.s32.totalorder %v5019_v6, %v3713_v26  ;;  %v1546_v43 = vsel %vm1538_vm14, %v3993_v11, 0.0  ;;  %v5021_v58 = vld [vmem:[#allocation86_spill] sm:$0xff] }
 0x347   : > { %1947 = vperm.xlu2 %2854, %v3601_v18   ;;  %1950 = vperm.xlu1 %2855, %v3605_v25   ;;  %v1314_v41 = vadd.f32 %v1306_v56, %v1266_v38  ;;  %vm1489_vm8 = vcmp.eq.s32.totalorder %v5011_v15, %v3713_v26  ;;  %v1402_v18 = vsel %vm1394_vm7, %v3993_v11, 0.0  ;;  %v1498_v38 = vsel %vm1490_vm11, %v3993_v11, 0.0  ;;  %v5023_v15 = vld [vmem:[#allocation92_spill] sm:$0xff] }
 0x348   : > { %v1497_v25 = vsel %vm1489_vm8, %v3954_v4, 0.0  ;;  %vm1586_vm3 = vcmp.eq.s32.totalorder %v5021_v58, %v3713_v26  ;;  %vm1681_vm4 = vcmp.eq.s32.totalorder %v3705_v27, %v3713_v26  ;;  %vm1062_vm6 = vcmp.eq.s32.totalorder %v5022_v42, %v3713_v26 }
 0x349   : > { %v1362_v49 = vadd.f32 %v1354_v57, %v1314_v41  ;;  %v1505_v61 = vadd.f32 %v1497_v25, %v1457_v44  ;;  %v5020_v41 = vld [vmem:[#allocation18_spill] sm:$0xff]  ;;  %v1641_v57 = vsel %vm1633_vm15, %v3954_v4, 0.0  ;;  %vm1634_vm7 = vcmp.eq.s32.totalorder %v5023_v15, %v3713_v26  ;;  %v5024_v25 = vld [vmem:[#allocation101_spill] sm:$0xff] }
 0x34a   : > { %2865 = vset.pattern.permute.xlu0 %v2988_v40  ;;  %vm1014_vm2 = vcmp.eq.s32.totalorder %v5020_v41, %v3713_v26  ;;  %v1689_v44 = vsel %vm1681_vm4, %v3954_v4, 0.0  ;;  %vm1682_vm8 = vcmp.eq.s32.totalorder %v5024_v25, %v3713_v26  ;;  %vm1729_vm9 = vcmp.eq.s32.totalorder %v3759_v60, %v3713_v26  ;;  %v5029_v25 = vld [vmem:[#allocation48_spill] sm:$0xff] }
 0x34b   : > { %2136 = vperm.xlu0 %2865, %v3688_v14   ;;  %v1410_v24 = vadd.f32 %v1402_v18, %v1362_v49  ;;  %v1553_v22 = vadd.f32 %v1545_v31, %v1505_v61  ;;  %v1594_v49 = vsel %vm1586_vm3, %v3993_v11, 0.0  ;;  %vm1730_vm10 = vcmp.eq.s32.totalorder %v5025_v51, %v3713_v26 }
 0x34c   : > { %v726_v13 = vpop.xlane.xlu0 %725  ;;  %v1642_v61 = vsel %vm1634_vm7, %v3993_v11, 0.0  ;;  %v1737_v53 = vsel %vm1729_vm9, %v3954_v4, 0.0  ;;  %vm1777_vm11 = vcmp.eq.s32.totalorder %v3849_v34, %v3713_v26  ;;  %vm1825_vm12 = vcmp.eq.s32.totalorder %v3912_v55, %v3713_v26 }
 0x34d   : > { %2915 = vrcp.f32 %v726_v13  ;;  %v1458_v54 = vadd.f32 %v1450_v33, %v1410_v24  ;;  %v1601_v59 = vadd.f32 %v1593_v48, %v1553_v22  ;;  %v1690_v33 = vsel %vm1682_vm8, %v3993_v11, 0.0 }
 0x34e   : > { %v1785_v31 = vsel %vm1777_vm11, %v3954_v4, 0.0  ;;  %v1738_v22 = vsel %vm1730_vm10, %v3993_v11, 0.0  ;;  %v1833_v36 = vsel %vm1825_vm12, %v3954_v4, 0.0  ;;  %vm1826_vm15 = vcmp.eq.s32.totalorder %v3938_v52, %v3713_v26 }
 0x34f   : > { %1953 = vperm.xlu2 %2854, %v4974_v9   ;;  %1956 = vperm.xlu1 %2855, %v3616_v8   ;;  %v1506_v56 = vadd.f32 %v1498_v38, %v1458_v54  ;;  %v1649_v8 = vadd.f32 %v1641_v57, %v1601_v59  ;;  %v2989_v59 = vmov 27   ;;  %v1834_v41 = vsel %vm1826_vm15, %v3993_v11, 0.0  ;;  %v5027_v57 = vld [vmem:[#allocation35_spill] sm:$0xff] }
 0x350   : > { %vm1254_vm3 = vcmp.eq.s32.totalorder %v5029_v25, %v3713_v26  ;;  %vm1734_vm15 = vcmp.eq.s32.totalorder %v3819_v19, %v3713_v26 }
 0x351   : > { %v1554_v9 = vadd.f32 %v1546_v43, %v1506_v56  ;;  %v1697_v37 = vadd.f32 %v1689_v44, %v1649_v8  ;;  %v5026_v56 = vld [vmem:[#allocation28_spill] sm:$0xff]  ;;  %v5028_v8 = vld [vmem:[#allocation41_spill] sm:$0xff] }
 0x352   : > { %vm1110_vm14 = vcmp.eq.s32.totalorder %v5026_v56, %v3713_v26  ;;  %v4201_v44 = vld [vmem:[%s3062_s7 + $0x10] sm:$0xff]  ;;  %v2990_v56 = vmov 28  }
 0x353   : > { %v2916_v18 = vpop.eup %2915  ;;  %2151 = vperm.xlu0 %2865, %v3790_v16   ;;  %v1602_v27 = vadd.f32 %v1594_v49, %v1554_v9  ;;  %v1745_v13 = vadd.f32 %v1737_v53, %v1697_v37  ;;  %v4197_v49 = vld [vmem:[%s3062_s7 + $0x8] sm:$0xff]  ;;  %v5030_v37 = vld [vmem:[#allocation54_spill] sm:$0xff]  ;;  %v5031_v53 = vld [vmem:[#allocation61_spill] sm:$0xff] }
 0x354   : > { %v4139_v24 = vmul.f32 %v2916_v18, %v3731_v32  ;;  %vm1302_vm4 = vcmp.eq.s32.totalorder %v5030_v37, %v3713_v26 }
 0x355   : > { %v1650_v60 = vadd.f32 %v1642_v61, %v1602_v27  ;;  %v1793_v55 = vadd.f32 %v1785_v31, %v1745_v13  ;;  %v4217_v31 = vpop.permute.xlu1 %1821 }
 0x356   : > { %v926_v32 = vsel %vm918_vm13, %v4139_v24, 0.0  ;;  %v974_v35 = vsel %vm966_vm0, %v4139_v24, 0.0  ;;  %v1022_v45 = vsel %vm1014_vm2, %v4139_v24, 0.0  ;;  %vm1778_vm13 = vcmp.eq.s32.totalorder %v3727_v29, %v3713_v26 }
 0x357   : > { %1962 = vperm.xlu2 %2854, %v3620_v12   ;;  %1965 = vperm.xlu1 %2855, %v3626_v46   ;;  %v1698_v34 = vadd.f32 %v1690_v33, %v1650_v60  ;;  %v982_v54 = vadd.f32 %v974_v35, %v926_v32  ;;  %v4170_v46 = vadd.f32 %v1833_v36, %v1793_v55  ;;  %v1786_v48 = vsel %vm1778_vm13, %v3993_v11, 0.0  ;;  %v5032_v33 = vld [vmem:[#allocation67_spill] sm:$0xff]  ;;  %v4220_v35 = vld [vmem:[%s3062_s7 + $0x18] sm:$0xff] }
 0x358   : > { %v1070_v62 = vsel %vm1062_vm6, %v4139_v24, 0.0  ;;  %v1118_v43 = vsel %vm1110_vm14, %v4139_v24, 0.0  ;;  %vm1158_vm0 = vcmp.eq.s32.totalorder %v5027_v57, %v3713_v26  ;;  %vm1206_vm2 = vcmp.eq.s32.totalorder %v5028_v8, %v3713_v26  ;;  %v5036_v57 = vld [vmem:[#allocation91_spill] sm:$0xff]  ;;  %v4251_v8 = vld [vmem:[%s3062_s7 + $0x38] sm:$0xff] }
 0x359   : > { %v1746_v12 = vadd.f32 %v1738_v22, %v1698_v34  ;;  %v1030_v38 = vadd.f32 %v1022_v45, %v982_v54  ;;  %v1166_v52 = vsel %vm1158_vm0, %v4139_v24, 0.0  ;;  %v1214_v18 = vsel %vm1206_vm2, %v4139_v24, 0.0  ;;  %v4224_v34 = vld [vmem:[%s3062_s7 + $0x20] sm:$0xff]  ;;  %v5033_v22 = vld [vmem:[#allocation73_spill] sm:$0xff] }
 0x35a   : > { %v1310_v61 = vsel %vm1302_vm4, %v4139_v24, 0.0  ;;  %vm1350_vm6 = vcmp.eq.s32.totalorder %v5031_v53, %v3713_v26  ;;  %vm1398_vm7 = vcmp.eq.s32.totalorder %v5032_v33, %v3713_v26  ;;  %vm1446_vm8 = vcmp.eq.s32.totalorder %v5033_v22, %v3713_v26  ;;  %v5038_v33 = vld [vmem:[#allocation30_spill] sm:$0xff] }
 0x35b   : > { %2868 = vset.pattern.permute.xlu0 %v2989_v59  ;;  %v1794_v29 = vadd.f32 %v1786_v48, %v1746_v12  ;;  %v1078_v6 = vadd.f32 %v1070_v62, %v1030_v38  ;;  %v1358_v13 = vsel %vm1350_vm6, %v4139_v24, 0.0  ;;  %v1406_v54 = vsel %vm1398_vm7, %v4139_v24, 0.0  ;;  %v5034_v38 = vld [vmem:[#allocation79_spill] sm:$0xff] }
 0x35c   : > { %2184 = vperm.xlu0 %2868, %v3688_v14   ;;  %v1454_v12 = vsel %vm1446_vm8, %v4139_v24, 0.0  ;;  %vm1494_vm10 = vcmp.eq.s32.totalorder %v5034_v38, %v3713_v26  ;;  %vm1590_vm12 = vcmp.eq.s32.totalorder %v5036_v57, %v3713_v26  ;;  %vm1686_vm14 = vcmp.eq.s32.totalorder %v3735_v63, %v3713_v26  ;;  %v5039_v63 = vld [vmem:[#allocation34_spill] sm:$0xff] }
 0x35d   : > { %v4187_v58 = vadd.f32 %v1834_v41, %v1794_v29  ;;  %v1126_v9 = vadd.f32 %v1118_v43, %v1078_v6  ;;  %v1502_v29 = vsel %vm1494_vm10, %v4139_v24, 0.0  ;;  %v5035_v6 = vld [vmem:[#allocation85_spill] sm:$0xff]  ;;  %v1694_v37 = vsel %vm1686_vm14, %v4139_v24, 0.0 }
 0x35e   : > { %vm1542_vm11 = vcmp.eq.s32.totalorder %v5035_v6, %v3713_v26  ;;  %v1742_v53 = vsel %vm1734_vm15, %v4139_v24, 0.0  ;;  %vm916_vm0 = vcmp.eq.s32.totalorder %v5038_v33, %v3713_v26  ;;  %vm964_vm2 = vcmp.eq.s32.totalorder %v5039_v63, %v3713_v26  ;;  %v5043_v6 = vld [vmem:[#allocation51_spill] sm:$0xff] }
 0x35f   : > { %2857 = vset.pattern.permute.xlu2 %v2985_v39  ;;  %2858 = vset.pattern.permute.xlu1 %v2985_v39  ;;  %v4194_v42 = vpop.permute.xlu0 %1863  ;;  %v1174_v15 = vadd.f32 %v1166_v52, %v1126_v9  ;;  %v1262_v39 = vsel %vm1254_vm3, %v4139_v24, 0.0  ;;  %v1550_v43 = vsel %vm1542_vm11, %v4139_v24, 0.0  ;;  %v4247_v52 = vld [vmem:[%s3062_s7 + $0x30] sm:$0xff]  ;;  %vm1782_vm6 = vcmp.eq.s32.totalorder %v3892_v0, %v3713_v26 }
 0x360   : > { %1995 = vperm.xlu2 %2857, %v4197_v49   ;;  %1998 = vperm.xlu1 %2858, %v4201_v44   ;;  %vm1156_vm8 = vcmp.eq.s32.totalorder %v5043_v6, %v3713_v26  ;;  %v1790_v57 = vsel %vm1782_vm6, %v4139_v24, 0.0  ;;  %vm1830_vm10 = vcmp.eq.s32.totalorder %v4217_v31, %v3713_v26 }
 0x361   : > { %v1222_v27 = vadd.f32 %v1214_v18, %v1174_v15  ;;  %v5037_v18 = vld [vmem:[#allocation99_spill] sm:$0xff]  ;;  %v1838_v31 = vsel %vm1830_vm10, %v4139_v24, 0.0 }
 0x362   : > { %vm1638_vm13 = vcmp.eq.s32.totalorder %v5037_v18, %v3713_v26 }
 0x363   : > { %v1270_v51 = vadd.f32 %v1262_v39, %v1222_v27  ;;  %v1646_v27 = vsel %vm1638_vm13, %v4139_v24, 0.0 }
 0x364   : > { %2199 = vperm.xlu0 %2868, %v3790_v16  }
 0x365   : > { %v1318_v60 = vadd.f32 %v1310_v61, %v1270_v51 }
 0x367   : > { %v1366_v32 = vadd.f32 %v1358_v13, %v1318_v60 }
 0x368   : > { %2001 = vperm.xlu2 %2857, %v4220_v35   ;;  %2004 = vperm.xlu1 %2858, %v4224_v34   ;;  %v1897_v55 = vpop.permute.xlu0 %1896 }
 0x369   : > { %vm1919_vm9 = vcmp.eq.s32.totalorder %v1897_v55, %v3713_v26  ;;  %v1414_v36 = vadd.f32 %v1406_v54, %v1366_v32  ;;  %v5040_v54 = vld [vmem:[#allocation38_spill] sm:$0xff] }
 0x36a   : > { %v1927_v45 = vsel %vm1919_vm9, %v3787_v23, 0.0  ;;  %vm1012_vm3 = vcmp.eq.s32.totalorder %v5040_v54, %v3713_v26 }
 0x36b   : > { %v4236_v48 = vadd.f32 %v1927_v45, %v3931_v17  ;;  %v1462_v62 = vadd.f32 %v1454_v12, %v1414_v36  ;;  %v5041_v45 = vld [vmem:[#allocation42_spill] sm:$0xff] }
 0x36c   : > { %2871 = vset.pattern.permute.xlu0 %v2990_v56  ;;  %vm1060_vm4 = vcmp.eq.s32.totalorder %v5041_v45, %v3713_v26  ;;  %v5049_v45 = vld [vmem:[#allocation14_spill] sm:$0xff] }
 0x36d   : > { %2232 = vperm.xlu0 %2871, %v3688_v14   ;;  %v1510_v41 = vadd.f32 %v1502_v29, %v1462_v62  ;;  %v1598_v14 = vsel %vm1590_vm12, %v4139_v24, 0.0  ;;  %v2991_v62 = vmov 29   ;;  %v5042_v29 = vld [vmem:[#allocation45_spill] sm:$0xff] }
 0x36e   : > { %vm1108_vm7 = vcmp.eq.s32.totalorder %v5042_v29, %v3713_v26 }
 0x36f   : > { %v720_v9 = vpop.xlane.xlu1 %719  ;;  %v1558_v17 = vadd.f32 %v1550_v43, %v1510_v41  ;;  %v4302_v43 = vld [vmem:[%s3062_s7] sm:$0xff] }
 0x370   : > { %2917 = vrcp.f32 %v720_v9  ;;  %2010 = vperm.xlu2 %2857, %v4247_v52   ;;  %2013 = vperm.xlu1 %2858, %v4251_v8   ;;  %v4254_v15 = vpop.permute.xlu0 %1911 }
 0x371   : > { %v1606_v25 = vadd.f32 %v1598_v14, %v1558_v17 }
 0x373   : > { %v1654_v39 = vadd.f32 %v1646_v27, %v1606_v25 }
 0x375   : > { %2247 = vperm.xlu0 %2871, %v3790_v16   ;;  %v1702_v51 = vadd.f32 %v1694_v37, %v1654_v39 }
 0x376   : > { %v2918_v61 = vpop.eup %2917  ;;  %v808_v36 = vpop.f32.mrf.mxu2 }
 0x377   : > { %v4268_v60 = vmul.f32 %v2918_v61, %v3830_v20  ;;  %v1750_v13 = vadd.f32 %v1742_v53, %v1702_v51  ;;  %828 = vst.msk [vmem:[%s4282_s17] sm:$0xff] %vm369_vm1, %v808_v36  ;;  %v5044_v51 = vld [vmem:[#allocation56_spill] sm:$0xff] }
 0x378   : > { %2860 = vset.pattern.permute.xlu2 %v2986_v50  ;;  %v723_v32 = vpop.xlane.xlu2 %722  ;;  %2861 = vset.pattern.permute.xlu1 %v2986_v50  ;;  %vm1204_vm12 = vcmp.eq.s32.totalorder %v5044_v51, %v3713_v26 }
 0x379   : > { %v924_v19 = vsel %vm916_vm0, %v4268_v60, 0.0  ;;  %v972_v55 = vsel %vm964_vm2, %v4268_v60, 0.0  ;;  %2043 = vperm.xlu2 %2860, %v4197_v49   ;;  %2046 = vperm.xlu1 %2861, %v4201_v44   ;;  %v1945_v20 = vpop.permute.xlu0 %1944  ;;  %v1020_v22 = vsel %vm1012_vm3, %v4268_v60, 0.0  ;;  %v1068_v38 = vsel %vm1060_vm4, %v4268_v60, 0.0 }
 0x37a   : > { %v980_v50 = vadd.f32 %v972_v55, %v924_v19  ;;  %v1116_v0 = vsel %vm1108_vm7, %v4268_v60, 0.0  ;;  %2919 = vrcp.f32 %v723_v32  ;;  %vm1967_vm9 = vcmp.eq.s32.totalorder %v1945_v20, %v3713_v26  ;;  %v5045_v32 = vld [vmem:[#allocation60_spill] sm:$0xff]  ;;  %v5046_v20 = vld [vmem:[#allocation5_spill] sm:$0xff] }
 0x37b   : > { %v745_v9 = vpack.c.bf16 %v4268_v60, %v3897_v7  ;;  %v1975_v14 = vsel %vm1967_vm9, %v3787_v23, 0.0  ;;  %v1798_v25 = vadd.f32 %v1790_v57, %v1750_v13  ;;  %v1164_v27 = vsel %vm1156_vm8, %v4268_v60, 0.0 }
 0x37c   : > { %v1028_v12 = vadd.f32 %v1020_v22, %v980_v50  ;;  %v4315_v39 = vadd.f32 %v1975_v14, %v4236_v48  ;;  %v1212_v13 = vsel %vm1204_vm12, %v4268_v60, 0.0  ;;  %vm1252_vm13 = vcmp.eq.s32.totalorder %v5045_v32, %v3713_v26  ;;  %v5047_v50 = vld [vmem:[#allocation9_spill] sm:$0xff] }
 0x37d   : > { %2874 = vset.pattern.permute.xlu0 %v2991_v62  ;;  %2711 = vmatmul.msk.bf16.gmra.mxu2 %vm654_vm5, %v745_v9  ;;  %v4327_v48 = vadd.f32 %v1838_v31, %v1798_v25  ;;  %vm917_vm14 = vcmp.eq.s32.totalorder %v5046_v20, %v3713_v26  ;;  %v1260_v54 = vsel %vm1252_vm13, %v4268_v60, 0.0  ;;  %vm965_vm15 = vcmp.eq.s32.totalorder %v5047_v50, %v3713_v26  ;;  %v5048_v22 = vld [vmem:[#allocation65_spill] sm:$0xff]  ;;  %v5058_v20 = vld [vmem:[#allocation84_spill] sm:$0xff] }
 0x37e   : > { %v1076_v41 = vadd.f32 %v1068_v38, %v1028_v12  ;;  %2280 = vperm.xlu0 %2874, %v4302_v43   ;;  %v810_v33 = vpop.f32.mrf.mxu2  ;;  %vm1300_vm0 = vcmp.eq.s32.totalorder %v5048_v22, %v3713_v26  ;;  %vm1013_vm2 = vcmp.eq.s32.totalorder %v5049_v45, %v3713_v26  ;;  %v5050_v12 = vld [vmem:[#allocation19_spill] sm:$0xff]  ;;  %v5051_v38 = vld [vmem:[#allocation70_spill] sm:$0xff]  ;;  %vm1492_vm13 = vcmp.eq.s32.totalorder %v5058_v20, %v3713_v26  ;;  %v5059_v22 = vld [vmem:[#allocation89_spill] sm:$0xff] }
 0x37f   : > { %829 = vst.msk [vmem:[%s4282_s17 + $0x8] sm:$0xff] %vm369_vm1, %v810_v33  ;;  %vm1061_vm3 = vcmp.eq.s32.totalorder %v5050_v12, %v3713_v26  ;;  %vm1348_vm4 = vcmp.eq.s32.totalorder %v5051_v38, %v3713_v26  ;;  %v1308_v29 = vsel %vm1300_vm0, %v4268_v60, 0.0  ;;  %v5055_v33 = vld [vmem:[#allocation36_spill] sm:$0xff]  ;;  %v2992_v38 = vmov 30  }
 0x380   : > { %v1124_v17 = vadd.f32 %v1116_v0, %v1076_v41  ;;  %v1858_v18 = vpop.permute.xlu2 %1857  ;;  %v2920_v55 = vpop.eup %2919  ;;  %v5052_v0 = vld [vmem:[#allocation24_spill] sm:$0xff]  ;;  %v1356_v9 = vsel %vm1348_vm4, %v4268_v60, 0.0  ;;  %vm1205_vm10 = vcmp.eq.s32.totalorder %v5055_v33, %v3713_v26 }
 0x381   : > { %vm1874_vm11 = vcmp.eq.s32.totalorder %v1858_v18, %v3713_v26  ;;  %2049 = vperm.xlu2 %2860, %v4220_v35   ;;  %v4320_v37 = vpop.permute.xlu0 %1959  ;;  %2052 = vperm.xlu1 %2861, %v4224_v34   ;;  %v4345_v36 = vmul.f32 %v2920_v55, %v3855_v2  ;;  %vm1109_vm7 = vcmp.eq.s32.totalorder %v5052_v0, %v3713_v26  ;;  %v5053_v18 = vld [vmem:[#allocation76_spill] sm:$0xff]  ;;  %v5057_v55 = vld [vmem:[#allocation43_spill] sm:$0xff] }
 0x382   : > { %v1172_v61 = vadd.f32 %v1164_v27, %v1124_v17  ;;  %v1882_v53 = vsel %vm1874_vm11, %v3993_v11, 0.0  ;;  %vm1396_vm8 = vcmp.eq.s32.totalorder %v5053_v18, %v3713_v26  ;;  %vm1253_vm12 = vcmp.eq.s32.totalorder %v5057_v55, %v3713_v26  ;;  %v5066_v55 = vld [vmem:[#allocation68_spill] sm:$0xff] }
 0x383   : > { %v4331_v63 = vadd.f32 %v1882_v53, %v4187_v58  ;;  %v925_v2 = vsel %vm917_vm14, %v4345_v36, 0.0  ;;  %v973_v57 = vsel %vm965_vm15, %v4345_v36, 0.0  ;;  %v1021_v31 = vsel %vm1013_vm2, %v4345_v36, 0.0 }
 0x384   : > { %v1220_v19 = vadd.f32 %v1212_v13, %v1172_v61  ;;  %v981_v14 = vadd.f32 %v973_v57, %v925_v2  ;;  %v5054_v61 = vld [vmem:[#allocation29_spill] sm:$0xff]  ;;  %v1404_v53 = vsel %vm1396_vm8, %v4268_v60, 0.0  ;;  %vm1540_vm14 = vcmp.eq.s32.totalorder %v5059_v22, %v3713_v26  ;;  %v5064_v22 = vld [vmem:[#allocation62_spill] sm:$0xff] }
 0x385   : > { %vm1157_vm9 = vcmp.eq.s32.totalorder %v5054_v61, %v3713_v26  ;;  %v1117_v12 = vsel %vm1109_vm7, %v4345_v36, 0.0  ;;  %v1213_v0 = vsel %vm1205_vm10, %v4345_v36, 0.0  ;;  %v1261_v20 = vsel %vm1253_vm12, %v4345_v36, 0.0 }
 0x386   : > { %v1268_v58 = vadd.f32 %v1260_v54, %v1220_v19  ;;  %2295 = vperm.xlu0 %2874, %v3790_v16   ;;  %v1029_v13 = vadd.f32 %v1021_v31, %v981_v14  ;;  %v1069_v19 = vsel %vm1061_vm3, %v4345_v36, 0.0  ;;  %v1165_v2 = vsel %vm1157_vm9, %v4345_v36, 0.0 }
 0x387   : > { %v1855_v6 = vpop.permute.xlu1 %1854  ;;  %vm1397_vm7 = vcmp.eq.s32.totalorder %v5064_v22, %v3713_v26  ;;  %vm1445_vm9 = vcmp.eq.s32.totalorder %v5066_v55, %v3713_v26  ;;  %v5069_v22 = vld [vmem:[#allocation81_spill] sm:$0xff] }
 0x388   : > { %v1316_v41 = vadd.f32 %v1308_v29, %v1268_v58  ;;  %vm1873_vm6 = vcmp.eq.s32.totalorder %v1855_v6, %v3713_v26  ;;  %v4358_v16 = vpop.permute.xlu2 %1866  ;;  %v1077_v50 = vadd.f32 %v1069_v19, %v1029_v13  ;;  %v5060_v58 = vld [vmem:[#allocation93_spill] sm:$0xff]  ;;  %v1500_v29 = vsel %vm1492_vm13, %v4268_v60, 0.0 }
 0x389   : > { %v1881_v17 = vsel %vm1873_vm6, %v3954_v4, 0.0  ;;  %2058 = vperm.xlu2 %2860, %v4247_v52   ;;  %2061 = vperm.xlu1 %2861, %v4251_v8   ;;  %vm1588_vm15 = vcmp.eq.s32.totalorder %v5060_v58, %v3713_v26  ;;  %v1548_v6 = vsel %vm1540_vm14, %v4268_v60, 0.0  ;;  %v5065_v58 = vld [vmem:[#allocation100_spill] sm:$0xff]  ;;  %vm1828_vm14 = vcmp.eq.s32.totalorder %v3865_v28, %v3713_v26 }
 0x38a   : > { %v1364_v25 = vadd.f32 %v1356_v9, %v1316_v41  ;;  %v4368_v27 = vadd.f32 %v1881_v17, %v4170_v46  ;;  %v1993_v51 = vpop.permute.xlu0 %1992  ;;  %v5056_v46 = vld [vmem:[#allocation80_spill] sm:$0xff]  ;;  %v1125_v41 = vadd.f32 %v1117_v12, %v1077_v50  ;;  %v746_v17 = vpack.c.bf16 %v4139_v24, %v4345_v36 }
 0x38b   : > { %vm1444_vm11 = vcmp.eq.s32.totalorder %v5056_v46, %v3713_v26  ;;  %vm2015_vm0 = vcmp.eq.s32.totalorder %v1993_v51, %v3713_v26  ;;  %v1596_v33 = vsel %vm1588_vm15, %v4268_v60, 0.0  ;;  %vm1684_vm8 = vcmp.eq.s32.totalorder %v5065_v58, %v3713_v26 }
 0x38c   : > { %v1412_v32 = vadd.f32 %v1404_v53, %v1364_v25  ;;  %v1452_v54 = vsel %vm1444_vm11, %v4268_v60, 0.0  ;;  %v1173_v18 = vadd.f32 %v1165_v2, %v1125_v41  ;;  %v2023_v25 = vsel %vm2015_vm0, %v3787_v23, 0.0 }
 0x38d   : > { %v2031_v61 = vadd.f32 %v2023_v25, %v4315_v39  ;;  %2712 = vmatmul.msk.bf16.gmra.mxu2 %vm654_vm5, %v746_v17  ;;  %v2993_v2 = vmov 31   ;;  %vm1780_vm11 = vcmp.eq.s32.totalorder %v3701_v30, %v3713_v26  ;;  %v1405_v30 = vsel %vm1397_vm7, %v4345_v36, 0.0 }
 0x38e   : > { %v1460_v45 = vadd.f32 %v1452_v54, %v1412_v32  ;;  %2877 = vset.pattern.permute.xlu0 %v2992_v38  ;;  %v1221_v46 = vadd.f32 %v1213_v0, %v1173_v18  ;;  %v5062_v54 = vld [vmem:[#allocation49_spill] sm:$0xff]  ;;  %vm1876_vm15 = vcmp.eq.s32.totalorder %v4194_v42, %v3713_v26  ;;  %v1453_v28 = vsel %vm1445_vm9, %v4345_v36, 0.0 }
 0x38f   : > { %2328 = vperm.xlu0 %2877, %v4302_v43   ;;  %v1861_v57 = vpop.permute.xlu1 %1860  ;;  %vm1301_vm4 = vcmp.eq.s32.totalorder %v5062_v54, %v3713_v26  ;;  %v1884_v58 = vsel %vm1876_vm15, %v4268_v60, 0.0 }
 0x390   : > { %v1508_v9 = vadd.f32 %v1500_v29, %v1460_v45  ;;  %v1900_v14 = vpop.permute.xlu2 %1899  ;;  %vm1875_vm2 = vcmp.eq.s32.totalorder %v1861_v57, %v3713_v26  ;;  %v1269_v50 = vadd.f32 %v1261_v20, %v1221_v46  ;;  %v1309_v12 = vsel %vm1301_vm4, %v4345_v36, 0.0  ;;  %v5067_v29 = vld [vmem:[#allocation103_spill] sm:$0xff]  ;;  %v5068_v20 = vld [vmem:[#allocation74_spill] sm:$0xff] }
 0x391   : > { %vm1920_vm3 = vcmp.eq.s32.totalorder %v1900_v14, %v3713_v26  ;;  %2863 = vset.pattern.permute.xlu2 %v2987_v1  ;;  %v1883_v51 = vsel %vm1875_vm2, %v3897_v7, 0.0  ;;  %2864 = vset.pattern.permute.xlu1 %v2987_v1  ;;  %v5061_v1 = vld [vmem:[#allocation94_spill] sm:$0xff]  ;;  %vm1732_vm10 = vcmp.eq.s32.totalorder %v5067_v29, %v3713_v26  ;;  %vm1493_vm2 = vcmp.eq.s32.totalorder %v5068_v20, %v3713_v26 }
 0x392   : > { %v1556_v31 = vadd.f32 %v1548_v6, %v1508_v9  ;;  %v1928_v53 = vsel %vm1920_vm3, %v3716_v10, 0.0  ;;  %v4423_v13 = vpop.permute.xlu0 %2007  ;;  %v4430_v32 = vadd.f32 %v1883_v51, %v4046_v47  ;;  %2091 = vperm.xlu2 %2863, %v4197_v49   ;;  %2094 = vperm.xlu1 %2864, %v4201_v44   ;;  %vm1636_vm5 = vcmp.eq.s32.totalorder %v5061_v1, %v3713_v26  ;;  %v5063_v47 = vld [vmem:[#allocation55_spill] sm:$0xff] }
 0x393   : > { %v4433_v39 = vadd.f32 %v1928_v53, %v4060_v5  ;;  %vm1349_vm6 = vcmp.eq.s32.totalorder %v5063_v47, %v3713_v26  ;;  %v1644_v5 = vsel %vm1636_vm5, %v4268_v60, 0.0  ;;  %v1692_v6 = vsel %vm1684_vm8, %v4268_v60, 0.0 }
 0x394   : > { %v1604_v19 = vadd.f32 %v1596_v33, %v1556_v31  ;;  %v1317_v41 = vadd.f32 %v1309_v12, %v1269_v50  ;;  %v1357_v0 = vsel %vm1349_vm6, %v4345_v36, 0.0  ;;  %v1740_v14 = vsel %vm1732_vm10, %v4268_v60, 0.0 }
 0x395   : > { %v1788_v33 = vsel %vm1780_vm11, %v4268_v60, 0.0  ;;  %vm1924_vm3 = vcmp.eq.s32.totalorder %v4254_v15, %v3713_v26  ;;  %v1501_v42 = vsel %vm1493_vm2, %v4345_v36, 0.0  ;;  %vm1541_vm5 = vcmp.eq.s32.totalorder %v5069_v22, %v3713_v26 }
 0x396   : > { %v1652_v45 = vadd.f32 %v1644_v5, %v1604_v19  ;;  %v1365_v18 = vadd.f32 %v1357_v0, %v1317_v41  ;;  %vm1972_vm4 = vcmp.eq.s32.totalorder %v4320_v37, %v3713_v26  ;;  %v1549_v55 = vsel %vm1541_vm5, %v4345_v36, 0.0  ;;  %v5071_v0 = vld [vmem:[#allocation98_spill] sm:$0xff] }
 0x397   : > { %2881 = vset.pattern.permute.xlu0 %v2993_v2  ;;  %v1870_v57 = vpop.permute.xlu1 %1869  ;;  %vm2020_vm8 = vcmp.eq.s32.totalorder %v4423_v13, %v3713_v26  ;;  %vm1637_vm9 = vcmp.eq.s32.totalorder %v5071_v0, %v3713_v26  ;;  %v5072_v13 = vld [vmem:[#allocation102_spill] sm:$0xff]  ;;  %vm1877_vm2 = vcmp.eq.s32.totalorder %v4358_v16, %v3713_v26 }
 0x398   : > { %v1700_v9 = vadd.f32 %v1692_v6, %v1652_v45  ;;  %vm1878_vm12 = vcmp.eq.s32.totalorder %v1870_v57, %v3713_v26  ;;  %v1906_v17 = vpop.permute.xlu2 %1905  ;;  %2379 = vperm.xlu0 %2881, %v4197_v49   ;;  %v1413_v46 = vadd.f32 %v1405_v30, %v1365_v18  ;;  %v5070_v6 = vld [vmem:[#allocation88_spill] sm:$0xff]  ;;  %v1645_v30 = vsel %vm1637_vm9, %v4345_v36, 0.0 }
 0x399   : > { %v1886_v25 = vsel %vm1878_vm12, %v4139_v24, 0.0  ;;  %vm1922_vm13 = vcmp.eq.s32.totalorder %v1906_v17, %v3713_v26  ;;  %vm1589_vm6 = vcmp.eq.s32.totalorder %v5070_v6, %v3713_v26  ;;  %v1980_v17 = vsel %vm1972_vm4, %v4268_v60, 0.0 }
 0x39a   : > { %v1748_v31 = vadd.f32 %v1740_v14, %v1700_v9  ;;  %v4475_v51 = vadd.f32 %v1886_v25, %v4327_v48  ;;  %v1930_v53 = vsel %vm1922_vm13, %v3993_v11, 0.0  ;;  %2097 = vperm.xlu2 %2863, %v4220_v35   ;;  %2100 = vperm.xlu1 %2864, %v4224_v34   ;;  %v1461_v54 = vadd.f32 %v1453_v28, %v1413_v46 }
 0x39b   : > { %v4482_v1 = vadd.f32 %v1930_v53, %v4331_v63  ;;  %v2041_v19 = vpop.permute.xlu0 %2040  ;;  %v1836_v63 = vsel %vm1828_vm14, %v4268_v60, 0.0  ;;  %v1597_v9 = vsel %vm1589_vm6, %v4345_v36, 0.0  ;;  %vm1685_vm11 = vcmp.eq.s32.totalorder %v5072_v13, %v3713_v26 }
 0x39c   : > { %v1796_v48 = vadd.f32 %v1788_v33, %v1748_v31  ;;  %vm2063_vm0 = vcmp.eq.s32.totalorder %v2041_v19, %v3713_v26  ;;  %v1509_v45 = vadd.f32 %v1501_v42, %v1461_v54  ;;  %v2028_v33 = vsel %vm2020_vm8, %v4268_v60, 0.0  ;;  %v5073_v19 = vld [vmem:[#allocation107_spill] sm:$0xff] }
 0x39d   : > { %v2071_v47 = vsel %vm2063_vm0, %v3787_v23, 0.0  ;;  %v1693_v46 = vsel %vm1685_vm11, %v4345_v36, 0.0  ;;  %vm1733_vm12 = vcmp.eq.s32.totalorder %v5073_v19, %v3713_v26  ;;  %vm1781_vm13 = vcmp.eq.s32.totalorder %v3754_v21, %v3713_v26 }
 0x39e   : > { %v1844_v5 = vadd.f32 %v1836_v63, %v1796_v48  ;;  %v4500_v50 = vadd.f32 %v2071_v47, %v2031_v61  ;;  %v1932_v61 = vsel %vm1924_vm3, %v4268_v60, 0.0  ;;  %v1557_v41 = vadd.f32 %v1549_v55, %v1509_v45 }
 0x39f   : > { %v1741_v20 = vsel %vm1733_vm12, %v4345_v36, 0.0  ;;  %vm1829_vm14 = vcmp.eq.s32.totalorder %v3995_v3, %v3713_v26  ;;  %v1789_v42 = vsel %vm1781_vm13, %v4345_v36, 0.0 }
 0x3a0   : > { %v1892_v12 = vadd.f32 %v1884_v58, %v1844_v5  ;;  %v1915_v29 = vpop.permute.xlu2 %1914  ;;  %2388 = vperm.xlu0 %2881, %v4224_v34   ;;  %v1903_v15 = vpop.permute.xlu1 %1902  ;;  %v1605_v14 = vadd.f32 %v1597_v9, %v1557_v41 }
 0x3a1   : > { %vm1921_vm7 = vcmp.eq.s32.totalorder %v1903_v15, %v3713_v26  ;;  %vm1925_vm3 = vcmp.eq.s32.totalorder %v1915_v29, %v3713_v26 }
 0x3a2   : > { %v1940_v57 = vadd.f32 %v1932_v61, %v1892_v12  ;;  %v1929_v37 = vsel %vm1921_vm7, %v3954_v4, 0.0  ;;  %2106 = vperm.xlu2 %2863, %v4247_v52   ;;  %2109 = vperm.xlu1 %2864, %v4251_v8   ;;  %v1653_v53 = vadd.f32 %v1645_v30, %v1605_v14  ;;  %v1837_v12 = vsel %vm1829_vm14, %v4345_v36, 0.0 }
 0x3a3   : > { %v4521_v18 = vadd.f32 %v1929_v37, %v4368_v27  ;;  %v2056_v25 = vpop.permute.xlu0 %2055 }
 0x3a4   : > { %v1988_v31 = vadd.f32 %v1980_v17, %v1940_v57  ;;  %vm2068_vm10 = vcmp.eq.s32.totalorder %v2056_v25, %v3713_v26  ;;  %v1701_v48 = vadd.f32 %v1693_v46, %v1653_v53 }
 0x3a5   : > { %v2076_v28 = vsel %vm2068_vm10, %v4268_v60, 0.0 }
 0x3a6   : > { %v2036_v27 = vadd.f32 %v2028_v33, %v1988_v31  ;;  %v1749_v5 = vadd.f32 %v1741_v20, %v1701_v48 }
 0x3a8   : > { %v2084_v63 = vadd.f32 %v2076_v28, %v2036_v27  ;;  %v1948_v54 = vpop.permute.xlu2 %1947  ;;  %2886 = vset.pattern.permute.xlu0 %v2992_v38  ;;  %v1909_v47 = vpop.permute.xlu1 %1908  ;;  %v1797_v58 = vadd.f32 %v1789_v42, %v1749_v5 }
 0x3a9   : > { %vm1968_vm15 = vcmp.eq.s32.totalorder %v1948_v54, %v3713_v26  ;;  %vm1923_vm0 = vcmp.eq.s32.totalorder %v1909_v47, %v3713_v26  ;;  %2349 = vperm.xlu0 %2886, %v4251_v8  }
 0x3aa   : > { %v1976_v21 = vsel %vm1968_vm15, %v3716_v10, 0.0  ;;  %v1931_v22 = vsel %vm1923_vm0, %v3897_v7, 0.0  ;;  %2866 = vset.pattern.permute.xlu2 %v2988_v40  ;;  %2867 = vset.pattern.permute.xlu1 %v2988_v40  ;;  %v1845_v55 = vadd.f32 %v1837_v12, %v1797_v58  ;;  %v1933_v40 = vsel %vm1925_vm3, %v4345_v36, 0.0 }
 0x3ab   : > { %v1984_v45 = vadd.f32 %v1976_v21, %v4433_v39  ;;  %v1939_v3 = vadd.f32 %v1931_v22, %v4430_v32  ;;  %2139 = vperm.xlu2 %2866, %v4197_v49   ;;  %2142 = vperm.xlu1 %2867, %v4201_v44   ;;  %v1885_v39 = vsel %vm1877_vm2, %v4345_v36, 0.0 }
 0x3ac   : > { %v2089_v16 = vpop.permute.xlu0 %2088  ;;  %v1893_v15 = vadd.f32 %v1885_v39, %v1845_v55 }
 0x3ad   : > { %vm2111_vm5 = vcmp.eq.s32.totalorder %v2089_v16, %v3713_v26 }
 0x3ae   : > { %v2119_v32 = vsel %vm2111_vm5, %v3787_v23, 0.0  ;;  %v1941_v57 = vadd.f32 %v1933_v40, %v1893_v15 }
 0x3af   : > { %v2127_v6 = vadd.f32 %v2119_v32, %v4500_v50 }
 0x3b0   : > { %v1954_v61 = vpop.permute.xlu2 %1953  ;;  %v1918_v41 = vpop.permute.xlu1 %1917 }
 0x3b1   : > { %vm1970_vm4 = vcmp.eq.s32.totalorder %v1954_v61, %v3713_v26  ;;  %vm1926_vm6 = vcmp.eq.s32.totalorder %v1918_v41, %v3713_v26  ;;  %2888 = vset.pattern.permute.xlu0 %v2993_v2 }
 0x3b2   : > { %v1978_v29 = vsel %vm1970_vm4, %v3993_v11, 0.0  ;;  %v1934_v9 = vsel %vm1926_vm6, %v4139_v24, 0.0 }
 0x3b3   : > { %v1986_v37 = vadd.f32 %v1978_v29, %v4482_v1  ;;  %v1942_v0 = vadd.f32 %v1934_v9, %v4475_v51  ;;  %2145 = vperm.xlu2 %2866, %v4220_v35   ;;  %2148 = vperm.xlu1 %2867, %v4224_v34  }
 0x3b4   : > { %v2104_v50 = vpop.permute.xlu0 %2103 }
 0x3b5   : > { %vm2116_vm7 = vcmp.eq.s32.totalorder %v2104_v50, %v3713_v26 }
 0x3b6   : > { %v2124_v17 = vsel %vm2116_vm7, %v4268_v60, 0.0 }
 0x3b7   : > { %v2132_v14 = vadd.f32 %v2124_v17, %v2084_v63 }
 0x3b8   : > { %v1963_v25 = vpop.permute.xlu2 %1962 }
 0x3b9   : > { %vm1973_vm8 = vcmp.eq.s32.totalorder %v1963_v25, %v3713_v26  ;;  %v1951_v31 = vpop.permute.xlu1 %1950 }
 0x3ba   : > { %v1981_v30 = vsel %vm1973_vm8, %v4345_v36, 0.0  ;;  %vm1969_vm9 = vcmp.eq.s32.totalorder %v1951_v31, %v3713_v26 }
 0x3bb   : > { %v1989_v51 = vadd.f32 %v1981_v30, %v1941_v57  ;;  %v1977_v1 = vsel %vm1969_vm9, %v3954_v4, 0.0  ;;  %2154 = vperm.xlu2 %2866, %v4247_v52   ;;  %2157 = vperm.xlu1 %2867, %v4251_v8  }
 0x3bc   : > { %v1985_v13 = vadd.f32 %v1977_v1, %v4521_v18 }
 0x3bd   : > { %v2137_v53 = vpop.permute.xlu0 %2136  ;;  %v813_v33 = vpop.f32.mrf.mxu2 }
 0x3be   : > { %vm2159_vm10 = vcmp.eq.s32.totalorder %v2137_v53, %v3713_v26  ;;  %830 = vst.msk [vmem:[%s4282_s17 + $0x10] sm:$0xff] %vm369_vm1, %v813_v33 }
 0x3bf   : > { %v2167_v46 = vsel %vm2159_vm10, %v3787_v23, 0.0 }
 0x3c0   : > { %v4583_v27 = vadd.f32 %v2167_v46, %v2127_v6  ;;  %v1996_v19 = vpop.permute.xlu2 %1995 }
 0x3c1   : > { %vm2016_vm11 = vcmp.eq.s32.totalorder %v1996_v19, %v3713_v26  ;;  %v1957_v48 = vpop.permute.xlu1 %1956 }
 0x3c2   : > { %v2024_v18 = vsel %vm2016_vm11, %v3716_v10, 0.0  ;;  %vm1971_vm12 = vcmp.eq.s32.totalorder %v1957_v48, %v3713_v26 }
 0x3c3   : > { %v2032_v28 = vadd.f32 %v2024_v18, %v1984_v45  ;;  %v1979_v20 = vsel %vm1971_vm12, %v3897_v7, 0.0  ;;  %2869 = vset.pattern.permute.xlu2 %v2989_v59  ;;  %2870 = vset.pattern.permute.xlu1 %v2989_v59 }
 0x3c4   : > { %v1987_v63 = vadd.f32 %v1979_v20, %v1939_v3  ;;  %2187 = vperm.xlu2 %2869, %v4197_v49   ;;  %2190 = vperm.xlu1 %2870, %v4201_v44  }
 0x3c5   : > { %v2152_v54 = vpop.permute.xlu0 %2151  ;;  %v815_v47 = vpop.f32.mrf.mxu2 }
 0x3c6   : > { %vm2164_vm13 = vcmp.eq.s32.totalorder %v2152_v54, %v3713_v26  ;;  %831 = vst.msk [vmem:[%s4282_s17 + $0x18] sm:$0xff] %vm369_vm1, %v815_v47 }
 0x3c7   : > { %v2172_v5 = vsel %vm2164_vm13, %v4268_v60, 0.0 }
 0x3c8   : > { %v4597_v42 = vadd.f32 %v2172_v5, %v2132_v14  ;;  %v2002_v21 = vpop.permute.xlu2 %2001 }
 0x3c9   : > { %vm2018_vm14 = vcmp.eq.s32.totalorder %v2002_v21, %v3713_v26  ;;  %v1966_v22 = vpop.permute.xlu1 %1965 }
 0x3ca   : > { %v2026_v59 = vsel %vm2018_vm14, %v3993_v11, 0.0  ;;  %vm1974_vm15 = vcmp.eq.s32.totalorder %v1966_v22, %v3713_v26 }
 0x3cb   : > { %v2034_v58 = vadd.f32 %v2026_v59, %v1986_v37  ;;  %v1982_v45 = vsel %vm1974_vm15, %v4139_v24, 0.0 }
 0x3cc   : > { %v1990_v3 = vadd.f32 %v1982_v45, %v1942_v0  ;;  %2193 = vperm.xlu2 %2869, %v4220_v35   ;;  %2196 = vperm.xlu1 %2870, %v4224_v34  }
 0x3d0   : > { %v2011_v12 = vpop.permute.xlu2 %2010 }
 0x3d1   : > { %vm2021_vm0 = vcmp.eq.s32.totalorder %v2011_v12, %v3713_v26 }
 0x3d2   : > { %v2029_v16 = vsel %vm2021_vm0, %v4345_v36, 0.0  ;;  %v1999_v55 = vpop.permute.xlu1 %1998 }
 0x3d3   : > { %v2037_v39 = vadd.f32 %v2029_v16, %v1989_v51  ;;  %vm2017_vm2 = vcmp.eq.s32.totalorder %v1999_v55, %v3713_v26 }
 0x3d4   : > { %v2025_v32 = vsel %vm2017_vm2, %v3954_v4, 0.0  ;;  %2202 = vperm.xlu2 %2869, %v4247_v52   ;;  %2205 = vperm.xlu1 %2870, %v4251_v8  }
 0x3d5   : > { %v2033_v15 = vadd.f32 %v2025_v32, %v1985_v13 }
 0x3d8   : > { %v2044_v6 = vpop.permute.xlu2 %2043 }
 0x3d9   : > { %vm2064_vm3 = vcmp.eq.s32.totalorder %v2044_v6, %v3713_v26 }
 0x3da   : > { %v2072_v40 = vsel %vm2064_vm3, %v3716_v10, 0.0  ;;  %v2005_v61 = vpop.permute.xlu1 %2004 }
 0x3db   : > { %v2080_v41 = vadd.f32 %v2072_v40, %v2032_v28  ;;  %vm2019_vm5 = vcmp.eq.s32.totalorder %v2005_v61, %v3713_v26 }
 0x3dc   : > { %v2027_v57 = vsel %vm2019_vm5, %v3897_v7, 0.0  ;;  %2872 = vset.pattern.permute.xlu2 %v2990_v56  ;;  %2873 = vset.pattern.permute.xlu1 %v2990_v56 }
 0x3dd   : > { %v2035_v29 = vadd.f32 %v2027_v57, %v1987_v63  ;;  %2235 = vperm.xlu2 %2872, %v4197_v49   ;;  %2238 = vperm.xlu1 %2873, %v4201_v44  }
 0x3e0   : > { %v2050_v9 = vpop.permute.xlu2 %2049 }
 0x3e1   : > { %vm2066_vm4 = vcmp.eq.s32.totalorder %v2050_v9, %v3713_v26 }
 0x3e2   : > { %v2074_v37 = vsel %vm2066_vm4, %v3993_v11, 0.0  ;;  %v2014_v0 = vpop.permute.xlu1 %2013 }
 0x3e3   : > { %v2082_v50 = vadd.f32 %v2074_v37, %v2034_v58  ;;  %vm2022_vm6 = vcmp.eq.s32.totalorder %v2014_v0, %v3713_v26 }
 0x3e4   : > { %v2030_v17 = vsel %vm2022_vm6, %v4139_v24, 0.0 }
 0x3e5   : > { %v2038_v14 = vadd.f32 %v2030_v17, %v1990_v3  ;;  %2241 = vperm.xlu2 %2872, %v4220_v35   ;;  %2244 = vperm.xlu1 %2873, %v4224_v34  }
 0x3e8   : > { %v2059_v56 = vpop.permute.xlu2 %2058 }
 0x3e9   : > { %vm2069_vm7 = vcmp.eq.s32.totalorder %v2059_v56, %v3713_v26 }
 0x3ea   : > { %v2077_v25 = vsel %vm2069_vm7, %v4345_v36, 0.0 }
 0x3eb   : > { %v2085_v31 = vadd.f32 %v2077_v25, %v2037_v39  ;;  %v2047_v30 = vpop.permute.xlu1 %2046 }
 0x3ec   : > { %vm2065_vm8 = vcmp.eq.s32.totalorder %v2047_v30, %v3713_v26 }
 0x3ed   : > { %v2073_v51 = vsel %vm2065_vm8, %v3954_v4, 0.0  ;;  %2250 = vperm.xlu2 %2872, %v4247_v52   ;;  %2253 = vperm.xlu1 %2873, %v4251_v8  }
 0x3ee   : > { %v2081_v1 = vadd.f32 %v2073_v51, %v2033_v15 }
 0x3f0   : > { %v2092_v13 = vpop.permute.xlu2 %2091 }
 0x3f1   : > { %vm2112_vm9 = vcmp.eq.s32.totalorder %v2092_v13, %v3713_v26 }
 0x3f2   : > { %v2120_v53 = vsel %vm2112_vm9, %v3716_v10, 0.0 }
 0x3f3   : > { %v2128_v33 = vadd.f32 %v2120_v53, %v2080_v41  ;;  %v2053_v46 = vpop.permute.xlu1 %2052  ;;  %v2936_v53 = vld [vmem:[%s3062_s7 + $0x28] sm:$0xff] }
 0x3f4   : > { %vm2067_vm10 = vcmp.eq.s32.totalorder %v2053_v46, %v3713_v26 }
 0x3f5   : > { %v2075_v19 = vsel %vm2067_vm10, %v3897_v7, 0.0  ;;  %2875 = vset.pattern.permute.xlu2 %v2991_v62  ;;  %2876 = vset.pattern.permute.xlu1 %v2991_v62 }
 0x3f6   : > { %v2083_v48 = vadd.f32 %v2075_v19, %v2035_v29  ;;  %2283 = vperm.xlu2 %2875, %v4197_v49   ;;  %2286 = vperm.xlu1 %2876, %v4201_v44  }
 0x3f8   : > { %v2098_v18 = vpop.permute.xlu2 %2097 }
 0x3f9   : > { %vm2114_vm11 = vcmp.eq.s32.totalorder %v2098_v18, %v3713_v26 }
 0x3fa   : > { %v2122_v28 = vsel %vm2114_vm11, %v3993_v11, 0.0 }
 0x3fb   : > { %v2130_v20 = vadd.f32 %v2122_v28, %v2082_v50  ;;  %v2062_v63 = vpop.permute.xlu1 %2061 }
 0x3fc   : > { %vm2070_vm12 = vcmp.eq.s32.totalorder %v2062_v63, %v3713_v26 }
 0x3fd   : > { %v2078_v54 = vsel %vm2070_vm12, %v4139_v24, 0.0 }
 0x3fe   : > { %v2086_v47 = vadd.f32 %v2078_v54, %v2038_v14  ;;  %2289 = vperm.xlu2 %2875, %v4220_v35   ;;  %2292 = vperm.xlu1 %2876, %v4224_v34  }
 0x400   : > { %v2107_v62 = vpop.permute.xlu2 %2106  ;;  %v818_v22 = vpop.f32.mrf.mxu2 }
 0x401   : > { %vm2117_vm13 = vcmp.eq.s32.totalorder %v2107_v62, %v3713_v26  ;;  %832 = vst.msk [vmem:[%s4282_s17 + $0x20] sm:$0xff] %vm369_vm1, %v818_v22  ;;  %v2185_v62 = vpop.permute.xlu0 %2184 }
 0x402   : > { %v2125_v5 = vsel %vm2117_vm13, %v4345_v36, 0.0 }
 0x403   : > { %v2133_v21 = vadd.f32 %v2125_v5, %v2085_v31 }
 0x404   : > { %v2095_v59 = vpop.permute.xlu1 %2094 }
 0x405   : > { %vm2113_vm14 = vcmp.eq.s32.totalorder %v2095_v59, %v3713_v26 }
 0x406   : > { %v2121_v58 = vsel %vm2113_vm14, %v3954_v4, 0.0  ;;  %2298 = vperm.xlu2 %2875, %v4247_v52   ;;  %2301 = vperm.xlu1 %2876, %v4251_v8  }
 0x407   : > { %v2129_v45 = vadd.f32 %v2121_v58, %v2081_v1 }
 0x408   : > { %v2140_v3 = vpop.permute.xlu2 %2139  ;;  %v820_v55 = vpop.f32.mrf.mxu2 }
 0x409   : > { %vm2160_vm15 = vcmp.eq.s32.totalorder %v2140_v3, %v3713_v26  ;;  %833 = vst.msk [vmem:[%s4282_s17 + $0x28] sm:$0xff] %vm369_vm1, %v820_v55  ;;  %v4713_v3 = vpop.permute.xlu0 %2199 }
 0x40a   : > { %v2168_v12 = vsel %vm2160_vm15, %v3716_v10, 0.0 }
 0x40b   : > { %v2176_v16 = vadd.f32 %v2168_v12, %v2128_v33 }
 0x40c   : > { %v2101_v39 = vpop.permute.xlu1 %2100 }
 0x40d   : > { %vm2115_vm0 = vcmp.eq.s32.totalorder %v2101_v39, %v3713_v26 }
 0x40e   : > { %v2123_v32 = vsel %vm2115_vm0, %v3897_v7, 0.0  ;;  %2878 = vset.pattern.permute.xlu2 %v2992_v38  ;;  %2879 = vset.pattern.permute.xlu1 %v2992_v38 }
 0x40f   : > { %v2131_v15 = vadd.f32 %v2123_v32, %v2083_v48  ;;  %2331 = vperm.xlu2 %2878, %v4197_v49   ;;  %2334 = vperm.xlu1 %2879, %v4201_v44  }
 0x410   : > { %v2146_v6 = vpop.permute.xlu2 %2145  ;;  %v823_v41 = vpop.f32.mrf.mxu2 }
 0x411   : > { %vm2162_vm2 = vcmp.eq.s32.totalorder %v2146_v6, %v3713_v26  ;;  %834 = vst.msk [vmem:[%s4282_s17 + $0x30] sm:$0xff] %vm369_vm1, %v823_v41  ;;  %v2233_v6 = vpop.permute.xlu0 %2232 }
 0x412   : > { %v2170_v40 = vsel %vm2162_vm2, %v3993_v11, 0.0 }
 0x413   : > { %v2178_v61 = vadd.f32 %v2170_v40, %v2130_v20 }
 0x414   : > { %v2110_v57 = vpop.permute.xlu1 %2109 }
 0x415   : > { %vm2118_vm3 = vcmp.eq.s32.totalorder %v2110_v57, %v3713_v26 }
 0x416   : > { %v2126_v29 = vsel %vm2118_vm3, %v4139_v24, 0.0 }
 0x417   : > { %v2134_v9 = vadd.f32 %v2126_v29, %v2086_v47  ;;  %2337 = vperm.xlu2 %2878, %v4220_v35   ;;  %2880 = vset.pattern.permute.xlu1 %v2993_v2 }
 0x418   : > { %v2155_v49 = vpop.permute.xlu2 %2154  ;;  %2376 = vperm.xlu1 %2880, %v4302_v43   ;;  %v825_v50 = vpop.f32.mrf.mxu2 }
 0x419   : > { %vm2165_vm5 = vcmp.eq.s32.totalorder %v2155_v49, %v3713_v26  ;;  %835 = vst.msk [vmem:[%s4282_s17 + $0x38] sm:$0xff] %vm369_vm1, %v825_v50 }
 0x41a   : > { %v2173_v37 = vsel %vm2165_vm5, %v4345_v36, 0.0  ;;  %vm2207_vm5 = vcmp.eq.s32.totalorder %v2185_v62, %v3713_v26 }
 0x41b   : > { %v2181_v0 = vadd.f32 %v2173_v37, %v2133_v21 }
 0x41d   : > { %v2143_v17 = vpop.permute.xlu1 %2142 }
 0x41e   : > { %vm2161_vm4 = vcmp.eq.s32.totalorder %v2143_v17, %v3713_v26 }
 0x41f   : > { %v2169_v14 = vsel %vm2161_vm4, %v3954_v4, 0.0  ;;  %2882 = vset.pattern.permute.xlu2 %v2993_v2 }
 0x420   : > { %v2188_v56 = vpop.permute.xlu2 %2187  ;;  %v2177_v25 = vadd.f32 %v2169_v14, %v2129_v45  ;;  %2382 = vperm.xlu2 %2882, %v4201_v44   ;;  %2883 = vset.pattern.permute.xlu1 %v2992_v38 }
 0x421   : > { %vm2208_vm6 = vcmp.eq.s32.totalorder %v2188_v56, %v3713_v26  ;;  %2340 = vperm.xlu1 %2883, %v4224_v34  }
 0x422   : > { %v2216_v43 = vsel %vm2208_vm6, %v3716_v10, 0.0  ;;  %vm2255_vm6 = vcmp.eq.s32.totalorder %v2233_v6, %v3713_v26 }
 0x423   : > { %v2224_v31 = vadd.f32 %v2216_v43, %v2176_v16 }
 0x425   : > { %v2149_v30 = vpop.permute.xlu1 %2148 }
 0x426   : > { %vm2163_vm1 = vcmp.eq.s32.totalorder %v2149_v30, %v3713_v26 }
 0x427   : > { %v2171_v51 = vsel %vm2163_vm1, %v3897_v7, 0.0 }
 0x428   : > { %v2194_v1 = vpop.permute.xlu2 %2193  ;;  %v2179_v13 = vadd.f32 %v2171_v51, %v2131_v15  ;;  %2385 = vperm.xlu2 %2882, %v4220_v35  }
 0x429   : > { %vm2210_vm7 = vcmp.eq.s32.totalorder %v2194_v1, %v3713_v26  ;;  %2343 = vperm.xlu1 %2883, %v2936_v53  }
 0x42a   : > { %v2218_v44 = vsel %vm2210_vm7, %v3993_v11, 0.0 }
 0x42b   : > { %v2226_v33 = vadd.f32 %v2218_v44, %v2178_v61 }
 0x42d   : > { %v2158_v46 = vpop.permute.xlu1 %2157 }
 0x42e   : > { %vm2166_vm8 = vcmp.eq.s32.totalorder %v2158_v46, %v3713_v26 }
 0x42f   : > { %v2174_v34 = vsel %vm2166_vm8, %v4139_v24, 0.0 }
 0x430   : > { %v2203_v19 = vpop.permute.xlu2 %2202  ;;  %v2182_v48 = vadd.f32 %v2174_v34, %v2134_v9  ;;  %2884 = vset.pattern.permute.xlu2 %v2992_v38  ;;  %v4726_v9 = vpop.permute.xlu0 %2247 }
 0x431   : > { %vm2213_vm9 = vcmp.eq.s32.totalorder %v2203_v19, %v3713_v26  ;;  %2346 = vperm.xlu2 %2884, %v4247_v52   ;;  %2885 = vset.pattern.permute.xlu1 %v2993_v2 }
 0x432   : > { %v2221_v35 = vsel %vm2213_vm9, %v4345_v36, 0.0  ;;  %2391 = vperm.xlu1 %2885, %v2936_v53  }
 0x433   : > { %v2229_v18 = vadd.f32 %v2221_v35, %v2181_v0 }
 0x436   : > { %v2191_v28 = vpop.permute.xlu1 %2190 }
 0x437   : > { %vm2209_vm10 = vcmp.eq.s32.totalorder %v2191_v28, %v3713_v26 }
 0x438   : > { %v2236_v20 = vpop.permute.xlu2 %2235  ;;  %v2217_v63 = vsel %vm2209_vm10, %v3954_v4, 0.0  ;;  %v2281_v17 = vpop.permute.xlu0 %2280 }
 0x439   : > { %vm2256_vm11 = vcmp.eq.s32.totalorder %v2236_v20, %v3713_v26  ;;  %v2225_v54 = vadd.f32 %v2217_v63, %v2177_v25  ;;  %2887 = vset.pattern.permute.xlu2 %v2993_v2  ;;  %vm2303_vm8 = vcmp.eq.s32.totalorder %v2281_v17, %v3713_v26 }
 0x43a   : > { %v2264_v38 = vsel %vm2256_vm11, %v3716_v10, 0.0  ;;  %2394 = vperm.xlu2 %2887, %v4247_v52   ;;  %2397 = vperm.xlu1 %2885, %v4251_v8   ;;  %v2311_v28 = vsel %vm2303_vm8, %v3787_v23, 0.0 }
 0x43b   : > { %v4702_v47 = vadd.f32 %v2264_v38, %v2224_v31 }
 0x43e   : > { %v2197_v5 = vpop.permute.xlu1 %2196 }
 0x43f   : > { %vm2211_vm12 = vcmp.eq.s32.totalorder %v2197_v5, %v3713_v26 }
 0x440   : > { %v2242_v21 = vpop.permute.xlu2 %2241  ;;  %v2219_v22 = vsel %vm2211_vm12, %v3897_v7, 0.0  ;;  %v4734_v25 = vpop.permute.xlu0 %2295 }
 0x441   : > { %vm2258_vm13 = vcmp.eq.s32.totalorder %v2242_v21, %v3713_v26  ;;  %v2227_v59 = vadd.f32 %v2219_v22, %v2179_v13  ;;  %v2215_v13 = vsel %vm2207_vm5, %v3787_v23, 0.0  ;;  %vm2308_vm8 = vcmp.eq.s32.totalorder %v4734_v25, %v3713_v26 }
 0x442   : > { %v2266_v58 = vsel %vm2258_vm13, %v3993_v11, 0.0  ;;  %v2223_v46 = vadd.f32 %v2215_v13, %v4583_v27 }
 0x443   : > { %v4710_v45 = vadd.f32 %v2266_v58, %v2226_v33  ;;  %v2263_v33 = vsel %vm2255_vm6, %v3787_v23, 0.0 }
 0x446   : > { %v2206_v2 = vpop.permute.xlu1 %2205 }
 0x447   : > { %vm2214_vm14 = vcmp.eq.s32.totalorder %v2206_v2, %v3713_v26 }
 0x448   : > { %v2251_v52 = vpop.permute.xlu2 %2250  ;;  %v2222_v8 = vsel %vm2214_vm14, %v4139_v24, 0.0  ;;  %v2329_v51 = vpop.permute.xlu0 %2328 }
 0x449   : > { %vm2261_vm15 = vcmp.eq.s32.totalorder %v2251_v52, %v3713_v26  ;;  %v2230_v12 = vadd.f32 %v2222_v8, %v2182_v48  ;;  %vm2351_vm10 = vcmp.eq.s32.totalorder %v2329_v51, %v3713_v26  ;;  %v2994_v8 = vmov 0.0  }
 0x44a   : > { %v2269_v16 = vsel %vm2261_vm15, %v4345_v36, 0.0  ;;  %v2359_v38 = vsel %vm2351_vm10, %v3787_v23, 0.0 }
 0x44b   : > { %v4718_v55 = vadd.f32 %v2269_v16, %v2229_v18  ;;  %v2271_v18 = vadd.f32 %v2263_v33, %v2223_v46 }
 0x44f   : > { %v2239_v39 = vpop.permute.xlu1 %2238 }
 0x450   : > { %vm2257_vm0 = vcmp.eq.s32.totalorder %v2239_v39, %v3713_v26  ;;  %v2284_v32 = vpop.permute.xlu2 %2283  ;;  %v2380_v34 = vpop.permute.xlu0 %2379 }
 0x451   : > { %v2265_v15 = vsel %vm2257_vm0, %v3954_v4, 0.0  ;;  %vm2304_vm4 = vcmp.eq.s32.totalorder %v2284_v32, %v3713_v26  ;;  %vm2400_vm12 = vcmp.eq.s32.totalorder %v2380_v34, %v3713_v26  ;;  %vm498_vm0 = vcmask 516096  }
 0x452   : > { %v2273_v40 = vadd.f32 %v2265_v15, %v2225_v54  ;;  %v2312_v53 = vsel %vm2304_vm4, %v3716_v10, 0.0  ;;  %v2408_v21 = vsel %vm2400_vm12, %v3716_v10, 0.0  ;;  %499 = vst.msk [vmem:[%s4764_s24] sm:$0x1] %vm498_vm0, %v2994_v8 }
 0x453   : > { %v2320_v35 = vadd.f32 %v2312_v53, %v4702_v47  ;;  %v2319_v47 = vadd.f32 %v2311_v28, %v2271_v18 }
 0x455   : > { %v2367_v58 = vadd.f32 %v2359_v38, %v2319_v47 }
 0x457   : > { %v2245_v61 = vpop.permute.xlu1 %2244 }
 0x458   : > { %vm2259_vm2 = vcmp.eq.s32.totalorder %v2245_v61, %v3713_v26  ;;  %v2290_v41 = vpop.permute.xlu2 %2289 }
 0x459   : > { %v2267_v57 = vsel %vm2259_vm2, %v3897_v7, 0.0  ;;  %vm2306_vm11 = vcmp.eq.s32.totalorder %v2290_v41, %v3713_v26  ;;  %v2389_v41 = vpop.permute.xlu0 %2388 }
 0x45a   : > { %v4724_v29 = vadd.f32 %v2267_v57, %v2227_v59  ;;  %v2314_v62 = vsel %vm2306_vm11, %v3993_v11, 0.0  ;;  %vm2403_vm4 = vcmp.eq.s32.totalorder %v2389_v41, %v3713_v26 }
 0x45b   : > { %v2322_v2 = vadd.f32 %v2314_v62, %v4710_v45 }
 0x45f   : > { %v2254_v49 = vpop.permute.xlu1 %2253 }
 0x460   : > { %vm2262_vm3 = vcmp.eq.s32.totalorder %v2254_v49, %v3713_v26  ;;  %v4729_v37 = vpop.permute.xlu2 %2298 }
 0x461   : > { %v2270_v0 = vsel %vm2262_vm3, %v4139_v24, 0.0  ;;  %vm2424_vm3 = vcmask 523264   ;;  %v2350_v28 = vpop.permute.xlu0 %2349 }
 0x462   : > { %v4732_v50 = vadd.f32 %v2270_v0, %v2230_v12 }
 0x468   : > { %v2287_v14 = vpop.permute.xlu1 %2286 }
 0x469   : > { %v2332_v56 = vpop.permute.xlu2 %2331  ;;  %vm2305_vm1 = vcmp.eq.s32.totalorder %v2287_v14, %v3713_v26 }
 0x46a   : > { %vm2352_vm7 = vcmp.eq.s32.totalorder %v2332_v56, %v3713_v26  ;;  %v2313_v19 = vsel %vm2305_vm1, %v3954_v4, 0.0  ;;  %vm2212_vm1 = vcmp.eq.s32.totalorder %v4713_v3, %v3713_v26 }
 0x46b   : > { %v2360_v48 = vsel %vm2352_vm7, %v3716_v10, 0.0  ;;  %v2321_v27 = vadd.f32 %v2313_v19, %v2273_v40  ;;  %vm2260_vm7 = vcmp.eq.s32.totalorder %v4726_v9, %v3713_v26  ;;  %v2316_v9 = vsel %vm2308_vm8, %v4268_v60, 0.0 }
 0x46c   : > { %v2368_v54 = vadd.f32 %v2360_v48, %v2320_v35 }
 0x46e   : > { %v2416_v52 = vadd.f32 %v2408_v21, %v2368_v54 }
 0x470   : > { %v2293_v43 = vpop.permute.xlu1 %2292  ;;  %v2426_v45 = vsel %vm2424_vm3, %v2416_v52, 0.0 }
 0x471   : > { %v2338_v31 = vpop.permute.xlu2 %2337  ;;  %vm2307_vm5 = vcmp.eq.s32.totalorder %v2293_v43, %v3713_v26 }
 0x472   : > { %vm2354_vm13 = vcmp.eq.s32.totalorder %v2338_v31, %v3713_v26  ;;  %v2315_v57 = vsel %vm2307_vm5, %v3897_v7, 0.0  ;;  %v2411_v31 = vsel %vm2403_vm4, %v3897_v7, 0.0 }
 0x473   : > { %v2362_v22 = vsel %vm2354_vm13, %v3993_v11, 0.0  ;;  %v2323_v0 = vadd.f32 %v2315_v57, %v4724_v29 }
 0x474   : > { %v2370_v39 = vadd.f32 %v2362_v22, %v2322_v2 }
 0x478   : > { %v4736_v30 = vpop.permute.xlu1 %2301 }
 0x479   : > { %vm2310_vm13 = vcmp.eq.s32.totalorder %v4736_v30, %v3713_v26 }
 0x47a   : > { %v2383_v1 = vpop.permute.xlu2 %2382 }
 0x47b   : > { %vm2401_vm14 = vcmp.eq.s32.totalorder %v2383_v1, %v3713_v26 }
 0x47c   : > { %v2409_v12 = vsel %vm2401_vm14, %v3954_v4, 0.0 }
 0x481   : > { %v2335_v44 = vpop.permute.xlu1 %2334 }
 0x482   : > { %vm2353_vm9 = vcmp.eq.s32.totalorder %v2335_v44, %v3713_v26  ;;  %v2386_v63 = vpop.permute.xlu2 %2385  ;;  %v2220_v44 = vsel %vm2212_vm1, %v4268_v60, 0.0 }
 0x483   : > { %v2361_v20 = vsel %vm2353_vm9, %v3954_v4, 0.0  ;;  %vm2402_vm15 = vcmp.eq.s32.totalorder %v2386_v63, %v3713_v26  ;;  %vm2309_vm9 = vcmp.eq.s32.totalorder %v4729_v37, %v3713_v26  ;;  %v2228_v3 = vadd.f32 %v2220_v44, %v4597_v42 }
 0x484   : > { %v2369_v5 = vadd.f32 %v2361_v20, %v2321_v27  ;;  %v2410_v16 = vsel %vm2402_vm15, %v3993_v11, 0.0  ;;  %v2317_v33 = vsel %vm2309_vm9, %v4345_v36, 0.0  ;;  %v2318_v20 = vsel %vm2310_vm13, %v4139_v24, 0.0 }
 0x485   : > { %v2418_v6 = vadd.f32 %v2410_v16, %v2370_v39  ;;  %v2325_v19 = vadd.f32 %v2317_v33, %v4718_v55  ;;  %vm2358_vm15 = vcmp.eq.s32.totalorder %v2350_v28, %v3713_v26  ;;  %v2326_v55 = vadd.f32 %v2318_v20, %v4732_v50  ;;  %v2423_v16 = vld [vmem:[%s4764_s24] sm:$0x1] }
 0x486   : > { %v2417_v32 = vadd.f32 %v2409_v12, %v2369_v5  ;;  %v2366_v62 = vsel %vm2358_vm15, %v4139_v24, 0.0 }
 0x487   : > { %v2430_v11 = vsel %vm2424_vm3, %v2418_v6, 0.0  ;;  %v2374_v21 = vadd.f32 %v2366_v62, %v2326_v55 }
 0x488   : > { %v2428_v4 = vsel %vm2424_vm3, %v2417_v32, 0.0 }
 0x48a   : > { %v2377_v59 = vpop.permute.xlu1 %2376 }
 0x48b   : > { %vm2399_vm2 = vcmp.eq.s32.totalorder %v2377_v59, %v3713_v26  ;;  %v2347_v17 = vpop.permute.xlu2 %2346 }
 0x48c   : > { %v2407_v10 = vsel %vm2399_vm2, %v3787_v23, 0.0  ;;  %vm2357_vm10 = vcmp.eq.s32.totalorder %v2347_v17, %v3713_v26 }
 0x48d   : > { %v2415_v15 = vadd.f32 %v2407_v10, %v2367_v58  ;;  %v2365_v25 = vsel %vm2357_vm10, %v4345_v36, 0.0 }
 0x48e   : > { %v2373_v35 = vadd.f32 %v2365_v25, %v2325_v19 }
 0x48f   : > { %v2425_v40 = vsel %vm2424_vm3, %v2415_v15, 0.0 }
 0x490   : > { %v2427_v61 = vadd.f32 %v2426_v45, %v2425_v40 }
 0x492   : > { %v2429_v49 = vadd.f32 %v2428_v4, %v2427_v61 }
 0x493   : > { %v2341_v23 = vpop.permute.xlu1 %2340 }
 0x494   : > { %vm2355_vm6 = vcmp.eq.s32.totalorder %v2341_v23, %v3713_v26  ;;  %v2431_v14 = vadd.f32 %v2430_v11, %v2429_v49  ;;  %v2395_v53 = vpop.permute.xlu2 %2394 }
 0x495   : > { %v2363_v56 = vsel %vm2355_vm6, %v3897_v7, 0.0  ;;  %v2268_v7 = vsel %vm2260_vm7, %v4268_v60, 0.0  ;;  %vm2405_vm12 = vcmp.eq.s32.totalorder %v2395_v53, %v3713_v26 }
 0x496   : > { %v2371_v43 = vadd.f32 %v2363_v56, %v2323_v0  ;;  %v2276_v46 = vadd.f32 %v2268_v7, %v2228_v3  ;;  %v2413_v42 = vsel %vm2405_vm12, %v4345_v36, 0.0 }
 0x497   : > { %v2421_v27 = vadd.f32 %v2413_v42, %v2373_v35 }
 0x498   : > { %v2419_v51 = vadd.f32 %v2411_v31, %v2371_v43  ;;  %v2324_v34 = vadd.f32 %v2316_v9, %v2276_v46 }
 0x499   : > { %v2436_v36 = vsel %vm2424_vm3, %v2421_v27, 0.0 }
 0x49a   : > { %v2432_v1 = vsel %vm2424_vm3, %v2419_v51, 0.0 }
 0x49b   : > { %v2344_v13 = vpop.permute.xlu1 %2343  ;;  %v2433_v29 = vadd.f32 %v2432_v1, %v2431_v14 }
 0x49c   : > { %vm2356_vm11 = vcmp.eq.s32.totalorder %v2344_v13, %v3713_v26 }
 0x49d   : > { %v2364_v37 = vsel %vm2356_vm11, %v4268_v60, 0.0 }
 0x49e   : > { %v2372_v18 = vadd.f32 %v2364_v37, %v2324_v34 }
 0x4a4   : > { %v2392_v48 = vpop.permute.xlu1 %2391 }
 0x4a5   : > { %vm2404_vm14 = vcmp.eq.s32.totalorder %v2392_v48, %v3713_v26 }
 0x4a6   : > { %v2412_v63 = vsel %vm2404_vm14, %v4268_v60, 0.0 }
 0x4a7   : > { %v2420_v54 = vadd.f32 %v2412_v63, %v2372_v18 }
 0x4a9   : > { %v2434_v30 = vsel %vm2424_vm3, %v2420_v54, 0.0 }
 0x4aa   : > { %v2435_v38 = vadd.f32 %v2434_v30, %v2433_v29 }
 0x4ac   : > { %v2437_v47 = vadd.f32 %v2436_v36, %v2435_v38  ;;  %v2398_v5 = vpop.permute.xlu1 %2397 }
 0x4ad   : > { %vm2406_vm2 = vcmp.eq.s32.totalorder %v2398_v5, %v3713_v26 }
 0x4ae   : > { %v2414_v60 = vsel %vm2406_vm2, %v4139_v24, 0.0 }
 0x4af   : > { %v2422_v22 = vadd.f32 %v2414_v60, %v2374_v21 }
 0x4b1   : > { %v2438_v59 = vsel %vm2424_vm3, %v2422_v22, 0.0 }
 0x4b2   : > { %v2439_v50 = vadd.f32 %v2438_v59, %v2437_v47 }
 0x4b4   : > { %v2440_v58 = vrot.slane %v2439_v50, 4 }
 0x4b6   : > { %v2441_v2 = vadd.f32 %v2440_v58, %v2439_v50 }
 0x4b8   : > { %v2442_v52 = vrot.slane %v2441_v2, 2 }
 0x4ba   : > { %v2443_v8 = vadd.f32 %v2442_v52, %v2441_v2 }
 0x4bc   : > { %v2444_v12 = vrot.slane %v2443_v8, 1 }
 0x4be   : > { %v2445_v10 = vadd.f32 %v2444_v12, %v2443_v8 }
 0x4c0   : > { %v2446_v39 = vadd.f32 %v2445_v10, %v2423_v16 }
 0x4c2   : > { %2448 = vst.msk [vmem:[%s4764_s24] sm:$0x1] %vm498_vm0, %v2446_v39 }
 0x4c3 PF: > { %s16_s20 = sadd.s32 1, %s2959_s20   ;;  %s5074_s18 = smov %s2955_s19 }
 0x4c4   : > { %p13_p5 = scmp.ge.s32.totalorder %s16_s20, 4   ;;  %s5075_s19 = smov %s5077_s21 }
 0x4c6   :  { %15 = sbr.rel (!%p13_p5) target bundleno = 2 (0x2), region = 96 }

// kernel: local_grouper_forward.6
= control target key start
LH: loop header
LB: loop body
LE: loop exit
PB: predicated region body
PF: predicated region fallthrough
CT: control target
= control target key end

     0   :  { %s588_s12 = smov 0   ;;  %s590_s13 = smov 0   ;;  %s695_s0 = inlined_call_operand.vmem [shape: f32[2,32,3], index: 0, kind: input, shape index: {}]   ;;  %s696_s1 = inlined_call_operand.vmem [shape: f32[2,64,3], index: 1, kind: input, shape index: {}]   ;;  %s697_s2 = inlined_call_operand.vmem [shape: f32[2,1,64], index: 2, kind: input, shape index: {}]   ;;  %s698_s3 = inlined_call_operand.vmem [shape: f32[2,32,64], index: 3, kind: output, shape index: {}]  }
   0x1   :  { %s592_s14 = smov 0  }
   0x2 LB: > { %s25_s15 = sadd.s32 1, %s562_s13  ;;  %p471_p0 = scmp.ge.s32.totalorder %s566_s14, 1  ;;  %s566_s14 = sphi %s592_s14, %s13_s14   ;;  %s562_s13 = sphi %s590_s13, %s700_s13   ;;  %s558_s12 = sphi %s588_s12, %s699_s12  }
   0x3   : > { %p27_p1 = scmp.ge.s32.totalorder %s25_s15, 2  ;;  %p176_p2 = scmp.lt.s32.totalorder %s566_s14, 3 }
   0x5   : > { %s702_s15 = smov (%p27_p1, %s25_s15), 0  ;;  %p177_p3 = pnand %p471_p0, %p176_p2 }
   0x6   : > { %p217_p4 = scmp.lt.s32.totalorder (!%p177_p3), %s558_s12, 1 }
   0x7   : > { %180 = sbr.rel (%p177_p3) target bundleno = 187 (0xbb), region = 32 }
   0xc   : > { %s704_s12 = smov (!%p217_p4, %s558_s12), 1  ;;  %vm256_vm0 = vcmask 23552   ;;  %vm354_vm1 = vcmask 523264  }
   0xd   : > { %s493_s16 = sshll.u32 %s704_s12, 6  ;;  %s492_s17 = sshll.u32 %s704_s12, 5 }
   0xe   : > { %s613_s20 = scalar_lea.vmem %s696_s1, %s493_s16  ;;  %s224_s23 = scalar_lea.vmem %s695_s0, %s492_s17 }
   0xf   : > { %v255_v0 = vld [vmem:[%s613_s20 + $0x38] sm:$0xff]  ;;  %v254_v1 = vld [vmem:[%s613_s20 + $0x30] sm:$0xff]  ;;  %v244_v2 = vld [vmem:[%s224_s23] sm:$0xff]  ;;  %s233_s26 = scalar_lea.vmem %s697_s2, %s704_s12  ;;  %s242_s4 = scalar_lea.vmem %s698_s3, %s492_s17 }
  0x10   : > { %478 = vmatpush.xpose.msk.msra.mxu0 %vm256_vm0, %v255_v0  ;;  %496 = vmatpush.xpose.msk.msra.mxu2 %vm256_vm0, %v255_v0  ;;  %v246_v3 = vld [vmem:[%s224_s23 + $0x10] sm:$0xff]  ;;  %v322_v4 = vmul.f32 %v244_v2, %v244_v2  ;;  %v253_v7 = vld [vmem:[%s613_s20 + $0x28] sm:$0xff]  ;;  %v247_v9 = vld [vmem:[%s224_s23 + $0x18] sm:$0xff] }
  0x11   : > { %497 = vmatpush.xpose.msk.msra.mxu3 %vm256_vm0, %v255_v0  ;;  %495 = vmatpush.xpose.msk.msra.mxu1 %vm256_vm0, %v255_v0  ;;  %v324_v5 = vmul.f32 %v246_v3, %v246_v3  ;;  %v245_v10 = vld [vmem:[%s224_s23 + $0x8] sm:$0xff]  ;;  %v325_v11 = vmul.f32 %v247_v9, %v247_v9  ;;  %v252_v13 = vld [vmem:[%s613_s20 + $0x20] sm:$0xff]  ;;  %v251_v16 = vld [vmem:[%s613_s20 + $0x18] sm:$0xff] }
  0x12   : > { %v326_v6 = vsel %vm256_vm0, %v322_v4, 0.0  ;;  %v323_v12 = vmul.f32 %v245_v10, %v245_v10  ;;  %v250_v17 = vld [vmem:[%s613_s20 + $0x10] sm:$0xff]  ;;  %v249_v18 = vld [vmem:[%s613_s20 + $0x8] sm:$0xff]  ;;  %v248_v19 = vld [vmem:[%s613_s20] sm:$0xff] }
  0x13   : > { %v332_v8 = vsel %vm256_vm0, %v324_v5, 0.0  ;;  %327 = vadd.xlane.f32.xlu0 %v326_v6  ;;  %v335_v14 = vsel %vm256_vm0, %v325_v11, 0.0  ;;  %v543_v24 = vld [vmem:[%s233_s26] ss:$0 sm:$0xff] }
  0x14   : > { %479 = vmatpush.xpose.msk.msra.mxu0 %vm256_vm0, %v254_v1  ;;  %499 = vmatpush.xpose.msk.msra.mxu2 %vm256_vm0, %v254_v1  ;;  %v329_v15 = vsel %vm256_vm0, %v323_v12, 0.0 }
  0x15   : > { %500 = vmatpush.xpose.msk.msra.mxu3 %vm256_vm0, %v254_v1  ;;  %498 = vmatpush.xpose.msk.msra.mxu1 %vm256_vm0, %v254_v1 }
  0x16   : > { %333 = vadd.xlane.f32.xlu1 %v332_v8 }
  0x18   : > { %480 = vmatpush.xpose.msk.msra.mxu0 %vm256_vm0, %v253_v7  ;;  %502 = vmatpush.xpose.msk.msra.mxu2 %vm256_vm0, %v253_v7 }
  0x19   : > { %503 = vmatpush.xpose.msk.msra.mxu3 %vm256_vm0, %v253_v7  ;;  %501 = vmatpush.xpose.msk.msra.mxu1 %vm256_vm0, %v253_v7 }
  0x1b   : > { %330 = vadd.xlane.f32.xlu0 %v329_v15 }
  0x1c   : > { %481 = vmatpush.xpose.msk.msra.mxu0 %vm256_vm0, %v252_v13  ;;  %505 = vmatpush.xpose.msk.msra.mxu2 %vm256_vm0, %v252_v13 }
  0x1d   : > { %506 = vmatpush.xpose.msk.msra.mxu3 %vm256_vm0, %v252_v13  ;;  %504 = vmatpush.xpose.msk.msra.mxu1 %vm256_vm0, %v252_v13 }
  0x1e   : > { %336 = vadd.xlane.f32.xlu1 %v335_v14 }
  0x20   : > { %482 = vmatpush.xpose.msk.msra.mxu0 %vm256_vm0, %v251_v16  ;;  %508 = vmatpush.xpose.msk.msra.mxu2 %vm256_vm0, %v251_v16 }
  0x21   : > { %509 = vmatpush.xpose.msk.msra.mxu3 %vm256_vm0, %v251_v16  ;;  %507 = vmatpush.xpose.msk.msra.mxu1 %vm256_vm0, %v251_v16 }
  0x24   : > { %483 = vmatpush.xpose.msk.msra.mxu0 %vm256_vm0, %v250_v17  ;;  %511 = vmatpush.xpose.msk.msra.mxu2 %vm256_vm0, %v250_v17 }
  0x25   : > { %512 = vmatpush.xpose.msk.msra.mxu3 %vm256_vm0, %v250_v17  ;;  %510 = vmatpush.xpose.msk.msra.mxu1 %vm256_vm0, %v250_v17 }
  0x28   : > { %484 = vmatpush.xpose.msk.msra.mxu0 %vm256_vm0, %v249_v18  ;;  %514 = vmatpush.xpose.msk.msra.mxu2 %vm256_vm0, %v249_v18 }
  0x29   : > { %515 = vmatpush.xpose.msk.msra.mxu3 %vm256_vm0, %v249_v18  ;;  %513 = vmatpush.xpose.msk.msra.mxu1 %vm256_vm0, %v249_v18 }
  0x2c   : > { %485 = vmatpush.xpose.msk.msra.mxu0 %vm256_vm0, %v248_v19  ;;  %517 = vmatpush.xpose.msk.msra.mxu2 %vm256_vm0, %v248_v19 }
  0x2d   : > { %518 = vmatpush.xpose.msk.msra.mxu3 %vm256_vm0, %v248_v19  ;;  %516 = vmatpush.xpose.msk.msra.mxu1 %vm256_vm0, %v248_v19 }
  0x2f   : > { %486 = vmatmul.msk.f32.vlgmr.msra.gmra.mxu0 %vm256_vm0, %v244_v2  ;;  %488 = vmatmul.msk.f32.vlgmr.msra.gmra.mxu2 %vm256_vm0, %v246_v3 }
  0x30   : > { %489 = vmatmul.msk.f32.vlgmr.msra.gmra.mxu3 %vm256_vm0, %v247_v9  ;;  %487 = vmatmul.msk.f32.vlgmr.msra.gmra.mxu1 %vm256_vm0, %v245_v10 }
  0x86   : > { %v328_v20 = vpop.xlane.xlu0 %327 }
  0x89   : > { %v334_v21 = vpop.xlane.xlu1 %333 }
  0x8e   : > { %v331_v26 = vpop.xlane.xlu0 %330 }
  0x91   : > { %v337_v35 = vpop.xlane.xlu1 %336 }
  0xac   : > { %v310_v22 = vpop.f32.mrf.mxu0 }
  0xad   : > { %v338_v23 = vmul.f32 2.0, %v310_v22  ;;  %v313_v25 = vpop.f32.mrf.mxu1 }
  0xae   : > { %v339_v27 = vmul.f32 2.0, %v313_v25 }
  0xaf   : > { %v342_v28 = vsub.f32 %v338_v23, %v328_v20 }
  0xb0   : > { %v343_v29 = vsub.f32 %v339_v27, %v331_v26 }
  0xb1   : > { %v350_v30 = vsub.f32 %v342_v28, %v543_v24 }
  0xb2   : > { %v316_v31 = vpop.f32.mrf.mxu2  ;;  %v351_v32 = vsub.f32 %v343_v29, %v543_v24 }
  0xb3   : > { %355 = vst.msk [vmem:[%s242_s4] sm:$0xff] %vm354_vm1, %v350_v30  ;;  %v340_v33 = vmul.f32 2.0, %v316_v31  ;;  %v319_v34 = vpop.f32.mrf.mxu3 }
  0xb4   : > { %v341_v36 = vmul.f32 2.0, %v319_v34  ;;  %356 = vst.msk [vmem:[%s242_s4 + $0x8] sm:$0xff] %vm354_vm1, %v351_v32 }
  0xb5   : > { %v344_v37 = vsub.f32 %v340_v33, %v334_v21 }
  0xb6   : > { %v345_v38 = vsub.f32 %v341_v36, %v337_v35 }
  0xb7   : > { %v352_v39 = vsub.f32 %v344_v37, %v543_v24 }
  0xb8   : > { %v353_v40 = vsub.f32 %v345_v38, %v543_v24 }
  0xb9   : > { %357 = vst.msk [vmem:[%s242_s4 + $0x10] sm:$0xff] %vm354_vm1, %v352_v39 }
  0xba   : > { %358 = vst.msk [vmem:[%s242_s4 + $0x18] sm:$0xff] %vm354_vm1, %v353_v40 }
  0xbb PF: > { %s13_s14 = sadd.s32 1, %s566_s14   ;;  %s699_s12 = smov %s562_s13 }
  0xbc   : > { %p10_p5 = scmp.ge.s32.totalorder %s13_s14, 4   ;;  %s700_s13 = smov %s702_s15 }
  0xbe   :  { %12 = sbr.rel (!%p10_p5) target bundleno = 2 (0x2), region = 68 }

// kernel: local_grouper_forward.7
= control target key start
LH: loop header
LB: loop body
LE: loop exit
PB: predicated region body
PF: predicated region fallthrough
CT: control target
= control target key end

     0   :  { %s1814_s15 = smov 0   ;;  %s1816_s16 = smov 0   ;;  %s3018_s0 = inlined_call_operand.vmem [shape: f32[2,32,8,8], index: 0, kind: input, shape index: {}]   ;;  %s3019_s1 = inlined_call_operand.vmem [shape: f32[2,1,8], index: 1, kind: input, shape index: {}]   ;;  %s3020_s2 = inlined_call_operand.vmem [shape: f32[2,32,8], index: 2, kind: input, shape index: {}]   ;;  %s3021_s3 = inlined_call_operand.vmem [shape: f32[2,32,8], index: 3, kind: input, shape index: {}]   ;;  %s3022_s4 = inlined_call_operand.vmem [shape: f32[2,32,8,2,8], index: 4, kind: output, shape index: {}]  }
   0x1   :  { %s1818_s17 = smov 0  }
   0x2 LB: > { %s26_s18 = sadd.s32 1, %s1783_s16  ;;  %p1724_p0 = scmp.ge.s32.totalorder %s1787_s17, 1  ;;  %s1787_s17 = sphi %s1818_s17, %s14_s17   ;;  %s1783_s16 = sphi %s1816_s16, %s3024_s16   ;;  %s1779_s15 = sphi %s1814_s15, %s3023_s15  }
   0x3   : > { %p28_p1 = scmp.ge.s32.totalorder %s26_s18, 2  ;;  %p225_p2 = scmp.lt.s32.totalorder %s1787_s17, 3 }
   0x5   : > { %s3026_s18 = smov (%p28_p1, %s26_s18), 0  ;;  %p226_p3 = pnand %p1724_p0, %p225_p2 }
   0x6   : > { %p282_p4 = scmp.lt.s32.totalorder (!%p226_p3), %s1779_s15, 1 }
   0x7   : > { %229 = sbr.rel (%p226_p3) target bundleno = 534 (0x216), region = 36 }
   0xc   : > { %s3028_s15 = smov (!%p282_p4, %s1779_s15), 1  ;;  %vm1005_vm0 = vcmask 57344  }
   0xd   : > { %s1735_s19 = sshll.u32 %s3028_s15, 8  ;;  %s1839_s22 = scalar_lea.vmem %s3019_s1, %s3028_s15 }
   0xe   : > { %s1844_s25 = scalar_lea.vmem %s3018_s0, %s1735_s19  ;;  %s1736_s26 = sshll.u32 %s3028_s15, 5  ;;  %v1848_v0 = vld [vmem:[%s1839_s22] ss:$0 sm:$0xff] }
   0xf   : > { %s1855_s29 = scalar_lea.vmem %s3020_s2, %s1736_s26  ;;  %v325_v1 = vld [vmem:[%s1844_s25] sm:$0xff]  ;;  %s1738_s30 = sshll.u32 %s3028_s15, 9  ;;  %v326_v4 = vld [vmem:[%s1844_s25 + $0x8] sm:$0xff]  ;;  %v327_v18 = vld [vmem:[%s1844_s25 + $0x10] sm:$0xff] }
  0x10   : > { %v361_v2 = vmul.f32 %v1848_v0, %v325_v1  ;;  %v1861_v3 = vld [vmem:[%s1855_s29] sm:$0xff]  ;;  %s1869_s7 = scalar_lea.vmem %s3022_s4, %s1738_s30  ;;  %v362_v8 = vmul.f32 %v1848_v0, %v326_v4  ;;  %v363_v21 = vmul.f32 %v1848_v0, %v327_v18  ;;  %v328_v30 = vld [vmem:[%s1844_s25 + $0x18] sm:$0xff]  ;;  %v330_v54 = vld [vmem:[%s1844_s25 + $0x28] sm:$0xff]  ;;  %s2483_s10 = scalar_lea.vmem %s3021_s3, %s1736_s26 }
  0x11   : > { %v429_v5 = vperm.slane %v1861_v3, 0  ;;  %v401_v6 = vrot.slane %v1861_v3, 1  ;;  %v402_v16 = vrot.slane %v1861_v3, 2  ;;  %v403_v28 = vrot.slane %v1861_v3, 3  ;;  %v329_v42 = vld [vmem:[%s1844_s25 + $0x20] sm:$0xff]  ;;  %v331_v4 = vld [vmem:[%s1844_s25 + $0x30] sm:$0xff] }
  0x12   : > { %v364_v33 = vmul.f32 %v1848_v0, %v328_v30  ;;  %v404_v40 = vrot.slane %v1861_v3, 4  ;;  %v365_v45 = vmul.f32 %v1848_v0, %v329_v42  ;;  %v405_v52 = vrot.slane %v1861_v3, 5 }
  0x13   : > { %v493_v7 = vadd.f32 %v429_v5, %v361_v2  ;;  %v430_v9 = vperm.slane %v401_v6, 0  ;;  %v431_v22 = vperm.slane %v402_v16, 0  ;;  %v432_v34 = vperm.slane %v403_v28, 0  ;;  %v332_v16 = vld [vmem:[%s1844_s25 + $0x38] sm:$0xff]  ;;  %v1998_v28 = vld [vmem:[%s1855_s29 + $0x8] sm:$0xff] }
  0x14   : > { %v433_v46 = vperm.slane %v404_v40, 0  ;;  %v366_v57 = vmul.f32 %v1848_v0, %v330_v54  ;;  %v434_v58 = vperm.slane %v405_v52, 0  ;;  %v406_v1 = vrot.slane %v1861_v3, 6 }
  0x15   : > { %1006 = vst.msk [vmem:[%s1869_s7] sm:$0x1] %vm1005_vm0, %v493_v7  ;;  %v557_v10 = vrot.slane %v493_v7, 1  ;;  %v558_v11 = vrot.slane %v493_v7, 2  ;;  %v559_v12 = vrot.slane %v493_v7, 3  ;;  %v560_v13 = vrot.slane %v493_v7, 4 }
  0x16   : > { %v561_v14 = vrot.slane %v493_v7, 5  ;;  %v494_v15 = vadd.f32 %v430_v9, %v362_v8  ;;  %v562_v17 = vrot.slane %v493_v7, 6  ;;  %v563_v19 = vrot.slane %v493_v7, 7 }
  0x17   : > { %1007 = vst.msk [vmem:[%s1869_s7 + $0x2] sm:$0x1] %vm1005_vm0, %v557_v10  ;;  %v495_v27 = vadd.f32 %v431_v22, %v363_v21  ;;  %v496_v39 = vadd.f32 %v432_v34, %v364_v33  ;;  %v497_v51 = vadd.f32 %v433_v46, %v365_v45  ;;  %v498_v63 = vadd.f32 %v434_v58, %v366_v57 }
  0x18   : > { %1008 = vst.msk [vmem:[%s1869_s7 + $0x4] sm:$0x1] %vm1005_vm0, %v558_v11  ;;  %v564_v20 = vrot.slane %v494_v15, 1  ;;  %v565_v23 = vrot.slane %v494_v15, 2  ;;  %v566_v24 = vrot.slane %v494_v15, 3  ;;  %v567_v25 = vrot.slane %v494_v15, 4 }
  0x19   : > { %1009 = vst.msk [vmem:[%s1869_s7 + $0x6] sm:$0x1] %vm1005_vm0, %v559_v12  ;;  %v568_v26 = vrot.slane %v494_v15, 5  ;;  %v569_v29 = vrot.slane %v494_v15, 6  ;;  %v570_v31 = vrot.slane %v494_v15, 7  ;;  %v571_v32 = vrot.slane %v495_v27, 1 }
  0x1a   : > { %1010 = vst.msk [vmem:[%s1869_s7 + $0x8] sm:$0x1] %vm1005_vm0, %v560_v13  ;;  %v572_v35 = vrot.slane %v495_v27, 2  ;;  %v573_v36 = vrot.slane %v495_v27, 3  ;;  %v574_v37 = vrot.slane %v495_v27, 4  ;;  %v575_v38 = vrot.slane %v495_v27, 5 }
  0x1b   : > { %1011 = vst.msk [vmem:[%s1869_s7 + $0xa] sm:$0x1] %vm1005_vm0, %v561_v14  ;;  %v576_v41 = vrot.slane %v495_v27, 6  ;;  %v577_v43 = vrot.slane %v495_v27, 7  ;;  %v578_v44 = vrot.slane %v496_v39, 1  ;;  %v579_v47 = vrot.slane %v496_v39, 2 }
  0x1c   : > { %1012 = vst.msk [vmem:[%s1869_s7 + $0xc] sm:$0x1] %vm1005_vm0, %v562_v17  ;;  %v580_v48 = vrot.slane %v496_v39, 3  ;;  %v581_v49 = vrot.slane %v496_v39, 4  ;;  %v582_v50 = vrot.slane %v496_v39, 5  ;;  %v583_v53 = vrot.slane %v496_v39, 6 }
  0x1d   : > { %1013 = vst.msk [vmem:[%s1869_s7 + $0xe] sm:$0x1] %vm1005_vm0, %v563_v19  ;;  %v584_v55 = vrot.slane %v496_v39, 7  ;;  %v585_v56 = vrot.slane %v497_v51, 1  ;;  %v586_v59 = vrot.slane %v497_v51, 2  ;;  %v587_v60 = vrot.slane %v497_v51, 3 }
  0x1e   : > { %1014 = vst.msk [vmem:[%s1869_s7 + $0x10] sm:$0x1] %vm1005_vm0, %v494_v15  ;;  %v588_v61 = vrot.slane %v497_v51, 4  ;;  %v589_v62 = vrot.slane %v497_v51, 5  ;;  %v590_v2 = vrot.slane %v497_v51, 6  ;;  %v591_v5 = vrot.slane %v497_v51, 7 }
  0x1f   : > { %1015 = vst.msk [vmem:[%s1869_s7 + $0x12] sm:$0x1] %vm1005_vm0, %v564_v20  ;;  %v592_v6 = vrot.slane %v498_v63, 1  ;;  %v367_v7 = vmul.f32 %v1848_v0, %v331_v4  ;;  %v435_v8 = vperm.slane %v406_v1, 0  ;;  %v593_v9 = vrot.slane %v498_v63, 2 }
  0x20   : > { %1016 = vst.msk [vmem:[%s1869_s7 + $0x14] sm:$0x1] %vm1005_vm0, %v565_v23  ;;  %v594_v10 = vrot.slane %v498_v63, 3  ;;  %v595_v11 = vrot.slane %v498_v63, 4  ;;  %v596_v12 = vrot.slane %v498_v63, 5  ;;  %v407_v14 = vrot.slane %v1861_v3, 7 }
  0x21   : > { %1017 = vst.msk [vmem:[%s1869_s7 + $0x16] sm:$0x1] %vm1005_vm0, %v566_v24  ;;  %v499_v13 = vadd.f32 %v435_v8, %v367_v7  ;;  %v597_v15 = vrot.slane %v498_v63, 6  ;;  %v598_v17 = vrot.slane %v498_v63, 7  ;;  %v368_v19 = vmul.f32 %v1848_v0, %v332_v16 }
  0x22   : > { %1018 = vst.msk [vmem:[%s1869_s7 + $0x18] sm:$0x1] %vm1005_vm0, %v567_v25  ;;  %v436_v3 = vperm.slane %v407_v14, 0 }
  0x23   : > { %1019 = vst.msk [vmem:[%s1869_s7 + $0x1a] sm:$0x1] %vm1005_vm0, %v568_v26  ;;  %v599_v18 = vrot.slane %v499_v13, 1  ;;  %v600_v20 = vrot.slane %v499_v13, 2  ;;  %v601_v21 = vrot.slane %v499_v13, 3  ;;  %v602_v22 = vrot.slane %v499_v13, 4 }
  0x24   : > { %1020 = vst.msk [vmem:[%s1869_s7 + $0x1c] sm:$0x1] %vm1005_vm0, %v569_v29  ;;  %v603_v23 = vrot.slane %v499_v13, 5  ;;  %v500_v24 = vadd.f32 %v436_v3, %v368_v19  ;;  %v604_v25 = vrot.slane %v499_v13, 6  ;;  %v333_v26 = vld [vmem:[%s1844_s25 + $0x40] sm:$0xff] }
  0x25   : > { %1021 = vst.msk [vmem:[%s1869_s7 + $0x1e] sm:$0x1] %vm1005_vm0, %v570_v31  ;;  %v369_v30 = vmul.f32 %v1848_v0, %v333_v26  ;;  %v437_v31 = vperm.slane %v1998_v28, 0 }
  0x26   : > { %1022 = vst.msk [vmem:[%s1869_s7 + $0x20] sm:$0x1] %vm1005_vm0, %v495_v27  ;;  %v605_v27 = vrot.slane %v499_v13, 7  ;;  %v606_v29 = vrot.slane %v500_v24, 1  ;;  %v608_v33 = vrot.slane %v500_v24, 3  ;;  %v609_v34 = vrot.slane %v500_v24, 4 }
  0x27   : > { %1023 = vst.msk [vmem:[%s1869_s7 + $0x22] sm:$0x1] %vm1005_vm0, %v571_v32  ;;  %v607_v32 = vrot.slane %v500_v24, 2  ;;  %v612_v40 = vrot.slane %v500_v24, 7 }
  0x28   : > { %1024 = vst.msk [vmem:[%s1869_s7 + $0x24] sm:$0x1] %vm1005_vm0, %v572_v35  ;;  %v610_v35 = vrot.slane %v500_v24, 5 }
  0x29   : > { %1025 = vst.msk [vmem:[%s1869_s7 + $0x26] sm:$0x1] %vm1005_vm0, %v573_v36  ;;  %v501_v36 = vadd.f32 %v437_v31, %v369_v30 }
  0x2a   : > { %1026 = vst.msk [vmem:[%s1869_s7 + $0x28] sm:$0x1] %vm1005_vm0, %v574_v37  ;;  %v408_v37 = vrot.slane %v1998_v28, 1 }
  0x2b   : > { %1027 = vst.msk [vmem:[%s1869_s7 + $0x2a] sm:$0x1] %vm1005_vm0, %v575_v38  ;;  %v611_v38 = vrot.slane %v500_v24, 6  ;;  %v615_v45 = vrot.slane %v501_v36, 3  ;;  %v616_v46 = vrot.slane %v501_v36, 4  ;;  %v619_v52 = vrot.slane %v501_v36, 7 }
  0x2c   : > { %1028 = vst.msk [vmem:[%s1869_s7 + $0x2c] sm:$0x1] %vm1005_vm0, %v576_v41  ;;  %v613_v41 = vrot.slane %v501_v36, 1 }
  0x2d   : > { %1029 = vst.msk [vmem:[%s1869_s7 + $0x2e] sm:$0x1] %vm1005_vm0, %v577_v43  ;;  %v438_v43 = vperm.slane %v408_v37, 0  ;;  %v339_v37 = vld [vmem:[%s1844_s25 + $0x70] sm:$0xff] }
  0x2e   : > { %1030 = vst.msk [vmem:[%s1869_s7 + $0x30] sm:$0x1] %vm1005_vm0, %v496_v39  ;;  %v334_v39 = vld [vmem:[%s1844_s25 + $0x48] sm:$0xff] }
  0x2f   : > { %1031 = vst.msk [vmem:[%s1869_s7 + $0x32] sm:$0x1] %vm1005_vm0, %v578_v44  ;;  %v370_v42 = vmul.f32 %v1848_v0, %v334_v39  ;;  %v614_v44 = vrot.slane %v501_v36, 2 }
  0x30   : > { %1032 = vst.msk [vmem:[%s1869_s7 + $0x34] sm:$0x1] %vm1005_vm0, %v579_v47  ;;  %v617_v47 = vrot.slane %v501_v36, 5 }
  0x31   : > { %1033 = vst.msk [vmem:[%s1869_s7 + $0x36] sm:$0x1] %vm1005_vm0, %v580_v48  ;;  %v502_v48 = vadd.f32 %v438_v43, %v370_v42 }
  0x32   : > { %1034 = vst.msk [vmem:[%s1869_s7 + $0x38] sm:$0x1] %vm1005_vm0, %v581_v49  ;;  %v409_v49 = vrot.slane %v1998_v28, 2 }
  0x33   : > { %1035 = vst.msk [vmem:[%s1869_s7 + $0x3a] sm:$0x1] %vm1005_vm0, %v582_v50  ;;  %v618_v50 = vrot.slane %v501_v36, 6  ;;  %v622_v57 = vrot.slane %v502_v48, 3  ;;  %v623_v58 = vrot.slane %v502_v48, 4  ;;  %v626_v1 = vrot.slane %v502_v48, 7 }
  0x34   : > { %1036 = vst.msk [vmem:[%s1869_s7 + $0x3c] sm:$0x1] %vm1005_vm0, %v583_v53  ;;  %v620_v53 = vrot.slane %v502_v48, 1 }
  0x35   : > { %1037 = vst.msk [vmem:[%s1869_s7 + $0x3e] sm:$0x1] %vm1005_vm0, %v584_v55  ;;  %v439_v55 = vperm.slane %v409_v49, 0  ;;  %v340_v49 = vld [vmem:[%s1844_s25 + $0x78] sm:$0xff] }
  0x36   : > { %1038 = vst.msk [vmem:[%s1869_s7 + $0x40] sm:$0x1] %vm1005_vm0, %v497_v51  ;;  %v335_v51 = vld [vmem:[%s1844_s25 + $0x50] sm:$0xff] }
  0x37   : > { %1039 = vst.msk [vmem:[%s1869_s7 + $0x42] sm:$0x1] %vm1005_vm0, %v585_v56  ;;  %v371_v54 = vmul.f32 %v1848_v0, %v335_v51  ;;  %v621_v56 = vrot.slane %v502_v48, 2 }
  0x38   : > { %1040 = vst.msk [vmem:[%s1869_s7 + $0x44] sm:$0x1] %vm1005_vm0, %v586_v59  ;;  %v624_v59 = vrot.slane %v502_v48, 5 }
  0x39   : > { %1041 = vst.msk [vmem:[%s1869_s7 + $0x46] sm:$0x1] %vm1005_vm0, %v587_v60  ;;  %v503_v60 = vadd.f32 %v439_v55, %v371_v54 }
  0x3a   : > { %1042 = vst.msk [vmem:[%s1869_s7 + $0x48] sm:$0x1] %vm1005_vm0, %v588_v61  ;;  %v410_v61 = vrot.slane %v1998_v28, 3 }
  0x3b   : > { %1043 = vst.msk [vmem:[%s1869_s7 + $0x4a] sm:$0x1] %vm1005_vm0, %v589_v62  ;;  %v625_v62 = vrot.slane %v502_v48, 6  ;;  %v629_v7 = vrot.slane %v503_v60, 3  ;;  %v630_v8 = vrot.slane %v503_v60, 4  ;;  %v633_v14 = vrot.slane %v503_v60, 7 }
  0x3c   : > { %1044 = vst.msk [vmem:[%s1869_s7 + $0x4c] sm:$0x1] %vm1005_vm0, %v590_v2  ;;  %v627_v2 = vrot.slane %v503_v60, 1 }
  0x3d   : > { %1045 = vst.msk [vmem:[%s1869_s7 + $0x4e] sm:$0x1] %vm1005_vm0, %v591_v5  ;;  %v440_v5 = vperm.slane %v410_v61, 0  ;;  %v2153_v61 = vld [vmem:[%s1855_s29 + $0x10] sm:$0xff] }
  0x3e   : > { %1046 = vst.msk [vmem:[%s1869_s7 + $0x50] sm:$0x1] %vm1005_vm0, %v498_v63  ;;  %v336_v63 = vld [vmem:[%s1844_s25 + $0x58] sm:$0xff] }
  0x3f   : > { %1047 = vst.msk [vmem:[%s1869_s7 + $0x52] sm:$0x1] %vm1005_vm0, %v592_v6  ;;  %v372_v4 = vmul.f32 %v1848_v0, %v336_v63  ;;  %v628_v6 = vrot.slane %v503_v60, 2 }
  0x40   : > { %1048 = vst.msk [vmem:[%s1869_s7 + $0x54] sm:$0x1] %vm1005_vm0, %v593_v9  ;;  %v631_v9 = vrot.slane %v503_v60, 5 }
  0x41   : > { %1049 = vst.msk [vmem:[%s1869_s7 + $0x56] sm:$0x1] %vm1005_vm0, %v594_v10  ;;  %v504_v10 = vadd.f32 %v440_v5, %v372_v4 }
  0x42   : > { %1050 = vst.msk [vmem:[%s1869_s7 + $0x58] sm:$0x1] %vm1005_vm0, %v595_v11  ;;  %v411_v11 = vrot.slane %v1998_v28, 4 }
  0x43   : > { %1051 = vst.msk [vmem:[%s1869_s7 + $0x5a] sm:$0x1] %vm1005_vm0, %v596_v12  ;;  %v632_v12 = vrot.slane %v503_v60, 6  ;;  %v636_v19 = vrot.slane %v504_v10, 3  ;;  %v637_v3 = vrot.slane %v504_v10, 4 }
  0x44   : > { %1052 = vst.msk [vmem:[%s1869_s7 + $0x5c] sm:$0x1] %vm1005_vm0, %v597_v15  ;;  %v634_v15 = vrot.slane %v504_v10, 1 }
  0x45   : > { %1053 = vst.msk [vmem:[%s1869_s7 + $0x5e] sm:$0x1] %vm1005_vm0, %v598_v17  ;;  %v441_v17 = vperm.slane %v411_v11, 0 }
  0x46   : > { %1054 = vst.msk [vmem:[%s1869_s7 + $0x60] sm:$0x1] %vm1005_vm0, %v499_v13  ;;  %v337_v13 = vld [vmem:[%s1844_s25 + $0x60] sm:$0xff] }
  0x47   : > { %1055 = vst.msk [vmem:[%s1869_s7 + $0x62] sm:$0x1] %vm1005_vm0, %v599_v18  ;;  %v373_v16 = vmul.f32 %v1848_v0, %v337_v13  ;;  %v635_v18 = vrot.slane %v504_v10, 2 }
  0x48   : > { %1056 = vst.msk [vmem:[%s1869_s7 + $0x64] sm:$0x1] %vm1005_vm0, %v600_v20  ;;  %v638_v20 = vrot.slane %v504_v10, 5 }
  0x49   : > { %1057 = vst.msk [vmem:[%s1869_s7 + $0x66] sm:$0x1] %vm1005_vm0, %v601_v21  ;;  %v505_v21 = vadd.f32 %v441_v17, %v373_v16 }
  0x4a   : > { %1058 = vst.msk [vmem:[%s1869_s7 + $0x68] sm:$0x1] %vm1005_vm0, %v602_v22  ;;  %v412_v22 = vrot.slane %v1998_v28, 5 }
  0x4b   : > { %1059 = vst.msk [vmem:[%s1869_s7 + $0x6a] sm:$0x1] %vm1005_vm0, %v603_v23  ;;  %v639_v23 = vrot.slane %v504_v10, 6  ;;  %v641_v26 = vrot.slane %v505_v21, 1  ;;  %v642_v30 = vrot.slane %v505_v21, 2  ;;  %v643_v31 = vrot.slane %v505_v21, 3 }
  0x4c   : > { %1060 = vst.msk [vmem:[%s1869_s7 + $0x6c] sm:$0x1] %vm1005_vm0, %v604_v25  ;;  %v640_v25 = vrot.slane %v504_v10, 7 }
  0x4d   : > { %1061 = vst.msk [vmem:[%s1869_s7 + $0x6e] sm:$0x1] %vm1005_vm0, %v605_v27 }
  0x4e   : > { %1062 = vst.msk [vmem:[%s1869_s7 + $0x70] sm:$0x1] %vm1005_vm0, %v500_v24  ;;  %v338_v24 = vld [vmem:[%s1844_s25 + $0x68] sm:$0xff] }
  0x4f   : > { %1063 = vst.msk [vmem:[%s1869_s7 + $0x72] sm:$0x1] %vm1005_vm0, %v606_v29  ;;  %v374_v27 = vmul.f32 %v1848_v0, %v338_v24  ;;  %v442_v29 = vperm.slane %v412_v22, 0 }
  0x50   : > { %1064 = vst.msk [vmem:[%s1869_s7 + $0x74] sm:$0x1] %vm1005_vm0, %v607_v32  ;;  %v644_v32 = vrot.slane %v505_v21, 4 }
  0x51   : > { %1065 = vst.msk [vmem:[%s1869_s7 + $0x76] sm:$0x1] %vm1005_vm0, %v608_v33  ;;  %v645_v33 = vrot.slane %v505_v21, 5 }
  0x52   : > { %1066 = vst.msk [vmem:[%s1869_s7 + $0x78] sm:$0x1] %vm1005_vm0, %v609_v34  ;;  %v506_v34 = vadd.f32 %v442_v29, %v374_v27 }
  0x53   : > { %1067 = vst.msk [vmem:[%s1869_s7 + $0x7a] sm:$0x1] %vm1005_vm0, %v610_v35  ;;  %v413_v35 = vrot.slane %v1998_v28, 6 }
  0x54   : > { %1068 = vst.msk [vmem:[%s1869_s7 + $0x7c] sm:$0x1] %vm1005_vm0, %v611_v38  ;;  %v647_v38 = vrot.slane %v505_v21, 7  ;;  %v648_v39 = vrot.slane %v506_v34, 1  ;;  %v649_v42 = vrot.slane %v506_v34, 2  ;;  %v650_v43 = vrot.slane %v506_v34, 3 }
  0x55   : > { %1069 = vst.msk [vmem:[%s1869_s7 + $0x7e] sm:$0x1] %vm1005_vm0, %v612_v40  ;;  %v375_v40 = vmul.f32 %v1848_v0, %v339_v37 }
  0x56   : > { %1070 = vst.msk [vmem:[%s1869_s7 + $0x80] sm:$0x1] %vm1005_vm0, %v501_v36  ;;  %v646_v36 = vrot.slane %v505_v21, 6 }
  0x57   : > { %1071 = vst.msk [vmem:[%s1869_s7 + $0x82] sm:$0x1] %vm1005_vm0, %v613_v41  ;;  %v443_v41 = vperm.slane %v413_v35, 0 }
  0x58   : > { %1072 = vst.msk [vmem:[%s1869_s7 + $0x84] sm:$0x1] %vm1005_vm0, %v614_v44  ;;  %v651_v44 = vrot.slane %v506_v34, 4 }
  0x59   : > { %1073 = vst.msk [vmem:[%s1869_s7 + $0x86] sm:$0x1] %vm1005_vm0, %v615_v45  ;;  %v652_v45 = vrot.slane %v506_v34, 5 }
  0x5a   : > { %1074 = vst.msk [vmem:[%s1869_s7 + $0x88] sm:$0x1] %vm1005_vm0, %v616_v46  ;;  %v507_v46 = vadd.f32 %v443_v41, %v375_v40 }
  0x5b   : > { %1075 = vst.msk [vmem:[%s1869_s7 + $0x8a] sm:$0x1] %vm1005_vm0, %v617_v47  ;;  %v414_v47 = vrot.slane %v1998_v28, 7 }
  0x5c   : > { %1076 = vst.msk [vmem:[%s1869_s7 + $0x8c] sm:$0x1] %vm1005_vm0, %v618_v50  ;;  %v654_v50 = vrot.slane %v506_v34, 7  ;;  %v655_v51 = vrot.slane %v507_v46, 1  ;;  %v657_v54 = vrot.slane %v507_v46, 3  ;;  %v658_v55 = vrot.slane %v507_v46, 4 }
  0x5d   : > { %1077 = vst.msk [vmem:[%s1869_s7 + $0x8e] sm:$0x1] %vm1005_vm0, %v619_v52  ;;  %v376_v52 = vmul.f32 %v1848_v0, %v340_v49  ;;  %v444_v28 = vperm.slane %v414_v47, 0 }
  0x5e   : > { %1078 = vst.msk [vmem:[%s1869_s7 + $0x90] sm:$0x1] %vm1005_vm0, %v502_v48  ;;  %v653_v48 = vrot.slane %v506_v34, 6 }
  0x5f   : > { %1079 = vst.msk [vmem:[%s1869_s7 + $0x92] sm:$0x1] %vm1005_vm0, %v620_v53  ;;  %v656_v53 = vrot.slane %v507_v46, 2 }
  0x60   : > { %1080 = vst.msk [vmem:[%s1869_s7 + $0x94] sm:$0x1] %vm1005_vm0, %v621_v56  ;;  %v659_v56 = vrot.slane %v507_v46, 5 }
  0x61   : > { %1081 = vst.msk [vmem:[%s1869_s7 + $0x96] sm:$0x1] %vm1005_vm0, %v622_v57  ;;  %v508_v57 = vadd.f32 %v444_v28, %v376_v52 }
  0x62   : > { %1082 = vst.msk [vmem:[%s1869_s7 + $0x98] sm:$0x1] %vm1005_vm0, %v623_v58  ;;  %v660_v58 = vrot.slane %v507_v46, 6 }
  0x63   : > { %1083 = vst.msk [vmem:[%s1869_s7 + $0x9a] sm:$0x1] %vm1005_vm0, %v624_v59  ;;  %v341_v59 = vld [vmem:[%s1844_s25 + $0x80] sm:$0xff]  ;;  %v664_v4 = vrot.slane %v508_v57, 3  ;;  %v665_v5 = vrot.slane %v508_v57, 4  ;;  %v668_v11 = vrot.slane %v508_v57, 7 }
  0x64   : > { %1084 = vst.msk [vmem:[%s1869_s7 + $0x9c] sm:$0x1] %vm1005_vm0, %v625_v62  ;;  %v662_v62 = vrot.slane %v508_v57, 1  ;;  %v377_v63 = vmul.f32 %v1848_v0, %v341_v59 }
  0x65   : > { %1085 = vst.msk [vmem:[%s1869_s7 + $0x9e] sm:$0x1] %vm1005_vm0, %v626_v1  ;;  %v445_v1 = vperm.slane %v2153_v61, 0 }
  0x66   : > { %1086 = vst.msk [vmem:[%s1869_s7 + $0xa0] sm:$0x1] %vm1005_vm0, %v503_v60  ;;  %v661_v60 = vrot.slane %v507_v46, 7 }
  0x67   : > { %1087 = vst.msk [vmem:[%s1869_s7 + $0xa2] sm:$0x1] %vm1005_vm0, %v627_v2  ;;  %v663_v2 = vrot.slane %v508_v57, 2 }
  0x68   : > { %1088 = vst.msk [vmem:[%s1869_s7 + $0xa4] sm:$0x1] %vm1005_vm0, %v628_v6  ;;  %v666_v6 = vrot.slane %v508_v57, 5 }
  0x69   : > { %1089 = vst.msk [vmem:[%s1869_s7 + $0xa6] sm:$0x1] %vm1005_vm0, %v629_v7  ;;  %v509_v7 = vadd.f32 %v445_v1, %v377_v63 }
  0x6a   : > { %1090 = vst.msk [vmem:[%s1869_s7 + $0xa8] sm:$0x1] %vm1005_vm0, %v630_v8  ;;  %v415_v8 = vrot.slane %v2153_v61, 1 }
  0x6b   : > { %1091 = vst.msk [vmem:[%s1869_s7 + $0xaa] sm:$0x1] %vm1005_vm0, %v631_v9  ;;  %v667_v9 = vrot.slane %v508_v57, 6  ;;  %v671_v16 = vrot.slane %v509_v7, 3  ;;  %v672_v17 = vrot.slane %v509_v7, 4  ;;  %v675_v22 = vrot.slane %v509_v7, 7 }
  0x6c   : > { %1092 = vst.msk [vmem:[%s1869_s7 + $0xac] sm:$0x1] %vm1005_vm0, %v632_v12  ;;  %v669_v12 = vrot.slane %v509_v7, 1 }
  0x6d   : > { %1093 = vst.msk [vmem:[%s1869_s7 + $0xae] sm:$0x1] %vm1005_vm0, %v633_v14  ;;  %v446_v14 = vperm.slane %v415_v8, 0  ;;  %v347_v8 = vld [vmem:[%s1844_s25 + $0xb0] sm:$0xff] }
  0x6e   : > { %1094 = vst.msk [vmem:[%s1869_s7 + $0xb0] sm:$0x1] %vm1005_vm0, %v504_v10  ;;  %v342_v10 = vld [vmem:[%s1844_s25 + $0x88] sm:$0xff] }
  0x6f   : > { %1095 = vst.msk [vmem:[%s1869_s7 + $0xb2] sm:$0x1] %vm1005_vm0, %v634_v15  ;;  %v378_v13 = vmul.f32 %v1848_v0, %v342_v10  ;;  %v670_v15 = vrot.slane %v509_v7, 2 }
  0x70   : > { %1096 = vst.msk [vmem:[%s1869_s7 + $0xb4] sm:$0x1] %vm1005_vm0, %v635_v18  ;;  %v673_v18 = vrot.slane %v509_v7, 5 }
  0x71   : > { %1097 = vst.msk [vmem:[%s1869_s7 + $0xb6] sm:$0x1] %vm1005_vm0, %v636_v19  ;;  %v510_v19 = vadd.f32 %v446_v14, %v378_v13 }
  0x72   : > { %1098 = vst.msk [vmem:[%s1869_s7 + $0xb8] sm:$0x1] %vm1005_vm0, %v637_v3  ;;  %v416_v3 = vrot.slane %v2153_v61, 2 }
  0x73   : > { %1099 = vst.msk [vmem:[%s1869_s7 + $0xba] sm:$0x1] %vm1005_vm0, %v638_v20  ;;  %v674_v20 = vrot.slane %v509_v7, 6  ;;  %v678_v27 = vrot.slane %v510_v19, 3  ;;  %v679_v29 = vrot.slane %v510_v19, 4  ;;  %v682_v35 = vrot.slane %v510_v19, 7 }
  0x74   : > { %1100 = vst.msk [vmem:[%s1869_s7 + $0xbc] sm:$0x1] %vm1005_vm0, %v639_v23  ;;  %v676_v23 = vrot.slane %v510_v19, 1 }
  0x75   : > { %1101 = vst.msk [vmem:[%s1869_s7 + $0xbe] sm:$0x1] %vm1005_vm0, %v640_v25  ;;  %v447_v25 = vperm.slane %v416_v3, 0  ;;  %v348_v3 = vld [vmem:[%s1844_s25 + $0xb8] sm:$0xff] }
  0x76   : > { %1102 = vst.msk [vmem:[%s1869_s7 + $0xc0] sm:$0x1] %vm1005_vm0, %v505_v21  ;;  %v343_v21 = vld [vmem:[%s1844_s25 + $0x90] sm:$0xff] }
  0x77   : > { %1103 = vst.msk [vmem:[%s1869_s7 + $0xc2] sm:$0x1] %vm1005_vm0, %v641_v26  ;;  %v379_v24 = vmul.f32 %v1848_v0, %v343_v21  ;;  %v677_v26 = vrot.slane %v510_v19, 2 }
  0x78   : > { %1104 = vst.msk [vmem:[%s1869_s7 + $0xc4] sm:$0x1] %vm1005_vm0, %v642_v30  ;;  %v680_v30 = vrot.slane %v510_v19, 5 }
  0x79   : > { %1105 = vst.msk [vmem:[%s1869_s7 + $0xc6] sm:$0x1] %vm1005_vm0, %v643_v31  ;;  %v511_v31 = vadd.f32 %v447_v25, %v379_v24 }
  0x7a   : > { %1106 = vst.msk [vmem:[%s1869_s7 + $0xc8] sm:$0x1] %vm1005_vm0, %v644_v32  ;;  %v417_v32 = vrot.slane %v2153_v61, 3 }
  0x7b   : > { %1107 = vst.msk [vmem:[%s1869_s7 + $0xca] sm:$0x1] %vm1005_vm0, %v645_v33  ;;  %v681_v33 = vrot.slane %v510_v19, 6  ;;  %v685_v40 = vrot.slane %v511_v31, 3  ;;  %v686_v41 = vrot.slane %v511_v31, 4  ;;  %v689_v47 = vrot.slane %v511_v31, 7 }
  0x7c   : > { %1108 = vst.msk [vmem:[%s1869_s7 + $0xcc] sm:$0x1] %vm1005_vm0, %v646_v36  ;;  %v683_v36 = vrot.slane %v511_v31, 1 }
  0x7d   : > { %1109 = vst.msk [vmem:[%s1869_s7 + $0xce] sm:$0x1] %vm1005_vm0, %v647_v38  ;;  %v448_v38 = vperm.slane %v417_v32, 0  ;;  %v2308_v32 = vld [vmem:[%s1855_s29 + $0x18] sm:$0xff] }
  0x7e   : > { %1110 = vst.msk [vmem:[%s1869_s7 + $0xd0] sm:$0x1] %vm1005_vm0, %v506_v34  ;;  %v344_v34 = vld [vmem:[%s1844_s25 + $0x98] sm:$0xff] }
  0x7f   : > { %1111 = vst.msk [vmem:[%s1869_s7 + $0xd2] sm:$0x1] %vm1005_vm0, %v648_v39  ;;  %v380_v37 = vmul.f32 %v1848_v0, %v344_v34  ;;  %v684_v39 = vrot.slane %v511_v31, 2 }
  0x80   : > { %1112 = vst.msk [vmem:[%s1869_s7 + $0xd4] sm:$0x1] %vm1005_vm0, %v649_v42  ;;  %v687_v42 = vrot.slane %v511_v31, 5 }
  0x81   : > { %1113 = vst.msk [vmem:[%s1869_s7 + $0xd6] sm:$0x1] %vm1005_vm0, %v650_v43  ;;  %v512_v43 = vadd.f32 %v448_v38, %v380_v37 }
  0x82   : > { %1114 = vst.msk [vmem:[%s1869_s7 + $0xd8] sm:$0x1] %vm1005_vm0, %v651_v44  ;;  %v418_v44 = vrot.slane %v2153_v61, 4 }
  0x83   : > { %1115 = vst.msk [vmem:[%s1869_s7 + $0xda] sm:$0x1] %vm1005_vm0, %v652_v45  ;;  %v688_v45 = vrot.slane %v511_v31, 6  ;;  %v692_v52 = vrot.slane %v512_v43, 3  ;;  %v693_v28 = vrot.slane %v512_v43, 4 }
  0x84   : > { %1116 = vst.msk [vmem:[%s1869_s7 + $0xdc] sm:$0x1] %vm1005_vm0, %v653_v48  ;;  %v690_v48 = vrot.slane %v512_v43, 1 }
  0x85   : > { %1117 = vst.msk [vmem:[%s1869_s7 + $0xde] sm:$0x1] %vm1005_vm0, %v654_v50  ;;  %v449_v50 = vperm.slane %v418_v44, 0 }
  0x86   : > { %1118 = vst.msk [vmem:[%s1869_s7 + $0xe0] sm:$0x1] %vm1005_vm0, %v507_v46  ;;  %v345_v46 = vld [vmem:[%s1844_s25 + $0xa0] sm:$0xff] }
  0x87   : > { %1119 = vst.msk [vmem:[%s1869_s7 + $0xe2] sm:$0x1] %vm1005_vm0, %v655_v51  ;;  %v381_v49 = vmul.f32 %v1848_v0, %v345_v46  ;;  %v691_v51 = vrot.slane %v512_v43, 2 }
  0x88   : > { %1120 = vst.msk [vmem:[%s1869_s7 + $0xe4] sm:$0x1] %vm1005_vm0, %v656_v53  ;;  %v694_v53 = vrot.slane %v512_v43, 5 }
  0x89   : > { %1121 = vst.msk [vmem:[%s1869_s7 + $0xe6] sm:$0x1] %vm1005_vm0, %v657_v54  ;;  %v513_v54 = vadd.f32 %v449_v50, %v381_v49 }
  0x8a   : > { %1122 = vst.msk [vmem:[%s1869_s7 + $0xe8] sm:$0x1] %vm1005_vm0, %v658_v55  ;;  %v419_v55 = vrot.slane %v2153_v61, 5 }
  0x8b   : > { %1123 = vst.msk [vmem:[%s1869_s7 + $0xea] sm:$0x1] %vm1005_vm0, %v659_v56  ;;  %v695_v56 = vrot.slane %v512_v43, 6  ;;  %v697_v59 = vrot.slane %v513_v54, 1  ;;  %v698_v63 = vrot.slane %v513_v54, 2  ;;  %v699_v1 = vrot.slane %v513_v54, 3 }
  0x8c   : > { %1124 = vst.msk [vmem:[%s1869_s7 + $0xec] sm:$0x1] %vm1005_vm0, %v660_v58  ;;  %v696_v58 = vrot.slane %v512_v43, 7 }
  0x8d   : > { %1125 = vst.msk [vmem:[%s1869_s7 + $0xee] sm:$0x1] %vm1005_vm0, %v661_v60 }
  0x8e   : > { %1126 = vst.msk [vmem:[%s1869_s7 + $0xf0] sm:$0x1] %vm1005_vm0, %v508_v57  ;;  %v346_v57 = vld [vmem:[%s1844_s25 + $0xa8] sm:$0xff] }
  0x8f   : > { %1127 = vst.msk [vmem:[%s1869_s7 + $0xf2] sm:$0x1] %vm1005_vm0, %v662_v62  ;;  %v382_v60 = vmul.f32 %v1848_v0, %v346_v57  ;;  %v450_v62 = vperm.slane %v419_v55, 0 }
  0x90   : > { %1128 = vst.msk [vmem:[%s1869_s7 + $0xf4] sm:$0x1] %vm1005_vm0, %v663_v2  ;;  %v700_v2 = vrot.slane %v513_v54, 4 }
  0x91   : > { %1129 = vst.msk [vmem:[%s1869_s7 + $0xf6] sm:$0x1] %vm1005_vm0, %v664_v4  ;;  %v701_v4 = vrot.slane %v513_v54, 5 }
  0x92   : > { %1130 = vst.msk [vmem:[%s1869_s7 + $0xf8] sm:$0x1] %vm1005_vm0, %v665_v5  ;;  %v514_v5 = vadd.f32 %v450_v62, %v382_v60 }
  0x93   : > { %1131 = vst.msk [vmem:[%s1869_s7 + $0xfa] sm:$0x1] %vm1005_vm0, %v666_v6  ;;  %v420_v6 = vrot.slane %v2153_v61, 6 }
  0x94   : > { %1132 = vst.msk [vmem:[%s1869_s7 + $0xfc] sm:$0x1] %vm1005_vm0, %v667_v9  ;;  %v703_v9 = vrot.slane %v513_v54, 7  ;;  %v704_v10 = vrot.slane %v514_v5, 1  ;;  %v705_v13 = vrot.slane %v514_v5, 2  ;;  %v706_v14 = vrot.slane %v514_v5, 3 }
  0x95   : > { %1133 = vst.msk [vmem:[%s1869_s7 + $0xfe] sm:$0x1] %vm1005_vm0, %v668_v11  ;;  %v383_v11 = vmul.f32 %v1848_v0, %v347_v8 }
  0x96   : > { %1134 = vst.msk [vmem:[%s1869_s7 + $0x100] sm:$0x1] %vm1005_vm0, %v509_v7  ;;  %v702_v7 = vrot.slane %v513_v54, 6 }
  0x97   : > { %1135 = vst.msk [vmem:[%s1869_s7 + $0x102] sm:$0x1] %vm1005_vm0, %v669_v12  ;;  %v451_v12 = vperm.slane %v420_v6, 0 }
  0x98   : > { %1136 = vst.msk [vmem:[%s1869_s7 + $0x104] sm:$0x1] %vm1005_vm0, %v670_v15  ;;  %v707_v15 = vrot.slane %v514_v5, 4 }
  0x99   : > { %1137 = vst.msk [vmem:[%s1869_s7 + $0x106] sm:$0x1] %vm1005_vm0, %v671_v16  ;;  %v708_v16 = vrot.slane %v514_v5, 5 }
  0x9a   : > { %1138 = vst.msk [vmem:[%s1869_s7 + $0x108] sm:$0x1] %vm1005_vm0, %v672_v17  ;;  %v515_v17 = vadd.f32 %v451_v12, %v383_v11 }
  0x9b   : > { %1139 = vst.msk [vmem:[%s1869_s7 + $0x10a] sm:$0x1] %vm1005_vm0, %v673_v18  ;;  %v421_v18 = vrot.slane %v2153_v61, 7 }
  0x9c   : > { %1140 = vst.msk [vmem:[%s1869_s7 + $0x10c] sm:$0x1] %vm1005_vm0, %v674_v20  ;;  %v710_v20 = vrot.slane %v514_v5, 7  ;;  %v711_v21 = vrot.slane %v515_v17, 1  ;;  %v713_v24 = vrot.slane %v515_v17, 3  ;;  %v714_v25 = vrot.slane %v515_v17, 4 }
  0x9d   : > { %1141 = vst.msk [vmem:[%s1869_s7 + $0x10e] sm:$0x1] %vm1005_vm0, %v675_v22  ;;  %v384_v22 = vmul.f32 %v1848_v0, %v348_v3  ;;  %v452_v61 = vperm.slane %v421_v18, 0 }
  0x9e   : > { %1142 = vst.msk [vmem:[%s1869_s7 + $0x110] sm:$0x1] %vm1005_vm0, %v510_v19  ;;  %v709_v19 = vrot.slane %v514_v5, 6 }
  0x9f   : > { %1143 = vst.msk [vmem:[%s1869_s7 + $0x112] sm:$0x1] %vm1005_vm0, %v676_v23  ;;  %v712_v23 = vrot.slane %v515_v17, 2 }
  0xa0   : > { %1144 = vst.msk [vmem:[%s1869_s7 + $0x114] sm:$0x1] %vm1005_vm0, %v677_v26  ;;  %v715_v26 = vrot.slane %v515_v17, 5 }
  0xa1   : > { %1145 = vst.msk [vmem:[%s1869_s7 + $0x116] sm:$0x1] %vm1005_vm0, %v678_v27  ;;  %v516_v27 = vadd.f32 %v452_v61, %v384_v22 }
  0xa2   : > { %1146 = vst.msk [vmem:[%s1869_s7 + $0x118] sm:$0x1] %vm1005_vm0, %v679_v29  ;;  %v716_v29 = vrot.slane %v515_v17, 6 }
  0xa3   : > { %1147 = vst.msk [vmem:[%s1869_s7 + $0x11a] sm:$0x1] %vm1005_vm0, %v680_v30  ;;  %v349_v30 = vld [vmem:[%s1844_s25 + $0xc0] sm:$0xff]  ;;  %v720_v37 = vrot.slane %v516_v27, 3  ;;  %v721_v38 = vrot.slane %v516_v27, 4  ;;  %v724_v44 = vrot.slane %v516_v27, 7 }
  0xa4   : > { %1148 = vst.msk [vmem:[%s1869_s7 + $0x11c] sm:$0x1] %vm1005_vm0, %v681_v33  ;;  %v718_v33 = vrot.slane %v516_v27, 1  ;;  %v385_v34 = vmul.f32 %v1848_v0, %v349_v30 }
  0xa5   : > { %1149 = vst.msk [vmem:[%s1869_s7 + $0x11e] sm:$0x1] %vm1005_vm0, %v682_v35  ;;  %v453_v35 = vperm.slane %v2308_v32, 0 }
  0xa6   : > { %1150 = vst.msk [vmem:[%s1869_s7 + $0x120] sm:$0x1] %vm1005_vm0, %v511_v31  ;;  %v717_v31 = vrot.slane %v515_v17, 7 }
  0xa7   : > { %1151 = vst.msk [vmem:[%s1869_s7 + $0x122] sm:$0x1] %vm1005_vm0, %v683_v36  ;;  %v719_v36 = vrot.slane %v516_v27, 2 }
  0xa8   : > { %1152 = vst.msk [vmem:[%s1869_s7 + $0x124] sm:$0x1] %vm1005_vm0, %v684_v39  ;;  %v722_v39 = vrot.slane %v516_v27, 5 }
  0xa9   : > { %1153 = vst.msk [vmem:[%s1869_s7 + $0x126] sm:$0x1] %vm1005_vm0, %v685_v40  ;;  %v517_v40 = vadd.f32 %v453_v35, %v385_v34 }
  0xaa   : > { %1154 = vst.msk [vmem:[%s1869_s7 + $0x128] sm:$0x1] %vm1005_vm0, %v686_v41  ;;  %v422_v41 = vrot.slane %v2308_v32, 1 }
  0xab   : > { %1155 = vst.msk [vmem:[%s1869_s7 + $0x12a] sm:$0x1] %vm1005_vm0, %v687_v42  ;;  %v723_v42 = vrot.slane %v516_v27, 6  ;;  %v727_v49 = vrot.slane %v517_v40, 3  ;;  %v728_v50 = vrot.slane %v517_v40, 4  ;;  %v731_v55 = vrot.slane %v517_v40, 7 }
  0xac   : > { %1156 = vst.msk [vmem:[%s1869_s7 + $0x12c] sm:$0x1] %vm1005_vm0, %v688_v45  ;;  %v725_v45 = vrot.slane %v517_v40, 1 }
  0xad   : > { %1157 = vst.msk [vmem:[%s1869_s7 + $0x12e] sm:$0x1] %vm1005_vm0, %v689_v47  ;;  %v454_v47 = vperm.slane %v422_v41, 0  ;;  %v355_v41 = vld [vmem:[%s1844_s25 + $0xf0] sm:$0xff] }
  0xae   : > { %1158 = vst.msk [vmem:[%s1869_s7 + $0x130] sm:$0x1] %vm1005_vm0, %v512_v43  ;;  %v350_v43 = vld [vmem:[%s1844_s25 + $0xc8] sm:$0xff] }
  0xaf   : > { %1159 = vst.msk [vmem:[%s1869_s7 + $0x132] sm:$0x1] %vm1005_vm0, %v690_v48  ;;  %v386_v46 = vmul.f32 %v1848_v0, %v350_v43  ;;  %v726_v48 = vrot.slane %v517_v40, 2 }
  0xb0   : > { %1160 = vst.msk [vmem:[%s1869_s7 + $0x134] sm:$0x1] %vm1005_vm0, %v691_v51  ;;  %v729_v51 = vrot.slane %v517_v40, 5 }
  0xb1   : > { %1161 = vst.msk [vmem:[%s1869_s7 + $0x136] sm:$0x1] %vm1005_vm0, %v692_v52  ;;  %v518_v52 = vadd.f32 %v454_v47, %v386_v46 }
  0xb2   : > { %1162 = vst.msk [vmem:[%s1869_s7 + $0x138] sm:$0x1] %vm1005_vm0, %v693_v28  ;;  %v423_v28 = vrot.slane %v2308_v32, 2 }
  0xb3   : > { %1163 = vst.msk [vmem:[%s1869_s7 + $0x13a] sm:$0x1] %vm1005_vm0, %v694_v53  ;;  %v730_v53 = vrot.slane %v517_v40, 6  ;;  %v734_v60 = vrot.slane %v518_v52, 3  ;;  %v735_v62 = vrot.slane %v518_v52, 4 }
  0xb4   : > { %1164 = vst.msk [vmem:[%s1869_s7 + $0x13c] sm:$0x1] %vm1005_vm0, %v695_v56  ;;  %v732_v56 = vrot.slane %v518_v52, 1 }
  0xb5   : > { %1165 = vst.msk [vmem:[%s1869_s7 + $0x13e] sm:$0x1] %vm1005_vm0, %v696_v58  ;;  %v455_v58 = vperm.slane %v423_v28, 0  ;;  %v356_v28 = vld [vmem:[%s1844_s25 + $0xf8] sm:$0xff] }
  0xb6   : > { %1166 = vst.msk [vmem:[%s1869_s7 + $0x140] sm:$0x1] %vm1005_vm0, %v513_v54  ;;  %v351_v54 = vld [vmem:[%s1844_s25 + $0xd0] sm:$0xff] }
  0xb7   : > { %1167 = vst.msk [vmem:[%s1869_s7 + $0x142] sm:$0x1] %vm1005_vm0, %v697_v59  ;;  %v387_v57 = vmul.f32 %v1848_v0, %v351_v54  ;;  %v733_v59 = vrot.slane %v518_v52, 2  ;;  %v424_v0 = vrot.slane %v2308_v32, 3 }
  0xb8   : > { %1168 = vst.msk [vmem:[%s1869_s7 + $0x144] sm:$0x1] %vm1005_vm0, %v698_v63  ;;  %v736_v63 = vrot.slane %v518_v52, 5 }
  0xb9   : > { %1169 = vst.msk [vmem:[%s1869_s7 + $0x146] sm:$0x1] %vm1005_vm0, %v699_v1  ;;  %v519_v1 = vadd.f32 %v455_v58, %v387_v57 }
  0xba   : > { %1170 = vst.msk [vmem:[%s1869_s7 + $0x148] sm:$0x1] %vm1005_vm0, %v700_v2  ;;  %v737_v2 = vrot.slane %v518_v52, 6 }
  0xbb   : > { %1171 = vst.msk [vmem:[%s1869_s7 + $0x14a] sm:$0x1] %vm1005_vm0, %v701_v4  ;;  %v352_v4 = vld [vmem:[%s1844_s25 + $0xd8] sm:$0xff]  ;;  %v739_v6 = vrot.slane %v519_v1, 1  ;;  %v741_v11 = vrot.slane %v519_v1, 3  ;;  %v742_v12 = vrot.slane %v519_v1, 4 }
  0xbc   : > { %1172 = vst.msk [vmem:[%s1869_s7 + $0x14c] sm:$0x1] %vm1005_vm0, %v702_v7  ;;  %v2371_v7 = vld [vmem:[%s1839_s22] ss:$0 sm:$0xff]  ;;  %v745_v18 = vrot.slane %v519_v1, 7 }
  0xbd   : > { %1173 = vst.msk [vmem:[%s1869_s7 + $0x14e] sm:$0x1] %vm1005_vm0, %v703_v9  ;;  %v388_v8 = vmul.f32 %v2371_v7, %v352_v4  ;;  %v456_v9 = vperm.slane %v424_v0, 0 }
  0xbe   : > { %1174 = vst.msk [vmem:[%s1869_s7 + $0x150] sm:$0x1] %vm1005_vm0, %v514_v5  ;;  %v738_v5 = vrot.slane %v518_v52, 7 }
  0xbf   : > { %1175 = vst.msk [vmem:[%s1869_s7 + $0x152] sm:$0x1] %vm1005_vm0, %v704_v10  ;;  %v740_v10 = vrot.slane %v519_v1, 2 }
  0xc0   : > { %1176 = vst.msk [vmem:[%s1869_s7 + $0x154] sm:$0x1] %vm1005_vm0, %v705_v13  ;;  %v743_v13 = vrot.slane %v519_v1, 5 }
  0xc1   : > { %1177 = vst.msk [vmem:[%s1869_s7 + $0x156] sm:$0x1] %vm1005_vm0, %v706_v14  ;;  %v520_v14 = vadd.f32 %v456_v9, %v388_v8  ;;  %v1262_v8 = vld [vmem:[%s2483_s10] sm:$0xff] }
  0xc2   : > { %1178 = vst.msk [vmem:[%s1869_s7 + $0x158] sm:$0x1] %vm1005_vm0, %v707_v15  ;;  %v425_v15 = vrot.slane %v2308_v32, 4  ;;  %v1270_v9 = vrot.slane %v1262_v8, 1 }
  0xc3   : > { %1179 = vst.msk [vmem:[%s1869_s7 + $0x15a] sm:$0x1] %vm1005_vm0, %v708_v16  ;;  %v744_v16 = vrot.slane %v519_v1, 6  ;;  %v748_v22 = vrot.slane %v520_v14, 3  ;;  %v749_v61 = vrot.slane %v520_v14, 4 }
  0xc4   : > { %1180 = vst.msk [vmem:[%s1869_s7 + $0x15c] sm:$0x1] %vm1005_vm0, %v709_v19  ;;  %v746_v19 = vrot.slane %v520_v14, 1 }
  0xc5   : > { %1181 = vst.msk [vmem:[%s1869_s7 + $0x15e] sm:$0x1] %vm1005_vm0, %v710_v20  ;;  %v457_v20 = vperm.slane %v425_v15, 0  ;;  %v1276_v15 = vrot.slane %v1262_v8, 7 }
  0xc6   : > { %1182 = vst.msk [vmem:[%s1869_s7 + $0x160] sm:$0x1] %vm1005_vm0, %v515_v17  ;;  %v353_v17 = vld [vmem:[%s1844_s25 + $0xe0] sm:$0xff] }
  0xc7   : > { %1183 = vst.msk [vmem:[%s1869_s7 + $0x162] sm:$0x1] %vm1005_vm0, %v711_v21  ;;  %v389_v3 = vmul.f32 %v2371_v7, %v353_v17  ;;  %v747_v21 = vrot.slane %v520_v14, 2 }
  0xc8   : > { %1184 = vst.msk [vmem:[%s1869_s7 + $0x164] sm:$0x1] %vm1005_vm0, %v712_v23  ;;  %v750_v23 = vrot.slane %v520_v14, 5 }
  0xc9   : > { %1185 = vst.msk [vmem:[%s1869_s7 + $0x166] sm:$0x1] %vm1005_vm0, %v713_v24  ;;  %v521_v24 = vadd.f32 %v457_v20, %v389_v3 }
  0xca   : > { %1186 = vst.msk [vmem:[%s1869_s7 + $0x168] sm:$0x1] %vm1005_vm0, %v714_v25  ;;  %v426_v25 = vrot.slane %v2308_v32, 5 }
  0xcb   : > { %1187 = vst.msk [vmem:[%s1869_s7 + $0x16a] sm:$0x1] %vm1005_vm0, %v715_v26  ;;  %v751_v26 = vrot.slane %v520_v14, 6  ;;  %v753_v30 = vrot.slane %v521_v24, 1  ;;  %v754_v34 = vrot.slane %v521_v24, 2  ;;  %v755_v35 = vrot.slane %v521_v24, 3 }
  0xcc   : > { %1188 = vst.msk [vmem:[%s1869_s7 + $0x16c] sm:$0x1] %vm1005_vm0, %v716_v29  ;;  %v752_v29 = vrot.slane %v520_v14, 7 }
  0xcd   : > { %1189 = vst.msk [vmem:[%s1869_s7 + $0x16e] sm:$0x1] %vm1005_vm0, %v717_v31 }
  0xce   : > { %1190 = vst.msk [vmem:[%s1869_s7 + $0x170] sm:$0x1] %vm1005_vm0, %v516_v27  ;;  %v354_v27 = vld [vmem:[%s1844_s25 + $0xe8] sm:$0xff] }
  0xcf   : > { %1191 = vst.msk [vmem:[%s1869_s7 + $0x172] sm:$0x1] %vm1005_vm0, %v718_v33  ;;  %v390_v31 = vmul.f32 %v2371_v7, %v354_v27  ;;  %v458_v33 = vperm.slane %v426_v25, 0 }
  0xd0   : > { %1192 = vst.msk [vmem:[%s1869_s7 + $0x174] sm:$0x1] %vm1005_vm0, %v719_v36  ;;  %v756_v36 = vrot.slane %v521_v24, 4 }
  0xd1   : > { %1193 = vst.msk [vmem:[%s1869_s7 + $0x176] sm:$0x1] %vm1005_vm0, %v720_v37  ;;  %v757_v37 = vrot.slane %v521_v24, 5 }
  0xd2   : > { %1194 = vst.msk [vmem:[%s1869_s7 + $0x178] sm:$0x1] %vm1005_vm0, %v721_v38  ;;  %v522_v38 = vadd.f32 %v458_v33, %v390_v31  ;;  %v1265_v31 = vld [vmem:[%s2483_s10 + $0x18] sm:$0xff] }
  0xd3   : > { %1195 = vst.msk [vmem:[%s1869_s7 + $0x17a] sm:$0x1] %vm1005_vm0, %v722_v39  ;;  %v427_v39 = vrot.slane %v2308_v32, 6  ;;  %v1291_v33 = vrot.slane %v1265_v31, 1 }
  0xd4   : > { %1196 = vst.msk [vmem:[%s1869_s7 + $0x17c] sm:$0x1] %vm1005_vm0, %v723_v42  ;;  %v759_v42 = vrot.slane %v521_v24, 7  ;;  %v760_v43 = vrot.slane %v522_v38, 1  ;;  %v761_v46 = vrot.slane %v522_v38, 2  ;;  %v762_v47 = vrot.slane %v522_v38, 3 }
  0xd5   : > { %1197 = vst.msk [vmem:[%s1869_s7 + $0x17e] sm:$0x1] %vm1005_vm0, %v724_v44  ;;  %v391_v44 = vmul.f32 %v2371_v7, %v355_v41 }
  0xd6   : > { %1198 = vst.msk [vmem:[%s1869_s7 + $0x180] sm:$0x1] %vm1005_vm0, %v517_v40  ;;  %v758_v40 = vrot.slane %v521_v24, 6 }
  0xd7   : > { %1199 = vst.msk [vmem:[%s1869_s7 + $0x182] sm:$0x1] %vm1005_vm0, %v725_v45  ;;  %v459_v45 = vperm.slane %v427_v39, 0  ;;  %v1297_v39 = vrot.slane %v1265_v31, 7 }
  0xd8   : > { %1200 = vst.msk [vmem:[%s1869_s7 + $0x184] sm:$0x1] %vm1005_vm0, %v726_v48  ;;  %v763_v48 = vrot.slane %v522_v38, 4 }
  0xd9   : > { %1201 = vst.msk [vmem:[%s1869_s7 + $0x186] sm:$0x1] %vm1005_vm0, %v727_v49  ;;  %v764_v49 = vrot.slane %v522_v38, 5 }
  0xda   : > { %1202 = vst.msk [vmem:[%s1869_s7 + $0x188] sm:$0x1] %vm1005_vm0, %v728_v50  ;;  %v523_v50 = vadd.f32 %v459_v45, %v391_v44 }
  0xdb   : > { %1203 = vst.msk [vmem:[%s1869_s7 + $0x18a] sm:$0x1] %vm1005_vm0, %v729_v51  ;;  %v428_v51 = vrot.slane %v2308_v32, 7 }
  0xdc   : > { %1204 = vst.msk [vmem:[%s1869_s7 + $0x18c] sm:$0x1] %vm1005_vm0, %v730_v53  ;;  %v766_v53 = vrot.slane %v522_v38, 7  ;;  %v767_v54 = vrot.slane %v523_v50, 1  ;;  %v769_v57 = vrot.slane %v523_v50, 3  ;;  %v770_v58 = vrot.slane %v523_v50, 4 }
  0xdd   : > { %1205 = vst.msk [vmem:[%s1869_s7 + $0x18e] sm:$0x1] %vm1005_vm0, %v731_v55  ;;  %v392_v55 = vmul.f32 %v2371_v7, %v356_v28  ;;  %v460_v32 = vperm.slane %v428_v51, 0 }
  0xde   : > { %1206 = vst.msk [vmem:[%s1869_s7 + $0x190] sm:$0x1] %vm1005_vm0, %v518_v52  ;;  %v765_v52 = vrot.slane %v522_v38, 6 }
  0xdf   : > { %1207 = vst.msk [vmem:[%s1869_s7 + $0x192] sm:$0x1] %vm1005_vm0, %v732_v56  ;;  %v768_v56 = vrot.slane %v523_v50, 2 }
  0xe0   : > { %1208 = vst.msk [vmem:[%s1869_s7 + $0x194] sm:$0x1] %vm1005_vm0, %v733_v59  ;;  %v771_v59 = vrot.slane %v523_v50, 5 }
  0xe1   : > { %1209 = vst.msk [vmem:[%s1869_s7 + $0x196] sm:$0x1] %vm1005_vm0, %v734_v60  ;;  %v524_v60 = vadd.f32 %v460_v32, %v392_v55 }
  0xe2   : > { %1210 = vst.msk [vmem:[%s1869_s7 + $0x198] sm:$0x1] %vm1005_vm0, %v735_v62  ;;  %v772_v62 = vrot.slane %v523_v50, 6 }
  0xe3   : > { %1211 = vst.msk [vmem:[%s1869_s7 + $0x19a] sm:$0x1] %vm1005_vm0, %v736_v63  ;;  %v773_v63 = vrot.slane %v523_v50, 7  ;;  %v775_v0 = vrot.slane %v524_v60, 2  ;;  %v777_v4 = vrot.slane %v524_v60, 4  ;;  %v780_v7 = vrot.slane %v524_v60, 7 }
  0xe4   : > { %1212 = vst.msk [vmem:[%s1869_s7 + $0x19c] sm:$0x1] %vm1005_vm0, %v737_v2  ;;  %v776_v2 = vrot.slane %v524_v60, 3 }
  0xe5   : > { %1213 = vst.msk [vmem:[%s1869_s7 + $0x19e] sm:$0x1] %vm1005_vm0, %v738_v5  ;;  %v778_v5 = vrot.slane %v524_v60, 5 }
  0xe6   : > { %1214 = vst.msk [vmem:[%s1869_s7 + $0x1a0] sm:$0x1] %vm1005_vm0, %v519_v1  ;;  %v774_v1 = vrot.slane %v524_v60, 1 }
  0xe7   : > { %1215 = vst.msk [vmem:[%s1869_s7 + $0x1a2] sm:$0x1] %vm1005_vm0, %v739_v6  ;;  %v779_v6 = vrot.slane %v524_v60, 6 }
  0xe8   : > { %1216 = vst.msk [vmem:[%s1869_s7 + $0x1a4] sm:$0x1] %vm1005_vm0, %v740_v10  ;;  %v1271_v10 = vrot.slane %v1262_v8, 2 }
  0xe9   : > { %1217 = vst.msk [vmem:[%s1869_s7 + $0x1a6] sm:$0x1] %vm1005_vm0, %v741_v11  ;;  %v1272_v11 = vrot.slane %v1262_v8, 3 }
  0xea   : > { %1218 = vst.msk [vmem:[%s1869_s7 + $0x1a8] sm:$0x1] %vm1005_vm0, %v742_v12  ;;  %v1273_v12 = vrot.slane %v1262_v8, 4 }
  0xeb   : > { %1219 = vst.msk [vmem:[%s1869_s7 + $0x1aa] sm:$0x1] %vm1005_vm0, %v743_v13  ;;  %v1274_v13 = vrot.slane %v1262_v8, 5 }
  0xec   : > { %1220 = vst.msk [vmem:[%s1869_s7 + $0x1ac] sm:$0x1] %vm1005_vm0, %v744_v16  ;;  %v1263_v16 = vld [vmem:[%s2483_s10 + $0x8] sm:$0xff] }
  0xed   : > { %1221 = vst.msk [vmem:[%s1869_s7 + $0x1ae] sm:$0x1] %vm1005_vm0, %v745_v18  ;;  %v1277_v17 = vrot.slane %v1263_v16, 1  ;;  %v1278_v18 = vrot.slane %v1263_v16, 2  ;;  %v1280_v3 = vrot.slane %v1263_v16, 4  ;;  %v1281_v20 = vrot.slane %v1263_v16, 5 }
  0xee   : > { %1222 = vst.msk [vmem:[%s1869_s7 + $0x1b0] sm:$0x1] %vm1005_vm0, %v520_v14  ;;  %v1275_v14 = vrot.slane %v1262_v8, 6 }
  0xef   : > { %1223 = vst.msk [vmem:[%s1869_s7 + $0x1b2] sm:$0x1] %vm1005_vm0, %v746_v19  ;;  %v1279_v19 = vrot.slane %v1263_v16, 3 }
  0xf0   : > { %1224 = vst.msk [vmem:[%s1869_s7 + $0x1b4] sm:$0x1] %vm1005_vm0, %v747_v21  ;;  %v1282_v21 = vrot.slane %v1263_v16, 6 }
  0xf1   : > { %1225 = vst.msk [vmem:[%s1869_s7 + $0x1b6] sm:$0x1] %vm1005_vm0, %v748_v22  ;;  %v1283_v22 = vrot.slane %v1263_v16, 7 }
  0xf2   : > { %1226 = vst.msk [vmem:[%s1869_s7 + $0x1b8] sm:$0x1] %vm1005_vm0, %v749_v61  ;;  %v1264_v61 = vld [vmem:[%s2483_s10 + $0x10] sm:$0xff] }
  0xf3   : > { %1227 = vst.msk [vmem:[%s1869_s7 + $0x1ba] sm:$0x1] %vm1005_vm0, %v750_v23  ;;  %v1284_v23 = vrot.slane %v1264_v61, 1  ;;  %v1286_v25 = vrot.slane %v1264_v61, 3  ;;  %v1288_v27 = vrot.slane %v1264_v61, 5 }
  0xf4   : > { %1228 = vst.msk [vmem:[%s1869_s7 + $0x1bc] sm:$0x1] %vm1005_vm0, %v751_v26  ;;  %v1287_v26 = vrot.slane %v1264_v61, 4 }
  0xf5   : > { %1229 = vst.msk [vmem:[%s1869_s7 + $0x1be] sm:$0x1] %vm1005_vm0, %v752_v29  ;;  %v1289_v29 = vrot.slane %v1264_v61, 6 }
  0xf6   : > { %1230 = vst.msk [vmem:[%s1869_s7 + $0x1c0] sm:$0x1] %vm1005_vm0, %v521_v24  ;;  %v1285_v24 = vrot.slane %v1264_v61, 2 }
  0xf7   : > { %1231 = vst.msk [vmem:[%s1869_s7 + $0x1c2] sm:$0x1] %vm1005_vm0, %v753_v30  ;;  %v1290_v30 = vrot.slane %v1264_v61, 7 }
  0xf8   : > { %1232 = vst.msk [vmem:[%s1869_s7 + $0x1c4] sm:$0x1] %vm1005_vm0, %v754_v34  ;;  %v1292_v34 = vrot.slane %v1265_v31, 2 }
  0xf9   : > { %1233 = vst.msk [vmem:[%s1869_s7 + $0x1c6] sm:$0x1] %vm1005_vm0, %v755_v35  ;;  %v1293_v35 = vrot.slane %v1265_v31, 3 }
  0xfa   : > { %1234 = vst.msk [vmem:[%s1869_s7 + $0x1c8] sm:$0x1] %vm1005_vm0, %v756_v36  ;;  %v1294_v36 = vrot.slane %v1265_v31, 4 }
  0xfb   : > { %1235 = vst.msk [vmem:[%s1869_s7 + $0x1ca] sm:$0x1] %vm1005_vm0, %v757_v37  ;;  %v1295_v37 = vrot.slane %v1265_v31, 5 }
  0xfc   : > { %1236 = vst.msk [vmem:[%s1869_s7 + $0x1cc] sm:$0x1] %vm1005_vm0, %v758_v40 }
  0xfd   : > { %1237 = vst.msk [vmem:[%s1869_s7 + $0x1ce] sm:$0x1] %vm1005_vm0, %v759_v42 }
  0xfe   : > { %1238 = vst.msk [vmem:[%s1869_s7 + $0x1d0] sm:$0x1] %vm1005_vm0, %v522_v38  ;;  %v1296_v38 = vrot.slane %v1265_v31, 6 }
  0xff   : > { %1239 = vst.msk [vmem:[%s1869_s7 + $0x1d2] sm:$0x1] %vm1005_vm0, %v760_v43 }
 0x100   : > { %1240 = vst.msk [vmem:[%s1869_s7 + $0x1d4] sm:$0x1] %vm1005_vm0, %v761_v46 }
 0x101   : > { %1241 = vst.msk [vmem:[%s1869_s7 + $0x1d6] sm:$0x1] %vm1005_vm0, %v762_v47 }
 0x102   : > { %1242 = vst.msk [vmem:[%s1869_s7 + $0x1d8] sm:$0x1] %vm1005_vm0, %v763_v48 }
 0x103   : > { %1243 = vst.msk [vmem:[%s1869_s7 + $0x1da] sm:$0x1] %vm1005_vm0, %v764_v49 }
 0x104   : > { %1244 = vst.msk [vmem:[%s1869_s7 + $0x1dc] sm:$0x1] %vm1005_vm0, %v765_v52 }
 0x105   : > { %1245 = vst.msk [vmem:[%s1869_s7 + $0x1de] sm:$0x1] %vm1005_vm0, %v766_v53 }
 0x106   : > { %1246 = vst.msk [vmem:[%s1869_s7 + $0x1e0] sm:$0x1] %vm1005_vm0, %v523_v50 }
 0x107   : > { %1247 = vst.msk [vmem:[%s1869_s7 + $0x1e2] sm:$0x1] %vm1005_vm0, %v767_v54 }
 0x108   : > { %1248 = vst.msk [vmem:[%s1869_s7 + $0x1e4] sm:$0x1] %vm1005_vm0, %v768_v56 }
 0x109   : > { %1249 = vst.msk [vmem:[%s1869_s7 + $0x1e6] sm:$0x1] %vm1005_vm0, %v769_v57 }
 0x10a   : > { %1250 = vst.msk [vmem:[%s1869_s7 + $0x1e8] sm:$0x1] %vm1005_vm0, %v770_v58 }
 0x10b   : > { %1251 = vst.msk [vmem:[%s1869_s7 + $0x1ea] sm:$0x1] %vm1005_vm0, %v771_v59 }
 0x10c   : > { %1252 = vst.msk [vmem:[%s1869_s7 + $0x1ec] sm:$0x1] %vm1005_vm0, %v772_v62 }
 0x10d   : > { %1253 = vst.msk [vmem:[%s1869_s7 + $0x1ee] sm:$0x1] %vm1005_vm0, %v773_v63 }
 0x10e   : > { %1254 = vst.msk [vmem:[%s1869_s7 + $0x1f0] sm:$0x1] %vm1005_vm0, %v524_v60 }
 0x10f   : > { %1255 = vst.msk [vmem:[%s1869_s7 + $0x1f2] sm:$0x1] %vm1005_vm0, %v774_v1 }
 0x110   : > { %1256 = vst.msk [vmem:[%s1869_s7 + $0x1f4] sm:$0x1] %vm1005_vm0, %v775_v0 }
 0x111   : > { %1257 = vst.msk [vmem:[%s1869_s7 + $0x1f6] sm:$0x1] %vm1005_vm0, %v776_v2 }
 0x112   : > { %1258 = vst.msk [vmem:[%s1869_s7 + $0x1f8] sm:$0x1] %vm1005_vm0, %v777_v4 }
 0x113   : > { %1259 = vst.msk [vmem:[%s1869_s7 + $0x1fa] sm:$0x1] %vm1005_vm0, %v778_v5 }
 0x114   : > { %1260 = vst.msk [vmem:[%s1869_s7 + $0x1fc] sm:$0x1] %vm1005_vm0, %v779_v6 }
 0x115   : > { %1261 = vst.msk [vmem:[%s1869_s7 + $0x1fe] sm:$0x1] %vm1005_vm0, %v780_v7 }
 0x116   : > { %1326 = vst.msk [vmem:[%s1869_s7 + $0x1] sm:$0x1] %vm1005_vm0, %v1262_v8 }
 0x117   : > { %1327 = vst.msk [vmem:[%s1869_s7 + $0x3] sm:$0x1] %vm1005_vm0, %v1262_v8 }
 0x118   : > { %1328 = vst.msk [vmem:[%s1869_s7 + $0x5] sm:$0x1] %vm1005_vm0, %v1262_v8 }
 0x119   : > { %1329 = vst.msk [vmem:[%s1869_s7 + $0x7] sm:$0x1] %vm1005_vm0, %v1262_v8 }
 0x11a   : > { %1330 = vst.msk [vmem:[%s1869_s7 + $0x9] sm:$0x1] %vm1005_vm0, %v1262_v8 }
 0x11b   : > { %1331 = vst.msk [vmem:[%s1869_s7 + $0xb] sm:$0x1] %vm1005_vm0, %v1262_v8 }
 0x11c   : > { %1332 = vst.msk [vmem:[%s1869_s7 + $0xd] sm:$0x1] %vm1005_vm0, %v1262_v8 }
 0x11d   : > { %1333 = vst.msk [vmem:[%s1869_s7 + $0xf] sm:$0x1] %vm1005_vm0, %v1262_v8 }
 0x11e   : > { %1334 = vst.msk [vmem:[%s1869_s7 + $0x11] sm:$0x1] %vm1005_vm0, %v1270_v9 }
 0x11f   : > { %1335 = vst.msk [vmem:[%s1869_s7 + $0x13] sm:$0x1] %vm1005_vm0, %v1270_v9 }
 0x120   : > { %1336 = vst.msk [vmem:[%s1869_s7 + $0x15] sm:$0x1] %vm1005_vm0, %v1270_v9 }
 0x121   : > { %1337 = vst.msk [vmem:[%s1869_s7 + $0x17] sm:$0x1] %vm1005_vm0, %v1270_v9 }
 0x122   : > { %1338 = vst.msk [vmem:[%s1869_s7 + $0x19] sm:$0x1] %vm1005_vm0, %v1270_v9 }
 0x123   : > { %1339 = vst.msk [vmem:[%s1869_s7 + $0x1b] sm:$0x1] %vm1005_vm0, %v1270_v9 }
 0x124   : > { %1340 = vst.msk [vmem:[%s1869_s7 + $0x1d] sm:$0x1] %vm1005_vm0, %v1270_v9 }
 0x125   : > { %1341 = vst.msk [vmem:[%s1869_s7 + $0x1f] sm:$0x1] %vm1005_vm0, %v1270_v9 }
 0x126   : > { %1342 = vst.msk [vmem:[%s1869_s7 + $0x21] sm:$0x1] %vm1005_vm0, %v1271_v10 }
 0x127   : > { %1343 = vst.msk [vmem:[%s1869_s7 + $0x23] sm:$0x1] %vm1005_vm0, %v1271_v10 }
 0x128   : > { %1344 = vst.msk [vmem:[%s1869_s7 + $0x25] sm:$0x1] %vm1005_vm0, %v1271_v10 }
 0x129   : > { %1345 = vst.msk [vmem:[%s1869_s7 + $0x27] sm:$0x1] %vm1005_vm0, %v1271_v10 }
 0x12a   : > { %1346 = vst.msk [vmem:[%s1869_s7 + $0x29] sm:$0x1] %vm1005_vm0, %v1271_v10 }
 0x12b   : > { %1347 = vst.msk [vmem:[%s1869_s7 + $0x2b] sm:$0x1] %vm1005_vm0, %v1271_v10 }
 0x12c   : > { %1348 = vst.msk [vmem:[%s1869_s7 + $0x2d] sm:$0x1] %vm1005_vm0, %v1271_v10 }
 0x12d   : > { %1349 = vst.msk [vmem:[%s1869_s7 + $0x2f] sm:$0x1] %vm1005_vm0, %v1271_v10 }
 0x12e   : > { %1350 = vst.msk [vmem:[%s1869_s7 + $0x31] sm:$0x1] %vm1005_vm0, %v1272_v11 }
 0x12f   : > { %1351 = vst.msk [vmem:[%s1869_s7 + $0x33] sm:$0x1] %vm1005_vm0, %v1272_v11 }
 0x130   : > { %1352 = vst.msk [vmem:[%s1869_s7 + $0x35] sm:$0x1] %vm1005_vm0, %v1272_v11 }
 0x131   : > { %1353 = vst.msk [vmem:[%s1869_s7 + $0x37] sm:$0x1] %vm1005_vm0, %v1272_v11 }
 0x132   : > { %1354 = vst.msk [vmem:[%s1869_s7 + $0x39] sm:$0x1] %vm1005_vm0, %v1272_v11 }
 0x133   : > { %1355 = vst.msk [vmem:[%s1869_s7 + $0x3b] sm:$0x1] %vm1005_vm0, %v1272_v11 }
 0x134   : > { %1356 = vst.msk [vmem:[%s1869_s7 + $0x3d] sm:$0x1] %vm1005_vm0, %v1272_v11 }
 0x135   : > { %1357 = vst.msk [vmem:[%s1869_s7 + $0x3f] sm:$0x1] %vm1005_vm0, %v1272_v11 }
 0x136   : > { %1358 = vst.msk [vmem:[%s1869_s7 + $0x41] sm:$0x1] %vm1005_vm0, %v1273_v12 }
 0x137   : > { %1359 = vst.msk [vmem:[%s1869_s7 + $0x43] sm:$0x1] %vm1005_vm0, %v1273_v12 }
 0x138   : > { %1360 = vst.msk [vmem:[%s1869_s7 + $0x45] sm:$0x1] %vm1005_vm0, %v1273_v12 }
 0x139   : > { %1361 = vst.msk [vmem:[%s1869_s7 + $0x47] sm:$0x1] %vm1005_vm0, %v1273_v12 }
 0x13a   : > { %1362 = vst.msk [vmem:[%s1869_s7 + $0x49] sm:$0x1] %vm1005_vm0, %v1273_v12 }
 0x13b   : > { %1363 = vst.msk [vmem:[%s1869_s7 + $0x4b] sm:$0x1] %vm1005_vm0, %v1273_v12 }
 0x13c   : > { %1364 = vst.msk [vmem:[%s1869_s7 + $0x4d] sm:$0x1] %vm1005_vm0, %v1273_v12 }
 0x13d   : > { %1365 = vst.msk [vmem:[%s1869_s7 + $0x4f] sm:$0x1] %vm1005_vm0, %v1273_v12 }
 0x13e   : > { %1366 = vst.msk [vmem:[%s1869_s7 + $0x51] sm:$0x1] %vm1005_vm0, %v1274_v13 }
 0x13f   : > { %1367 = vst.msk [vmem:[%s1869_s7 + $0x53] sm:$0x1] %vm1005_vm0, %v1274_v13 }
 0x140   : > { %1368 = vst.msk [vmem:[%s1869_s7 + $0x55] sm:$0x1] %vm1005_vm0, %v1274_v13 }
 0x141   : > { %1369 = vst.msk [vmem:[%s1869_s7 + $0x57] sm:$0x1] %vm1005_vm0, %v1274_v13 }
 0x142   : > { %1370 = vst.msk [vmem:[%s1869_s7 + $0x59] sm:$0x1] %vm1005_vm0, %v1274_v13 }
 0x143   : > { %1371 = vst.msk [vmem:[%s1869_s7 + $0x5b] sm:$0x1] %vm1005_vm0, %v1274_v13 }
 0x144   : > { %1372 = vst.msk [vmem:[%s1869_s7 + $0x5d] sm:$0x1] %vm1005_vm0, %v1274_v13 }
 0x145   : > { %1373 = vst.msk [vmem:[%s1869_s7 + $0x5f] sm:$0x1] %vm1005_vm0, %v1274_v13 }
 0x146   : > { %1374 = vst.msk [vmem:[%s1869_s7 + $0x61] sm:$0x1] %vm1005_vm0, %v1275_v14 }
 0x147   : > { %1375 = vst.msk [vmem:[%s1869_s7 + $0x63] sm:$0x1] %vm1005_vm0, %v1275_v14 }
 0x148   : > { %1376 = vst.msk [vmem:[%s1869_s7 + $0x65] sm:$0x1] %vm1005_vm0, %v1275_v14 }
 0x149   : > { %1377 = vst.msk [vmem:[%s1869_s7 + $0x67] sm:$0x1] %vm1005_vm0, %v1275_v14 }
 0x14a   : > { %1378 = vst.msk [vmem:[%s1869_s7 + $0x69] sm:$0x1] %vm1005_vm0, %v1275_v14 }
 0x14b   : > { %1379 = vst.msk [vmem:[%s1869_s7 + $0x6b] sm:$0x1] %vm1005_vm0, %v1275_v14 }
 0x14c   : > { %1380 = vst.msk [vmem:[%s1869_s7 + $0x6d] sm:$0x1] %vm1005_vm0, %v1275_v14 }
 0x14d   : > { %1381 = vst.msk [vmem:[%s1869_s7 + $0x6f] sm:$0x1] %vm1005_vm0, %v1275_v14 }
 0x14e   : > { %1382 = vst.msk [vmem:[%s1869_s7 + $0x71] sm:$0x1] %vm1005_vm0, %v1276_v15 }
 0x14f   : > { %1383 = vst.msk [vmem:[%s1869_s7 + $0x73] sm:$0x1] %vm1005_vm0, %v1276_v15 }
 0x150   : > { %1384 = vst.msk [vmem:[%s1869_s7 + $0x75] sm:$0x1] %vm1005_vm0, %v1276_v15 }
 0x151   : > { %1385 = vst.msk [vmem:[%s1869_s7 + $0x77] sm:$0x1] %vm1005_vm0, %v1276_v15 }
 0x152   : > { %1386 = vst.msk [vmem:[%s1869_s7 + $0x79] sm:$0x1] %vm1005_vm0, %v1276_v15 }
 0x153   : > { %1387 = vst.msk [vmem:[%s1869_s7 + $0x7b] sm:$0x1] %vm1005_vm0, %v1276_v15 }
 0x154   : > { %1388 = vst.msk [vmem:[%s1869_s7 + $0x7d] sm:$0x1] %vm1005_vm0, %v1276_v15 }
 0x155   : > { %1389 = vst.msk [vmem:[%s1869_s7 + $0x7f] sm:$0x1] %vm1005_vm0, %v1276_v15 }
 0x156   : > { %1390 = vst.msk [vmem:[%s1869_s7 + $0x81] sm:$0x1] %vm1005_vm0, %v1263_v16 }
 0x157   : > { %1391 = vst.msk [vmem:[%s1869_s7 + $0x83] sm:$0x1] %vm1005_vm0, %v1263_v16 }
 0x158   : > { %1392 = vst.msk [vmem:[%s1869_s7 + $0x85] sm:$0x1] %vm1005_vm0, %v1263_v16 }
 0x159   : > { %1393 = vst.msk [vmem:[%s1869_s7 + $0x87] sm:$0x1] %vm1005_vm0, %v1263_v16 }
 0x15a   : > { %1394 = vst.msk [vmem:[%s1869_s7 + $0x89] sm:$0x1] %vm1005_vm0, %v1263_v16 }
 0x15b   : > { %1395 = vst.msk [vmem:[%s1869_s7 + $0x8b] sm:$0x1] %vm1005_vm0, %v1263_v16 }
 0x15c   : > { %1396 = vst.msk [vmem:[%s1869_s7 + $0x8d] sm:$0x1] %vm1005_vm0, %v1263_v16 }
 0x15d   : > { %1397 = vst.msk [vmem:[%s1869_s7 + $0x8f] sm:$0x1] %vm1005_vm0, %v1263_v16 }
 0x15e   : > { %1398 = vst.msk [vmem:[%s1869_s7 + $0x91] sm:$0x1] %vm1005_vm0, %v1277_v17 }
 0x15f   : > { %1399 = vst.msk [vmem:[%s1869_s7 + $0x93] sm:$0x1] %vm1005_vm0, %v1277_v17 }
 0x160   : > { %1400 = vst.msk [vmem:[%s1869_s7 + $0x95] sm:$0x1] %vm1005_vm0, %v1277_v17 }
 0x161   : > { %1401 = vst.msk [vmem:[%s1869_s7 + $0x97] sm:$0x1] %vm1005_vm0, %v1277_v17 }
 0x162   : > { %1402 = vst.msk [vmem:[%s1869_s7 + $0x99] sm:$0x1] %vm1005_vm0, %v1277_v17 }
 0x163   : > { %1403 = vst.msk [vmem:[%s1869_s7 + $0x9b] sm:$0x1] %vm1005_vm0, %v1277_v17 }
 0x164   : > { %1404 = vst.msk [vmem:[%s1869_s7 + $0x9d] sm:$0x1] %vm1005_vm0, %v1277_v17 }
 0x165   : > { %1405 = vst.msk [vmem:[%s1869_s7 + $0x9f] sm:$0x1] %vm1005_vm0, %v1277_v17 }
 0x166   : > { %1406 = vst.msk [vmem:[%s1869_s7 + $0xa1] sm:$0x1] %vm1005_vm0, %v1278_v18 }
 0x167   : > { %1407 = vst.msk [vmem:[%s1869_s7 + $0xa3] sm:$0x1] %vm1005_vm0, %v1278_v18 }
 0x168   : > { %1408 = vst.msk [vmem:[%s1869_s7 + $0xa5] sm:$0x1] %vm1005_vm0, %v1278_v18 }
 0x169   : > { %1409 = vst.msk [vmem:[%s1869_s7 + $0xa7] sm:$0x1] %vm1005_vm0, %v1278_v18 }
 0x16a   : > { %1410 = vst.msk [vmem:[%s1869_s7 + $0xa9] sm:$0x1] %vm1005_vm0, %v1278_v18 }
 0x16b   : > { %1411 = vst.msk [vmem:[%s1869_s7 + $0xab] sm:$0x1] %vm1005_vm0, %v1278_v18 }
 0x16c   : > { %1412 = vst.msk [vmem:[%s1869_s7 + $0xad] sm:$0x1] %vm1005_vm0, %v1278_v18 }
 0x16d   : > { %1413 = vst.msk [vmem:[%s1869_s7 + $0xaf] sm:$0x1] %vm1005_vm0, %v1278_v18 }
 0x16e   : > { %1414 = vst.msk [vmem:[%s1869_s7 + $0xb1] sm:$0x1] %vm1005_vm0, %v1279_v19 }
 0x16f   : > { %1415 = vst.msk [vmem:[%s1869_s7 + $0xb3] sm:$0x1] %vm1005_vm0, %v1279_v19 }
 0x170   : > { %1416 = vst.msk [vmem:[%s1869_s7 + $0xb5] sm:$0x1] %vm1005_vm0, %v1279_v19 }
 0x171   : > { %1417 = vst.msk [vmem:[%s1869_s7 + $0xb7] sm:$0x1] %vm1005_vm0, %v1279_v19 }
 0x172   : > { %1418 = vst.msk [vmem:[%s1869_s7 + $0xb9] sm:$0x1] %vm1005_vm0, %v1279_v19 }
 0x173   : > { %1419 = vst.msk [vmem:[%s1869_s7 + $0xbb] sm:$0x1] %vm1005_vm0, %v1279_v19 }
 0x174   : > { %1420 = vst.msk [vmem:[%s1869_s7 + $0xbd] sm:$0x1] %vm1005_vm0, %v1279_v19 }
 0x175   : > { %1421 = vst.msk [vmem:[%s1869_s7 + $0xbf] sm:$0x1] %vm1005_vm0, %v1279_v19 }
 0x176   : > { %1422 = vst.msk [vmem:[%s1869_s7 + $0xc1] sm:$0x1] %vm1005_vm0, %v1280_v3 }
 0x177   : > { %1423 = vst.msk [vmem:[%s1869_s7 + $0xc3] sm:$0x1] %vm1005_vm0, %v1280_v3 }
 0x178   : > { %1424 = vst.msk [vmem:[%s1869_s7 + $0xc5] sm:$0x1] %vm1005_vm0, %v1280_v3 }
 0x179   : > { %1425 = vst.msk [vmem:[%s1869_s7 + $0xc7] sm:$0x1] %vm1005_vm0, %v1280_v3 }
 0x17a   : > { %1426 = vst.msk [vmem:[%s1869_s7 + $0xc9] sm:$0x1] %vm1005_vm0, %v1280_v3 }
 0x17b   : > { %1427 = vst.msk [vmem:[%s1869_s7 + $0xcb] sm:$0x1] %vm1005_vm0, %v1280_v3 }
 0x17c   : > { %1428 = vst.msk [vmem:[%s1869_s7 + $0xcd] sm:$0x1] %vm1005_vm0, %v1280_v3 }
 0x17d   : > { %1429 = vst.msk [vmem:[%s1869_s7 + $0xcf] sm:$0x1] %vm1005_vm0, %v1280_v3 }
 0x17e   : > { %1430 = vst.msk [vmem:[%s1869_s7 + $0xd1] sm:$0x1] %vm1005_vm0, %v1281_v20 }
 0x17f   : > { %1431 = vst.msk [vmem:[%s1869_s7 + $0xd3] sm:$0x1] %vm1005_vm0, %v1281_v20 }
 0x180   : > { %1432 = vst.msk [vmem:[%s1869_s7 + $0xd5] sm:$0x1] %vm1005_vm0, %v1281_v20 }
 0x181   : > { %1433 = vst.msk [vmem:[%s1869_s7 + $0xd7] sm:$0x1] %vm1005_vm0, %v1281_v20 }
 0x182   : > { %1434 = vst.msk [vmem:[%s1869_s7 + $0xd9] sm:$0x1] %vm1005_vm0, %v1281_v20 }
 0x183   : > { %1435 = vst.msk [vmem:[%s1869_s7 + $0xdb] sm:$0x1] %vm1005_vm0, %v1281_v20 }
 0x184   : > { %1436 = vst.msk [vmem:[%s1869_s7 + $0xdd] sm:$0x1] %vm1005_vm0, %v1281_v20 }
 0x185   : > { %1437 = vst.msk [vmem:[%s1869_s7 + $0xdf] sm:$0x1] %vm1005_vm0, %v1281_v20 }
 0x186   : > { %1438 = vst.msk [vmem:[%s1869_s7 + $0xe1] sm:$0x1] %vm1005_vm0, %v1282_v21 }
 0x187   : > { %1439 = vst.msk [vmem:[%s1869_s7 + $0xe3] sm:$0x1] %vm1005_vm0, %v1282_v21 }
 0x188   : > { %1440 = vst.msk [vmem:[%s1869_s7 + $0xe5] sm:$0x1] %vm1005_vm0, %v1282_v21 }
 0x189   : > { %1441 = vst.msk [vmem:[%s1869_s7 + $0xe7] sm:$0x1] %vm1005_vm0, %v1282_v21 }
 0x18a   : > { %1442 = vst.msk [vmem:[%s1869_s7 + $0xe9] sm:$0x1] %vm1005_vm0, %v1282_v21 }
 0x18b   : > { %1443 = vst.msk [vmem:[%s1869_s7 + $0xeb] sm:$0x1] %vm1005_vm0, %v1282_v21 }
 0x18c   : > { %1444 = vst.msk [vmem:[%s1869_s7 + $0xed] sm:$0x1] %vm1005_vm0, %v1282_v21 }
 0x18d   : > { %1445 = vst.msk [vmem:[%s1869_s7 + $0xef] sm:$0x1] %vm1005_vm0, %v1282_v21 }
 0x18e   : > { %1446 = vst.msk [vmem:[%s1869_s7 + $0xf1] sm:$0x1] %vm1005_vm0, %v1283_v22 }
 0x18f   : > { %1447 = vst.msk [vmem:[%s1869_s7 + $0xf3] sm:$0x1] %vm1005_vm0, %v1283_v22 }
 0x190   : > { %1448 = vst.msk [vmem:[%s1869_s7 + $0xf5] sm:$0x1] %vm1005_vm0, %v1283_v22 }
 0x191   : > { %1449 = vst.msk [vmem:[%s1869_s7 + $0xf7] sm:$0x1] %vm1005_vm0, %v1283_v22 }
 0x192   : > { %1450 = vst.msk [vmem:[%s1869_s7 + $0xf9] sm:$0x1] %vm1005_vm0, %v1283_v22 }
 0x193   : > { %1451 = vst.msk [vmem:[%s1869_s7 + $0xfb] sm:$0x1] %vm1005_vm0, %v1283_v22 }
 0x194   : > { %1452 = vst.msk [vmem:[%s1869_s7 + $0xfd] sm:$0x1] %vm1005_vm0, %v1283_v22 }
 0x195   : > { %1453 = vst.msk [vmem:[%s1869_s7 + $0xff] sm:$0x1] %vm1005_vm0, %v1283_v22 }
 0x196   : > { %1454 = vst.msk [vmem:[%s1869_s7 + $0x101] sm:$0x1] %vm1005_vm0, %v1264_v61 }
 0x197   : > { %1455 = vst.msk [vmem:[%s1869_s7 + $0x103] sm:$0x1] %vm1005_vm0, %v1264_v61 }
 0x198   : > { %1456 = vst.msk [vmem:[%s1869_s7 + $0x105] sm:$0x1] %vm1005_vm0, %v1264_v61 }
 0x199   : > { %1457 = vst.msk [vmem:[%s1869_s7 + $0x107] sm:$0x1] %vm1005_vm0, %v1264_v61 }
 0x19a   : > { %1458 = vst.msk [vmem:[%s1869_s7 + $0x109] sm:$0x1] %vm1005_vm0, %v1264_v61 }
 0x19b   : > { %1459 = vst.msk [vmem:[%s1869_s7 + $0x10b] sm:$0x1] %vm1005_vm0, %v1264_v61 }
 0x19c   : > { %1460 = vst.msk [vmem:[%s1869_s7 + $0x10d] sm:$0x1] %vm1005_vm0, %v1264_v61 }
 0x19d   : > { %1461 = vst.msk [vmem:[%s1869_s7 + $0x10f] sm:$0x1] %vm1005_vm0, %v1264_v61 }
 0x19e   : > { %1462 = vst.msk [vmem:[%s1869_s7 + $0x111] sm:$0x1] %vm1005_vm0, %v1284_v23 }
 0x19f   : > { %1463 = vst.msk [vmem:[%s1869_s7 + $0x113] sm:$0x1] %vm1005_vm0, %v1284_v23 }
 0x1a0   : > { %1464 = vst.msk [vmem:[%s1869_s7 + $0x115] sm:$0x1] %vm1005_vm0, %v1284_v23 }
 0x1a1   : > { %1465 = vst.msk [vmem:[%s1869_s7 + $0x117] sm:$0x1] %vm1005_vm0, %v1284_v23 }
 0x1a2   : > { %1466 = vst.msk [vmem:[%s1869_s7 + $0x119] sm:$0x1] %vm1005_vm0, %v1284_v23 }
 0x1a3   : > { %1467 = vst.msk [vmem:[%s1869_s7 + $0x11b] sm:$0x1] %vm1005_vm0, %v1284_v23 }
 0x1a4   : > { %1468 = vst.msk [vmem:[%s1869_s7 + $0x11d] sm:$0x1] %vm1005_vm0, %v1284_v23 }
 0x1a5   : > { %1469 = vst.msk [vmem:[%s1869_s7 + $0x11f] sm:$0x1] %vm1005_vm0, %v1284_v23 }
 0x1a6   : > { %1470 = vst.msk [vmem:[%s1869_s7 + $0x121] sm:$0x1] %vm1005_vm0, %v1285_v24 }
 0x1a7   : > { %1471 = vst.msk [vmem:[%s1869_s7 + $0x123] sm:$0x1] %vm1005_vm0, %v1285_v24 }
 0x1a8   : > { %1472 = vst.msk [vmem:[%s1869_s7 + $0x125] sm:$0x1] %vm1005_vm0, %v1285_v24 }
 0x1a9   : > { %1473 = vst.msk [vmem:[%s1869_s7 + $0x127] sm:$0x1] %vm1005_vm0, %v1285_v24 }
 0x1aa   : > { %1474 = vst.msk [vmem:[%s1869_s7 + $0x129] sm:$0x1] %vm1005_vm0, %v1285_v24 }
 0x1ab   : > { %1475 = vst.msk [vmem:[%s1869_s7 + $0x12b] sm:$0x1] %vm1005_vm0, %v1285_v24 }
 0x1ac   : > { %1476 = vst.msk [vmem:[%s1869_s7 + $0x12d] sm:$0x1] %vm1005_vm0, %v1285_v24 }
 0x1ad   : > { %1477 = vst.msk [vmem:[%s1869_s7 + $0x12f] sm:$0x1] %vm1005_vm0, %v1285_v24 }
 0x1ae   : > { %1478 = vst.msk [vmem:[%s1869_s7 + $0x131] sm:$0x1] %vm1005_vm0, %v1286_v25 }
 0x1af   : > { %1479 = vst.msk [vmem:[%s1869_s7 + $0x133] sm:$0x1] %vm1005_vm0, %v1286_v25 }
 0x1b0   : > { %1480 = vst.msk [vmem:[%s1869_s7 + $0x135] sm:$0x1] %vm1005_vm0, %v1286_v25 }
 0x1b1   : > { %1481 = vst.msk [vmem:[%s1869_s7 + $0x137] sm:$0x1] %vm1005_vm0, %v1286_v25 }
 0x1b2   : > { %1482 = vst.msk [vmem:[%s1869_s7 + $0x139] sm:$0x1] %vm1005_vm0, %v1286_v25 }
 0x1b3   : > { %1483 = vst.msk [vmem:[%s1869_s7 + $0x13b] sm:$0x1] %vm1005_vm0, %v1286_v25 }
 0x1b4   : > { %1484 = vst.msk [vmem:[%s1869_s7 + $0x13d] sm:$0x1] %vm1005_vm0, %v1286_v25 }
 0x1b5   : > { %1485 = vst.msk [vmem:[%s1869_s7 + $0x13f] sm:$0x1] %vm1005_vm0, %v1286_v25 }
 0x1b6   : > { %1486 = vst.msk [vmem:[%s1869_s7 + $0x141] sm:$0x1] %vm1005_vm0, %v1287_v26 }
 0x1b7   : > { %1487 = vst.msk [vmem:[%s1869_s7 + $0x143] sm:$0x1] %vm1005_vm0, %v1287_v26 }
 0x1b8   : > { %1488 = vst.msk [vmem:[%s1869_s7 + $0x145] sm:$0x1] %vm1005_vm0, %v1287_v26 }
 0x1b9   : > { %1489 = vst.msk [vmem:[%s1869_s7 + $0x147] sm:$0x1] %vm1005_vm0, %v1287_v26 }
 0x1ba   : > { %1490 = vst.msk [vmem:[%s1869_s7 + $0x149] sm:$0x1] %vm1005_vm0, %v1287_v26 }
 0x1bb   : > { %1491 = vst.msk [vmem:[%s1869_s7 + $0x14b] sm:$0x1] %vm1005_vm0, %v1287_v26 }
 0x1bc   : > { %1492 = vst.msk [vmem:[%s1869_s7 + $0x14d] sm:$0x1] %vm1005_vm0, %v1287_v26 }
 0x1bd   : > { %1493 = vst.msk [vmem:[%s1869_s7 + $0x14f] sm:$0x1] %vm1005_vm0, %v1287_v26 }
 0x1be   : > { %1494 = vst.msk [vmem:[%s1869_s7 + $0x151] sm:$0x1] %vm1005_vm0, %v1288_v27 }
 0x1bf   : > { %1495 = vst.msk [vmem:[%s1869_s7 + $0x153] sm:$0x1] %vm1005_vm0, %v1288_v27 }
 0x1c0   : > { %1496 = vst.msk [vmem:[%s1869_s7 + $0x155] sm:$0x1] %vm1005_vm0, %v1288_v27 }
 0x1c1   : > { %1497 = vst.msk [vmem:[%s1869_s7 + $0x157] sm:$0x1] %vm1005_vm0, %v1288_v27 }
 0x1c2   : > { %1498 = vst.msk [vmem:[%s1869_s7 + $0x159] sm:$0x1] %vm1005_vm0, %v1288_v27 }
 0x1c3   : > { %1499 = vst.msk [vmem:[%s1869_s7 + $0x15b] sm:$0x1] %vm1005_vm0, %v1288_v27 }
 0x1c4   : > { %1500 = vst.msk [vmem:[%s1869_s7 + $0x15d] sm:$0x1] %vm1005_vm0, %v1288_v27 }
 0x1c5   : > { %1501 = vst.msk [vmem:[%s1869_s7 + $0x15f] sm:$0x1] %vm1005_vm0, %v1288_v27 }
 0x1c6   : > { %1502 = vst.msk [vmem:[%s1869_s7 + $0x161] sm:$0x1] %vm1005_vm0, %v1289_v29 }
 0x1c7   : > { %1503 = vst.msk [vmem:[%s1869_s7 + $0x163] sm:$0x1] %vm1005_vm0, %v1289_v29 }
 0x1c8   : > { %1504 = vst.msk [vmem:[%s1869_s7 + $0x165] sm:$0x1] %vm1005_vm0, %v1289_v29 }
 0x1c9   : > { %1505 = vst.msk [vmem:[%s1869_s7 + $0x167] sm:$0x1] %vm1005_vm0, %v1289_v29 }
 0x1ca   : > { %1506 = vst.msk [vmem:[%s1869_s7 + $0x169] sm:$0x1] %vm1005_vm0, %v1289_v29 }
 0x1cb   : > { %1507 = vst.msk [vmem:[%s1869_s7 + $0x16b] sm:$0x1] %vm1005_vm0, %v1289_v29 }
 0x1cc   : > { %1508 = vst.msk [vmem:[%s1869_s7 + $0x16d] sm:$0x1] %vm1005_vm0, %v1289_v29 }
 0x1cd   : > { %1509 = vst.msk [vmem:[%s1869_s7 + $0x16f] sm:$0x1] %vm1005_vm0, %v1289_v29 }
 0x1ce   : > { %1510 = vst.msk [vmem:[%s1869_s7 + $0x171] sm:$0x1] %vm1005_vm0, %v1290_v30 }
 0x1cf   : > { %1511 = vst.msk [vmem:[%s1869_s7 + $0x173] sm:$0x1] %vm1005_vm0, %v1290_v30 }
 0x1d0   : > { %1512 = vst.msk [vmem:[%s1869_s7 + $0x175] sm:$0x1] %vm1005_vm0, %v1290_v30 }
 0x1d1   : > { %1513 = vst.msk [vmem:[%s1869_s7 + $0x177] sm:$0x1] %vm1005_vm0, %v1290_v30 }
 0x1d2   : > { %1514 = vst.msk [vmem:[%s1869_s7 + $0x179] sm:$0x1] %vm1005_vm0, %v1290_v30 }
 0x1d3   : > { %1515 = vst.msk [vmem:[%s1869_s7 + $0x17b] sm:$0x1] %vm1005_vm0, %v1290_v30 }
 0x1d4   : > { %1516 = vst.msk [vmem:[%s1869_s7 + $0x17d] sm:$0x1] %vm1005_vm0, %v1290_v30 }
 0x1d5   : > { %1517 = vst.msk [vmem:[%s1869_s7 + $0x17f] sm:$0x1] %vm1005_vm0, %v1290_v30 }
 0x1d6   : > { %1518 = vst.msk [vmem:[%s1869_s7 + $0x181] sm:$0x1] %vm1005_vm0, %v1265_v31 }
 0x1d7   : > { %1519 = vst.msk [vmem:[%s1869_s7 + $0x183] sm:$0x1] %vm1005_vm0, %v1265_v31 }
 0x1d8   : > { %1520 = vst.msk [vmem:[%s1869_s7 + $0x185] sm:$0x1] %vm1005_vm0, %v1265_v31 }
 0x1d9   : > { %1521 = vst.msk [vmem:[%s1869_s7 + $0x187] sm:$0x1] %vm1005_vm0, %v1265_v31 }
 0x1da   : > { %1522 = vst.msk [vmem:[%s1869_s7 + $0x189] sm:$0x1] %vm1005_vm0, %v1265_v31 }
 0x1db   : > { %1523 = vst.msk [vmem:[%s1869_s7 + $0x18b] sm:$0x1] %vm1005_vm0, %v1265_v31 }
 0x1dc   : > { %1524 = vst.msk [vmem:[%s1869_s7 + $0x18d] sm:$0x1] %vm1005_vm0, %v1265_v31 }
 0x1dd   : > { %1525 = vst.msk [vmem:[%s1869_s7 + $0x18f] sm:$0x1] %vm1005_vm0, %v1265_v31 }
 0x1de   : > { %1526 = vst.msk [vmem:[%s1869_s7 + $0x191] sm:$0x1] %vm1005_vm0, %v1291_v33 }
 0x1df   : > { %1527 = vst.msk [vmem:[%s1869_s7 + $0x193] sm:$0x1] %vm1005_vm0, %v1291_v33 }
 0x1e0   : > { %1528 = vst.msk [vmem:[%s1869_s7 + $0x195] sm:$0x1] %vm1005_vm0, %v1291_v33 }
 0x1e1   : > { %1529 = vst.msk [vmem:[%s1869_s7 + $0x197] sm:$0x1] %vm1005_vm0, %v1291_v33 }
 0x1e2   : > { %1530 = vst.msk [vmem:[%s1869_s7 + $0x199] sm:$0x1] %vm1005_vm0, %v1291_v33 }
 0x1e3   : > { %1531 = vst.msk [vmem:[%s1869_s7 + $0x19b] sm:$0x1] %vm1005_vm0, %v1291_v33 }
 0x1e4   : > { %1532 = vst.msk [vmem:[%s1869_s7 + $0x19d] sm:$0x1] %vm1005_vm0, %v1291_v33 }
 0x1e5   : > { %1533 = vst.msk [vmem:[%s1869_s7 + $0x19f] sm:$0x1] %vm1005_vm0, %v1291_v33 }
 0x1e6   : > { %1534 = vst.msk [vmem:[%s1869_s7 + $0x1a1] sm:$0x1] %vm1005_vm0, %v1292_v34 }
 0x1e7   : > { %1535 = vst.msk [vmem:[%s1869_s7 + $0x1a3] sm:$0x1] %vm1005_vm0, %v1292_v34 }
 0x1e8   : > { %1536 = vst.msk [vmem:[%s1869_s7 + $0x1a5] sm:$0x1] %vm1005_vm0, %v1292_v34 }
 0x1e9   : > { %1537 = vst.msk [vmem:[%s1869_s7 + $0x1a7] sm:$0x1] %vm1005_vm0, %v1292_v34 }
 0x1ea   : > { %1538 = vst.msk [vmem:[%s1869_s7 + $0x1a9] sm:$0x1] %vm1005_vm0, %v1292_v34 }
 0x1eb   : > { %1539 = vst.msk [vmem:[%s1869_s7 + $0x1ab] sm:$0x1] %vm1005_vm0, %v1292_v34 }
 0x1ec   : > { %1540 = vst.msk [vmem:[%s1869_s7 + $0x1ad] sm:$0x1] %vm1005_vm0, %v1292_v34 }
 0x1ed   : > { %1541 = vst.msk [vmem:[%s1869_s7 + $0x1af] sm:$0x1] %vm1005_vm0, %v1292_v34 }
 0x1ee   : > { %1542 = vst.msk [vmem:[%s1869_s7 + $0x1b1] sm:$0x1] %vm1005_vm0, %v1293_v35 }
 0x1ef   : > { %1543 = vst.msk [vmem:[%s1869_s7 + $0x1b3] sm:$0x1] %vm1005_vm0, %v1293_v35 }
 0x1f0   : > { %1544 = vst.msk [vmem:[%s1869_s7 + $0x1b5] sm:$0x1] %vm1005_vm0, %v1293_v35 }
 0x1f1   : > { %1545 = vst.msk [vmem:[%s1869_s7 + $0x1b7] sm:$0x1] %vm1005_vm0, %v1293_v35 }
 0x1f2   : > { %1546 = vst.msk [vmem:[%s1869_s7 + $0x1b9] sm:$0x1] %vm1005_vm0, %v1293_v35 }
 0x1f3   : > { %1547 = vst.msk [vmem:[%s1869_s7 + $0x1bb] sm:$0x1] %vm1005_vm0, %v1293_v35 }
 0x1f4   : > { %1548 = vst.msk [vmem:[%s1869_s7 + $0x1bd] sm:$0x1] %vm1005_vm0, %v1293_v35 }
 0x1f5   : > { %1549 = vst.msk [vmem:[%s1869_s7 + $0x1bf] sm:$0x1] %vm1005_vm0, %v1293_v35 }
 0x1f6   : > { %1550 = vst.msk [vmem:[%s1869_s7 + $0x1c1] sm:$0x1] %vm1005_vm0, %v1294_v36 }
 0x1f7   : > { %1551 = vst.msk [vmem:[%s1869_s7 + $0x1c3] sm:$0x1] %vm1005_vm0, %v1294_v36 }
 0x1f8   : > { %1552 = vst.msk [vmem:[%s1869_s7 + $0x1c5] sm:$0x1] %vm1005_vm0, %v1294_v36 }
 0x1f9   : > { %1553 = vst.msk [vmem:[%s1869_s7 + $0x1c7] sm:$0x1] %vm1005_vm0, %v1294_v36 }
 0x1fa   : > { %1554 = vst.msk [vmem:[%s1869_s7 + $0x1c9] sm:$0x1] %vm1005_vm0, %v1294_v36 }
 0x1fb   : > { %1555 = vst.msk [vmem:[%s1869_s7 + $0x1cb] sm:$0x1] %vm1005_vm0, %v1294_v36 }
 0x1fc   : > { %1556 = vst.msk [vmem:[%s1869_s7 + $0x1cd] sm:$0x1] %vm1005_vm0, %v1294_v36 }
 0x1fd   : > { %1557 = vst.msk [vmem:[%s1869_s7 + $0x1cf] sm:$0x1] %vm1005_vm0, %v1294_v36 }
 0x1fe   : > { %1558 = vst.msk [vmem:[%s1869_s7 + $0x1d1] sm:$0x1] %vm1005_vm0, %v1295_v37 }
 0x1ff   : > { %1559 = vst.msk [vmem:[%s1869_s7 + $0x1d3] sm:$0x1] %vm1005_vm0, %v1295_v37 }
 0x200   : > { %1560 = vst.msk [vmem:[%s1869_s7 + $0x1d5] sm:$0x1] %vm1005_vm0, %v1295_v37 }
 0x201   : > { %1561 = vst.msk [vmem:[%s1869_s7 + $0x1d7] sm:$0x1] %vm1005_vm0, %v1295_v37 }
 0x202   : > { %1562 = vst.msk [vmem:[%s1869_s7 + $0x1d9] sm:$0x1] %vm1005_vm0, %v1295_v37 }
 0x203   : > { %1563 = vst.msk [vmem:[%s1869_s7 + $0x1db] sm:$0x1] %vm1005_vm0, %v1295_v37 }
 0x204   : > { %1564 = vst.msk [vmem:[%s1869_s7 + $0x1dd] sm:$0x1] %vm1005_vm0, %v1295_v37 }
 0x205   : > { %1565 = vst.msk [vmem:[%s1869_s7 + $0x1df] sm:$0x1] %vm1005_vm0, %v1295_v37 }
 0x206   : > { %1566 = vst.msk [vmem:[%s1869_s7 + $0x1e1] sm:$0x1] %vm1005_vm0, %v1296_v38 }
 0x207   : > { %1567 = vst.msk [vmem:[%s1869_s7 + $0x1e3] sm:$0x1] %vm1005_vm0, %v1296_v38 }
 0x208   : > { %1568 = vst.msk [vmem:[%s1869_s7 + $0x1e5] sm:$0x1] %vm1005_vm0, %v1296_v38 }
 0x209   : > { %1569 = vst.msk [vmem:[%s1869_s7 + $0x1e7] sm:$0x1] %vm1005_vm0, %v1296_v38 }
 0x20a   : > { %1570 = vst.msk [vmem:[%s1869_s7 + $0x1e9] sm:$0x1] %vm1005_vm0, %v1296_v38 }
 0x20b   : > { %1571 = vst.msk [vmem:[%s1869_s7 + $0x1eb] sm:$0x1] %vm1005_vm0, %v1296_v38 }
 0x20c   : > { %1572 = vst.msk [vmem:[%s1869_s7 + $0x1ed] sm:$0x1] %vm1005_vm0, %v1296_v38 }
 0x20d   : > { %1573 = vst.msk [vmem:[%s1869_s7 + $0x1ef] sm:$0x1] %vm1005_vm0, %v1296_v38 }
 0x20e   : > { %1574 = vst.msk [vmem:[%s1869_s7 + $0x1f1] sm:$0x1] %vm1005_vm0, %v1297_v39 }
 0x20f   : > { %1575 = vst.msk [vmem:[%s1869_s7 + $0x1f3] sm:$0x1] %vm1005_vm0, %v1297_v39 }
 0x210   : > { %1576 = vst.msk [vmem:[%s1869_s7 + $0x1f5] sm:$0x1] %vm1005_vm0, %v1297_v39 }
 0x211   : > { %1577 = vst.msk [vmem:[%s1869_s7 + $0x1f7] sm:$0x1] %vm1005_vm0, %v1297_v39 }
 0x212   : > { %1578 = vst.msk [vmem:[%s1869_s7 + $0x1f9] sm:$0x1] %vm1005_vm0, %v1297_v39 }
 0x213   : > { %1579 = vst.msk [vmem:[%s1869_s7 + $0x1fb] sm:$0x1] %vm1005_vm0, %v1297_v39 }
 0x214   : > { %1580 = vst.msk [vmem:[%s1869_s7 + $0x1fd] sm:$0x1] %vm1005_vm0, %v1297_v39 }
 0x215   : > { %1581 = vst.msk [vmem:[%s1869_s7 + $0x1ff] sm:$0x1] %vm1005_vm0, %v1297_v39 }
 0x216 PF: > { %s14_s17 = sadd.s32 1, %s1787_s17   ;;  %s3023_s15 = smov %s1783_s16 }
 0x217   : > { %p11_p5 = scmp.ge.s32.totalorder %s14_s17, 4   ;;  %s3024_s16 = smov %s3026_s18 }
 0x219   :  { %13 = sbr.rel (!%p11_p5) target bundleno = 2 (0x2), region = 75 }

</bundles_post_ra>
